<compile_context>
chip_gen: v7x
topology: tpu7x:2x2x1
jax: 0.10.0
libtpu: 0.0.40
codegen_flags: <defaults>
</compile_context>

<pallas_src>
import functools
import math

import jax
import jax.numpy as jnp
from jax.experimental import pallas as pl
from jax.experimental.pallas import tpu as pltpu


def _round_up(x, m):
    return ((x + m - 1) // m) * m


# ----------------------------- fused Pallas kernel ----------------------------

def _actor_critic_kernel(x_ref, w1_ref, b1_ref, w2_ref, b2_ref,
                         wfc_ref, bfc_ref, wh_ref, bh_ref, out_ref,
                         y1_ref, y2_ref,
                         *, offs, sel_rows, t1, t2, bs):
    """Full ActorCritic forward for BS samples, entirely in VMEM.

    x_ref   : (BS, XR, C)      input rows (row = h*W + w), channels in lanes
    w1_ref  : (9, C, 16)       conv1 tap weights, tap t = kh*3 + kw
    w2_ref  : (9, 16, 16)      conv2 tap weights
    wfc_ref : (H2*W2, 16, 256) fc weights, one (in_ch, out) block per conv2 position
    wh_ref  : (256, HEAD_N)    [actor | critic] weights, zero-padded to 128 lanes
    out_ref : (BS, HEAD_N)     [logits | value | 0...]   (lane-dense store)
    y1_ref  : (T1, 16) VMEM    per-sample conv1 rows (reused across samples)
    y2_ref  : (BS*T2, 16) VMEM conv2 rows for the whole batch tile
    """
    cdt = w1_ref.dtype                                   # MXU operand dtype
    f32 = jnp.float32

    for b in range(bs):
        # ---- conv1 (stride 1): 9 accumulating MXU tap-dots on shifted row slabs ----
        acc1 = None
        for t, off in enumerate(offs):
            xs = x_ref[b, off:off + t1, :].astype(cdt)               # (T1, C)
            d = jnp.dot(xs, w1_ref[t], preferred_element_type=f32)   # (T1, 16)
            acc1 = d if acc1 is None else acc1 + d
        y1_ref[...] = jnp.maximum(acc1 + b1_ref[...], 0.0)           # f32 bias/ReLU

        # ---- conv2: evaluated at stride-1 rows; stride-2 handled by the flatten ----
        acc2 = None
        for t, off in enumerate(offs):
            ys = y1_ref[off:off + t2, :].astype(cdt)                 # (T2, 16)
            d = jnp.dot(ys, w2_ref[t], preferred_element_type=f32)   # (T2, 16)
            acc2 = d if acc2 is None else acc2 + d
        y2_ref[b * t2:(b + 1) * t2, :] = jnp.maximum(acc2 + b2_ref[...], 0.0)

    # ---- flatten + fc: one strided cross-sample gather + one accumulating dot per
    # selected conv2 position; gather/relayout cost amortized over the BS tile. ----
    h = None
    for idx, row in enumerate(sel_rows):
        g = y2_ref[pl.ds(row, bs, stride=t2), :].astype(cdt)         # (BS, 16)
        d = jnp.dot(g, wfc_ref[idx], preferred_element_type=f32)     # (BS, 256)
        h = d if h is None else h + d
    h = jnp.maximum(h + bfc_ref[...], 0.0)                           # (BS, 256) f32

    # ---- fused actor/critic head, lane-dense (BS, 128) output ----
    out = jnp.dot(h.astype(cdt), wh_ref[...], preferred_element_type=f32)
    out_ref[...] = out + bh_ref[...]


# ----------------------------- wrapper ----------------------------------------

def actor_critic_forward(params, x_nchw, *, use_bf16=True, bs_max=8):
    """Returns (logit, value) exactly like ActorCritic.forward."""
    B, C, H, W = x_nchw.shape
    H1, W1 = H - 2, W - 2
    H2, W2 = (H1 - 3) // 2 + 1, (W1 - 3) // 2 + 1
    F = 16 * H2 * W2
    A = params["w_a"].shape[1]
    A1 = A + 1
    HEAD_N = _round_up(A1, 128)

    # Static geometry for the in-kernel "wide-row" im2col.
    offs = tuple(kh * W + kw for kh in range(3) for kw in range(3))
    max_off = offs[-1]                                    # 2*W + 2
    sel_rows = tuple(2 * h2 * W + 2 * w2 for h2 in range(H2) for w2 in range(W2))
    T2 = _round_up(sel_rows[-1] + 1, 8)                   # conv2 rows computed/sample
    T1 = _round_up(T2 + max_off, 8)                       # conv1 rows computed/sample
    XR = _round_up(max(H * W, T1 + max_off), 8)           # padded input rows/sample

    # --- wrap-around invariant of the wide-row im2col (review correctness concern):
    # every selected conv2 position must correspond to a fully in-image window, and
    # every tap read must stay inside the rows computed for the SAME sample.
    assert H >= 7 and W >= 7 and H2 >= 1 and W2 >= 1
    assert 2 * (H2 - 1) + 4 <= H - 1 and 2 * (W2 - 1) + 4 <= W - 1
    assert T2 + max_off <= T1
    assert T1 + max_off <= XR
    assert sel_rows[-1] < T2
    assert params["w_fc"].shape[0] == F

    BS = min(int(bs_max), B)
    Bp = _round_up(B, BS)

    # ---- cheap wrapper-side layout plumbing (no host-side im2col / patch copies) ----
    x_rows = jnp.transpose(x_nchw, (0, 2, 3, 1)).reshape(B, H * W, C).astype(jnp.float32)
    if XR > H * W:
        x_rows = jnp.pad(x_rows, ((0, 0), (0, XR - H * W), (0, 0)))
    if Bp > B:
        x_rows = jnp.pad(x_rows, ((0, Bp - B), (0, 0), (0, 0)))

    wdt = jnp.bfloat16 if use_bf16 else jnp.float32
    # conv taps: [t = kh*3+kw, in_ch, out_ch]
    w1_t = jnp.transpose(params["w1"], (2, 3, 1, 0)).reshape(9, C, 16).astype(wdt)
    w2_t = jnp.transpose(params["w2"], (2, 3, 1, 0)).reshape(9, 16, 16).astype(wdt)
    # fc: PyTorch flat index oc*(H2*W2) + pos  ->  per-position (in_ch, out) blocks
    wfc_t = (params["w_fc"].reshape(16, H2 * W2, 256)
             .transpose(1, 0, 2).astype(wdt))                        # (H2*W2, 16, 256)
    # fused [actor | critic] head, zero-padded to a full 128-lane tile
    wh = jnp.zeros((256, HEAD_N), wdt)
    wh = wh.at[:, :A].set(params["w_a"].astype(wdt))
    wh = wh.at[:, A:A1].set(params["w_c"].astype(wdt))
    bh = jnp.zeros((1, HEAD_N), jnp.float32)
    bh = bh.at[0, :A].set(params["b_a"].astype(jnp.float32))
    bh = bh.at[0, A:A1].set(params["b_c"].astype(jnp.float32))

    b1m = params["b1"].reshape(1, 16).astype(jnp.float32)
    b2m = params["b2"].reshape(1, 16).astype(jnp.float32)
    bfcm = params["b_fc"].reshape(1, 256).astype(jnp.float32)

    kernel = functools.partial(_actor_critic_kernel, offs=offs, sel_rows=sel_rows,
                               t1=T1, t2=T2, bs=BS)

    operands = (x_rows, w1_t, b1m, w2_t, b2m, wfc_t, bfcm, wh, bh)
    flops = 2 * Bp * (T1 * 9 * C * 16 + T2 * 9 * 16 * 16
                      + H2 * W2 * 16 * 256 + 256 * HEAD_N)
    bytes_accessed = int(sum(int(a.size) * a.dtype.itemsize for a in operands)
                         + Bp * HEAD_N * 4)

    out = pl.pallas_call(
        kernel,
        out_shape=jax.ShapeDtypeStruct((Bp, HEAD_N), jnp.float32),
        grid_spec=pltpu.PrefetchScalarGridSpec(
            num_scalar_prefetch=0,
            grid=(Bp // BS,),
            in_specs=[
                pl.BlockSpec((BS, XR, C), lambda i: (i, 0, 0)),        # batch tile
                pl.BlockSpec((9, C, 16), lambda i: (0, 0, 0)),         # conv1 taps
                pl.BlockSpec((1, 16), lambda i: (0, 0)),
                pl.BlockSpec((9, 16, 16), lambda i: (0, 0, 0)),        # conv2 taps
                pl.BlockSpec((1, 16), lambda i: (0, 0)),
                pl.BlockSpec((H2 * W2, 16, 256), lambda i: (0, 0, 0)),  # fc blocks
                pl.BlockSpec((1, 256), lambda i: (0, 0)),
                pl.BlockSpec((256, HEAD_N), lambda i: (0, 0)),         # fused head
                pl.BlockSpec((1, HEAD_N), lambda i: (0, 0)),
            ],
            out_specs=pl.BlockSpec((BS, HEAD_N), lambda i: (i, 0)),
            scratch_shapes=[
                pltpu.VMEM((T1, 16), jnp.float32),        # per-sample conv1 rows
                pltpu.VMEM((BS * T2, 16), jnp.float32),   # conv2 rows, whole tile
            ],
        ),
        compiler_params=pltpu.CompilerParams(
            dimension_semantics=("parallel",),            # batch tiles across TCs (v7x)
        ),
        cost_estimate=pl.CostEstimate(flops=int(flops), transcendentals=0,
                                      bytes_accessed=bytes_accessed),
    )(*operands)

    return out[:B, :A], out[:B, A:A1]


# ----------------------------- plain-JAX reference ----------------------------

def actor_critic_reference(params, x_nchw):
    hp = jax.lax.Precision.HIGHEST
    y = jax.lax.conv_general_dilated(
        x_nchw, params["w1"], window_strides=(1, 1), padding="VALID",
        dimension_numbers=("NCHW", "OIHW", "NCHW"), precision=hp)
    y = jnp.maximum(y + params["b1"][None, :, None, None], 0.0)
    y = jax.lax.conv_general_dilated(
        y, params["w2"], window_strides=(2, 2), padding="VALID",
        dimension_numbers=("NCHW", "OIHW", "NCHW"), precision=hp)
    y = jnp.maximum(y + params["b2"][None, :, None, None], 0.0)
    flat = y.reshape(y.shape[0], -1)
    h = jnp.maximum(jnp.dot(flat, params["w_fc"], precision=hp) + params["b_fc"], 0.0)
    logit = jnp.dot(h, params["w_a"], precision=hp) + params["b_a"]
    value = jnp.dot(h, params["w_c"], precision=hp) + params["b_c"]
    return logit, value


# ----------------------------- parameter init ---------------------------------

def _uniform(key, shape, fan_in):
    bound = 1.0 / math.sqrt(fan_in)
    return jax.random.uniform(key, shape, jnp.float32, -bound, bound)


def init_params(key, in_shape, num_actions):
    C, H, W = in_shape
    ks = jax.random.split(key, 10)
    w1 = _uniform(ks[0], (16, C, 3, 3), C * 9)
    b1 = _uniform(ks[1], (16,), C * 9)
    w2 = _uniform(ks[2], (16, 16, 3, 3), 16 * 9)
    b2 = _uniform(ks[3], (16,), 16 * 9)
    H1, W1 = H - 2, W - 2
    H2, W2 = (H1 - 3) // 2 + 1, (W1 - 3) // 2 + 1
    feat = 16 * H2 * W2
    w_fc = _uniform(ks[4], (feat, 256), feat)
    b_fc = _uniform(ks[5], (256,), feat)
    w_a = _uniform(ks[6], (256, num_actions), 256)
    b_a = _uniform(ks[7], (num_actions,), 256)
    w_c = _uniform(ks[8], (256, 1), 256)
    b_c = _uniform(ks[9], (1,), 256)
    return dict(w1=w1, b1=b1, w2=w2, b2=b2, w_fc=w_fc, b_fc=b_fc,
                w_a=w_a, b_a=b_a, w_c=w_c, b_c=b_c)


if __name__ == "__main__":
    key = jax.random.PRNGKey(0)
    k_param, k_x, k_x2 = jax.random.split(key, 3)

    in_shape = (4, 16, 16)      # (C, H, W)
    num_actions = 6
    batch = 2

    params = init_params(k_param, in_shape, num_actions)
    x = jax.random.normal(k_x, (batch,) + in_shape, jnp.float32)     # NCHW input

    fwd_bf16 = jax.jit(functools.partial(actor_critic_forward, use_bf16=True))
    fwd_f32 = jax.jit(functools.partial(actor_critic_forward, use_bf16=False))
    ref = jax.jit(actor_critic_reference)

    # default (bf16 MXU operand) path
    logit, value = fwd_bf16(params, x)
    jax.block_until_ready((logit, value))
    assert logit.shape == (batch, num_actions)
    assert value.shape == (batch, 1)
    ref_logit, ref_value = ref(params, x)
    assert jnp.allclose(logit, ref_logit, atol=2e-2, rtol=2e-2)
    assert jnp.allclose(value, ref_value, atol=2e-2, rtol=2e-2)

    # exact f32 path at a tight tolerance (catches indexing/permutation regressions)
    l32, v32 = fwd_f32(params, x)
    jax.block_until_ready((l32, v32))
    assert jnp.allclose(l32, ref_logit, atol=1e-4, rtol=1e-4)
    assert jnp.allclose(v32, ref_value, atol=1e-4, rtol=1e-4)

    # larger batch: exercises batch tiling (BS=8), a multi-step grid and batch padding
    xb = jax.random.normal(k_x2, (12,) + in_shape, jnp.float32)
    lb, vb = fwd_bf16(params, xb)
    jax.block_until_ready((lb, vb))
    rlb, rvb = ref(params, xb)
    assert lb.shape == (12, num_actions) and vb.shape == (12, 1)
    assert jnp.allclose(lb, rlb, atol=2e-2, rtol=2e-2)
    assert jnp.allclose(vb, rvb, atol=2e-2, rtol=2e-2)

    print("KERNEL_OK")
</pallas_src>

<mosaic_0001>
module attributes {stable_mosaic.version = 11 : i64} {
  func.func @_actor_critic_kernel(%arg0: i32, %arg1: memref<2x256x4xf32, #tpu.memory_space<vmem>>, %arg2: memref<9x4x16xbf16, #tpu.memory_space<vmem>>, %arg3: memref<1x16xf32, #tpu.memory_space<vmem>>, %arg4: memref<9x16x16xbf16, #tpu.memory_space<vmem>>, %arg5: memref<1x16xf32, #tpu.memory_space<vmem>>, %arg6: memref<36x16x256xbf16, #tpu.memory_space<vmem>>, %arg7: memref<1x256xf32, #tpu.memory_space<vmem>>, %arg8: memref<256x128xbf16, #tpu.memory_space<vmem>>, %arg9: memref<1x128xf32, #tpu.memory_space<vmem>>, %arg10: memref<2x128xf32, #tpu.memory_space<vmem>>, %arg11: memref<216x16xf32, #tpu.memory_space<vmem>>, %arg12: memref<352x16xf32, #tpu.memory_space<vmem>>) attributes {dimension_semantics = [#tpu.dimension_semantics<parallel>], iteration_bounds = array<i64: 1>, scalar_prefetch = 0 : i64, scratch_operands = 2 : i64, tpu.core_type = #tpu.core_type<tc>, window_params = [{transform_indices = @transform_0, window_bounds = array<i64: 2, 256, 4>}, {pipeline_mode = #tpu.pipeline_mode<synchronous>, transform_indices = @transform_1, window_bounds = array<i64: 9, 4, 16>}, {pipeline_mode = #tpu.pipeline_mode<synchronous>, transform_indices = @transform_2, window_bounds = array<i64: 1, 16>}, {pipeline_mode = #tpu.pipeline_mode<synchronous>, transform_indices = @transform_3, window_bounds = array<i64: 9, 16, 16>}, {pipeline_mode = #tpu.pipeline_mode<synchronous>, transform_indices = @transform_4, window_bounds = array<i64: 1, 16>}, {pipeline_mode = #tpu.pipeline_mode<synchronous>, transform_indices = @transform_5, window_bounds = array<i64: 36, 16, 256>}, {pipeline_mode = #tpu.pipeline_mode<synchronous>, transform_indices = @transform_6, window_bounds = array<i64: 1, 256>}, {pipeline_mode = #tpu.pipeline_mode<synchronous>, transform_indices = @transform_7, window_bounds = array<i64: 256, 128>}, {pipeline_mode = #tpu.pipeline_mode<synchronous>, transform_indices = @transform_8, window_bounds = array<i64: 1, 128>}, {transform_indices = @transform_9, window_bounds = array<i64: 2, 128>}]} {
    %c0 = arith.constant 0 : index
    %c0_0 = arith.constant 0 : index
    %c0_1 = arith.constant 0 : index
    %0 = vector.load %arg1[%c0, %c0_0, %c0_1] : memref<2x256x4xf32, #tpu.memory_space<vmem>>, vector<1x216x4xf32>
    %1 = vector.shape_cast %0 : vector<1x216x4xf32> to vector<216x4xf32>
    %2 = arith.truncf %1 : vector<216x4xf32> to vector<216x4xbf16>
    %c0_2 = arith.constant 0 : index
    %c0_3 = arith.constant 0 : index
    %c0_4 = arith.constant 0 : index
    %3 = vector.load %arg2[%c0_2, %c0_3, %c0_4] : memref<9x4x16xbf16, #tpu.memory_space<vmem>>, vector<1x4x16xbf16>
    %4 = vector.shape_cast %3 : vector<1x4x16xbf16> to vector<4x16xbf16>
    %cst = arith.constant dense<0.000000e+00> : vector<216x16xf32>
    %5 = tpu.matmul %2, %4, %cst {dimension_numbers = #tpu.dot_dimension_numbers<[1], [0], [0], [1], [0, 0, 1, 1], [], []>} : vector<216x4xbf16>, vector<4x16xbf16>, vector<216x16xf32> -> vector<216x16xf32>
    %c0_5 = arith.constant 0 : index
    %c1 = arith.constant 1 : index
    %c0_6 = arith.constant 0 : index
    %6 = vector.load %arg1[%c0_5, %c1, %c0_6] : memref<2x256x4xf32, #tpu.memory_space<vmem>>, vector<1x216x4xf32>
    %7 = vector.shape_cast %6 : vector<1x216x4xf32> to vector<216x4xf32>
    %8 = arith.truncf %7 : vector<216x4xf32> to vector<216x4xbf16>
    %c1_7 = arith.constant 1 : index
    %c0_8 = arith.constant 0 : index
    %c0_9 = arith.constant 0 : index
    %9 = vector.load %arg2[%c1_7, %c0_8, %c0_9] : memref<9x4x16xbf16, #tpu.memory_space<vmem>>, vector<1x4x16xbf16>
    %10 = vector.shape_cast %9 : vector<1x4x16xbf16> to vector<4x16xbf16>
    %cst_10 = arith.constant dense<0.000000e+00> : vector<216x16xf32>
    %11 = tpu.matmul %8, %10, %cst_10 {dimension_numbers = #tpu.dot_dimension_numbers<[1], [0], [0], [1], [0, 0, 1, 1], [], []>} : vector<216x4xbf16>, vector<4x16xbf16>, vector<216x16xf32> -> vector<216x16xf32>
    %12 = arith.addf %5, %11 : vector<216x16xf32>
    %c0_11 = arith.constant 0 : index
    %c2 = arith.constant 2 : index
    %c0_12 = arith.constant 0 : index
    %13 = vector.load %arg1[%c0_11, %c2, %c0_12] : memref<2x256x4xf32, #tpu.memory_space<vmem>>, vector<1x216x4xf32>
    %14 = vector.shape_cast %13 : vector<1x216x4xf32> to vector<216x4xf32>
    %15 = arith.truncf %14 : vector<216x4xf32> to vector<216x4xbf16>
    %c2_13 = arith.constant 2 : index
    %c0_14 = arith.constant 0 : index
    %c0_15 = arith.constant 0 : index
    %16 = vector.load %arg2[%c2_13, %c0_14, %c0_15] : memref<9x4x16xbf16, #tpu.memory_space<vmem>>, vector<1x4x16xbf16>
    %17 = vector.shape_cast %16 : vector<1x4x16xbf16> to vector<4x16xbf16>
    %cst_16 = arith.constant dense<0.000000e+00> : vector<216x16xf32>
    %18 = tpu.matmul %15, %17, %cst_16 {dimension_numbers = #tpu.dot_dimension_numbers<[1], [0], [0], [1], [0, 0, 1, 1], [], []>} : vector<216x4xbf16>, vector<4x16xbf16>, vector<216x16xf32> -> vector<216x16xf32>
    %19 = arith.addf %12, %18 : vector<216x16xf32>
    %c0_17 = arith.constant 0 : index
    %c16 = arith.constant 16 : index
    %c0_18 = arith.constant 0 : index
    %20 = vector.load %arg1[%c0_17, %c16, %c0_18] : memref<2x256x4xf32, #tpu.memory_space<vmem>>, vector<1x216x4xf32>
    %21 = vector.shape_cast %20 : vector<1x216x4xf32> to vector<216x4xf32>
    %22 = arith.truncf %21 : vector<216x4xf32> to vector<216x4xbf16>
    %c3 = arith.constant 3 : index
    %c0_19 = arith.constant 0 : index
    %c0_20 = arith.constant 0 : index
    %23 = vector.load %arg2[%c3, %c0_19, %c0_20] : memref<9x4x16xbf16, #tpu.memory_space<vmem>>, vector<1x4x16xbf16>
    %24 = vector.shape_cast %23 : vector<1x4x16xbf16> to vector<4x16xbf16>
    %cst_21 = arith.constant dense<0.000000e+00> : vector<216x16xf32>
    %25 = tpu.matmul %22, %24, %cst_21 {dimension_numbers = #tpu.dot_dimension_numbers<[1], [0], [0], [1], [0, 0, 1, 1], [], []>} : vector<216x4xbf16>, vector<4x16xbf16>, vector<216x16xf32> -> vector<216x16xf32>
    %26 = arith.addf %19, %25 : vector<216x16xf32>
    %c0_22 = arith.constant 0 : index
    %c17 = arith.constant 17 : index
    %c0_23 = arith.constant 0 : index
    %27 = vector.load %arg1[%c0_22, %c17, %c0_23] : memref<2x256x4xf32, #tpu.memory_space<vmem>>, vector<1x216x4xf32>
    %28 = vector.shape_cast %27 : vector<1x216x4xf32> to vector<216x4xf32>
    %29 = arith.truncf %28 : vector<216x4xf32> to vector<216x4xbf16>
    %c4 = arith.constant 4 : index
    %c0_24 = arith.constant 0 : index
    %c0_25 = arith.constant 0 : index
    %30 = vector.load %arg2[%c4, %c0_24, %c0_25] : memref<9x4x16xbf16, #tpu.memory_space<vmem>>, vector<1x4x16xbf16>
    %31 = vector.shape_cast %30 : vector<1x4x16xbf16> to vector<4x16xbf16>
    %cst_26 = arith.constant dense<0.000000e+00> : vector<216x16xf32>
    %32 = tpu.matmul %29, %31, %cst_26 {dimension_numbers = #tpu.dot_dimension_numbers<[1], [0], [0], [1], [0, 0, 1, 1], [], []>} : vector<216x4xbf16>, vector<4x16xbf16>, vector<216x16xf32> -> vector<216x16xf32>
    %33 = arith.addf %26, %32 : vector<216x16xf32>
    %c0_27 = arith.constant 0 : index
    %c18 = arith.constant 18 : index
    %c0_28 = arith.constant 0 : index
    %34 = vector.load %arg1[%c0_27, %c18, %c0_28] : memref<2x256x4xf32, #tpu.memory_space<vmem>>, vector<1x216x4xf32>
    %35 = vector.shape_cast %34 : vector<1x216x4xf32> to vector<216x4xf32>
    %36 = arith.truncf %35 : vector<216x4xf32> to vector<216x4xbf16>
    %c5 = arith.constant 5 : index
    %c0_29 = arith.constant 0 : index
    %c0_30 = arith.constant 0 : index
    %37 = vector.load %arg2[%c5, %c0_29, %c0_30] : memref<9x4x16xbf16, #tpu.memory_space<vmem>>, vector<1x4x16xbf16>
    %38 = vector.shape_cast %37 : vector<1x4x16xbf16> to vector<4x16xbf16>
    %cst_31 = arith.constant dense<0.000000e+00> : vector<216x16xf32>
    %39 = tpu.matmul %36, %38, %cst_31 {dimension_numbers = #tpu.dot_dimension_numbers<[1], [0], [0], [1], [0, 0, 1, 1], [], []>} : vector<216x4xbf16>, vector<4x16xbf16>, vector<216x16xf32> -> vector<216x16xf32>
    %40 = arith.addf %33, %39 : vector<216x16xf32>
    %c0_32 = arith.constant 0 : index
    %c32 = arith.constant 32 : index
    %c0_33 = arith.constant 0 : index
    %41 = vector.load %arg1[%c0_32, %c32, %c0_33] : memref<2x256x4xf32, #tpu.memory_space<vmem>>, vector<1x216x4xf32>
    %42 = vector.shape_cast %41 : vector<1x216x4xf32> to vector<216x4xf32>
    %43 = arith.truncf %42 : vector<216x4xf32> to vector<216x4xbf16>
    %c6 = arith.constant 6 : index
    %c0_34 = arith.constant 0 : index
    %c0_35 = arith.constant 0 : index
    %44 = vector.load %arg2[%c6, %c0_34, %c0_35] : memref<9x4x16xbf16, #tpu.memory_space<vmem>>, vector<1x4x16xbf16>
    %45 = vector.shape_cast %44 : vector<1x4x16xbf16> to vector<4x16xbf16>
    %cst_36 = arith.constant dense<0.000000e+00> : vector<216x16xf32>
    %46 = tpu.matmul %43, %45, %cst_36 {dimension_numbers = #tpu.dot_dimension_numbers<[1], [0], [0], [1], [0, 0, 1, 1], [], []>} : vector<216x4xbf16>, vector<4x16xbf16>, vector<216x16xf32> -> vector<216x16xf32>
    %47 = arith.addf %40, %46 : vector<216x16xf32>
    %c0_37 = arith.constant 0 : index
    %c33 = arith.constant 33 : index
    %c0_38 = arith.constant 0 : index
    %48 = vector.load %arg1[%c0_37, %c33, %c0_38] : memref<2x256x4xf32, #tpu.memory_space<vmem>>, vector<1x216x4xf32>
    %49 = vector.shape_cast %48 : vector<1x216x4xf32> to vector<216x4xf32>
    %50 = arith.truncf %49 : vector<216x4xf32> to vector<216x4xbf16>
    %c7 = arith.constant 7 : index
    %c0_39 = arith.constant 0 : index
    %c0_40 = arith.constant 0 : index
    %51 = vector.load %arg2[%c7, %c0_39, %c0_40] : memref<9x4x16xbf16, #tpu.memory_space<vmem>>, vector<1x4x16xbf16>
    %52 = vector.shape_cast %51 : vector<1x4x16xbf16> to vector<4x16xbf16>
    %cst_41 = arith.constant dense<0.000000e+00> : vector<216x16xf32>
    %53 = tpu.matmul %50, %52, %cst_41 {dimension_numbers = #tpu.dot_dimension_numbers<[1], [0], [0], [1], [0, 0, 1, 1], [], []>} : vector<216x4xbf16>, vector<4x16xbf16>, vector<216x16xf32> -> vector<216x16xf32>
    %54 = arith.addf %47, %53 : vector<216x16xf32>
    %c0_42 = arith.constant 0 : index
    %c34 = arith.constant 34 : index
    %c0_43 = arith.constant 0 : index
    %55 = vector.load %arg1[%c0_42, %c34, %c0_43] : memref<2x256x4xf32, #tpu.memory_space<vmem>>, vector<1x216x4xf32>
    %56 = vector.shape_cast %55 : vector<1x216x4xf32> to vector<216x4xf32>
    %57 = arith.truncf %56 : vector<216x4xf32> to vector<216x4xbf16>
    %c8 = arith.constant 8 : index
    %c0_44 = arith.constant 0 : index
    %c0_45 = arith.constant 0 : index
    %58 = vector.load %arg2[%c8, %c0_44, %c0_45] : memref<9x4x16xbf16, #tpu.memory_space<vmem>>, vector<1x4x16xbf16>
    %59 = vector.shape_cast %58 : vector<1x4x16xbf16> to vector<4x16xbf16>
    %cst_46 = arith.constant dense<0.000000e+00> : vector<216x16xf32>
    %60 = tpu.matmul %57, %59, %cst_46 {dimension_numbers = #tpu.dot_dimension_numbers<[1], [0], [0], [1], [0, 0, 1, 1], [], []>} : vector<216x4xbf16>, vector<4x16xbf16>, vector<216x16xf32> -> vector<216x16xf32>
    %61 = arith.addf %54, %60 : vector<216x16xf32>
    %c0_47 = arith.constant 0 : index
    %c0_48 = arith.constant 0 : index
    %62 = vector.load %arg3[%c0_47, %c0_48] : memref<1x16xf32, #tpu.memory_space<vmem>>, vector<1x16xf32>
    %63 = vector.broadcast %62 : vector<1x16xf32> to vector<216x16xf32>
    %64 = arith.addf %61, %63 : vector<216x16xf32>
    %cst_49 = arith.constant 0.000000e+00 : f32
    %65 = vector.broadcast %cst_49 : f32 to vector<216x16xf32>
    %66 = arith.maximumf %64, %65 : vector<216x16xf32>
    %c0_50 = arith.constant 0 : index
    %c0_51 = arith.constant 0 : index
    %67 = vector.load %arg11[%c0_50, %c0_51] : memref<216x16xf32, #tpu.memory_space<vmem>>, vector<216x16xf32>
    tpu.vector_store %arg11[%c0_50, %c0_51], %66 {strides = array<i32>} : memref<216x16xf32, #tpu.memory_space<vmem>>, vector<216x16xf32>,
    %c0_52 = arith.constant 0 : index
    %c0_53 = arith.constant 0 : index
    %68 = vector.load %arg11[%c0_52, %c0_53] : memref<216x16xf32, #tpu.memory_space<vmem>>, vector<176x16xf32>
    %69 = arith.truncf %68 : vector<176x16xf32> to vector<176x16xbf16>
    %c0_54 = arith.constant 0 : index
    %c0_55 = arith.constant 0 : index
    %c0_56 = arith.constant 0 : index
    %70 = vector.load %arg4[%c0_54, %c0_55, %c0_56] : memref<9x16x16xbf16, #tpu.memory_space<vmem>>, vector<1x16x16xbf16>
    %71 = vector.shape_cast %70 : vector<1x16x16xbf16> to vector<16x16xbf16>
    %cst_57 = arith.constant dense<0.000000e+00> : vector<176x16xf32>
    %72 = tpu.matmul %69, %71, %cst_57 {dimension_numbers = #tpu.dot_dimension_numbers<[1], [0], [0], [1], [0, 0, 1, 1], [], []>} : vector<176x16xbf16>, vector<16x16xbf16>, vector<176x16xf32> -> vector<176x16xf32>
    %c1_58 = arith.constant 1 : index
    %c0_59 = arith.constant 0 : index
    %73 = vector.load %arg11[%c1_58, %c0_59] : memref<216x16xf32, #tpu.memory_space<vmem>>, vector<176x16xf32>
    %74 = arith.truncf %73 : vector<176x16xf32> to vector<176x16xbf16>
    %c1_60 = arith.constant 1 : index
    %c0_61 = arith.constant 0 : index
    %c0_62 = arith.constant 0 : index
    %75 = vector.load %arg4[%c1_60, %c0_61, %c0_62] : memref<9x16x16xbf16, #tpu.memory_space<vmem>>, vector<1x16x16xbf16>
    %76 = vector.shape_cast %75 : vector<1x16x16xbf16> to vector<16x16xbf16>
    %cst_63 = arith.constant dense<0.000000e+00> : vector<176x16xf32>
    %77 = tpu.matmul %74, %76, %cst_63 {dimension_numbers = #tpu.dot_dimension_numbers<[1], [0], [0], [1], [0, 0, 1, 1], [], []>} : vector<176x16xbf16>, vector<16x16xbf16>, vector<176x16xf32> -> vector<176x16xf32>
    %78 = arith.addf %72, %77 : vector<176x16xf32>
    %c2_64 = arith.constant 2 : index
    %c0_65 = arith.constant 0 : index
    %79 = vector.load %arg11[%c2_64, %c0_65] : memref<216x16xf32, #tpu.memory_space<vmem>>, vector<176x16xf32>
    %80 = arith.truncf %79 : vector<176x16xf32> to vector<176x16xbf16>
    %c2_66 = arith.constant 2 : index
    %c0_67 = arith.constant 0 : index
    %c0_68 = arith.constant 0 : index
    %81 = vector.load %arg4[%c2_66, %c0_67, %c0_68] : memref<9x16x16xbf16, #tpu.memory_space<vmem>>, vector<1x16x16xbf16>
    %82 = vector.shape_cast %81 : vector<1x16x16xbf16> to vector<16x16xbf16>
    %cst_69 = arith.constant dense<0.000000e+00> : vector<176x16xf32>
    %83 = tpu.matmul %80, %82, %cst_69 {dimension_numbers = #tpu.dot_dimension_numbers<[1], [0], [0], [1], [0, 0, 1, 1], [], []>} : vector<176x16xbf16>, vector<16x16xbf16>, vector<176x16xf32> -> vector<176x16xf32>
    %84 = arith.addf %78, %83 : vector<176x16xf32>
    %c16_70 = arith.constant 16 : index
    %c0_71 = arith.constant 0 : index
    %85 = vector.load %arg11[%c16_70, %c0_71] : memref<216x16xf32, #tpu.memory_space<vmem>>, vector<176x16xf32>
    %86 = arith.truncf %85 : vector<176x16xf32> to vector<176x16xbf16>
    %c3_72 = arith.constant 3 : index
    %c0_73 = arith.constant 0 : index
    %c0_74 = arith.constant 0 : index
    %87 = vector.load %arg4[%c3_72, %c0_73, %c0_74] : memref<9x16x16xbf16, #tpu.memory_space<vmem>>, vector<1x16x16xbf16>
    %88 = vector.shape_cast %87 : vector<1x16x16xbf16> to vector<16x16xbf16>
    %cst_75 = arith.constant dense<0.000000e+00> : vector<176x16xf32>
    %89 = tpu.matmul %86, %88, %cst_75 {dimension_numbers = #tpu.dot_dimension_numbers<[1], [0], [0], [1], [0, 0, 1, 1], [], []>} : vector<176x16xbf16>, vector<16x16xbf16>, vector<176x16xf32> -> vector<176x16xf32>
    %90 = arith.addf %84, %89 : vector<176x16xf32>
    %c17_76 = arith.constant 17 : index
    %c0_77 = arith.constant 0 : index
    %91 = vector.load %arg11[%c17_76, %c0_77] : memref<216x16xf32, #tpu.memory_space<vmem>>, vector<176x16xf32>
    %92 = arith.truncf %91 : vector<176x16xf32> to vector<176x16xbf16>
    %c4_78 = arith.constant 4 : index
    %c0_79 = arith.constant 0 : index
    %c0_80 = arith.constant 0 : index
    %93 = vector.load %arg4[%c4_78, %c0_79, %c0_80] : memref<9x16x16xbf16, #tpu.memory_space<vmem>>, vector<1x16x16xbf16>
    %94 = vector.shape_cast %93 : vector<1x16x16xbf16> to vector<16x16xbf16>
    %cst_81 = arith.constant dense<0.000000e+00> : vector<176x16xf32>
    %95 = tpu.matmul %92, %94, %cst_81 {dimension_numbers = #tpu.dot_dimension_numbers<[1], [0], [0], [1], [0, 0, 1, 1], [], []>} : vector<176x16xbf16>, vector<16x16xbf16>, vector<176x16xf32> -> vector<176x16xf32>
    %96 = arith.addf %90, %95 : vector<176x16xf32>
    %c18_82 = arith.constant 18 : index
    %c0_83 = arith.constant 0 : index
    %97 = vector.load %arg11[%c18_82, %c0_83] : memref<216x16xf32, #tpu.memory_space<vmem>>, vector<176x16xf32>
    %98 = arith.truncf %97 : vector<176x16xf32> to vector<176x16xbf16>
    %c5_84 = arith.constant 5 : index
    %c0_85 = arith.constant 0 : index
    %c0_86 = arith.constant 0 : index
    %99 = vector.load %arg4[%c5_84, %c0_85, %c0_86] : memref<9x16x16xbf16, #tpu.memory_space<vmem>>, vector<1x16x16xbf16>
    %100 = vector.shape_cast %99 : vector<1x16x16xbf16> to vector<16x16xbf16>
    %cst_87 = arith.constant dense<0.000000e+00> : vector<176x16xf32>
    %101 = tpu.matmul %98, %100, %cst_87 {dimension_numbers = #tpu.dot_dimension_numbers<[1], [0], [0], [1], [0, 0, 1, 1], [], []>} : vector<176x16xbf16>, vector<16x16xbf16>, vector<176x16xf32> -> vector<176x16xf32>
    %102 = arith.addf %96, %101 : vector<176x16xf32>
    %c32_88 = arith.constant 32 : index
    %c0_89 = arith.constant 0 : index
    %103 = vector.load %arg11[%c32_88, %c0_89] : memref<216x16xf32, #tpu.memory_space<vmem>>, vector<176x16xf32>
    %104 = arith.truncf %103 : vector<176x16xf32> to vector<176x16xbf16>
    %c6_90 = arith.constant 6 : index
    %c0_91 = arith.constant 0 : index
    %c0_92 = arith.constant 0 : index
    %105 = vector.load %arg4[%c6_90, %c0_91, %c0_92] : memref<9x16x16xbf16, #tpu.memory_space<vmem>>, vector<1x16x16xbf16>
    %106 = vector.shape_cast %105 : vector<1x16x16xbf16> to vector<16x16xbf16>
    %cst_93 = arith.constant dense<0.000000e+00> : vector<176x16xf32>
    %107 = tpu.matmul %104, %106, %cst_93 {dimension_numbers = #tpu.dot_dimension_numbers<[1], [0], [0], [1], [0, 0, 1, 1], [], []>} : vector<176x16xbf16>, vector<16x16xbf16>, vector<176x16xf32> -> vector<176x16xf32>
    %108 = arith.addf %102, %107 : vector<176x16xf32>
    %c33_94 = arith.constant 33 : index
    %c0_95 = arith.constant 0 : index
    %109 = vector.load %arg11[%c33_94, %c0_95] : memref<216x16xf32, #tpu.memory_space<vmem>>, vector<176x16xf32>
    %110 = arith.truncf %109 : vector<176x16xf32> to vector<176x16xbf16>
    %c7_96 = arith.constant 7 : index
    %c0_97 = arith.constant 0 : index
    %c0_98 = arith.constant 0 : index
    %111 = vector.load %arg4[%c7_96, %c0_97, %c0_98] : memref<9x16x16xbf16, #tpu.memory_space<vmem>>, vector<1x16x16xbf16>
    %112 = vector.shape_cast %111 : vector<1x16x16xbf16> to vector<16x16xbf16>
    %cst_99 = arith.constant dense<0.000000e+00> : vector<176x16xf32>
    %113 = tpu.matmul %110, %112, %cst_99 {dimension_numbers = #tpu.dot_dimension_numbers<[1], [0], [0], [1], [0, 0, 1, 1], [], []>} : vector<176x16xbf16>, vector<16x16xbf16>, vector<176x16xf32> -> vector<176x16xf32>
    %114 = arith.addf %108, %113 : vector<176x16xf32>
    %c34_100 = arith.constant 34 : index
    %c0_101 = arith.constant 0 : index
    %115 = vector.load %arg11[%c34_100, %c0_101] : memref<216x16xf32, #tpu.memory_space<vmem>>, vector<176x16xf32>
    %116 = arith.truncf %115 : vector<176x16xf32> to vector<176x16xbf16>
    %c8_102 = arith.constant 8 : index
    %c0_103 = arith.constant 0 : index
    %c0_104 = arith.constant 0 : index
    %117 = vector.load %arg4[%c8_102, %c0_103, %c0_104] : memref<9x16x16xbf16, #tpu.memory_space<vmem>>, vector<1x16x16xbf16>
    %118 = vector.shape_cast %117 : vector<1x16x16xbf16> to vector<16x16xbf16>
    %cst_105 = arith.constant dense<0.000000e+00> : vector<176x16xf32>
    %119 = tpu.matmul %116, %118, %cst_105 {dimension_numbers = #tpu.dot_dimension_numbers<[1], [0], [0], [1], [0, 0, 1, 1], [], []>} : vector<176x16xbf16>, vector<16x16xbf16>, vector<176x16xf32> -> vector<176x16xf32>
    %120 = arith.addf %114, %119 : vector<176x16xf32>
    %c0_106 = arith.constant 0 : index
    %c0_107 = arith.constant 0 : index
    %121 = vector.load %arg5[%c0_106, %c0_107] : memref<1x16xf32, #tpu.memory_space<vmem>>, vector<1x16xf32>
    %122 = vector.broadcast %121 : vector<1x16xf32> to vector<176x16xf32>
    %123 = arith.addf %120, %122 : vector<176x16xf32>
    %cst_108 = arith.constant 0.000000e+00 : f32
    %124 = vector.broadcast %cst_108 : f32 to vector<176x16xf32>
    %125 = arith.maximumf %123, %124 : vector<176x16xf32>
    %c0_109 = arith.constant 0 : index
    %c0_110 = arith.constant 0 : index
    %126 = vector.load %arg12[%c0_109, %c0_110] : memref<352x16xf32, #tpu.memory_space<vmem>>, vector<176x16xf32>
    tpu.vector_store %arg12[%c0_109, %c0_110], %125 {strides = array<i32>} : memref<352x16xf32, #tpu.memory_space<vmem>>, vector<176x16xf32>,
    %c1_111 = arith.constant 1 : index
    %c0_112 = arith.constant 0 : index
    %c0_113 = arith.constant 0 : index
    %127 = vector.load %arg1[%c1_111, %c0_112, %c0_113] : memref<2x256x4xf32, #tpu.memory_space<vmem>>, vector<1x216x4xf32>
    %128 = vector.shape_cast %127 : vector<1x216x4xf32> to vector<216x4xf32>
    %129 = arith.truncf %128 : vector<216x4xf32> to vector<216x4xbf16>
    %c0_114 = arith.constant 0 : index
    %c0_115 = arith.constant 0 : index
    %c0_116 = arith.constant 0 : index
    %130 = vector.load %arg2[%c0_114, %c0_115, %c0_116] : memref<9x4x16xbf16, #tpu.memory_space<vmem>>, vector<1x4x16xbf16>
    %131 = vector.shape_cast %130 : vector<1x4x16xbf16> to vector<4x16xbf16>
    %cst_117 = arith.constant dense<0.000000e+00> : vector<216x16xf32>
    %132 = tpu.matmul %129, %131, %cst_117 {dimension_numbers = #tpu.dot_dimension_numbers<[1], [0], [0], [1], [0, 0, 1, 1], [], []>} : vector<216x4xbf16>, vector<4x16xbf16>, vector<216x16xf32> -> vector<216x16xf32>
    %c1_118 = arith.constant 1 : index
    %c1_119 = arith.constant 1 : index
    %c0_120 = arith.constant 0 : index
    %133 = vector.load %arg1[%c1_118, %c1_119, %c0_120] : memref<2x256x4xf32, #tpu.memory_space<vmem>>, vector<1x216x4xf32>
    %134 = vector.shape_cast %133 : vector<1x216x4xf32> to vector<216x4xf32>
    %135 = arith.truncf %134 : vector<216x4xf32> to vector<216x4xbf16>
    %c1_121 = arith.constant 1 : index
    %c0_122 = arith.constant 0 : index
    %c0_123 = arith.constant 0 : index
    %136 = vector.load %arg2[%c1_121, %c0_122, %c0_123] : memref<9x4x16xbf16, #tpu.memory_space<vmem>>, vector<1x4x16xbf16>
    %137 = vector.shape_cast %136 : vector<1x4x16xbf16> to vector<4x16xbf16>
    %cst_124 = arith.constant dense<0.000000e+00> : vector<216x16xf32>
    %138 = tpu.matmul %135, %137, %cst_124 {dimension_numbers = #tpu.dot_dimension_numbers<[1], [0], [0], [1], [0, 0, 1, 1], [], []>} : vector<216x4xbf16>, vector<4x16xbf16>, vector<216x16xf32> -> vector<216x16xf32>
    %139 = arith.addf %132, %138 : vector<216x16xf32>
    %c1_125 = arith.constant 1 : index
    %c2_126 = arith.constant 2 : index
    %c0_127 = arith.constant 0 : index
    %140 = vector.load %arg1[%c1_125, %c2_126, %c0_127] : memref<2x256x4xf32, #tpu.memory_space<vmem>>, vector<1x216x4xf32>
    %141 = vector.shape_cast %140 : vector<1x216x4xf32> to vector<216x4xf32>
    %142 = arith.truncf %141 : vector<216x4xf32> to vector<216x4xbf16>
    %c2_128 = arith.constant 2 : index
    %c0_129 = arith.constant 0 : index
    %c0_130 = arith.constant 0 : index
    %143 = vector.load %arg2[%c2_128, %c0_129, %c0_130] : memref<9x4x16xbf16, #tpu.memory_space<vmem>>, vector<1x4x16xbf16>
    %144 = vector.shape_cast %143 : vector<1x4x16xbf16> to vector<4x16xbf16>
    %cst_131 = arith.constant dense<0.000000e+00> : vector<216x16xf32>
    %145 = tpu.matmul %142, %144, %cst_131 {dimension_numbers = #tpu.dot_dimension_numbers<[1], [0], [0], [1], [0, 0, 1, 1], [], []>} : vector<216x4xbf16>, vector<4x16xbf16>, vector<216x16xf32> -> vector<216x16xf32>
    %146 = arith.addf %139, %145 : vector<216x16xf32>
    %c1_132 = arith.constant 1 : index
    %c16_133 = arith.constant 16 : index
    %c0_134 = arith.constant 0 : index
    %147 = vector.load %arg1[%c1_132, %c16_133, %c0_134] : memref<2x256x4xf32, #tpu.memory_space<vmem>>, vector<1x216x4xf32>
    %148 = vector.shape_cast %147 : vector<1x216x4xf32> to vector<216x4xf32>
    %149 = arith.truncf %148 : vector<216x4xf32> to vector<216x4xbf16>
    %c3_135 = arith.constant 3 : index
    %c0_136 = arith.constant 0 : index
    %c0_137 = arith.constant 0 : index
    %150 = vector.load %arg2[%c3_135, %c0_136, %c0_137] : memref<9x4x16xbf16, #tpu.memory_space<vmem>>, vector<1x4x16xbf16>
    %151 = vector.shape_cast %150 : vector<1x4x16xbf16> to vector<4x16xbf16>
    %cst_138 = arith.constant dense<0.000000e+00> : vector<216x16xf32>
    %152 = tpu.matmul %149, %151, %cst_138 {dimension_numbers = #tpu.dot_dimension_numbers<[1], [0], [0], [1], [0, 0, 1, 1], [], []>} : vector<216x4xbf16>, vector<4x16xbf16>, vector<216x16xf32> -> vector<216x16xf32>
    %153 = arith.addf %146, %152 : vector<216x16xf32>
    %c1_139 = arith.constant 1 : index
    %c17_140 = arith.constant 17 : index
    %c0_141 = arith.constant 0 : index
    %154 = vector.load %arg1[%c1_139, %c17_140, %c0_141] : memref<2x256x4xf32, #tpu.memory_space<vmem>>, vector<1x216x4xf32>
    %155 = vector.shape_cast %154 : vector<1x216x4xf32> to vector<216x4xf32>
    %156 = arith.truncf %155 : vector<216x4xf32> to vector<216x4xbf16>
    %c4_142 = arith.constant 4 : index
    %c0_143 = arith.constant 0 : index
    %c0_144 = arith.constant 0 : index
    %157 = vector.load %arg2[%c4_142, %c0_143, %c0_144] : memref<9x4x16xbf16, #tpu.memory_space<vmem>>, vector<1x4x16xbf16>
    %158 = vector.shape_cast %157 : vector<1x4x16xbf16> to vector<4x16xbf16>
    %cst_145 = arith.constant dense<0.000000e+00> : vector<216x16xf32>
    %159 = tpu.matmul %156, %158, %cst_145 {dimension_numbers = #tpu.dot_dimension_numbers<[1], [0], [0], [1], [0, 0, 1, 1], [], []>} : vector<216x4xbf16>, vector<4x16xbf16>, vector<216x16xf32> -> vector<216x16xf32>
    %160 = arith.addf %153, %159 : vector<216x16xf32>
    %c1_146 = arith.constant 1 : index
    %c18_147 = arith.constant 18 : index
    %c0_148 = arith.constant 0 : index
    %161 = vector.load %arg1[%c1_146, %c18_147, %c0_148] : memref<2x256x4xf32, #tpu.memory_space<vmem>>, vector<1x216x4xf32>
    %162 = vector.shape_cast %161 : vector<1x216x4xf32> to vector<216x4xf32>
    %163 = arith.truncf %162 : vector<216x4xf32> to vector<216x4xbf16>
    %c5_149 = arith.constant 5 : index
    %c0_150 = arith.constant 0 : index
    %c0_151 = arith.constant 0 : index
    %164 = vector.load %arg2[%c5_149, %c0_150, %c0_151] : memref<9x4x16xbf16, #tpu.memory_space<vmem>>, vector<1x4x16xbf16>
    %165 = vector.shape_cast %164 : vector<1x4x16xbf16> to vector<4x16xbf16>
    %cst_152 = arith.constant dense<0.000000e+00> : vector<216x16xf32>
    %166 = tpu.matmul %163, %165, %cst_152 {dimension_numbers = #tpu.dot_dimension_numbers<[1], [0], [0], [1], [0, 0, 1, 1], [], []>} : vector<216x4xbf16>, vector<4x16xbf16>, vector<216x16xf32> -> vector<216x16xf32>
    %167 = arith.addf %160, %166 : vector<216x16xf32>
    %c1_153 = arith.constant 1 : index
    %c32_154 = arith.constant 32 : index
    %c0_155 = arith.constant 0 : index
    %168 = vector.load %arg1[%c1_153, %c32_154, %c0_155] : memref<2x256x4xf32, #tpu.memory_space<vmem>>, vector<1x216x4xf32>
    %169 = vector.shape_cast %168 : vector<1x216x4xf32> to vector<216x4xf32>
    %170 = arith.truncf %169 : vector<216x4xf32> to vector<216x4xbf16>
    %c6_156 = arith.constant 6 : index
    %c0_157 = arith.constant 0 : index
    %c0_158 = arith.constant 0 : index
    %171 = vector.load %arg2[%c6_156, %c0_157, %c0_158] : memref<9x4x16xbf16, #tpu.memory_space<vmem>>, vector<1x4x16xbf16>
    %172 = vector.shape_cast %171 : vector<1x4x16xbf16> to vector<4x16xbf16>
    %cst_159 = arith.constant dense<0.000000e+00> : vector<216x16xf32>
    %173 = tpu.matmul %170, %172, %cst_159 {dimension_numbers = #tpu.dot_dimension_numbers<[1], [0], [0], [1], [0, 0, 1, 1], [], []>} : vector<216x4xbf16>, vector<4x16xbf16>, vector<216x16xf32> -> vector<216x16xf32>
    %174 = arith.addf %167, %173 : vector<216x16xf32>
    %c1_160 = arith.constant 1 : index
    %c33_161 = arith.constant 33 : index
    %c0_162 = arith.constant 0 : index
    %175 = vector.load %arg1[%c1_160, %c33_161, %c0_162] : memref<2x256x4xf32, #tpu.memory_space<vmem>>, vector<1x216x4xf32>
    %176 = vector.shape_cast %175 : vector<1x216x4xf32> to vector<216x4xf32>
    %177 = arith.truncf %176 : vector<216x4xf32> to vector<216x4xbf16>
    %c7_163 = arith.constant 7 : index
    %c0_164 = arith.constant 0 : index
    %c0_165 = arith.constant 0 : index
    %178 = vector.load %arg2[%c7_163, %c0_164, %c0_165] : memref<9x4x16xbf16, #tpu.memory_space<vmem>>, vector<1x4x16xbf16>
    %179 = vector.shape_cast %178 : vector<1x4x16xbf16> to vector<4x16xbf16>
    %cst_166 = arith.constant dense<0.000000e+00> : vector<216x16xf32>
    %180 = tpu.matmul %177, %179, %cst_166 {dimension_numbers = #tpu.dot_dimension_numbers<[1], [0], [0], [1], [0, 0, 1, 1], [], []>} : vector<216x4xbf16>, vector<4x16xbf16>, vector<216x16xf32> -> vector<216x16xf32>
    %181 = arith.addf %174, %180 : vector<216x16xf32>
    %c1_167 = arith.constant 1 : index
    %c34_168 = arith.constant 34 : index
    %c0_169 = arith.constant 0 : index
    %182 = vector.load %arg1[%c1_167, %c34_168, %c0_169] : memref<2x256x4xf32, #tpu.memory_space<vmem>>, vector<1x216x4xf32>
    %183 = vector.shape_cast %182 : vector<1x216x4xf32> to vector<216x4xf32>
    %184 = arith.truncf %183 : vector<216x4xf32> to vector<216x4xbf16>
    %c8_170 = arith.constant 8 : index
    %c0_171 = arith.constant 0 : index
    %c0_172 = arith.constant 0 : index
    %185 = vector.load %arg2[%c8_170, %c0_171, %c0_172] : memref<9x4x16xbf16, #tpu.memory_space<vmem>>, vector<1x4x16xbf16>
    %186 = vector.shape_cast %185 : vector<1x4x16xbf16> to vector<4x16xbf16>
    %cst_173 = arith.constant dense<0.000000e+00> : vector<216x16xf32>
    %187 = tpu.matmul %184, %186, %cst_173 {dimension_numbers = #tpu.dot_dimension_numbers<[1], [0], [0], [1], [0, 0, 1, 1], [], []>} : vector<216x4xbf16>, vector<4x16xbf16>, vector<216x16xf32> -> vector<216x16xf32>
    %188 = arith.addf %181, %187 : vector<216x16xf32>
    %c0_174 = arith.constant 0 : index
    %c0_175 = arith.constant 0 : index
    %189 = vector.load %arg3[%c0_174, %c0_175] : memref<1x16xf32, #tpu.memory_space<vmem>>, vector<1x16xf32>
    %190 = vector.broadcast %189 : vector<1x16xf32> to vector<216x16xf32>
    %191 = arith.addf %188, %190 : vector<216x16xf32>
    %cst_176 = arith.constant 0.000000e+00 : f32
    %192 = vector.broadcast %cst_176 : f32 to vector<216x16xf32>
    %193 = arith.maximumf %191, %192 : vector<216x16xf32>
    %c0_177 = arith.constant 0 : index
    %c0_178 = arith.constant 0 : index
    %194 = vector.load %arg11[%c0_177, %c0_178] : memref<216x16xf32, #tpu.memory_space<vmem>>, vector<216x16xf32>
    tpu.vector_store %arg11[%c0_177, %c0_178], %193 {strides = array<i32>} : memref<216x16xf32, #tpu.memory_space<vmem>>, vector<216x16xf32>,
    %c0_179 = arith.constant 0 : index
    %c0_180 = arith.constant 0 : index
    %195 = vector.load %arg11[%c0_179, %c0_180] : memref<216x16xf32, #tpu.memory_space<vmem>>, vector<176x16xf32>
    %196 = arith.truncf %195 : vector<176x16xf32> to vector<176x16xbf16>
    %c0_181 = arith.constant 0 : index
    %c0_182 = arith.constant 0 : index
    %c0_183 = arith.constant 0 : index
    %197 = vector.load %arg4[%c0_181, %c0_182, %c0_183] : memref<9x16x16xbf16, #tpu.memory_space<vmem>>, vector<1x16x16xbf16>
    %198 = vector.shape_cast %197 : vector<1x16x16xbf16> to vector<16x16xbf16>
    %cst_184 = arith.constant dense<0.000000e+00> : vector<176x16xf32>
    %199 = tpu.matmul %196, %198, %cst_184 {dimension_numbers = #tpu.dot_dimension_numbers<[1], [0], [0], [1], [0, 0, 1, 1], [], []>} : vector<176x16xbf16>, vector<16x16xbf16>, vector<176x16xf32> -> vector<176x16xf32>
    %c1_185 = arith.constant 1 : index
    %c0_186 = arith.constant 0 : index
    %200 = vector.load %arg11[%c1_185, %c0_186] : memref<216x16xf32, #tpu.memory_space<vmem>>, vector<176x16xf32>
    %201 = arith.truncf %200 : vector<176x16xf32> to vector<176x16xbf16>
    %c1_187 = arith.constant 1 : index
    %c0_188 = arith.constant 0 : index
    %c0_189 = arith.constant 0 : index
    %202 = vector.load %arg4[%c1_187, %c0_188, %c0_189] : memref<9x16x16xbf16, #tpu.memory_space<vmem>>, vector<1x16x16xbf16>
    %203 = vector.shape_cast %202 : vector<1x16x16xbf16> to vector<16x16xbf16>
    %cst_190 = arith.constant dense<0.000000e+00> : vector<176x16xf32>
    %204 = tpu.matmul %201, %203, %cst_190 {dimension_numbers = #tpu.dot_dimension_numbers<[1], [0], [0], [1], [0, 0, 1, 1], [], []>} : vector<176x16xbf16>, vector<16x16xbf16>, vector<176x16xf32> -> vector<176x16xf32>
    %205 = arith.addf %199, %204 : vector<176x16xf32>
    %c2_191 = arith.constant 2 : index
    %c0_192 = arith.constant 0 : index
    %206 = vector.load %arg11[%c2_191, %c0_192] : memref<216x16xf32, #tpu.memory_space<vmem>>, vector<176x16xf32>
    %207 = arith.truncf %206 : vector<176x16xf32> to vector<176x16xbf16>
    %c2_193 = arith.constant 2 : index
    %c0_194 = arith.constant 0 : index
    %c0_195 = arith.constant 0 : index
    %208 = vector.load %arg4[%c2_193, %c0_194, %c0_195] : memref<9x16x16xbf16, #tpu.memory_space<vmem>>, vector<1x16x16xbf16>
    %209 = vector.shape_cast %208 : vector<1x16x16xbf16> to vector<16x16xbf16>
    %cst_196 = arith.constant dense<0.000000e+00> : vector<176x16xf32>
    %210 = tpu.matmul %207, %209, %cst_196 {dimension_numbers = #tpu.dot_dimension_numbers<[1], [0], [0], [1], [0, 0, 1, 1], [], []>} : vector<176x16xbf16>, vector<16x16xbf16>, vector<176x16xf32> -> vector<176x16xf32>
    %211 = arith.addf %205, %210 : vector<176x16xf32>
    %c16_197 = arith.constant 16 : index
    %c0_198 = arith.constant 0 : index
    %212 = vector.load %arg11[%c16_197, %c0_198] : memref<216x16xf32, #tpu.memory_space<vmem>>, vector<176x16xf32>
    %213 = arith.truncf %212 : vector<176x16xf32> to vector<176x16xbf16>
    %c3_199 = arith.constant 3 : index
    %c0_200 = arith.constant 0 : index
    %c0_201 = arith.constant 0 : index
    %214 = vector.load %arg4[%c3_199, %c0_200, %c0_201] : memref<9x16x16xbf16, #tpu.memory_space<vmem>>, vector<1x16x16xbf16>
    %215 = vector.shape_cast %214 : vector<1x16x16xbf16> to vector<16x16xbf16>
    %cst_202 = arith.constant dense<0.000000e+00> : vector<176x16xf32>
    %216 = tpu.matmul %213, %215, %cst_202 {dimension_numbers = #tpu.dot_dimension_numbers<[1], [0], [0], [1], [0, 0, 1, 1], [], []>} : vector<176x16xbf16>, vector<16x16xbf16>, vector<176x16xf32> -> vector<176x16xf32>
    %217 = arith.addf %211, %216 : vector<176x16xf32>
    %c17_203 = arith.constant 17 : index
    %c0_204 = arith.constant 0 : index
    %218 = vector.load %arg11[%c17_203, %c0_204] : memref<216x16xf32, #tpu.memory_space<vmem>>, vector<176x16xf32>
    %219 = arith.truncf %218 : vector<176x16xf32> to vector<176x16xbf16>
    %c4_205 = arith.constant 4 : index
    %c0_206 = arith.constant 0 : index
    %c0_207 = arith.constant 0 : index
    %220 = vector.load %arg4[%c4_205, %c0_206, %c0_207] : memref<9x16x16xbf16, #tpu.memory_space<vmem>>, vector<1x16x16xbf16>
    %221 = vector.shape_cast %220 : vector<1x16x16xbf16> to vector<16x16xbf16>
    %cst_208 = arith.constant dense<0.000000e+00> : vector<176x16xf32>
    %222 = tpu.matmul %219, %221, %cst_208 {dimension_numbers = #tpu.dot_dimension_numbers<[1], [0], [0], [1], [0, 0, 1, 1], [], []>} : vector<176x16xbf16>, vector<16x16xbf16>, vector<176x16xf32> -> vector<176x16xf32>
    %223 = arith.addf %217, %222 : vector<176x16xf32>
    %c18_209 = arith.constant 18 : index
    %c0_210 = arith.constant 0 : index
    %224 = vector.load %arg11[%c18_209, %c0_210] : memref<216x16xf32, #tpu.memory_space<vmem>>, vector<176x16xf32>
    %225 = arith.truncf %224 : vector<176x16xf32> to vector<176x16xbf16>
    %c5_211 = arith.constant 5 : index
    %c0_212 = arith.constant 0 : index
    %c0_213 = arith.constant 0 : index
    %226 = vector.load %arg4[%c5_211, %c0_212, %c0_213] : memref<9x16x16xbf16, #tpu.memory_space<vmem>>, vector<1x16x16xbf16>
    %227 = vector.shape_cast %226 : vector<1x16x16xbf16> to vector<16x16xbf16>
    %cst_214 = arith.constant dense<0.000000e+00> : vector<176x16xf32>
    %228 = tpu.matmul %225, %227, %cst_214 {dimension_numbers = #tpu.dot_dimension_numbers<[1], [0], [0], [1], [0, 0, 1, 1], [], []>} : vector<176x16xbf16>, vector<16x16xbf16>, vector<176x16xf32> -> vector<176x16xf32>
    %229 = arith.addf %223, %228 : vector<176x16xf32>
    %c32_215 = arith.constant 32 : index
    %c0_216 = arith.constant 0 : index
    %230 = vector.load %arg11[%c32_215, %c0_216] : memref<216x16xf32, #tpu.memory_space<vmem>>, vector<176x16xf32>
    %231 = arith.truncf %230 : vector<176x16xf32> to vector<176x16xbf16>
    %c6_217 = arith.constant 6 : index
    %c0_218 = arith.constant 0 : index
    %c0_219 = arith.constant 0 : index
    %232 = vector.load %arg4[%c6_217, %c0_218, %c0_219] : memref<9x16x16xbf16, #tpu.memory_space<vmem>>, vector<1x16x16xbf16>
    %233 = vector.shape_cast %232 : vector<1x16x16xbf16> to vector<16x16xbf16>
    %cst_220 = arith.constant dense<0.000000e+00> : vector<176x16xf32>
    %234 = tpu.matmul %231, %233, %cst_220 {dimension_numbers = #tpu.dot_dimension_numbers<[1], [0], [0], [1], [0, 0, 1, 1], [], []>} : vector<176x16xbf16>, vector<16x16xbf16>, vector<176x16xf32> -> vector<176x16xf32>
    %235 = arith.addf %229, %234 : vector<176x16xf32>
    %c33_221 = arith.constant 33 : index
    %c0_222 = arith.constant 0 : index
    %236 = vector.load %arg11[%c33_221, %c0_222] : memref<216x16xf32, #tpu.memory_space<vmem>>, vector<176x16xf32>
    %237 = arith.truncf %236 : vector<176x16xf32> to vector<176x16xbf16>
    %c7_223 = arith.constant 7 : index
    %c0_224 = arith.constant 0 : index
    %c0_225 = arith.constant 0 : index
    %238 = vector.load %arg4[%c7_223, %c0_224, %c0_225] : memref<9x16x16xbf16, #tpu.memory_space<vmem>>, vector<1x16x16xbf16>
    %239 = vector.shape_cast %238 : vector<1x16x16xbf16> to vector<16x16xbf16>
    %cst_226 = arith.constant dense<0.000000e+00> : vector<176x16xf32>
    %240 = tpu.matmul %237, %239, %cst_226 {dimension_numbers = #tpu.dot_dimension_numbers<[1], [0], [0], [1], [0, 0, 1, 1], [], []>} : vector<176x16xbf16>, vector<16x16xbf16>, vector<176x16xf32> -> vector<176x16xf32>
    %241 = arith.addf %235, %240 : vector<176x16xf32>
    %c34_227 = arith.constant 34 : index
    %c0_228 = arith.constant 0 : index
    %242 = vector.load %arg11[%c34_227, %c0_228] : memref<216x16xf32, #tpu.memory_space<vmem>>, vector<176x16xf32>
    %243 = arith.truncf %242 : vector<176x16xf32> to vector<176x16xbf16>
    %c8_229 = arith.constant 8 : index
    %c0_230 = arith.constant 0 : index
    %c0_231 = arith.constant 0 : index
    %244 = vector.load %arg4[%c8_229, %c0_230, %c0_231] : memref<9x16x16xbf16, #tpu.memory_space<vmem>>, vector<1x16x16xbf16>
    %245 = vector.shape_cast %244 : vector<1x16x16xbf16> to vector<16x16xbf16>
    %cst_232 = arith.constant dense<0.000000e+00> : vector<176x16xf32>
    %246 = tpu.matmul %243, %245, %cst_232 {dimension_numbers = #tpu.dot_dimension_numbers<[1], [0], [0], [1], [0, 0, 1, 1], [], []>} : vector<176x16xbf16>, vector<16x16xbf16>, vector<176x16xf32> -> vector<176x16xf32>
    %247 = arith.addf %241, %246 : vector<176x16xf32>
    %c0_233 = arith.constant 0 : index
    %c0_234 = arith.constant 0 : index
    %248 = vector.load %arg5[%c0_233, %c0_234] : memref<1x16xf32, #tpu.memory_space<vmem>>, vector<1x16xf32>
    %249 = vector.broadcast %248 : vector<1x16xf32> to vector<176x16xf32>
    %250 = arith.addf %247, %249 : vector<176x16xf32>
    %cst_235 = arith.constant 0.000000e+00 : f32
    %251 = vector.broadcast %cst_235 : f32 to vector<176x16xf32>
    %252 = arith.maximumf %250, %251 : vector<176x16xf32>
    %c176 = arith.constant 176 : index
    %c0_236 = arith.constant 0 : index
    %253 = vector.load %arg12[%c176, %c0_236] : memref<352x16xf32, #tpu.memory_space<vmem>>, vector<176x16xf32>
    tpu.vector_store %arg12[%c176, %c0_236], %252 {strides = array<i32>} : memref<352x16xf32, #tpu.memory_space<vmem>>, vector<176x16xf32>,
    %c0_237 = arith.constant 0 : index
    %c0_238 = arith.constant 0 : index
    %254 = tpu.strided_load %arg12[%c0_237, %c0_238] {strides = array<i32: 176, 1>} : memref<352x16xf32, #tpu.memory_space<vmem>>, vector<2x16xf32>
    %255 = arith.truncf %254 : vector<2x16xf32> to vector<2x16xbf16>
    %c0_239 = arith.constant 0 : index
    %c0_240 = arith.constant 0 : index
    %c0_241 = arith.constant 0 : index
    %256 = vector.load %arg6[%c0_239, %c0_240, %c0_241] : memref<36x16x256xbf16, #tpu.memory_space<vmem>>, vector<1x16x256xbf16>
    %257 = vector.shape_cast %256 : vector<1x16x256xbf16> to vector<16x256xbf16>
    %cst_242 = arith.constant dense<0.000000e+00> : vector<2x256xf32>
    %258 = tpu.matmul %255, %257, %cst_242 {dimension_numbers = #tpu.dot_dimension_numbers<[1], [0], [0], [1], [0, 0, 1, 1], [], []>} : vector<2x16xbf16>, vector<16x256xbf16>, vector<2x256xf32> -> vector<2x256xf32>
    %c2_243 = arith.constant 2 : index
    %c0_244 = arith.constant 0 : index
    %259 = tpu.strided_load %arg12[%c2_243, %c0_244] {strides = array<i32: 176, 1>} : memref<352x16xf32, #tpu.memory_space<vmem>>, vector<2x16xf32>
    %260 = arith.truncf %259 : vector<2x16xf32> to vector<2x16xbf16>
    %c1_245 = arith.constant 1 : index
    %c0_246 = arith.constant 0 : index
    %c0_247 = arith.constant 0 : index
    %261 = vector.load %arg6[%c1_245, %c0_246, %c0_247] : memref<36x16x256xbf16, #tpu.memory_space<vmem>>, vector<1x16x256xbf16>
    %262 = vector.shape_cast %261 : vector<1x16x256xbf16> to vector<16x256xbf16>
    %cst_248 = arith.constant dense<0.000000e+00> : vector<2x256xf32>
    %263 = tpu.matmul %260, %262, %cst_248 {dimension_numbers = #tpu.dot_dimension_numbers<[1], [0], [0], [1], [0, 0, 1, 1], [], []>} : vector<2x16xbf16>, vector<16x256xbf16>, vector<2x256xf32> -> vector<2x256xf32>
    %264 = arith.addf %258, %263 : vector<2x256xf32>
    %c4_249 = arith.constant 4 : index
    %c0_250 = arith.constant 0 : index
    %265 = tpu.strided_load %arg12[%c4_249, %c0_250] {strides = array<i32: 176, 1>} : memref<352x16xf32, #tpu.memory_space<vmem>>, vector<2x16xf32>
    %266 = arith.truncf %265 : vector<2x16xf32> to vector<2x16xbf16>
    %c2_251 = arith.constant 2 : index
    %c0_252 = arith.constant 0 : index
    %c0_253 = arith.constant 0 : index
    %267 = vector.load %arg6[%c2_251, %c0_252, %c0_253] : memref<36x16x256xbf16, #tpu.memory_space<vmem>>, vector<1x16x256xbf16>
    %268 = vector.shape_cast %267 : vector<1x16x256xbf16> to vector<16x256xbf16>
    %cst_254 = arith.constant dense<0.000000e+00> : vector<2x256xf32>
    %269 = tpu.matmul %266, %268, %cst_254 {dimension_numbers = #tpu.dot_dimension_numbers<[1], [0], [0], [1], [0, 0, 1, 1], [], []>} : vector<2x16xbf16>, vector<16x256xbf16>, vector<2x256xf32> -> vector<2x256xf32>
    %270 = arith.addf %264, %269 : vector<2x256xf32>
    %c6_255 = arith.constant 6 : index
    %c0_256 = arith.constant 0 : index
    %271 = tpu.strided_load %arg12[%c6_255, %c0_256] {strides = array<i32: 176, 1>} : memref<352x16xf32, #tpu.memory_space<vmem>>, vector<2x16xf32>
    %272 = arith.truncf %271 : vector<2x16xf32> to vector<2x16xbf16>
    %c3_257 = arith.constant 3 : index
    %c0_258 = arith.constant 0 : index
    %c0_259 = arith.constant 0 : index
    %273 = vector.load %arg6[%c3_257, %c0_258, %c0_259] : memref<36x16x256xbf16, #tpu.memory_space<vmem>>, vector<1x16x256xbf16>
    %274 = vector.shape_cast %273 : vector<1x16x256xbf16> to vector<16x256xbf16>
    %cst_260 = arith.constant dense<0.000000e+00> : vector<2x256xf32>
    %275 = tpu.matmul %272, %274, %cst_260 {dimension_numbers = #tpu.dot_dimension_numbers<[1], [0], [0], [1], [0, 0, 1, 1], [], []>} : vector<2x16xbf16>, vector<16x256xbf16>, vector<2x256xf32> -> vector<2x256xf32>
    %276 = arith.addf %270, %275 : vector<2x256xf32>
    %c8_261 = arith.constant 8 : index
    %c0_262 = arith.constant 0 : index
    %277 = tpu.strided_load %arg12[%c8_261, %c0_262] {strides = array<i32: 176, 1>} : memref<352x16xf32, #tpu.memory_space<vmem>>, vector<2x16xf32>
    %278 = arith.truncf %277 : vector<2x16xf32> to vector<2x16xbf16>
    %c4_263 = arith.constant 4 : index
    %c0_264 = arith.constant 0 : index
    %c0_265 = arith.constant 0 : index
    %279 = vector.load %arg6[%c4_263, %c0_264, %c0_265] : memref<36x16x256xbf16, #tpu.memory_space<vmem>>, vector<1x16x256xbf16>
    %280 = vector.shape_cast %279 : vector<1x16x256xbf16> to vector<16x256xbf16>
    %cst_266 = arith.constant dense<0.000000e+00> : vector<2x256xf32>
    %281 = tpu.matmul %278, %280, %cst_266 {dimension_numbers = #tpu.dot_dimension_numbers<[1], [0], [0], [1], [0, 0, 1, 1], [], []>} : vector<2x16xbf16>, vector<16x256xbf16>, vector<2x256xf32> -> vector<2x256xf32>
    %282 = arith.addf %276, %281 : vector<2x256xf32>
    %c10 = arith.constant 10 : index
    %c0_267 = arith.constant 0 : index
    %283 = tpu.strided_load %arg12[%c10, %c0_267] {strides = array<i32: 176, 1>} : memref<352x16xf32, #tpu.memory_space<vmem>>, vector<2x16xf32>
    %284 = arith.truncf %283 : vector<2x16xf32> to vector<2x16xbf16>
    %c5_268 = arith.constant 5 : index
    %c0_269 = arith.constant 0 : index
    %c0_270 = arith.constant 0 : index
    %285 = vector.load %arg6[%c5_268, %c0_269, %c0_270] : memref<36x16x256xbf16, #tpu.memory_space<vmem>>, vector<1x16x256xbf16>
    %286 = vector.shape_cast %285 : vector<1x16x256xbf16> to vector<16x256xbf16>
    %cst_271 = arith.constant dense<0.000000e+00> : vector<2x256xf32>
    %287 = tpu.matmul %284, %286, %cst_271 {dimension_numbers = #tpu.dot_dimension_numbers<[1], [0], [0], [1], [0, 0, 1, 1], [], []>} : vector<2x16xbf16>, vector<16x256xbf16>, vector<2x256xf32> -> vector<2x256xf32>
    %288 = arith.addf %282, %287 : vector<2x256xf32>
    %c32_272 = arith.constant 32 : index
    %c0_273 = arith.constant 0 : index
    %289 = tpu.strided_load %arg12[%c32_272, %c0_273] {strides = array<i32: 176, 1>} : memref<352x16xf32, #tpu.memory_space<vmem>>, vector<2x16xf32>
    %290 = arith.truncf %289 : vector<2x16xf32> to vector<2x16xbf16>
    %c6_274 = arith.constant 6 : index
    %c0_275 = arith.constant 0 : index
    %c0_276 = arith.constant 0 : index
    %291 = vector.load %arg6[%c6_274, %c0_275, %c0_276] : memref<36x16x256xbf16, #tpu.memory_space<vmem>>, vector<1x16x256xbf16>
    %292 = vector.shape_cast %291 : vector<1x16x256xbf16> to vector<16x256xbf16>
    %cst_277 = arith.constant dense<0.000000e+00> : vector<2x256xf32>
    %293 = tpu.matmul %290, %292, %cst_277 {dimension_numbers = #tpu.dot_dimension_numbers<[1], [0], [0], [1], [0, 0, 1, 1], [], []>} : vector<2x16xbf16>, vector<16x256xbf16>, vector<2x256xf32> -> vector<2x256xf32>
    %294 = arith.addf %288, %293 : vector<2x256xf32>
    %c34_278 = arith.constant 34 : index
    %c0_279 = arith.constant 0 : index
    %295 = tpu.strided_load %arg12[%c34_278, %c0_279] {strides = array<i32: 176, 1>} : memref<352x16xf32, #tpu.memory_space<vmem>>, vector<2x16xf32>
    %296 = arith.truncf %295 : vector<2x16xf32> to vector<2x16xbf16>
    %c7_280 = arith.constant 7 : index
    %c0_281 = arith.constant 0 : index
    %c0_282 = arith.constant 0 : index
    %297 = vector.load %arg6[%c7_280, %c0_281, %c0_282] : memref<36x16x256xbf16, #tpu.memory_space<vmem>>, vector<1x16x256xbf16>
    %298 = vector.shape_cast %297 : vector<1x16x256xbf16> to vector<16x256xbf16>
    %cst_283 = arith.constant dense<0.000000e+00> : vector<2x256xf32>
    %299 = tpu.matmul %296, %298, %cst_283 {dimension_numbers = #tpu.dot_dimension_numbers<[1], [0], [0], [1], [0, 0, 1, 1], [], []>} : vector<2x16xbf16>, vector<16x256xbf16>, vector<2x256xf32> -> vector<2x256xf32>
    %300 = arith.addf %294, %299 : vector<2x256xf32>
    %c36 = arith.constant 36 : index
    %c0_284 = arith.constant 0 : index
    %301 = tpu.strided_load %arg12[%c36, %c0_284] {strides = array<i32: 176, 1>} : memref<352x16xf32, #tpu.memory_space<vmem>>, vector<2x16xf32>
    %302 = arith.truncf %301 : vector<2x16xf32> to vector<2x16xbf16>
    %c8_285 = arith.constant 8 : index
    %c0_286 = arith.constant 0 : index
    %c0_287 = arith.constant 0 : index
    %303 = vector.load %arg6[%c8_285, %c0_286, %c0_287] : memref<36x16x256xbf16, #tpu.memory_space<vmem>>, vector<1x16x256xbf16>
    %304 = vector.shape_cast %303 : vector<1x16x256xbf16> to vector<16x256xbf16>
    %cst_288 = arith.constant dense<0.000000e+00> : vector<2x256xf32>
    %305 = tpu.matmul %302, %304, %cst_288 {dimension_numbers = #tpu.dot_dimension_numbers<[1], [0], [0], [1], [0, 0, 1, 1], [], []>} : vector<2x16xbf16>, vector<16x256xbf16>, vector<2x256xf32> -> vector<2x256xf32>
    %306 = arith.addf %300, %305 : vector<2x256xf32>
    %c38 = arith.constant 38 : index
    %c0_289 = arith.constant 0 : index
    %307 = tpu.strided_load %arg12[%c38, %c0_289] {strides = array<i32: 176, 1>} : memref<352x16xf32, #tpu.memory_space<vmem>>, vector<2x16xf32>
    %308 = arith.truncf %307 : vector<2x16xf32> to vector<2x16xbf16>
    %c9 = arith.constant 9 : index
    %c0_290 = arith.constant 0 : index
    %c0_291 = arith.constant 0 : index
    %309 = vector.load %arg6[%c9, %c0_290, %c0_291] : memref<36x16x256xbf16, #tpu.memory_space<vmem>>, vector<1x16x256xbf16>
    %310 = vector.shape_cast %309 : vector<1x16x256xbf16> to vector<16x256xbf16>
    %cst_292 = arith.constant dense<0.000000e+00> : vector<2x256xf32>
    %311 = tpu.matmul %308, %310, %cst_292 {dimension_numbers = #tpu.dot_dimension_numbers<[1], [0], [0], [1], [0, 0, 1, 1], [], []>} : vector<2x16xbf16>, vector<16x256xbf16>, vector<2x256xf32> -> vector<2x256xf32>
    %312 = arith.addf %306, %311 : vector<2x256xf32>
    %c40 = arith.constant 40 : index
    %c0_293 = arith.constant 0 : index
    %313 = tpu.strided_load %arg12[%c40, %c0_293] {strides = array<i32: 176, 1>} : memref<352x16xf32, #tpu.memory_space<vmem>>, vector<2x16xf32>
    %314 = arith.truncf %313 : vector<2x16xf32> to vector<2x16xbf16>
    %c10_294 = arith.constant 10 : index
    %c0_295 = arith.constant 0 : index
    %c0_296 = arith.constant 0 : index
    %315 = vector.load %arg6[%c10_294, %c0_295, %c0_296] : memref<36x16x256xbf16, #tpu.memory_space<vmem>>, vector<1x16x256xbf16>
    %316 = vector.shape_cast %315 : vector<1x16x256xbf16> to vector<16x256xbf16>
    %cst_297 = arith.constant dense<0.000000e+00> : vector<2x256xf32>
    %317 = tpu.matmul %314, %316, %cst_297 {dimension_numbers = #tpu.dot_dimension_numbers<[1], [0], [0], [1], [0, 0, 1, 1], [], []>} : vector<2x16xbf16>, vector<16x256xbf16>, vector<2x256xf32> -> vector<2x256xf32>
    %318 = arith.addf %312, %317 : vector<2x256xf32>
    %c42 = arith.constant 42 : index
    %c0_298 = arith.constant 0 : index
    %319 = tpu.strided_load %arg12[%c42, %c0_298] {strides = array<i32: 176, 1>} : memref<352x16xf32, #tpu.memory_space<vmem>>, vector<2x16xf32>
    %320 = arith.truncf %319 : vector<2x16xf32> to vector<2x16xbf16>
    %c11 = arith.constant 11 : index
    %c0_299 = arith.constant 0 : index
    %c0_300 = arith.constant 0 : index
    %321 = vector.load %arg6[%c11, %c0_299, %c0_300] : memref<36x16x256xbf16, #tpu.memory_space<vmem>>, vector<1x16x256xbf16>
    %322 = vector.shape_cast %321 : vector<1x16x256xbf16> to vector<16x256xbf16>
    %cst_301 = arith.constant dense<0.000000e+00> : vector<2x256xf32>
    %323 = tpu.matmul %320, %322, %cst_301 {dimension_numbers = #tpu.dot_dimension_numbers<[1], [0], [0], [1], [0, 0, 1, 1], [], []>} : vector<2x16xbf16>, vector<16x256xbf16>, vector<2x256xf32> -> vector<2x256xf32>
    %324 = arith.addf %318, %323 : vector<2x256xf32>
    %c64 = arith.constant 64 : index
    %c0_302 = arith.constant 0 : index
    %325 = tpu.strided_load %arg12[%c64, %c0_302] {strides = array<i32: 176, 1>} : memref<352x16xf32, #tpu.memory_space<vmem>>, vector<2x16xf32>
    %326 = arith.truncf %325 : vector<2x16xf32> to vector<2x16xbf16>
    %c12 = arith.constant 12 : index
    %c0_303 = arith.constant 0 : index
    %c0_304 = arith.constant 0 : index
    %327 = vector.load %arg6[%c12, %c0_303, %c0_304] : memref<36x16x256xbf16, #tpu.memory_space<vmem>>, vector<1x16x256xbf16>
    %328 = vector.shape_cast %327 : vector<1x16x256xbf16> to vector<16x256xbf16>
    %cst_305 = arith.constant dense<0.000000e+00> : vector<2x256xf32>
    %329 = tpu.matmul %326, %328, %cst_305 {dimension_numbers = #tpu.dot_dimension_numbers<[1], [0], [0], [1], [0, 0, 1, 1], [], []>} : vector<2x16xbf16>, vector<16x256xbf16>, vector<2x256xf32> -> vector<2x256xf32>
    %330 = arith.addf %324, %329 : vector<2x256xf32>
    %c66 = arith.constant 66 : index
    %c0_306 = arith.constant 0 : index
    %331 = tpu.strided_load %arg12[%c66, %c0_306] {strides = array<i32: 176, 1>} : memref<352x16xf32, #tpu.memory_space<vmem>>, vector<2x16xf32>
    %332 = arith.truncf %331 : vector<2x16xf32> to vector<2x16xbf16>
    %c13 = arith.constant 13 : index
    %c0_307 = arith.constant 0 : index
    %c0_308 = arith.constant 0 : index
    %333 = vector.load %arg6[%c13, %c0_307, %c0_308] : memref<36x16x256xbf16, #tpu.memory_space<vmem>>, vector<1x16x256xbf16>
    %334 = vector.shape_cast %333 : vector<1x16x256xbf16> to vector<16x256xbf16>
    %cst_309 = arith.constant dense<0.000000e+00> : vector<2x256xf32>
    %335 = tpu.matmul %332, %334, %cst_309 {dimension_numbers = #tpu.dot_dimension_numbers<[1], [0], [0], [1], [0, 0, 1, 1], [], []>} : vector<2x16xbf16>, vector<16x256xbf16>, vector<2x256xf32> -> vector<2x256xf32>
    %336 = arith.addf %330, %335 : vector<2x256xf32>
    %c68 = arith.constant 68 : index
    %c0_310 = arith.constant 0 : index
    %337 = tpu.strided_load %arg12[%c68, %c0_310] {strides = array<i32: 176, 1>} : memref<352x16xf32, #tpu.memory_space<vmem>>, vector<2x16xf32>
    %338 = arith.truncf %337 : vector<2x16xf32> to vector<2x16xbf16>
    %c14 = arith.constant 14 : index
    %c0_311 = arith.constant 0 : index
    %c0_312 = arith.constant 0 : index
    %339 = vector.load %arg6[%c14, %c0_311, %c0_312] : memref<36x16x256xbf16, #tpu.memory_space<vmem>>, vector<1x16x256xbf16>
    %340 = vector.shape_cast %339 : vector<1x16x256xbf16> to vector<16x256xbf16>
    %cst_313 = arith.constant dense<0.000000e+00> : vector<2x256xf32>
    %341 = tpu.matmul %338, %340, %cst_313 {dimension_numbers = #tpu.dot_dimension_numbers<[1], [0], [0], [1], [0, 0, 1, 1], [], []>} : vector<2x16xbf16>, vector<16x256xbf16>, vector<2x256xf32> -> vector<2x256xf32>
    %342 = arith.addf %336, %341 : vector<2x256xf32>
    %c70 = arith.constant 70 : index
    %c0_314 = arith.constant 0 : index
    %343 = tpu.strided_load %arg12[%c70, %c0_314] {strides = array<i32: 176, 1>} : memref<352x16xf32, #tpu.memory_space<vmem>>, vector<2x16xf32>
    %344 = arith.truncf %343 : vector<2x16xf32> to vector<2x16xbf16>
    %c15 = arith.constant 15 : index
    %c0_315 = arith.constant 0 : index
    %c0_316 = arith.constant 0 : index
    %345 = vector.load %arg6[%c15, %c0_315, %c0_316] : memref<36x16x256xbf16, #tpu.memory_space<vmem>>, vector<1x16x256xbf16>
    %346 = vector.shape_cast %345 : vector<1x16x256xbf16> to vector<16x256xbf16>
    %cst_317 = arith.constant dense<0.000000e+00> : vector<2x256xf32>
    %347 = tpu.matmul %344, %346, %cst_317 {dimension_numbers = #tpu.dot_dimension_numbers<[1], [0], [0], [1], [0, 0, 1, 1], [], []>} : vector<2x16xbf16>, vector<16x256xbf16>, vector<2x256xf32> -> vector<2x256xf32>
    %348 = arith.addf %342, %347 : vector<2x256xf32>
    %c72 = arith.constant 72 : index
    %c0_318 = arith.constant 0 : index
    %349 = tpu.strided_load %arg12[%c72, %c0_318] {strides = array<i32: 176, 1>} : memref<352x16xf32, #tpu.memory_space<vmem>>, vector<2x16xf32>
    %350 = arith.truncf %349 : vector<2x16xf32> to vector<2x16xbf16>
    %c16_319 = arith.constant 16 : index
    %c0_320 = arith.constant 0 : index
    %c0_321 = arith.constant 0 : index
    %351 = vector.load %arg6[%c16_319, %c0_320, %c0_321] : memref<36x16x256xbf16, #tpu.memory_space<vmem>>, vector<1x16x256xbf16>
    %352 = vector.shape_cast %351 : vector<1x16x256xbf16> to vector<16x256xbf16>
    %cst_322 = arith.constant dense<0.000000e+00> : vector<2x256xf32>
    %353 = tpu.matmul %350, %352, %cst_322 {dimension_numbers = #tpu.dot_dimension_numbers<[1], [0], [0], [1], [0, 0, 1, 1], [], []>} : vector<2x16xbf16>, vector<16x256xbf16>, vector<2x256xf32> -> vector<2x256xf32>
    %354 = arith.addf %348, %353 : vector<2x256xf32>
    %c74 = arith.constant 74 : index
    %c0_323 = arith.constant 0 : index
    %355 = tpu.strided_load %arg12[%c74, %c0_323] {strides = array<i32: 176, 1>} : memref<352x16xf32, #tpu.memory_space<vmem>>, vector<2x16xf32>
    %356 = arith.truncf %355 : vector<2x16xf32> to vector<2x16xbf16>
    %c17_324 = arith.constant 17 : index
    %c0_325 = arith.constant 0 : index
    %c0_326 = arith.constant 0 : index
    %357 = vector.load %arg6[%c17_324, %c0_325, %c0_326] : memref<36x16x256xbf16, #tpu.memory_space<vmem>>, vector<1x16x256xbf16>
    %358 = vector.shape_cast %357 : vector<1x16x256xbf16> to vector<16x256xbf16>
    %cst_327 = arith.constant dense<0.000000e+00> : vector<2x256xf32>
    %359 = tpu.matmul %356, %358, %cst_327 {dimension_numbers = #tpu.dot_dimension_numbers<[1], [0], [0], [1], [0, 0, 1, 1], [], []>} : vector<2x16xbf16>, vector<16x256xbf16>, vector<2x256xf32> -> vector<2x256xf32>
    %360 = arith.addf %354, %359 : vector<2x256xf32>
    %c96 = arith.constant 96 : index
    %c0_328 = arith.constant 0 : index
    %361 = tpu.strided_load %arg12[%c96, %c0_328] {strides = array<i32: 176, 1>} : memref<352x16xf32, #tpu.memory_space<vmem>>, vector<2x16xf32>
    %362 = arith.truncf %361 : vector<2x16xf32> to vector<2x16xbf16>
    %c18_329 = arith.constant 18 : index
    %c0_330 = arith.constant 0 : index
    %c0_331 = arith.constant 0 : index
    %363 = vector.load %arg6[%c18_329, %c0_330, %c0_331] : memref<36x16x256xbf16, #tpu.memory_space<vmem>>, vector<1x16x256xbf16>
    %364 = vector.shape_cast %363 : vector<1x16x256xbf16> to vector<16x256xbf16>
    %cst_332 = arith.constant dense<0.000000e+00> : vector<2x256xf32>
    %365 = tpu.matmul %362, %364, %cst_332 {dimension_numbers = #tpu.dot_dimension_numbers<[1], [0], [0], [1], [0, 0, 1, 1], [], []>} : vector<2x16xbf16>, vector<16x256xbf16>, vector<2x256xf32> -> vector<2x256xf32>
    %366 = arith.addf %360, %365 : vector<2x256xf32>
    %c98 = arith.constant 98 : index
    %c0_333 = arith.constant 0 : index
    %367 = tpu.strided_load %arg12[%c98, %c0_333] {strides = array<i32: 176, 1>} : memref<352x16xf32, #tpu.memory_space<vmem>>, vector<2x16xf32>
    %368 = arith.truncf %367 : vector<2x16xf32> to vector<2x16xbf16>
    %c19 = arith.constant 19 : index
    %c0_334 = arith.constant 0 : index
    %c0_335 = arith.constant 0 : index
    %369 = vector.load %arg6[%c19, %c0_334, %c0_335] : memref<36x16x256xbf16, #tpu.memory_space<vmem>>, vector<1x16x256xbf16>
    %370 = vector.shape_cast %369 : vector<1x16x256xbf16> to vector<16x256xbf16>
    %cst_336 = arith.constant dense<0.000000e+00> : vector<2x256xf32>
    %371 = tpu.matmul %368, %370, %cst_336 {dimension_numbers = #tpu.dot_dimension_numbers<[1], [0], [0], [1], [0, 0, 1, 1], [], []>} : vector<2x16xbf16>, vector<16x256xbf16>, vector<2x256xf32> -> vector<2x256xf32>
    %372 = arith.addf %366, %371 : vector<2x256xf32>
    %c100 = arith.constant 100 : index
    %c0_337 = arith.constant 0 : index
    %373 = tpu.strided_load %arg12[%c100, %c0_337] {strides = array<i32: 176, 1>} : memref<352x16xf32, #tpu.memory_space<vmem>>, vector<2x16xf32>
    %374 = arith.truncf %373 : vector<2x16xf32> to vector<2x16xbf16>
    %c20 = arith.constant 20 : index
    %c0_338 = arith.constant 0 : index
    %c0_339 = arith.constant 0 : index
    %375 = vector.load %arg6[%c20, %c0_338, %c0_339] : memref<36x16x256xbf16, #tpu.memory_space<vmem>>, vector<1x16x256xbf16>
    %376 = vector.shape_cast %375 : vector<1x16x256xbf16> to vector<16x256xbf16>
    %cst_340 = arith.constant dense<0.000000e+00> : vector<2x256xf32>
    %377 = tpu.matmul %374, %376, %cst_340 {dimension_numbers = #tpu.dot_dimension_numbers<[1], [0], [0], [1], [0, 0, 1, 1], [], []>} : vector<2x16xbf16>, vector<16x256xbf16>, vector<2x256xf32> -> vector<2x256xf32>
    %378 = arith.addf %372, %377 : vector<2x256xf32>
    %c102 = arith.constant 102 : index
    %c0_341 = arith.constant 0 : index
    %379 = tpu.strided_load %arg12[%c102, %c0_341] {strides = array<i32: 176, 1>} : memref<352x16xf32, #tpu.memory_space<vmem>>, vector<2x16xf32>
    %380 = arith.truncf %379 : vector<2x16xf32> to vector<2x16xbf16>
    %c21 = arith.constant 21 : index
    %c0_342 = arith.constant 0 : index
    %c0_343 = arith.constant 0 : index
    %381 = vector.load %arg6[%c21, %c0_342, %c0_343] : memref<36x16x256xbf16, #tpu.memory_space<vmem>>, vector<1x16x256xbf16>
    %382 = vector.shape_cast %381 : vector<1x16x256xbf16> to vector<16x256xbf16>
    %cst_344 = arith.constant dense<0.000000e+00> : vector<2x256xf32>
    %383 = tpu.matmul %380, %382, %cst_344 {dimension_numbers = #tpu.dot_dimension_numbers<[1], [0], [0], [1], [0, 0, 1, 1], [], []>} : vector<2x16xbf16>, vector<16x256xbf16>, vector<2x256xf32> -> vector<2x256xf32>
    %384 = arith.addf %378, %383 : vector<2x256xf32>
    %c104 = arith.constant 104 : index
    %c0_345 = arith.constant 0 : index
    %385 = tpu.strided_load %arg12[%c104, %c0_345] {strides = array<i32: 176, 1>} : memref<352x16xf32, #tpu.memory_space<vmem>>, vector<2x16xf32>
    %386 = arith.truncf %385 : vector<2x16xf32> to vector<2x16xbf16>
    %c22 = arith.constant 22 : index
    %c0_346 = arith.constant 0 : index
    %c0_347 = arith.constant 0 : index
    %387 = vector.load %arg6[%c22, %c0_346, %c0_347] : memref<36x16x256xbf16, #tpu.memory_space<vmem>>, vector<1x16x256xbf16>
    %388 = vector.shape_cast %387 : vector<1x16x256xbf16> to vector<16x256xbf16>
    %cst_348 = arith.constant dense<0.000000e+00> : vector<2x256xf32>
    %389 = tpu.matmul %386, %388, %cst_348 {dimension_numbers = #tpu.dot_dimension_numbers<[1], [0], [0], [1], [0, 0, 1, 1], [], []>} : vector<2x16xbf16>, vector<16x256xbf16>, vector<2x256xf32> -> vector<2x256xf32>
    %390 = arith.addf %384, %389 : vector<2x256xf32>
    %c106 = arith.constant 106 : index
    %c0_349 = arith.constant 0 : index
    %391 = tpu.strided_load %arg12[%c106, %c0_349] {strides = array<i32: 176, 1>} : memref<352x16xf32, #tpu.memory_space<vmem>>, vector<2x16xf32>
    %392 = arith.truncf %391 : vector<2x16xf32> to vector<2x16xbf16>
    %c23 = arith.constant 23 : index
    %c0_350 = arith.constant 0 : index
    %c0_351 = arith.constant 0 : index
    %393 = vector.load %arg6[%c23, %c0_350, %c0_351] : memref<36x16x256xbf16, #tpu.memory_space<vmem>>, vector<1x16x256xbf16>
    %394 = vector.shape_cast %393 : vector<1x16x256xbf16> to vector<16x256xbf16>
    %cst_352 = arith.constant dense<0.000000e+00> : vector<2x256xf32>
    %395 = tpu.matmul %392, %394, %cst_352 {dimension_numbers = #tpu.dot_dimension_numbers<[1], [0], [0], [1], [0, 0, 1, 1], [], []>} : vector<2x16xbf16>, vector<16x256xbf16>, vector<2x256xf32> -> vector<2x256xf32>
    %396 = arith.addf %390, %395 : vector<2x256xf32>
    %c128 = arith.constant 128 : index
    %c0_353 = arith.constant 0 : index
    %397 = tpu.strided_load %arg12[%c128, %c0_353] {strides = array<i32: 176, 1>} : memref<352x16xf32, #tpu.memory_space<vmem>>, vector<2x16xf32>
    %398 = arith.truncf %397 : vector<2x16xf32> to vector<2x16xbf16>
    %c24 = arith.constant 24 : index
    %c0_354 = arith.constant 0 : index
    %c0_355 = arith.constant 0 : index
    %399 = vector.load %arg6[%c24, %c0_354, %c0_355] : memref<36x16x256xbf16, #tpu.memory_space<vmem>>, vector<1x16x256xbf16>
    %400 = vector.shape_cast %399 : vector<1x16x256xbf16> to vector<16x256xbf16>
    %cst_356 = arith.constant dense<0.000000e+00> : vector<2x256xf32>
    %401 = tpu.matmul %398, %400, %cst_356 {dimension_numbers = #tpu.dot_dimension_numbers<[1], [0], [0], [1], [0, 0, 1, 1], [], []>} : vector<2x16xbf16>, vector<16x256xbf16>, vector<2x256xf32> -> vector<2x256xf32>
    %402 = arith.addf %396, %401 : vector<2x256xf32>
    %c130 = arith.constant 130 : index
    %c0_357 = arith.constant 0 : index
    %403 = tpu.strided_load %arg12[%c130, %c0_357] {strides = array<i32: 176, 1>} : memref<352x16xf32, #tpu.memory_space<vmem>>, vector<2x16xf32>
    %404 = arith.truncf %403 : vector<2x16xf32> to vector<2x16xbf16>
    %c25 = arith.constant 25 : index
    %c0_358 = arith.constant 0 : index
    %c0_359 = arith.constant 0 : index
    %405 = vector.load %arg6[%c25, %c0_358, %c0_359] : memref<36x16x256xbf16, #tpu.memory_space<vmem>>, vector<1x16x256xbf16>
    %406 = vector.shape_cast %405 : vector<1x16x256xbf16> to vector<16x256xbf16>
    %cst_360 = arith.constant dense<0.000000e+00> : vector<2x256xf32>
    %407 = tpu.matmul %404, %406, %cst_360 {dimension_numbers = #tpu.dot_dimension_numbers<[1], [0], [0], [1], [0, 0, 1, 1], [], []>} : vector<2x16xbf16>, vector<16x256xbf16>, vector<2x256xf32> -> vector<2x256xf32>
    %408 = arith.addf %402, %407 : vector<2x256xf32>
    %c132 = arith.constant 132 : index
    %c0_361 = arith.constant 0 : index
    %409 = tpu.strided_load %arg12[%c132, %c0_361] {strides = array<i32: 176, 1>} : memref<352x16xf32, #tpu.memory_space<vmem>>, vector<2x16xf32>
    %410 = arith.truncf %409 : vector<2x16xf32> to vector<2x16xbf16>
    %c26 = arith.constant 26 : index
    %c0_362 = arith.constant 0 : index
    %c0_363 = arith.constant 0 : index
    %411 = vector.load %arg6[%c26, %c0_362, %c0_363] : memref<36x16x256xbf16, #tpu.memory_space<vmem>>, vector<1x16x256xbf16>
    %412 = vector.shape_cast %411 : vector<1x16x256xbf16> to vector<16x256xbf16>
    %cst_364 = arith.constant dense<0.000000e+00> : vector<2x256xf32>
    %413 = tpu.matmul %410, %412, %cst_364 {dimension_numbers = #tpu.dot_dimension_numbers<[1], [0], [0], [1], [0, 0, 1, 1], [], []>} : vector<2x16xbf16>, vector<16x256xbf16>, vector<2x256xf32> -> vector<2x256xf32>
    %414 = arith.addf %408, %413 : vector<2x256xf32>
    %c134 = arith.constant 134 : index
    %c0_365 = arith.constant 0 : index
    %415 = tpu.strided_load %arg12[%c134, %c0_365] {strides = array<i32: 176, 1>} : memref<352x16xf32, #tpu.memory_space<vmem>>, vector<2x16xf32>
    %416 = arith.truncf %415 : vector<2x16xf32> to vector<2x16xbf16>
    %c27 = arith.constant 27 : index
    %c0_366 = arith.constant 0 : index
    %c0_367 = arith.constant 0 : index
    %417 = vector.load %arg6[%c27, %c0_366, %c0_367] : memref<36x16x256xbf16, #tpu.memory_space<vmem>>, vector<1x16x256xbf16>
    %418 = vector.shape_cast %417 : vector<1x16x256xbf16> to vector<16x256xbf16>
    %cst_368 = arith.constant dense<0.000000e+00> : vector<2x256xf32>
    %419 = tpu.matmul %416, %418, %cst_368 {dimension_numbers = #tpu.dot_dimension_numbers<[1], [0], [0], [1], [0, 0, 1, 1], [], []>} : vector<2x16xbf16>, vector<16x256xbf16>, vector<2x256xf32> -> vector<2x256xf32>
    %420 = arith.addf %414, %419 : vector<2x256xf32>
    %c136 = arith.constant 136 : index
    %c0_369 = arith.constant 0 : index
    %421 = tpu.strided_load %arg12[%c136, %c0_369] {strides = array<i32: 176, 1>} : memref<352x16xf32, #tpu.memory_space<vmem>>, vector<2x16xf32>
    %422 = arith.truncf %421 : vector<2x16xf32> to vector<2x16xbf16>
    %c28 = arith.constant 28 : index
    %c0_370 = arith.constant 0 : index
    %c0_371 = arith.constant 0 : index
    %423 = vector.load %arg6[%c28, %c0_370, %c0_371] : memref<36x16x256xbf16, #tpu.memory_space<vmem>>, vector<1x16x256xbf16>
    %424 = vector.shape_cast %423 : vector<1x16x256xbf16> to vector<16x256xbf16>
    %cst_372 = arith.constant dense<0.000000e+00> : vector<2x256xf32>
    %425 = tpu.matmul %422, %424, %cst_372 {dimension_numbers = #tpu.dot_dimension_numbers<[1], [0], [0], [1], [0, 0, 1, 1], [], []>} : vector<2x16xbf16>, vector<16x256xbf16>, vector<2x256xf32> -> vector<2x256xf32>
    %426 = arith.addf %420, %425 : vector<2x256xf32>
    %c138 = arith.constant 138 : index
    %c0_373 = arith.constant 0 : index
    %427 = tpu.strided_load %arg12[%c138, %c0_373] {strides = array<i32: 176, 1>} : memref<352x16xf32, #tpu.memory_space<vmem>>, vector<2x16xf32>
    %428 = arith.truncf %427 : vector<2x16xf32> to vector<2x16xbf16>
    %c29 = arith.constant 29 : index
    %c0_374 = arith.constant 0 : index
    %c0_375 = arith.constant 0 : index
    %429 = vector.load %arg6[%c29, %c0_374, %c0_375] : memref<36x16x256xbf16, #tpu.memory_space<vmem>>, vector<1x16x256xbf16>
    %430 = vector.shape_cast %429 : vector<1x16x256xbf16> to vector<16x256xbf16>
    %cst_376 = arith.constant dense<0.000000e+00> : vector<2x256xf32>
    %431 = tpu.matmul %428, %430, %cst_376 {dimension_numbers = #tpu.dot_dimension_numbers<[1], [0], [0], [1], [0, 0, 1, 1], [], []>} : vector<2x16xbf16>, vector<16x256xbf16>, vector<2x256xf32> -> vector<2x256xf32>
    %432 = arith.addf %426, %431 : vector<2x256xf32>
    %c160 = arith.constant 160 : index
    %c0_377 = arith.constant 0 : index
    %433 = tpu.strided_load %arg12[%c160, %c0_377] {strides = array<i32: 176, 1>} : memref<352x16xf32, #tpu.memory_space<vmem>>, vector<2x16xf32>
    %434 = arith.truncf %433 : vector<2x16xf32> to vector<2x16xbf16>
    %c30 = arith.constant 30 : index
    %c0_378 = arith.constant 0 : index
    %c0_379 = arith.constant 0 : index
    %435 = vector.load %arg6[%c30, %c0_378, %c0_379] : memref<36x16x256xbf16, #tpu.memory_space<vmem>>, vector<1x16x256xbf16>
    %436 = vector.shape_cast %435 : vector<1x16x256xbf16> to vector<16x256xbf16>
    %cst_380 = arith.constant dense<0.000000e+00> : vector<2x256xf32>
    %437 = tpu.matmul %434, %436, %cst_380 {dimension_numbers = #tpu.dot_dimension_numbers<[1], [0], [0], [1], [0, 0, 1, 1], [], []>} : vector<2x16xbf16>, vector<16x256xbf16>, vector<2x256xf32> -> vector<2x256xf32>
    %438 = arith.addf %432, %437 : vector<2x256xf32>
    %c162 = arith.constant 162 : index
    %c0_381 = arith.constant 0 : index
    %439 = tpu.strided_load %arg12[%c162, %c0_381] {strides = array<i32: 176, 1>} : memref<352x16xf32, #tpu.memory_space<vmem>>, vector<2x16xf32>
    %440 = arith.truncf %439 : vector<2x16xf32> to vector<2x16xbf16>
    %c31 = arith.constant 31 : index
    %c0_382 = arith.constant 0 : index
    %c0_383 = arith.constant 0 : index
    %441 = vector.load %arg6[%c31, %c0_382, %c0_383] : memref<36x16x256xbf16, #tpu.memory_space<vmem>>, vector<1x16x256xbf16>
    %442 = vector.shape_cast %441 : vector<1x16x256xbf16> to vector<16x256xbf16>
    %cst_384 = arith.constant dense<0.000000e+00> : vector<2x256xf32>
    %443 = tpu.matmul %440, %442, %cst_384 {dimension_numbers = #tpu.dot_dimension_numbers<[1], [0], [0], [1], [0, 0, 1, 1], [], []>} : vector<2x16xbf16>, vector<16x256xbf16>, vector<2x256xf32> -> vector<2x256xf32>
    %444 = arith.addf %438, %443 : vector<2x256xf32>
    %c164 = arith.constant 164 : index
    %c0_385 = arith.constant 0 : index
    %445 = tpu.strided_load %arg12[%c164, %c0_385] {strides = array<i32: 176, 1>} : memref<352x16xf32, #tpu.memory_space<vmem>>, vector<2x16xf32>
    %446 = arith.truncf %445 : vector<2x16xf32> to vector<2x16xbf16>
    %c32_386 = arith.constant 32 : index
    %c0_387 = arith.constant 0 : index
    %c0_388 = arith.constant 0 : index
    %447 = vector.load %arg6[%c32_386, %c0_387, %c0_388] : memref<36x16x256xbf16, #tpu.memory_space<vmem>>, vector<1x16x256xbf16>
    %448 = vector.shape_cast %447 : vector<1x16x256xbf16> to vector<16x256xbf16>
    %cst_389 = arith.constant dense<0.000000e+00> : vector<2x256xf32>
    %449 = tpu.matmul %446, %448, %cst_389 {dimension_numbers = #tpu.dot_dimension_numbers<[1], [0], [0], [1], [0, 0, 1, 1], [], []>} : vector<2x16xbf16>, vector<16x256xbf16>, vector<2x256xf32> -> vector<2x256xf32>
    %450 = arith.addf %444, %449 : vector<2x256xf32>
    %c166 = arith.constant 166 : index
    %c0_390 = arith.constant 0 : index
    %451 = tpu.strided_load %arg12[%c166, %c0_390] {strides = array<i32: 176, 1>} : memref<352x16xf32, #tpu.memory_space<vmem>>, vector<2x16xf32>
    %452 = arith.truncf %451 : vector<2x16xf32> to vector<2x16xbf16>
    %c33_391 = arith.constant 33 : index
    %c0_392 = arith.constant 0 : index
    %c0_393 = arith.constant 0 : index
    %453 = vector.load %arg6[%c33_391, %c0_392, %c0_393] : memref<36x16x256xbf16, #tpu.memory_space<vmem>>, vector<1x16x256xbf16>
    %454 = vector.shape_cast %453 : vector<1x16x256xbf16> to vector<16x256xbf16>
    %cst_394 = arith.constant dense<0.000000e+00> : vector<2x256xf32>
    %455 = tpu.matmul %452, %454, %cst_394 {dimension_numbers = #tpu.dot_dimension_numbers<[1], [0], [0], [1], [0, 0, 1, 1], [], []>} : vector<2x16xbf16>, vector<16x256xbf16>, vector<2x256xf32> -> vector<2x256xf32>
    %456 = arith.addf %450, %455 : vector<2x256xf32>
    %c168 = arith.constant 168 : index
    %c0_395 = arith.constant 0 : index
    %457 = tpu.strided_load %arg12[%c168, %c0_395] {strides = array<i32: 176, 1>} : memref<352x16xf32, #tpu.memory_space<vmem>>, vector<2x16xf32>
    %458 = arith.truncf %457 : vector<2x16xf32> to vector<2x16xbf16>
    %c34_396 = arith.constant 34 : index
    %c0_397 = arith.constant 0 : index
    %c0_398 = arith.constant 0 : index
    %459 = vector.load %arg6[%c34_396, %c0_397, %c0_398] : memref<36x16x256xbf16, #tpu.memory_space<vmem>>, vector<1x16x256xbf16>
    %460 = vector.shape_cast %459 : vector<1x16x256xbf16> to vector<16x256xbf16>
    %cst_399 = arith.constant dense<0.000000e+00> : vector<2x256xf32>
    %461 = tpu.matmul %458, %460, %cst_399 {dimension_numbers = #tpu.dot_dimension_numbers<[1], [0], [0], [1], [0, 0, 1, 1], [], []>} : vector<2x16xbf16>, vector<16x256xbf16>, vector<2x256xf32> -> vector<2x256xf32>
    %462 = arith.addf %456, %461 : vector<2x256xf32>
    %c170 = arith.constant 170 : index
    %c0_400 = arith.constant 0 : index
    %463 = tpu.strided_load %arg12[%c170, %c0_400] {strides = array<i32: 176, 1>} : memref<352x16xf32, #tpu.memory_space<vmem>>, vector<2x16xf32>
    %464 = arith.truncf %463 : vector<2x16xf32> to vector<2x16xbf16>
    %c35 = arith.constant 35 : index
    %c0_401 = arith.constant 0 : index
    %c0_402 = arith.constant 0 : index
    %465 = vector.load %arg6[%c35, %c0_401, %c0_402] : memref<36x16x256xbf16, #tpu.memory_space<vmem>>, vector<1x16x256xbf16>
    %466 = vector.shape_cast %465 : vector<1x16x256xbf16> to vector<16x256xbf16>
    %cst_403 = arith.constant dense<0.000000e+00> : vector<2x256xf32>
    %467 = tpu.matmul %464, %466, %cst_403 {dimension_numbers = #tpu.dot_dimension_numbers<[1], [0], [0], [1], [0, 0, 1, 1], [], []>} : vector<2x16xbf16>, vector<16x256xbf16>, vector<2x256xf32> -> vector<2x256xf32>
    %468 = arith.addf %462, %467 : vector<2x256xf32>
    %c0_404 = arith.constant 0 : index
    %c0_405 = arith.constant 0 : index
    %469 = vector.load %arg7[%c0_404, %c0_405] : memref<1x256xf32, #tpu.memory_space<vmem>>, vector<1x256xf32>
    %470 = vector.broadcast %469 : vector<1x256xf32> to vector<2x256xf32>
    %471 = arith.addf %468, %470 : vector<2x256xf32>
    %cst_406 = arith.constant 0.000000e+00 : f32
    %472 = vector.broadcast %cst_406 : f32 to vector<2x256xf32>
    %473 = arith.maximumf %471, %472 : vector<2x256xf32>
    %474 = arith.truncf %473 : vector<2x256xf32> to vector<2x256xbf16>
    %c0_407 = arith.constant 0 : index
    %c0_408 = arith.constant 0 : index
    %475 = vector.load %arg8[%c0_407, %c0_408] : memref<256x128xbf16, #tpu.memory_space<vmem>>, vector<256x128xbf16>
    %cst_409 = arith.constant dense<0.000000e+00> : vector<2x128xf32>
    %476 = tpu.matmul %474, %475, %cst_409 {dimension_numbers = #tpu.dot_dimension_numbers<[1], [0], [0], [1], [0, 0, 1, 1], [], []>} : vector<2x256xbf16>, vector<256x128xbf16>, vector<2x128xf32> -> vector<2x128xf32>
    %c0_410 = arith.constant 0 : index
    %c0_411 = arith.constant 0 : index
    %477 = vector.load %arg9[%c0_410, %c0_411] : memref<1x128xf32, #tpu.memory_space<vmem>>, vector<1x128xf32>
    %478 = vector.broadcast %477 : vector<1x128xf32> to vector<2x128xf32>
    %479 = arith.addf %476, %478 : vector<2x128xf32>
    %c0_412 = arith.constant 0 : index
    %c0_413 = arith.constant 0 : index
    %480 = vector.load %arg10[%c0_412, %c0_413] : memref<2x128xf32, #tpu.memory_space<vmem>>, vector<2x128xf32>
    tpu.vector_store %arg10[%c0_412, %c0_413], %479 {strides = array<i32>} : memref<2x128xf32, #tpu.memory_space<vmem>>, vector<2x128xf32>,
    return
  }
  func.func @transform_0(%arg0: i32) -> (i32, i32, i32) {
    %c0_i32 = arith.constant 0 : i32
    %c0_i32_0 = arith.constant 0 : i32
    %c0_i32_1 = arith.constant 0 : i32
    return %arg0, %c0_i32, %c0_i32_0 : i32, i32, i32
  }
  func.func @transform_1(%arg0: i32) -> (i32, i32, i32) {
    %c0_i32 = arith.constant 0 : i32
    %c0_i32_0 = arith.constant 0 : i32
    %c0_i32_1 = arith.constant 0 : i32
    %c0_i32_2 = arith.constant 0 : i32
    return %c0_i32, %c0_i32_0, %c0_i32_1 : i32, i32, i32
  }
  func.func @transform_2(%arg0: i32) -> (i32, i32) {
    %c0_i32 = arith.constant 0 : i32
    %c0_i32_0 = arith.constant 0 : i32
    %c0_i32_1 = arith.constant 0 : i32
    return %c0_i32, %c0_i32_0 : i32, i32
  }
  func.func @transform_3(%arg0: i32) -> (i32, i32, i32) {
    %c0_i32 = arith.constant 0 : i32
    %c0_i32_0 = arith.constant 0 : i32
    %c0_i32_1 = arith.constant 0 : i32
    %c0_i32_2 = arith.constant 0 : i32
    return %c0_i32, %c0_i32_0, %c0_i32_1 : i32, i32, i32
  }
  func.func @transform_4(%arg0: i32) -> (i32, i32) {
    %c0_i32 = arith.constant 0 : i32
    %c0_i32_0 = arith.constant 0 : i32
    %c0_i32_1 = arith.constant 0 : i32
    return %c0_i32, %c0_i32_0 : i32, i32
  }
  func.func @transform_5(%arg0: i32) -> (i32, i32, i32) {
    %c0_i32 = arith.constant 0 : i32
    %c0_i32_0 = arith.constant 0 : i32
    %c0_i32_1 = arith.constant 0 : i32
    %c0_i32_2 = arith.constant 0 : i32
    return %c0_i32, %c0_i32_0, %c0_i32_1 : i32, i32, i32
  }
  func.func @transform_6(%arg0: i32) -> (i32, i32) {
    %c0_i32 = arith.constant 0 : i32
    %c0_i32_0 = arith.constant 0 : i32
    %c0_i32_1 = arith.constant 0 : i32
    return %c0_i32, %c0_i32_0 : i32, i32
  }
  func.func @transform_7(%arg0: i32) -> (i32, i32) {
    %c0_i32 = arith.constant 0 : i32
    %c0_i32_0 = arith.constant 0 : i32
    %c0_i32_1 = arith.constant 0 : i32
    return %c0_i32, %c0_i32_0 : i32, i32
  }
  func.func @transform_8(%arg0: i32) -> (i32, i32) {
    %c0_i32 = arith.constant 0 : i32
    %c0_i32_0 = arith.constant 0 : i32
    %c0_i32_1 = arith.constant 0 : i32
    return %c0_i32, %c0_i32_0 : i32, i32
  }
  func.func @transform_9(%arg0: i32) -> (i32, i32) {
    %c0_i32 = arith.constant 0 : i32
    %c0_i32_0 = arith.constant 0 : i32
    return %arg0, %c0_i32 : i32, i32
  }
}

</mosaic_0001>

<bundles_post_ra>
// kernel: actor_critic_forward.1
= control target key start
LH: loop header
LB: loop body
LE: loop exit
PB: predicated region body
PF: predicated region fallthrough
CT: control target
= control target key end

     0   :  { %vm161_vm0 = vcmask 1041408   ;;  %vm118_vm1 = vcmask 31744   ;;  %vm14538_vm2 = vmmov 0   ;;  %vm2372_vm3 = vcmask 130048   ;;  %s18109_s1 = inlined_call_operand.vmem [shape: bf16[9,4,16], index: 1, kind: input, shape index: {}]   ;;  %s18110_s0 = inlined_call_operand.vmem [shape: f32[2,256,4], index: 0, kind: input, shape index: {}]   ;;  %s18111_s3 = inlined_call_operand.vmem [shape: bf16[9,16,16], index: 3, kind: input, shape index: {}]   ;;  %s18112_s2 = inlined_call_operand.vmem [shape: f32[1,16], index: 2, kind: input, shape index: {}]   ;;  %s18113_s4 = inlined_call_operand.vmem [shape: f32[1,16], index: 4, kind: input, shape index: {}]   ;;  %s18114_s5 = inlined_call_operand.vmem [shape: bf16[36,16,256], index: 5, kind: input, shape index: {}]   ;;  %s18115_s7 = inlined_call_operand.vmem [shape: bf16[256,128], index: 7, kind: input, shape index: {}]   ;;  %s18116_s6 = inlined_call_operand.vmem [shape: f32[1,256], index: 6, kind: input, shape index: {}]   ;;  %s18117_s8 = inlined_call_operand.vmem [shape: f32[1,128], index: 8, kind: input, shape index: {}]   ;;  %s18118_s9 = inlined_call_operand.vmem [shape: f32[2,128], index: 9, kind: output, shape index: {}]  }
   0x1   :  { %v11153_v0 = vld [vmem:[%s18109_s1 + $0x2] sm:$0x3]  ;;  %v76_v2 = vld [vmem:[%s18110_s0 + $0x9] sm:$0xff]  ;;  %v77_v5 = vld [vmem:[%s18110_s0 + $0x11] sm:$0xff] }
   0x2   :  { %v75_v1 = vld [vmem:[%s18110_s0 + $0x1] sm:$0xff]  ;;  %14373 = vmatprep.subr.msk.bf16.mxu0 %vm161_vm0, %v11153_v0  ;;  %v163_v3 = vsel %vm161_vm0, %v11153_v0, 0  ;;  %v78_v6 = vld [vmem:[%s18110_s0 + $0x19] sm:$0xff]  ;;  %14374 = vmatprep.subr.msk.bf16.mxu1 %vm161_vm0, %v11153_v0  ;;  %v80_v10 = vld [vmem:[%s18110_s0 + $0x29] sm:$0xff] }
   0x3   :  { %v102_v4 = vpack.c.bf16 %v76_v2, %v75_v1  ;;  %v74_v7 = vld [vmem:[%s18109_s1] sm:$0x3]  ;;  %12620 = vmatpush3.bf16.msra.mxu0 %v163_v3  ;;  %v14611_v8 = vpack.c.bf16 %v78_v6, %v77_v5  ;;  %13988 = vmatpush3.bf16.msra.mxu1 %v163_v3  ;;  %v81_v13 = vld [vmem:[%s18110_s0 + $0x31] sm:$0xff]  ;;  %v84_v16 = vld [vmem:[%s18110_s0 + $0x49] sm:$0xff] }
   0x4   :  { %v79_v9 = vld [vmem:[%s18110_s0 + $0x21] sm:$0xff]  ;;  %14375 = vmatprep.subr.msk.bf16.mxu0 %vm161_vm0, %v74_v7  ;;  %v352_v11 = vsel %vm161_vm0, %v74_v7, 0  ;;  %v82_v14 = vld [vmem:[%s18110_s0 + $0x39] sm:$0xff]  ;;  %v85_v20 = vld [vmem:[%s18110_s0 + $0x51] sm:$0xff] }
   0x5   :  { %12621 = vmatprep.mubr.msk.bf16.mxu0 %vm118_vm1, %v102_v4  ;;  %v14622_v12 = vpack.c.bf16 %v80_v10, %v79_v9  ;;  %v83_v15 = vld [vmem:[%s18110_s0 + $0x41] sm:$0xff]  ;;  %v14643_v18 = vpack.c.bf16 %v82_v14, %v81_v13  ;;  %v86_v21 = vld [vmem:[%s18110_s0 + $0x59] sm:$0xff]  ;;  %v96_v23 = vld [vmem:[%s18110_s0 + $0xa9] sm:$0xff] }
   0x6   :  { %12622 = vmatmul.mubr.msk.bf16.vlgmr.msra.gmra.mrb[0].mxu0 %vm118_vm1, %v14611_v8  ;;  %v11182_v17 = vld [vmem:[%s18109_s1 + $0x4] sm:$0x3]  ;;  %v14646_v19 = vpack.c.bf16 %v84_v16, %v83_v15  ;;  %v88_v25 = vld [vmem:[%s18110_s0 + $0x69] sm:$0xff]  ;;  %v97_v27 = vld [vmem:[%s18110_s0 + $0xb1] sm:$0xff]  ;;  %v14678_v29 = vpack.c.bf16 %v86_v21, %v85_v20 }
   0x7   :  { %12650 = vmatpush3.bf16.msra.mxu0 %v352_v11  ;;  %12625 = vmatprep.mubr.msk.bf16.mxu0 %vm118_vm1, %v14622_v12  ;;  %v95_v22 = vld [vmem:[%s18110_s0 + $0xa1] sm:$0xff]  ;;  %v98_v28 = vld [vmem:[%s18110_s0 + $0xb9] sm:$0xff]  ;;  %v100_v32 = vld [vmem:[%s18110_s0 + $0xc9] sm:$0xff]  ;;  %v584_v55 = vsel %vm161_vm0, %v11182_v17, 0 }
   0x8   :  { %14376 = vmatprep.subr.msk.bf16.mxu0 %vm161_vm0, %v11182_v17  ;;  %v87_v24 = vld [vmem:[%s18110_s0 + $0x61] sm:$0xff]  ;;  %v14670_v26 = vpack.c.bf16 %v96_v23, %v95_v22  ;;  %v14682_v30 = vpack.c.bf16 %v98_v28, %v97_v27  ;;  %v14701_v35 = vld [vmem:[%s18110_s0 + $0xd1] sm:$0xff]  ;;  %v90_v37 = vld [vmem:[%s18110_s0 + $0x79] sm:$0xff] }
   0x9   :  { %v99_v31 = vld [vmem:[%s18110_s0 + $0xc1] sm:$0xff]  ;;  %v14690_v33 = vpack.c.bf16 %v88_v25, %v87_v24  ;;  %v89_v36 = vld [vmem:[%s18110_s0 + $0x71] sm:$0xff]  ;;  %v92_v39 = vld [vmem:[%s18110_s0 + $0x89] sm:$0xff]  ;;  %v115_v40 = vpack.c.bf16 %v14701_v35, %v14701_v35 }
   0xa   :  { %12641 = vmatprep.mubr.msk.bf16.mxu1 %vm118_vm1, %v14670_v26  ;;  %v14692_v34 = vpack.c.bf16 %v100_v32, %v99_v31  ;;  %v91_v38 = vld [vmem:[%s18110_s0 + $0x81] sm:$0xff]  ;;  %v14721_v41 = vpack.c.bf16 %v90_v37, %v89_v36  ;;  %v93_v43 = vld [vmem:[%s18110_s0 + $0x91] sm:$0xff]  ;;  %v94_v44 = vld [vmem:[%s18110_s0 + $0x99] sm:$0xff] }
   0xb   :  { %12642 = vmatmul.mubr.msk.bf16.vlgmr.msra.gmra.mrb[0].mxu1 %vm118_vm1, %v14682_v30  ;;  %v14723_v42 = vpack.c.bf16 %v92_v39, %v91_v38  ;;  %v33_v45 = vld [vmem:[%s18110_s0] sm:$0xff]  ;;  %v34_v46 = vld [vmem:[%s18110_s0 + $0x8] sm:$0xff]  ;;  %v14742_v47 = vpack.c.bf16 %v94_v44, %v93_v43  ;;  %v35_v49 = vld [vmem:[%s18110_s0 + $0x10] sm:$0xff] }
   0xc   :  { %12645 = vmatprep.mubr.msk.bf16.mxu1 %vm118_vm1, %v14692_v34  ;;  %v60_v48 = vpack.c.bf16 %v34_v46, %v33_v45  ;;  %v36_v50 = vld [vmem:[%s18110_s0 + $0x18] sm:$0xff]  ;;  %v37_v51 = vld [vmem:[%s18110_s0 + $0x20] sm:$0xff]  ;;  %v38_v52 = vld [vmem:[%s18110_s0 + $0x28] sm:$0xff] }
   0xd   :  { %v14759_v53 = vpack.c.bf16 %v36_v50, %v35_v49  ;;  %v14761_v54 = vpack.c.bf16 %v38_v52, %v37_v51  ;;  %v11197_v56 = vld [vmem:[%s18109_s1 + $0x6] sm:$0x3]  ;;  %v39_v57 = vld [vmem:[%s18110_s0 + $0x30] sm:$0xff]  ;;  %v40_v58 = vld [vmem:[%s18110_s0 + $0x38] sm:$0xff] }
   0xe   :  { %12626 = vmatmul.mubr.msk.bf16.gmra.mrb[4].mxu0 %vm118_vm1, %v14643_v18  ;;  %v41_v59 = vld [vmem:[%s18110_s0 + $0x40] sm:$0xff]  ;;  %v42_v60 = vld [vmem:[%s18110_s0 + $0x48] sm:$0xff]  ;;  %v14784_v61 = vpack.c.bf16 %v40_v58, %v39_v57  ;;  %v43_v63 = vld [vmem:[%s18110_s0 + $0x50] sm:$0xff]  ;;  %v843_v46 = vsel %vm161_vm0, %v11197_v56, 0 }
   0xf   :  { %12629 = vmatprep.mubr.msk.bf16.mxu0 %vm118_vm1, %v14646_v19  ;;  %v14786_v62 = vpack.c.bf16 %v42_v60, %v41_v59  ;;  %v44_v0 = vld [vmem:[%s18110_s0 + $0x58] sm:$0xff]  ;;  %v45_v1 = vld [vmem:[%s18110_s0 + $0x60] sm:$0xff]  ;;  %v46_v2 = vld [vmem:[%s18110_s0 + $0x68] sm:$0xff] }
  0x10   :  { %v14804_v3 = vpack.c.bf16 %v44_v0, %v43_v63  ;;  %v14806_v4 = vpack.c.bf16 %v46_v2, %v45_v1  ;;  %v47_v5 = vld [vmem:[%s18110_s0 + $0x70] sm:$0xff]  ;;  %v48_v6 = vld [vmem:[%s18110_s0 + $0x78] sm:$0xff]  ;;  %v49_v7 = vld [vmem:[%s18110_s0 + $0x80] sm:$0xff] }
  0x11   :  { %v50_v9 = vld [vmem:[%s18110_s0 + $0x88] sm:$0xff]  ;;  %v14824_v10 = vpack.c.bf16 %v48_v6, %v47_v5  ;;  %v51_v13 = vld [vmem:[%s18110_s0 + $0x90] sm:$0xff]  ;;  %v52_v14 = vld [vmem:[%s18110_s0 + $0x98] sm:$0xff] }
  0x12   :  { %v14826_v11 = vpack.c.bf16 %v50_v9, %v49_v7  ;;  %v53_v15 = vld [vmem:[%s18110_s0 + $0xa0] sm:$0xff]  ;;  %v54_v16 = vld [vmem:[%s18110_s0 + $0xa8] sm:$0xff]  ;;  %v14844_v17 = vpack.c.bf16 %v52_v14, %v51_v13  ;;  %v55_v21 = vld [vmem:[%s18110_s0 + $0xb0] sm:$0xff] }
  0x13   :  { %12646 = vmatmul.mubr.msk.bf16.gmra.mrb[4].mxu1 %vm118_vm1, %v115_v40  ;;  %v14846_v20 = vpack.c.bf16 %v54_v16, %v53_v15  ;;  %v56_v22 = vld [vmem:[%s18110_s0 + $0xb8] sm:$0xff]  ;;  %v57_v23 = vld [vmem:[%s18110_s0 + $0xc0] sm:$0xff]  ;;  %v58_v24 = vld [vmem:[%s18110_s0 + $0xc8] sm:$0xff] }
  0x14   :  { %v14864_v25 = vpack.c.bf16 %v56_v22, %v55_v21  ;;  %v14866_v27 = vpack.c.bf16 %v58_v24, %v57_v23  ;;  %v14875_v28 = vld [vmem:[%s18110_s0 + $0xd0] sm:$0xff]  ;;  %v498_v31 = vld [vmem:[%s18110_s0 + $0x2] sm:$0xff]  ;;  %v501_v39 = vld [vmem:[%s18110_s0 + $0x1a] sm:$0xff] }
  0x15   :  { %v499_v32 = vld [vmem:[%s18110_s0 + $0xa] sm:$0xff]  ;;  %v73_v36 = vpack.c.bf16 %v14875_v28, %v14875_v28  ;;  %v500_v38 = vld [vmem:[%s18110_s0 + $0x12] sm:$0xff]  ;;  %v502_v40 = vld [vmem:[%s18110_s0 + $0x22] sm:$0xff] }
  0x16   :  { %12630 = vmatmul.mubr.msk.bf16.gmra.mrb[8].mxu0 %vm118_vm1, %v14678_v29  ;;  %v525_v37 = vpack.c.bf16 %v499_v32, %v498_v31  ;;  %v503_v43 = vld [vmem:[%s18110_s0 + $0x2a] sm:$0xff]  ;;  %v14899_v44 = vpack.c.bf16 %v501_v39, %v500_v38  ;;  %v504_v49 = vld [vmem:[%s18110_s0 + $0x32] sm:$0xff]  ;;  %v505_v50 = vld [vmem:[%s18110_s0 + $0x3a] sm:$0xff] }
  0x17   :  { %12633 = vmatprep.mubr.msk.bf16.mxu0 %vm118_vm1, %v14690_v33  ;;  %v14901_v45 = vpack.c.bf16 %v503_v43, %v502_v40  ;;  %v506_v51 = vld [vmem:[%s18110_s0 + $0x42] sm:$0xff]  ;;  %v507_v52 = vld [vmem:[%s18110_s0 + $0x4a] sm:$0xff]  ;;  %v508_v57 = vld [vmem:[%s18110_s0 + $0x52] sm:$0xff] }
  0x18   :  { %v509_v58 = vld [vmem:[%s18110_s0 + $0x5a] sm:$0xff]  ;;  %v510_v59 = vld [vmem:[%s18110_s0 + $0x62] sm:$0xff]  ;;  %v511_v60 = vld [vmem:[%s18110_s0 + $0x6a] sm:$0xff] }
  0x19   :  { %v14944_v63 = vpack.c.bf16 %v509_v58, %v508_v57  ;;  %v14946_v0 = vpack.c.bf16 %v511_v60, %v510_v59  ;;  %v512_v1 = vld [vmem:[%s18110_s0 + $0x72] sm:$0xff]  ;;  %v513_v2 = vld [vmem:[%s18110_s0 + $0x7a] sm:$0xff]  ;;  %v514_v5 = vld [vmem:[%s18110_s0 + $0x82] sm:$0xff] }
  0x1a   :  { %v515_v6 = vld [vmem:[%s18110_s0 + $0x8a] sm:$0xff]  ;;  %v14964_v7 = vpack.c.bf16 %v513_v2, %v512_v1  ;;  %v516_v13 = vld [vmem:[%s18110_s0 + $0x92] sm:$0xff]  ;;  %v517_v14 = vld [vmem:[%s18110_s0 + $0x9a] sm:$0xff] }
  0x1b   :  { %v14966_v9 = vpack.c.bf16 %v515_v6, %v514_v5  ;;  %v518_v15 = vld [vmem:[%s18110_s0 + $0xa2] sm:$0xff]  ;;  %v519_v16 = vld [vmem:[%s18110_s0 + $0xaa] sm:$0xff]  ;;  %v14984_v21 = vpack.c.bf16 %v517_v14, %v516_v13  ;;  %v520_v23 = vld [vmem:[%s18110_s0 + $0xb2] sm:$0xff] }
  0x1c   :  { %v14986_v22 = vpack.c.bf16 %v519_v16, %v518_v15  ;;  %v521_v24 = vld [vmem:[%s18110_s0 + $0xba] sm:$0xff]  ;;  %v522_v31 = vld [vmem:[%s18110_s0 + $0xc2] sm:$0xff]  ;;  %v523_v32 = vld [vmem:[%s18110_s0 + $0xca] sm:$0xff] }
  0x1d   :  { %v15015_v38 = vld [vmem:[%s18110_s0 + $0xd2] sm:$0xff]  ;;  %v11227_v43 = vld [vmem:[%s18109_s1 + $0xa] sm:$0x3]  ;;  %v15113_v6 = vld [vmem:[%s18110_s0 + $0xe1] sm:$0xff] }
  0x1e   :  { %12634 = vmatmul.mubr.msk.bf16.gmra.mrb[12].mxu0 %vm118_vm1, %v14721_v41  ;;  %v538_v39 = vpack.c.bf16 %v15015_v38, %v15015_v38  ;;  %v1041_v2 = vld [vmem:[%s18110_s0 + $0xd9] sm:$0xff]  ;;  %v1056_v13 = vpack.c.bf16 %v15113_v6, %v15113_v6  ;;  %v11257_v14 = vld [vmem:[%s18109_s1 + $0xe] sm:$0x3] }
  0x1f   :  { %12637 = vmatprep.mubr.msk.bf16.mxu0 %vm118_vm1, %v14723_v42  ;;  %v15104_v5 = vpack.c.bf16 %v1041_v2, %v14701_v35 }
  0x26   :  { %12638 = vmatmul.mubr.msk.bf16.gmra.mrb[16].mxu0 %vm118_vm1, %v14742_v47 }
  0x27   :  { %12651 = vmatprep.mubr.msk.bf16.mxu0 %vm118_vm1, %v60_v48  ;;  %v11212_v48 = vld [vmem:[%s18109_s1 + $0x8] sm:$0x3] }
  0x28   :  { %v1102_v40 = vsel %vm161_vm0, %v11212_v48, 0 }
  0x2e   :  { %12652 = vmatmul.mubr.msk.bf16.vlgmr.msra.gmra.mrb[0].mxu0 %vm118_vm1, %v14759_v53 }
  0x2f   :  { %12680 = vmatpush3.bf16.msra.mxu0 %v584_v55  ;;  %12655 = vmatprep.mubr.msk.bf16.mxu0 %vm118_vm1, %v14761_v54  ;;  %v14924_v55 = vpack.c.bf16 %v505_v50, %v504_v49  ;;  %v11242_v50 = vld [vmem:[%s18109_s1 + $0xc] sm:$0x3] }
  0x30   :  { %14377 = vmatprep.subr.msk.bf16.mxu0 %vm161_vm0, %v11197_v56  ;;  %v14926_v56 = vpack.c.bf16 %v507_v52, %v506_v51  ;;  %v1620_v35 = vsel %vm161_vm0, %v11242_v50, 0 }
  0x36   :  { %12656 = vmatmul.mubr.msk.bf16.gmra.mrb[4].mxu0 %vm118_vm1, %v14784_v61 }
  0x37   :  { %12659 = vmatprep.mubr.msk.bf16.mxu0 %vm118_vm1, %v14786_v62 }
  0x3e   :  { %12660 = vmatmul.mubr.msk.bf16.gmra.mrb[8].mxu0 %vm118_vm1, %v14804_v3 }
  0x3f   :  { %12663 = vmatprep.mubr.msk.bf16.mxu0 %vm118_vm1, %v14806_v4 }
  0x46   :  { %12664 = vmatmul.mubr.msk.bf16.gmra.mrb[12].mxu0 %vm118_vm1, %v14824_v10 }
  0x47   :  { %12667 = vmatprep.mubr.msk.bf16.mxu0 %vm118_vm1, %v14826_v11 }
  0x4e   :  { %12668 = vmatmul.mubr.msk.bf16.gmra.mrb[16].mxu0 %vm118_vm1, %v14844_v17 }
  0x4f   :  { %12671 = vmatprep.mubr.msk.bf16.mxu0 %vm118_vm1, %v14846_v20 }
  0x56   :  { %12672 = vmatmul.mubr.msk.bf16.gmra.mrb[20].mxu0 %vm118_vm1, %v14864_v25 }
  0x57   :  { %12675 = vmatprep.mubr.msk.bf16.mxu0 %vm118_vm1, %v14866_v27 }
  0x5e   :  { %12676 = vmatmul.mubr.msk.bf16.gmra.mrb[24].mxu0 %vm118_vm1, %v73_v36  ;;  %v15004_v36 = vpack.c.bf16 %v521_v24, %v520_v23 }
  0x5f   :  { %12681 = vmatprep.mubr.msk.bf16.mxu0 %vm118_vm1, %v525_v37  ;;  %v15006_v37 = vpack.c.bf16 %v523_v32, %v522_v31 }
  0x66   :  { %12682 = vmatmul.mubr.msk.bf16.vlgmr.msra.gmra.mrb[0].mxu0 %vm118_vm1, %v14899_v44 }
  0x67   :  { %12710 = vmatpush3.bf16.msra.mxu0 %v843_v46  ;;  %12685 = vmatprep.mubr.msk.bf16.mxu0 %vm118_vm1, %v14901_v45 }
  0x68   :  { %14378 = vmatprep.subr.msk.bf16.mxu0 %vm161_vm0, %v11212_v48  ;;  %v15060_v48 = vld [vmem:[%s18110_s0 + $0xe0] sm:$0xff] }
  0x69   :  { %v797_v49 = vpack.c.bf16 %v15060_v48, %v15060_v48 }
  0x6e   :  { %12686 = vmatmul.mubr.msk.bf16.gmra.mrb[4].mxu0 %vm118_vm1, %v14924_v55 }
  0x6f   :  { %12689 = vmatprep.mubr.msk.bf16.mxu0 %vm118_vm1, %v14926_v56 }
  0x76   :  { %12690 = vmatmul.mubr.msk.bf16.gmra.mrb[8].mxu0 %vm118_vm1, %v14944_v63 }
  0x77   :  { %12693 = vmatprep.mubr.msk.bf16.mxu0 %vm118_vm1, %v14946_v0 }
  0x7e   :  { %12694 = vmatmul.mubr.msk.bf16.gmra.mrb[12].mxu0 %vm118_vm1, %v14964_v7 }
  0x7f   :  { %12697 = vmatprep.mubr.msk.bf16.mxu0 %vm118_vm1, %v14966_v9 }
  0x86   :  { %12698 = vmatmul.mubr.msk.bf16.gmra.mrb[16].mxu0 %vm118_vm1, %v14984_v21 }
  0x87   :  { %12701 = vmatprep.mubr.msk.bf16.mxu0 %vm118_vm1, %v14986_v22 }
  0x8e   :  { %12702 = vmatmul.mubr.msk.bf16.gmra.mrb[20].mxu0 %vm118_vm1, %v15004_v36 }
  0x8f   :  { %12705 = vmatprep.mubr.msk.bf16.mxu0 %vm118_vm1, %v15006_v37 }
  0x96   :  { %12706 = vmatmul.mubr.msk.bf16.gmra.mrb[28].mxu0 %vm118_vm1, %v538_v39 }
  0x97   :  { %12711 = vmatprep.mubr.msk.bf16.mxu0 %vm118_vm1, %v14759_v53  ;;  %v782_v53 = vld [vmem:[%s18110_s0 + $0xd8] sm:$0xff] }
  0x98   :  { %v15051_v46 = vpack.c.bf16 %v782_v53, %v14875_v28  ;;  %v1361_v28 = vsel %vm161_vm0, %v11227_v43, 0 }
  0x9e   :  { %12712 = vmatmul.mubr.msk.bf16.vlgmr.msra.gmra.mrb[0].mxu0 %vm118_vm1, %v14761_v54 }
  0x9f   :  { %12740 = vmatpush3.bf16.msra.mxu0 %v1102_v40  ;;  %12715 = vmatprep.mubr.msk.bf16.mxu0 %vm118_vm1, %v14784_v61 }
  0xa0   :  { %14379 = vmatprep.subr.msk.bf16.mxu0 %vm161_vm0, %v11227_v43  ;;  %v15158_v43 = vld [vmem:[%s18110_s0 + $0xe2] sm:$0xff] }
  0xa1   :  { %v1315_v53 = vpack.c.bf16 %v15158_v43, %v15158_v43 }
  0xa6   :  { %12716 = vmatmul.mubr.msk.bf16.gmra.mrb[4].mxu0 %vm118_vm1, %v14786_v62 }
  0xa7   :  { %12719 = vmatprep.mubr.msk.bf16.mxu0 %vm118_vm1, %v14804_v3 }
  0xae   :  { %12720 = vmatmul.mubr.msk.bf16.gmra.mrb[8].mxu0 %vm118_vm1, %v14806_v4 }
  0xaf   :  { %12723 = vmatprep.mubr.msk.bf16.mxu0 %vm118_vm1, %v14824_v10 }
  0xb6   :  { %12724 = vmatmul.mubr.msk.bf16.gmra.mrb[12].mxu0 %vm118_vm1, %v14826_v11 }
  0xb7   :  { %12727 = vmatprep.mubr.msk.bf16.mxu0 %vm118_vm1, %v14844_v17 }
  0xbe   :  { %12728 = vmatmul.mubr.msk.bf16.gmra.mrb[16].mxu0 %vm118_vm1, %v14846_v20 }
  0xbf   :  { %12731 = vmatprep.mubr.msk.bf16.mxu0 %vm118_vm1, %v14864_v25 }
  0xc6   :  { %12732 = vmatmul.mubr.msk.bf16.gmra.mrb[20].mxu0 %vm118_vm1, %v14866_v27 }
  0xc7   :  { %12735 = vmatprep.mubr.msk.bf16.mxu0 %vm118_vm1, %v15051_v46 }
  0xce   :  { %12736 = vmatmul.mubr.msk.bf16.gmra.mrb[32].mxu0 %vm118_vm1, %v797_v49  ;;  %v11272_v49 = vld [vmem:[%s18109_s1 + $0x10] sm:$0x3] }
  0xcf   :  { %12741 = vmatprep.mubr.msk.bf16.mxu0 %vm118_vm1, %v14611_v8 }
  0xd6   :  { %12742 = vmatmul.mubr.msk.bf16.vlgmr.msra.gmra.mrb[0].mxu0 %vm118_vm1, %v14622_v12 }
  0xd7   :  { %12770 = vmatpush3.bf16.msra.mxu0 %v1361_v28  ;;  %12745 = vmatprep.mubr.msk.bf16.mxu0 %vm118_vm1, %v14643_v18 }
  0xd8   :  { %14380 = vmatprep.subr.msk.bf16.mxu0 %vm161_vm0, %v11242_v50 }
  0xde   :  { %12746 = vmatmul.mubr.msk.bf16.gmra.mrb[4].mxu0 %vm118_vm1, %v14646_v19  ;;  %v15084_v8 = vpop.f32.mrb[0].mxu1 }
  0xdf   :  { %12749 = vmatprep.mubr.msk.bf16.mxu0 %vm118_vm1, %v14678_v29  ;;  %v15086_v51 = vpop.f32.mrb[1].mxu1 }
  0xe0   :  { %v15088_v52 = vpop.f32.mrb[2].mxu1 }
  0xe1   :  { %v15090_v57 = vpop.f32.mrb[3].mxu1 }
  0xe6   :  { %12750 = vmatmul.mubr.msk.bf16.gmra.mrb[8].mxu0 %vm118_vm1, %v14690_v33  ;;  %v12647_v58 = vpop.f32.mrb[4].mxu1 }
  0xe7   :  { %12753 = vmatprep.mubr.msk.bf16.mxu0 %vm118_vm1, %v14721_v41  ;;  %v295_v59 = vpop.f32.mrb[5].mxu1 }
  0xe8   :  { %v12648_v60 = vpop.f32.mrb[6].mxu1 }
  0xe9   :  { %v298_v1 = vpop.f32.mrb[7].mxu1 }
  0xee   :  { %12754 = vmatmul.mubr.msk.bf16.gmra.mrb[12].mxu0 %vm118_vm1, %v14723_v42 }
  0xef   :  { %12757 = vmatprep.mubr.msk.bf16.mxu0 %vm118_vm1, %v14742_v47 }
  0xf6   :  { %12758 = vmatmul.mubr.msk.bf16.gmra.mrb[16].mxu0 %vm118_vm1, %v14670_v26 }
  0xf7   :  { %12761 = vmatprep.mubr.msk.bf16.mxu0 %vm118_vm1, %v14682_v30 }
  0xfe   :  { %12762 = vmatmul.mubr.msk.bf16.gmra.mrb[20].mxu0 %vm118_vm1, %v14692_v34 }
  0xff   :  { %12765 = vmatprep.mubr.msk.bf16.mxu0 %vm118_vm1, %v15104_v5 }
 0x106   :  { %12766 = vmatmul.mubr.msk.bf16.gmra.mrb[36].mxu0 %vm118_vm1, %v1056_v13 }
 0x107   :  { %12771 = vmatprep.mubr.msk.bf16.mxu0 %vm118_vm1, %v14899_v44  ;;  %v1300_v44 = vld [vmem:[%s18110_s0 + $0xda] sm:$0xff] }
 0x108   :  { %v15149_v32 = vpack.c.bf16 %v1300_v44, %v15015_v38  ;;  %v1879_v38 = vsel %vm161_vm0, %v11257_v14, 0 }
 0x10e   :  { %12772 = vmatmul.mubr.msk.bf16.vlgmr.msra.gmra.mrb[0].mxu0 %vm118_vm1, %v14901_v45 }
 0x10f   :  { %12800 = vmatpush3.bf16.msra.mxu0 %v1620_v35  ;;  %12775 = vmatprep.mubr.msk.bf16.mxu0 %vm118_vm1, %v14924_v55 }
 0x110   :  { %14381 = vmatprep.subr.msk.bf16.mxu0 %vm161_vm0, %v11257_v14 }
 0x116   :  { %12776 = vmatmul.mubr.msk.bf16.gmra.mrb[4].mxu0 %vm118_vm1, %v14926_v56 }
 0x117   :  { %12779 = vmatprep.mubr.msk.bf16.mxu0 %vm118_vm1, %v14944_v63 }
 0x11e   :  { %12780 = vmatmul.mubr.msk.bf16.gmra.mrb[8].mxu0 %vm118_vm1, %v14946_v0 }
 0x11f   :  { %12783 = vmatprep.mubr.msk.bf16.mxu0 %vm118_vm1, %v14964_v7 }
 0x126   :  { %12784 = vmatmul.mubr.msk.bf16.gmra.mrb[12].mxu0 %vm118_vm1, %v14966_v9 }
 0x127   :  { %12787 = vmatprep.mubr.msk.bf16.mxu0 %vm118_vm1, %v14984_v21 }
 0x12e   :  { %12788 = vmatmul.mubr.msk.bf16.gmra.mrb[16].mxu0 %vm118_vm1, %v14986_v22 }
 0x12f   :  { %12791 = vmatprep.mubr.msk.bf16.mxu0 %vm118_vm1, %v15004_v36 }
 0x131   :  { %v12677_v15 = vpop.f32.mrb[24].mxu0 }
 0x132   :  { %v493_v16 = vadd.f32 %v12677_v15, %v12647_v58  ;;  %v484_v23 = vpop.f32.mrb[25].mxu0 }
 0x133   :  { %v485_v24 = vadd.f32 %v484_v23, %v295_v59  ;;  %v12678_v31 = vpop.f32.mrb[26].mxu0  ;;  %v14395_v59 = vld [vmem:[%s18111_s3 + $0x8] sm:$0xff]  }
 0x134   :  { %v487_v39 = vpop.f32.mrb[27].mxu0 }
 0x135   :  { %v488_v40 = vadd.f32 %v487_v39, %v298_v1 }
 0x136   :  { %12792 = vmatmul.mubr.msk.bf16.gmra.mrb[20].mxu0 %vm118_vm1, %v15006_v37 }
 0x137   :  { %12795 = vmatprep.mubr.msk.bf16.mxu0 %vm118_vm1, %v15149_v32 }
 0x13e   :  { %12796 = vmatmul.mubr.msk.bf16.gmra.mrb[40].mxu0 %vm118_vm1, %v1315_v53 }
 0x13f   :  { %12801 = vmatprep.mubr.msk.bf16.mxu0 %vm118_vm1, %v14761_v54  ;;  %v1559_v54 = vld [vmem:[%s18110_s0 + $0xe8] sm:$0xff] }
 0x146   :  { %12802 = vmatmul.mubr.msk.bf16.vlgmr.msra.gmra.mrb[0].mxu0 %vm118_vm1, %v14784_v61 }
 0x147   :  { %12830 = vmatpush3.bf16.msra.mxu0 %v1879_v38  ;;  %12805 = vmatprep.mubr.msk.bf16.mxu0 %vm118_vm1, %v14786_v62  ;;  %v15291_v38 = vld [vmem:[%s18112_s2] ss:$0 sm:$0xff] }
 0x148   :  { %14382 = vmatprep.subr.msk.bf16.mxu0 %vm161_vm0, %v11272_v49 }
 0x14e   :  { %12806 = vmatmul.mubr.msk.bf16.gmra.mrb[4].mxu0 %vm118_vm1, %v14804_v3 }
 0x14f   :  { %12809 = vmatprep.mubr.msk.bf16.mxu0 %vm118_vm1, %v14806_v4 }
 0x156   :  { %12810 = vmatmul.mubr.msk.bf16.gmra.mrb[8].mxu0 %vm118_vm1, %v14824_v10 }
 0x157   :  { %12813 = vmatprep.mubr.msk.bf16.mxu0 %vm118_vm1, %v14826_v11  ;;  %v1573_v11 = vpack.c.bf16 %v1559_v54, %v15060_v48  ;;  %v18119_v48 = vmov 0.0  }
 0x158   :  { %12889 = vmatprep.subr.bf16.mxu1 %v18119_v48  ;;  %12891 = vmatprep.mubr.msk.bf16.mxu1 %vm14538_vm2, %v18119_v48 }
 0x159   :  { %12890 = vmatpush3.bf16.msra.mxu1 %v14395_v59 }
 0x15a   :  { %12935 = vmatprep.subr.bf16.mxu1 %v18119_v48 }
 0x15e   :  { %12814 = vmatmul.mubr.msk.bf16.gmra.mrb[12].mxu0 %vm118_vm1, %v14844_v17 }
 0x15f   :  { %12817 = vmatprep.mubr.msk.bf16.mxu0 %vm118_vm1, %v14846_v20  ;;  %v1560_v20 = vld [vmem:[%s18110_s0 + $0xf0] sm:$0xff] }
 0x166   :  { %12818 = vmatmul.mubr.msk.bf16.gmra.mrb[16].mxu0 %vm118_vm1, %v14864_v25  ;;  %v1574_v25 = vpack.c.bf16 %v1560_v20, %v1560_v20 }
 0x167   :  { %12821 = vmatprep.mubr.msk.bf16.mxu0 %vm118_vm1, %v14866_v27  ;;  %v2138_v27 = vsel %vm161_vm0, %v11272_v49, 0 }
 0x169   :  { %v12707_v61 = vpop.f32.mrb[28].mxu0 }
 0x16a   :  { %v756_v62 = vadd.f32 %v12707_v61, %v493_v16  ;;  %v716_v3 = vpop.f32.mrb[29].mxu0 }
 0x16b   :  { %v754_v4 = vadd.f32 %v716_v3, %v485_v24  ;;  %v12708_v10 = vpop.f32.mrb[30].mxu0 }
 0x16c   :  { %v719_v17 = vpop.f32.mrb[31].mxu0 }
 0x16d   :  { %v755_v28 = vadd.f32 %v719_v17, %v488_v40 }
 0x16e   :  { %12822 = vmatmul.mubr.msk.bf16.gmra.mrb[20].mxu0 %vm118_vm1, %v15051_v46 }
 0x16f   :  { %12825 = vmatprep.mubr.msk.bf16.mxu0 %vm118_vm1, %v1573_v11 }
 0x176   :  { %12826 = vmatmul.mubr.msk.bf16.gmra.mrb[44].mxu0 %vm118_vm1, %v1574_v25 }
 0x177   :  { %12831 = vmatprep.mubr.msk.bf16.mxu0 %vm118_vm1, %v14622_v12  ;;  %v1818_v12 = vld [vmem:[%s18110_s0 + $0xe9] sm:$0xff] }
 0x17e   :  { %12832 = vmatmul.mubr.msk.bf16.vlgmr.msra.gmra.mrb[0].mxu0 %vm118_vm1, %v14643_v18 }
 0x17f   :  { %12860 = vmatpush3.bf16.msra.mxu0 %v2138_v27  ;;  %12835 = vmatprep.mubr.msk.bf16.mxu0 %vm118_vm1, %v14646_v19 }
 0x180   :  { %13165 = vmatprep.subr.bf16.mxu0 %v18119_v48 }
 0x186   :  { %12836 = vmatmul.mubr.msk.bf16.gmra.mrb[4].mxu0 %vm118_vm1, %v14678_v29 }
 0x187   :  { %12839 = vmatprep.mubr.msk.bf16.mxu0 %vm118_vm1, %v14690_v33 }
 0x18e   :  { %12840 = vmatmul.mubr.msk.bf16.gmra.mrb[8].mxu0 %vm118_vm1, %v14721_v41 }
 0x18f   :  { %12843 = vmatprep.mubr.msk.bf16.mxu0 %vm118_vm1, %v14723_v42  ;;  %v1832_v42 = vpack.c.bf16 %v1818_v12, %v15113_v6  ;;  %v14397_v6 = vld [vmem:[%s18111_s3 + $0x30] sm:$0xff]  }
 0x196   :  { %12844 = vmatmul.mubr.msk.bf16.gmra.mrb[12].mxu0 %vm118_vm1, %v14742_v47 }
 0x197   :  { %12847 = vmatprep.mubr.msk.bf16.mxu0 %vm118_vm1, %v14670_v26  ;;  %v1819_v26 = vld [vmem:[%s18110_s0 + $0xf1] sm:$0xff] }
 0x19e   :  { %12848 = vmatmul.mubr.msk.bf16.gmra.mrb[16].mxu0 %vm118_vm1, %v14682_v30  ;;  %v1833_v30 = vpack.c.bf16 %v1819_v26, %v1819_v26 }
 0x19f   :  { %12851 = vmatprep.mubr.msk.bf16.mxu0 %vm118_vm1, %v14692_v34  ;;  %v2077_v34 = vld [vmem:[%s18110_s0 + $0xea] sm:$0xff] }
 0x1a1   :  { %v12737_v18 = vpop.f32.mrb[32].mxu0 }
 0x1a2   :  { %v1015_v19 = vadd.f32 %v12737_v18, %v756_v62  ;;  %v975_v29 = vpop.f32.mrb[33].mxu0 }
 0x1a3   :  { %v1013_v33 = vadd.f32 %v975_v29, %v754_v4  ;;  %v12738_v41 = vpop.f32.mrb[34].mxu0 }
 0x1a4   :  { %v978_v47 = vpop.f32.mrb[35].mxu0 }
 0x1a5   :  { %v1014_v46 = vadd.f32 %v978_v47, %v755_v28 }
 0x1a6   :  { %12852 = vmatmul.mubr.msk.bf16.gmra.mrb[20].mxu0 %vm118_vm1, %v15104_v5 }
 0x1a7   :  { %12855 = vmatprep.mubr.msk.bf16.mxu0 %vm118_vm1, %v1832_v42 }
 0x1ae   :  { %12856 = vmatmul.mubr.msk.bf16.gmra.mrb[48].mxu0 %vm118_vm1, %v1833_v30 }
 0x1af   :  { %12861 = vmatprep.mubr.msk.bf16.mxu0 %vm118_vm1, %v14901_v45 }
 0x1b6   :  { %12862 = vmatmul.mubr.msk.bf16.vlgmr.msra.gmra.mrb[0].mxu0 %vm118_vm1, %v14924_v55 }
 0x1b7   :  { %12865 = vmatprep.mubr.msk.bf16.mxu0 %vm118_vm1, %v14926_v56  ;;  %13166 = vmatpush3.bf16.msra.mxu0 %v14397_v6 }
 0x1b8   :  { %13257 = vmatprep.subr.bf16.mxu0 %v18119_v48 }
 0x1be   :  { %12866 = vmatmul.mubr.msk.bf16.gmra.mrb[4].mxu0 %vm118_vm1, %v14944_v63 }
 0x1bf   :  { %12869 = vmatprep.mubr.msk.bf16.mxu0 %vm118_vm1, %v14946_v0 }
 0x1c6   :  { %12870 = vmatmul.mubr.msk.bf16.gmra.mrb[8].mxu0 %vm118_vm1, %v14964_v7  ;;  %v2091_v7 = vpack.c.bf16 %v2077_v34, %v15158_v43 }
 0x1c7   :  { %12873 = vmatprep.mubr.msk.bf16.mxu0 %vm118_vm1, %v14966_v9 }
 0x1ce   :  { %12874 = vmatmul.mubr.msk.bf16.gmra.mrb[12].mxu0 %vm118_vm1, %v14984_v21 }
 0x1cf   :  { %12877 = vmatprep.mubr.msk.bf16.mxu0 %vm118_vm1, %v14986_v22  ;;  %v2078_v22 = vld [vmem:[%s18110_s0 + $0xf2] sm:$0xff] }
 0x1d6   :  { %12878 = vmatmul.mubr.msk.bf16.gmra.mrb[16].mxu0 %vm118_vm1, %v15004_v36  ;;  %v2092_v36 = vpack.c.bf16 %v2078_v22, %v2078_v22 }
 0x1d7   :  { %12881 = vmatprep.mubr.msk.bf16.mxu0 %vm118_vm1, %v15006_v37 }
 0x1d9   :  { %v12767_v45 = vpop.f32.mrb[36].mxu0 }
 0x1da   :  { %v1274_v55 = vadd.f32 %v12767_v45, %v1015_v19  ;;  %v1234_v56 = vpop.f32.mrb[37].mxu0 }
 0x1db   :  { %v1272_v63 = vadd.f32 %v1234_v56, %v1013_v33  ;;  %v12768_v0 = vpop.f32.mrb[38].mxu0 }
 0x1dc   :  { %v1237_v9 = vpop.f32.mrb[39].mxu0 }
 0x1dd   :  { %v1273_v21 = vadd.f32 %v1237_v9, %v1014_v46 }
 0x1de   :  { %12882 = vmatmul.mubr.msk.bf16.gmra.mrb[20].mxu0 %vm118_vm1, %v15149_v32 }
 0x1df   :  { %12885 = vmatprep.mubr.msk.bf16.mxu0 %vm118_vm1, %v2091_v7 }
 0x1e6   :  { %12886 = vmatmul.mubr.msk.bf16.gmra.mrb[52].mxu0 %vm118_vm1, %v2092_v36 }
 0x1e7   :  { %13167 = vmatprep.mubr.msk.bf16.mxu0 %vm14538_vm2, %v18119_v48 }
 0x211   :  { %v12797_v37 = vpop.f32.mrb[40].mxu0 }
 0x212   :  { %v1533_v50 = vadd.f32 %v12797_v37, %v1274_v55  ;;  %v1493_v58 = vpop.f32.mrb[41].mxu0  ;;  %v14396_v55 = vld [vmem:[%s18111_s3] sm:$0xff]  }
 0x213   :  { %v1531_v60 = vadd.f32 %v1493_v58, %v1272_v63  ;;  %v12798_v1 = vpop.f32.mrb[42].mxu0 }
 0x214   :  { %v1496_v2 = vpop.f32.mrb[43].mxu0 }
 0x215   :  { %v1532_v5 = vadd.f32 %v1496_v2, %v1273_v21 }
 0x249   :  { %v12827_v13 = vpop.f32.mrb[44].mxu0 }
 0x24a   :  { %v1792_v35 = vadd.f32 %v12827_v13, %v1533_v50  ;;  %v1752_v14 = vpop.f32.mrb[45].mxu0 }
 0x24b   :  { %v1790_v44 = vadd.f32 %v1752_v14, %v1531_v60  ;;  %v12828_v15 = vpop.f32.mrb[46].mxu0 }
 0x24c   :  { %v1755_v16 = vpop.f32.mrb[47].mxu0 }
 0x24d   :  { %v1791_v23 = vadd.f32 %v1755_v16, %v1532_v5 }
 0x281   :  { %v12857_v24 = vpop.f32.mrb[48].mxu0 }
 0x282   :  { %v15282_v31 = vadd.f32 %v12857_v24, %v1792_v35  ;;  %v2011_v32 = vpop.f32.mrb[49].mxu0 }
 0x283   :  { %v15284_v39 = vadd.f32 %v2011_v32, %v1790_v44  ;;  %v12858_v40 = vpop.f32.mrb[50].mxu0  ;;  %v14399_v44 = vld [vmem:[%s18111_s3 + $0x40] sm:$0xff]  }
 0x284   :  { %v2014_v43 = vpop.f32.mrb[51].mxu0 }
 0x285   :  { %v15286_v53 = vadd.f32 %v2014_v43, %v1791_v23 }
 0x289   :  { %v12863_v49 = vpop.f32.mrb[0].mxu0 }
 0x28a   :  { %v2320_v54 = vadd.f32 %v12863_v49, %v15291_v38  ;;  %v2174_v61 = vpop.f32.mrb[1].mxu0 }
 0x28b   :  { %v2318_v62 = vadd.f32 %v15291_v38, %v2174_v61  ;;  %v12864_v3 = vpop.f32.mrb[2].mxu0 }
 0x28c   :  { %v2347_v4 = vmax.f32 %v2320_v54, 0.0  ;;  %v2321_v10 = vadd.f32 %v12864_v3, %v15291_v38  ;;  %v2177_v11 = vpop.f32.mrb[3].mxu0 }
 0x28d   :  { %v2345_v17 = vmax.f32 %v2318_v62, 0.0  ;;  %v2319_v28 = vadd.f32 %v15291_v38, %v2177_v11 }
 0x28e   :  { %2375 = vst.msk [vmem:[#allocation2 + $0x10] sm:$0xff] %vm2372_vm3, %v2347_v4  ;;  %v2348_v20 = vmax.f32 %v2321_v10, 0.0 }
 0x28f   :  { %2373 = vst.msk [vmem:[#allocation2] sm:$0xff] %vm2372_vm3, %v2345_v17  ;;  %v2346_v25 = vmax.f32 %v2319_v28, 0.0 }
 0x290   :  { %2376 = vst.msk [vmem:[#allocation2 + $0x18] sm:$0xff] %vm2372_vm3, %v2348_v20 }
 0x291   :  { %2374 = vst.msk [vmem:[#allocation2 + $0x8] sm:$0xff] %vm2372_vm3, %v2346_v25  ;;  %v12867_v27 = vpop.f32.mrb[4].mxu0 }
 0x292   :  { %v2324_v12 = vadd.f32 %v12867_v27, %v15291_v38  ;;  %v2190_v18 = vpop.f32.mrb[5].mxu0 }
 0x293   :  { %v2322_v19 = vadd.f32 %v15291_v38, %v2190_v18  ;;  %v12868_v29 = vpop.f32.mrb[6].mxu0 }
 0x294   :  { %v2351_v33 = vmax.f32 %v2324_v12, 0.0  ;;  %v2325_v41 = vadd.f32 %v12868_v29, %v15291_v38  ;;  %v2193_v42 = vpop.f32.mrb[7].mxu0 }
 0x295   :  { %v2349_v47 = vmax.f32 %v2322_v19, 0.0  ;;  %v2323_v46 = vadd.f32 %v15291_v38, %v2193_v42 }
 0x296   :  { %2379 = vst.msk [vmem:[#allocation2 + $0x30] sm:$0xff] %vm2372_vm3, %v2351_v33  ;;  %v2352_v26 = vmax.f32 %v2325_v41, 0.0 }
 0x297   :  { %2377 = vst.msk [vmem:[#allocation2 + $0x20] sm:$0xff] %vm2372_vm3, %v2349_v47  ;;  %v2350_v30 = vmax.f32 %v2323_v46, 0.0  ;;  %v2437_v2 = vld [vmem:[#allocation2 + $0x11] sm:$0xff] }
 0x298   :  { %2380 = vst.msk [vmem:[#allocation2 + $0x38] sm:$0xff] %vm2372_vm3, %v2352_v26  ;;  %v2435_v34 = vld [vmem:[#allocation2 + $0x1] sm:$0xff]  ;;  %v2436_v45 = vld [vmem:[#allocation2 + $0x9] sm:$0xff] }
 0x299   :  { %2378 = vst.msk [vmem:[#allocation2 + $0x28] sm:$0xff] %vm2372_vm3, %v2350_v30  ;;  %v12871_v56 = vpop.f32.mrb[8].mxu0  ;;  %v2457_v63 = vpack.c.bf16 %v2436_v45, %v2435_v34 }
 0x29a   :  { %v2328_v0 = vadd.f32 %v12871_v56, %v15291_v38  ;;  %v2206_v7 = vpop.f32.mrb[9].mxu0 }
 0x29b   :  { %v2326_v9 = vadd.f32 %v15291_v38, %v2206_v7  ;;  %v12872_v21 = vpop.f32.mrb[10].mxu0  ;;  %12892 = vmatmul.mubr.msk.bf16.vlgmr.msra.gmra.mrb[8].mxu1 %vm2372_vm3, %v2457_v63 }
 0x29c   :  { %v2355_v22 = vmax.f32 %v2328_v0, 0.0  ;;  %v2329_v36 = vadd.f32 %v12872_v21, %v15291_v38  ;;  %v2209_v37 = vpop.f32.mrb[11].mxu0  ;;  %12936 = vmatpush3.bf16.msra.mxu1 %v14396_v55  ;;  %12895 = vmatprep.mubr.msk.bf16.mxu1 %vm14538_vm2, %v18119_v48 }
 0x29d   :  { %v2353_v50 = vmax.f32 %v2326_v9, 0.0  ;;  %v2327_v58 = vadd.f32 %v15291_v38, %v2209_v37  ;;  %12981 = vmatprep.subr.bf16.mxu1 %v18119_v48  ;;  %v3665_v11 = vld [vmem:[#allocation2 + $0x30] sm:$0xff] }
 0x29e   :  { %2383 = vst.msk [vmem:[#allocation2 + $0x50] sm:$0xff] %vm2372_vm3, %v2355_v22  ;;  %v2356_v59 = vmax.f32 %v2329_v36, 0.0  ;;  %v2438_v60 = vld [vmem:[#allocation2 + $0x19] sm:$0xff] }
 0x29f   :  { %2381 = vst.msk [vmem:[#allocation2 + $0x40] sm:$0xff] %vm2372_vm3, %v2353_v50  ;;  %v2354_v1 = vmax.f32 %v2327_v58, 0.0  ;;  %v3663_v5 = vld [vmem:[#allocation2 + $0x20] sm:$0xff]  ;;  %v2458_v35 = vpack.c.bf16 %v2438_v60, %v2437_v2  ;;  %v3666_v4 = vld [vmem:[#allocation2 + $0x38] sm:$0xff] }
 0x2a0   :  { %2384 = vst.msk [vmem:[#allocation2 + $0x58] sm:$0xff] %vm2372_vm3, %v2356_v59  ;;  %v3664_v6 = vld [vmem:[#allocation2 + $0x28] sm:$0xff]  ;;  %v15347_v20 = vpack.c.bf16 %v3666_v4, %v3665_v11  ;;  %v2441_v34 = vld [vmem:[#allocation2 + $0x31] sm:$0xff] }
 0x2a1   :  { %2382 = vst.msk [vmem:[#allocation2 + $0x48] sm:$0xff] %vm2372_vm3, %v2354_v1  ;;  %v12875_v13 = vpop.f32.mrb[12].mxu0  ;;  %v15324_v14 = vpack.c.bf16 %v3664_v6, %v3663_v5  ;;  %v3881_v61 = vld [vmem:[#allocation2 + $0x21] sm:$0xff]  ;;  %v3882_v62 = vld [vmem:[#allocation2 + $0x29] sm:$0xff] }
 0x2a2   :  { %v2332_v15 = vadd.f32 %v12875_v13, %v15291_v38  ;;  %v2222_v16 = vpop.f32.mrb[13].mxu0  ;;  %v15344_v17 = vpack.c.bf16 %v3882_v62, %v3881_v61 }
 0x2a3   :  { %v2330_v23 = vadd.f32 %v15291_v38, %v2222_v16  ;;  %v12876_v24 = vpop.f32.mrb[14].mxu0  ;;  %12896 = vmatmul.mubr.msk.bf16.gmra.mrb[12].mxu1 %vm2372_vm3, %v2458_v35  ;;  %13168 = vmatmul.mubr.msk.bf16.vlgmr.msra.gmra.mrb[56].mxu0 %vm2372_vm3, %v15324_v14 }
 0x2a4   :  { %v2359_v32 = vmax.f32 %v2332_v15, 0.0  ;;  %v2333_v40 = vadd.f32 %v12876_v24, %v15291_v38  ;;  %v2225_v43 = vpop.f32.mrb[15].mxu0  ;;  %12899 = vmatprep.mubr.msk.bf16.mxu1 %vm14538_vm2, %v18119_v48  ;;  %13171 = vmatprep.mubr.msk.bf16.mxu0 %vm14538_vm2, %v18119_v48 }
 0x2a5   :  { %v2357_v49 = vmax.f32 %v2330_v23, 0.0  ;;  %v2331_v54 = vadd.f32 %v15291_v38, %v2225_v43  ;;  %13258 = vmatpush3.bf16.msra.mxu0 %v14399_v44  ;;  %v3669_v6 = vld [vmem:[#allocation2 + $0x50] sm:$0xff] }
 0x2a6   :  { %2387 = vst.msk [vmem:[#allocation2 + $0x70] sm:$0xff] %vm2372_vm3, %v2359_v32  ;;  %v2360_v3 = vmax.f32 %v2333_v40, 0.0  ;;  %13573 = vmatprep.subr.bf16.mxu0 %v18119_v48  ;;  %v2442_v46 = vld [vmem:[#allocation2 + $0x39] sm:$0xff] }
 0x2a7   :  { %2385 = vst.msk [vmem:[#allocation2 + $0x60] sm:$0xff] %vm2372_vm3, %v2357_v49  ;;  %v2358_v10 = vmax.f32 %v2331_v54, 0.0  ;;  %v3667_v45 = vld [vmem:[#allocation2 + $0x40] sm:$0xff]  ;;  %v2460_v56 = vpack.c.bf16 %v2442_v46, %v2441_v34  ;;  %v3670_v1 = vld [vmem:[#allocation2 + $0x58] sm:$0xff] }
 0x2a8   :  { %2388 = vst.msk [vmem:[#allocation2 + $0x78] sm:$0xff] %vm2372_vm3, %v2360_v3  ;;  %v3668_v26 = vld [vmem:[#allocation2 + $0x48] sm:$0xff]  ;;  %v2445_v3 = vld [vmem:[#allocation2 + $0x51] sm:$0xff] }
 0x2a9   :  { %2386 = vst.msk [vmem:[#allocation2 + $0x68] sm:$0xff] %vm2372_vm3, %v2358_v10  ;;  %v12879_v28 = vpop.f32.mrb[16].mxu0  ;;  %v15365_v63 = vpack.c.bf16 %v3668_v26, %v3667_v45  ;;  %v2443_v59 = vld [vmem:[#allocation2 + $0x41] sm:$0xff]  ;;  %v2444_v60 = vld [vmem:[#allocation2 + $0x49] sm:$0xff] }
 0x2aa   :  { %v2336_v25 = vadd.f32 %v12879_v28, %v15291_v38  ;;  %v2238_v27 = vpop.f32.mrb[17].mxu0  ;;  %v15384_v44 = vpack.c.bf16 %v2444_v60, %v2443_v59  ;;  %v2401_v59 = vld [vmem:[#allocation2 + $0x8] sm:$0xff] }
 0x2ab   :  { %v2334_v12 = vadd.f32 %v15291_v38, %v2238_v27  ;;  %v12880_v18 = vpop.f32.mrb[18].mxu0  ;;  %12900 = vmatmul.mubr.msk.bf16.gmra.mrb[16].mxu1 %vm2372_vm3, %v15344_v17  ;;  %13172 = vmatmul.mubr.msk.bf16.gmra.mrb[60].mxu0 %vm2372_vm3, %v15347_v20 }
 0x2ac   :  { %v2363_v19 = vmax.f32 %v2336_v25, 0.0  ;;  %v2337_v29 = vadd.f32 %v12880_v18, %v15291_v38  ;;  %v2241_v33 = vpop.f32.mrb[19].mxu0  ;;  %12903 = vmatprep.mubr.msk.bf16.mxu1 %vm14538_vm2, %v18119_v48  ;;  %13175 = vmatprep.mubr.msk.bf16.mxu0 %vm14538_vm2, %v18119_v48 }
 0x2ad   :  { %v2361_v41 = vmax.f32 %v2334_v12, 0.0  ;;  %v2335_v42 = vadd.f32 %v15291_v38, %v2241_v33  ;;  %v3673_v27 = vld [vmem:[#allocation2 + $0x70] sm:$0xff] }
 0x2ae   :  { %2391 = vst.msk [vmem:[#allocation2 + $0x90] sm:$0xff] %vm2372_vm3, %v2363_v19  ;;  %v2364_v47 = vmax.f32 %v2337_v29, 0.0  ;;  %v2446_v49 = vld [vmem:[#allocation2 + $0x59] sm:$0xff] }
 0x2af   :  { %2389 = vst.msk [vmem:[#allocation2 + $0x80] sm:$0xff] %vm2372_vm3, %v2361_v41  ;;  %v2362_v30 = vmax.f32 %v2335_v42, 0.0  ;;  %v3671_v4 = vld [vmem:[#allocation2 + $0x60] sm:$0xff]  ;;  %v15406_v11 = vpack.c.bf16 %v2446_v49, %v2445_v3  ;;  %v3674_v25 = vld [vmem:[#allocation2 + $0x78] sm:$0xff] }
 0x2b0   :  { %2392 = vst.msk [vmem:[#allocation2 + $0x98] sm:$0xff] %vm2372_vm3, %v2364_v47  ;;  %v3672_v54 = vld [vmem:[#allocation2 + $0x68] sm:$0xff]  ;;  %v15419_v18 = vpack.c.bf16 %v3674_v25, %v3673_v27  ;;  %v2449_v33 = vld [vmem:[#allocation2 + $0x71] sm:$0xff] }
 0x2b1   :  { %2390 = vst.msk [vmem:[#allocation2 + $0x88] sm:$0xff] %vm2372_vm3, %v2362_v30  ;;  %v12883_v55 = vpop.f32.mrb[20].mxu0  ;;  %v15408_v28 = vpack.c.bf16 %v3672_v54, %v3671_v4  ;;  %v4106_v54 = vld [vmem:[#allocation2 + $0x5a] sm:$0xff]  ;;  %v4107_v3 = vld [vmem:[#allocation2 + $0x62] sm:$0xff]  ;;  %v4108_v4 = vld [vmem:[#allocation2 + $0x6a] sm:$0xff] }
 0x2b2   :  { %v13989_v0 = vadd.f32 %v12883_v55, %v15084_v8  ;;  %v2254_v7 = vpop.f32.mrb[21].mxu0 }
 0x2b3   :  { %v13990_v9 = vadd.f32 %v2254_v7, %v15086_v51  ;;  %v12884_v21 = vpop.f32.mrb[22].mxu0  ;;  %12904 = vmatmul.mubr.msk.bf16.gmra.mrb[20].mxu1 %vm2372_vm3, %v2460_v56  ;;  %13176 = vmatmul.mubr.msk.bf16.gmra.mrb[64].mxu0 %vm2372_vm3, %v15365_v63 }
 0x2b4   :  { %v2340_v22 = vadd.f32 %v13989_v0, %v15291_v38  ;;  %v13991_v36 = vadd.f32 %v12884_v21, %v15088_v52  ;;  %v2257_v37 = vpop.f32.mrb[23].mxu0  ;;  %12907 = vmatprep.mubr.msk.bf16.mxu1 %vm14538_vm2, %v18119_v48  ;;  %13179 = vmatprep.mubr.msk.bf16.mxu0 %vm14538_vm2, %v18119_v48 }
 0x2b5   :  { %v2338_v8 = vadd.f32 %v13990_v9, %v15291_v38  ;;  %v13992_v51 = vadd.f32 %v2257_v37, %v15090_v57  ;;  %v15386_v57 = vpack.c.bf16 %v3670_v1, %v3669_v6  ;;  %v3677_v34 = vld [vmem:[#allocation2 + $0x90] sm:$0xff]  ;;  %v2400_v1 = vld [vmem:[#allocation2] sm:$0xff] }
 0x2b6   :  { %v2367_v50 = vmax.f32 %v2340_v22, 0.0  ;;  %v2341_v58 = vadd.f32 %v13991_v36, %v15291_v38  ;;  %v2450_v19 = vld [vmem:[#allocation2 + $0x79] sm:$0xff] }
 0x2b7   :  { %v2365_v2 = vmax.f32 %v2338_v8, 0.0  ;;  %v2339_v52 = vadd.f32 %v13992_v51, %v15291_v38  ;;  %v3675_v41 = vld [vmem:[#allocation2 + $0x80] sm:$0xff]  ;;  %v2464_v42 = vpack.c.bf16 %v2450_v19, %v2449_v33  ;;  %v3678_v30 = vld [vmem:[#allocation2 + $0x98] sm:$0xff] }
 0x2b8   :  { %2395 = vst.msk [vmem:[#allocation2 + $0xb0] sm:$0xff] %vm2372_vm3, %v2367_v50  ;;  %v2368_v5 = vmax.f32 %v2341_v58, 0.0  ;;  %v3676_v29 = vld [vmem:[#allocation2 + $0x88] sm:$0xff]  ;;  %v15437_v55 = vpack.c.bf16 %v3678_v30, %v3677_v34  ;;  %v2453_v7 = vld [vmem:[#allocation2 + $0x91] sm:$0xff] }
 0x2b9   :  { %2393 = vst.msk [vmem:[#allocation2 + $0xa0] sm:$0xff] %vm2372_vm3, %v2365_v2  ;;  %v2366_v13 = vmax.f32 %v2339_v52, 0.0  ;;  %v12887_v35 = vpop.f32.mrb[52].mxu0  ;;  %v15428_v47 = vpack.c.bf16 %v3676_v29, %v3675_v41  ;;  %v2451_v46 = vld [vmem:[#allocation2 + $0x81] sm:$0xff]  ;;  %v2452_v26 = vld [vmem:[#allocation2 + $0x89] sm:$0xff]  ;;  %v4113_v33 = vld [vmem:[#allocation2 + $0x92] sm:$0xff] }
 0x2ba   :  { %2396 = vst.msk [vmem:[#allocation2 + $0xb8] sm:$0xff] %vm2372_vm3, %v2368_v5  ;;  %v2310_v15 = vadd.f32 %v12887_v35, %v15282_v31  ;;  %v2270_v16 = vpop.f32.mrb[53].mxu0  ;;  %v2465_v45 = vpack.c.bf16 %v2452_v26, %v2451_v46  ;;  %v14398_v52 = vld [vmem:[%s18111_s3 + $0x10] sm:$0xff]   ;;  %v2422_v5 = vpack.c.bf16 %v2401_v59, %v2400_v1  ;;  %v4099_v35 = vld [vmem:[#allocation2 + $0x22] sm:$0xff] }
 0x2bb   :  { %2394 = vst.msk [vmem:[#allocation2 + $0xa8] sm:$0xff] %vm2372_vm3, %v2366_v13  ;;  %v2308_v23 = vadd.f32 %v2270_v16, %v15284_v39  ;;  %v12888_v24 = vpop.f32.mrb[54].mxu0  ;;  %12908 = vmatmul.mubr.msk.bf16.gmra.mrb[24].mxu1 %vm2372_vm3, %v15384_v44  ;;  %13180 = vmatmul.mubr.msk.bf16.gmra.mrb[68].mxu0 %vm2372_vm3, %v15386_v57  ;;  %v2403_v13 = vld [vmem:[#allocation2 + $0x18] sm:$0xff]  ;;  %v2402_v16 = vld [vmem:[#allocation2 + $0x10] sm:$0xff]  ;;  %v4111_v27 = vld [vmem:[#allocation2 + $0x82] sm:$0xff] }
 0x2bc   :  { %v2344_v32 = vadd.f32 %v15291_v38, %v2310_v15  ;;  %v2273_v40 = vpop.f32.mrb[55].mxu0  ;;  %12911 = vmatprep.mubr.msk.bf16.mxu1 %vm14538_vm2, %v18119_v48  ;;  %13183 = vmatprep.mubr.msk.bf16.mxu0 %vm14538_vm2, %v18119_v48  ;;  %v4100_v15 = vld [vmem:[#allocation2 + $0x2a] sm:$0xff] }
 0x2bd   :  { %v2342_v31 = vadd.f32 %v15291_v38, %v2308_v23  ;;  %v2309_v39 = vadd.f32 %v2273_v40, %v15286_v53  ;;  %v2447_v53 = vld [vmem:[#allocation2 + $0x61] sm:$0xff]  ;;  %v15474_v23 = vpack.c.bf16 %v2403_v13, %v2402_v16  ;;  %v15476_v24 = vpack.c.bf16 %v4100_v15, %v4099_v35  ;;  %v4101_v40 = vld [vmem:[#allocation2 + $0x32] sm:$0xff] }
 0x2be   :  { %v2371_v43 = vmax.f32 %v2344_v32, 0.0  ;;  %v4102_v32 = vld [vmem:[#allocation2 + $0x3a] sm:$0xff] }
 0x2bf   :  { %v2369_v61 = vmax.f32 %v2342_v31, 0.0  ;;  %v2343_v62 = vadd.f32 %v15291_v38, %v2309_v39  ;;  %v2448_v38 = vld [vmem:[#allocation2 + $0x69] sm:$0xff]  ;;  %v15486_v31 = vpack.c.bf16 %v4102_v32, %v4101_v40 }
 0x2c0   :  { %2399 = vst.msk [vmem:[#allocation2 + $0xd0] sm:$0xff] %vm2372_vm3, %v2371_v43  ;;  %v2463_v12 = vpack.c.bf16 %v2448_v38, %v2447_v53  ;;  %v2454_v56 = vld [vmem:[#allocation2 + $0x99] sm:$0xff]  ;;  %v3681_v51 = vld [vmem:[#allocation2 + $0xb0] sm:$0xff]  ;;  %v4103_v39 = vld [vmem:[#allocation2 + $0x42] sm:$0xff] }
 0x2c1   :  { %2397 = vst.msk [vmem:[#allocation2 + $0xc0] sm:$0xff] %vm2372_vm3, %v2369_v61  ;;  %v2370_v10 = vmax.f32 %v2343_v62, 0.0  ;;  %v3679_v9 = vld [vmem:[#allocation2 + $0xa0] sm:$0xff]  ;;  %v2466_v21 = vpack.c.bf16 %v2454_v56, %v2453_v7  ;;  %v3682_v8 = vld [vmem:[#allocation2 + $0xb8] sm:$0xff]  ;;  %v4104_v43 = vld [vmem:[#allocation2 + $0x4a] sm:$0xff] }
 0x2c2   :  { %v3680_v0 = vld [vmem:[#allocation2 + $0xa8] sm:$0xff]  ;;  %v15455_v58 = vpack.c.bf16 %v3682_v8, %v3681_v51  ;;  %v15496_v49 = vpack.c.bf16 %v4104_v43, %v4103_v39  ;;  %v4105_v61 = vld [vmem:[#allocation2 + $0x52] sm:$0xff]  ;;  %v4110_v53 = vld [vmem:[#allocation2 + $0x7a] sm:$0xff] }
 0x2c3   :  { %2398 = vst.msk [vmem:[#allocation2 + $0xc8] sm:$0xff] %vm2372_vm3, %v2370_v10  ;;  %12912 = vmatmul.mubr.msk.bf16.gmra.mrb[28].mxu1 %vm2372_vm3, %v15406_v11  ;;  %13184 = vmatmul.mubr.msk.bf16.gmra.mrb[72].mxu0 %vm2372_vm3, %v15408_v28  ;;  %v15446_v22 = vpack.c.bf16 %v3680_v0, %v3679_v9  ;;  %v2455_v36 = vld [vmem:[#allocation2 + $0xa1] sm:$0xff]  ;;  %v2456_v37 = vld [vmem:[#allocation2 + $0xa9] sm:$0xff]  ;;  %v15506_v62 = vpack.c.bf16 %v4106_v54, %v4105_v61  ;;  %v4109_v38 = vld [vmem:[#allocation2 + $0x72] sm:$0xff] }
 0x2c4   :  { %12915 = vmatprep.mubr.msk.bf16.mxu1 %vm14538_vm2, %v18119_v48  ;;  %13187 = vmatprep.mubr.msk.bf16.mxu0 %vm14538_vm2, %v18119_v48  ;;  %v2467_v50 = vpack.c.bf16 %v2456_v37, %v2455_v36  ;;  %v15516_v10 = vpack.c.bf16 %v4108_v4, %v4107_v3  ;;  %v15526_v25 = vpack.c.bf16 %v4110_v53, %v4109_v38  ;;  %v4114_v29 = vld [vmem:[#allocation2 + $0x9a] sm:$0xff]  ;;  %v4116_v46 = vld [vmem:[#allocation2 + $0xaa] sm:$0xff]  ;;  %v4117_v34 = vld [vmem:[#allocation2 + $0xb2] sm:$0xff] }
 0x2c5   :  { %v15546_v41 = vpack.c.bf16 %v4114_v29, %v4113_v33  ;;  %v2791_v56 = vld [vmem:[#allocation2 + $0x2] sm:$0xff]  ;;  %v2792_v0 = vld [vmem:[#allocation2 + $0xa] sm:$0xff]  ;;  %v2794_v8 = vld [vmem:[#allocation2 + $0x1a] sm:$0xff] }
 0x2c6   :  { %v2813_v36 = vpack.c.bf16 %v2792_v0, %v2791_v56  ;;  %v2793_v51 = vld [vmem:[#allocation2 + $0x12] sm:$0xff] }
 0x2c8   :  { %v3683_v2 = vld [vmem:[#allocation2 + $0xc0] sm:$0xff] }
 0x2c9   :  { %v4118_v30 = vld [vmem:[#allocation2 + $0xba] sm:$0xff] }
 0x2ca   :  { %v3684_v60 = vld [vmem:[#allocation2 + $0xc8] sm:$0xff] }
 0x2cb   :  { %12916 = vmatmul.mubr.msk.bf16.gmra.mrb[32].mxu1 %vm2372_vm3, %v2463_v12  ;;  %13188 = vmatmul.mubr.msk.bf16.gmra.mrb[76].mxu0 %vm2372_vm3, %v15419_v18  ;;  %v3695_v6 = vpack.c.bf16 %v3684_v60, %v3683_v2  ;;  %v4112_v12 = vld [vmem:[#allocation2 + $0x8a] sm:$0xff]  ;;  %v4119_v7 = vld [vmem:[#allocation2 + $0xc2] sm:$0xff] }
 0x2cc   :  { %12919 = vmatprep.mubr.msk.bf16.mxu1 %vm14538_vm2, %v18119_v48  ;;  %13191 = vmatprep.mubr.msk.bf16.mxu0 %vm14538_vm2, %v18119_v48  ;;  %v15536_v19 = vpack.c.bf16 %v4112_v12, %v4111_v27  ;;  %v4120_v9 = vld [vmem:[#allocation2 + $0xca] sm:$0xff] }
 0x2cd   :  { %v4131_v37 = vpack.c.bf16 %v4120_v9, %v4119_v7 }
 0x2d3   :  { %12920 = vmatmul.mubr.msk.bf16.gmra.mrb[36].mxu1 %vm2372_vm3, %v2464_v42  ;;  %13192 = vmatmul.mubr.msk.bf16.gmra.mrb[80].mxu0 %vm2372_vm3, %v15428_v47  ;;  %v4115_v42 = vld [vmem:[#allocation2 + $0xa2] sm:$0xff] }
 0x2d4   :  { %12923 = vmatprep.mubr.msk.bf16.mxu1 %vm14538_vm2, %v18119_v48  ;;  %13195 = vmatprep.mubr.msk.bf16.mxu0 %vm14538_vm2, %v18119_v48  ;;  %v15556_v26 = vpack.c.bf16 %v4116_v46, %v4115_v42 }
 0x2db   :  { %12924 = vmatmul.mubr.msk.bf16.gmra.mrb[40].mxu1 %vm2372_vm3, %v2465_v45  ;;  %13196 = vmatmul.mubr.msk.bf16.gmra.mrb[84].mxu0 %vm2372_vm3, %v15437_v55  ;;  %v4130_v45 = vpack.c.bf16 %v4118_v30, %v4117_v34 }
 0x2dc   :  { %12927 = vmatprep.mubr.msk.bf16.mxu1 %vm14538_vm2, %v18119_v48  ;;  %13199 = vmatprep.mubr.msk.bf16.mxu0 %vm14538_vm2, %v18119_v48 }
 0x2e3   :  { %12928 = vmatmul.mubr.msk.bf16.gmra.mrb[44].mxu1 %vm2372_vm3, %v2466_v21  ;;  %13200 = vmatmul.mubr.msk.bf16.gmra.mrb[88].mxu0 %vm2372_vm3, %v15446_v22  ;;  %v14400_v21 = vld [vmem:[%s18111_s3 + $0x18] sm:$0xff]  }
 0x2e4   :  { %12931 = vmatprep.mubr.msk.bf16.mxu1 %vm14538_vm2, %v18119_v48  ;;  %13203 = vmatprep.mubr.msk.bf16.mxu0 %vm14538_vm2, %v18119_v48 }
 0x2eb   :  { %12932 = vmatmul.mubr.msk.bf16.gmra.mrb[48].mxu1 %vm2372_vm3, %v2467_v50  ;;  %13204 = vmatmul.mubr.msk.bf16.gmra.mrb[92].mxu0 %vm2372_vm3, %v15455_v58  ;;  %v15583_v50 = vpack.c.bf16 %v2794_v8, %v2793_v51 }
 0x2ec   :  { %12937 = vmatprep.mubr.msk.bf16.mxu1 %vm14538_vm2, %v18119_v48  ;;  %13207 = vmatprep.mubr.msk.bf16.mxu0 %vm14538_vm2, %v18119_v48 }
 0x2f3   :  { %12938 = vmatmul.mubr.msk.bf16.vlgmr.msra.gmra.mrb[52].mxu1 %vm2372_vm3, %v2422_v5  ;;  %13208 = vmatmul.mubr.msk.bf16.gmra.mrb[96].mxu0 %vm2372_vm3, %v3695_v6 }
 0x2f4   :  { %12982 = vmatpush3.bf16.msra.mxu1 %v14398_v52  ;;  %12941 = vmatprep.mubr.msk.bf16.mxu1 %vm14538_vm2, %v18119_v48 }
 0x2f5   :  { %13259 = vmatprep.mubr.msk.bf16.mxu0 %vm14538_vm2, %v18119_v48  ;;  %13027 = vmatprep.subr.bf16.mxu1 %v18119_v48 }
 0x2fb   :  { %12942 = vmatmul.mubr.msk.bf16.gmra.mrb[56].mxu1 %vm2372_vm3, %v15474_v23  ;;  %13260 = vmatmul.mubr.msk.bf16.vlgmr.msra.gmra.mrb[100].mxu0 %vm2372_vm3, %v15476_v24 }
 0x2fc   :  { %12945 = vmatprep.mubr.msk.bf16.mxu1 %vm14538_vm2, %v18119_v48  ;;  %13263 = vmatprep.mubr.msk.bf16.mxu0 %vm14538_vm2, %v18119_v48 }
 0x303   :  { %12946 = vmatmul.mubr.msk.bf16.gmra.mrb[60].mxu1 %vm2372_vm3, %v15324_v14  ;;  %13264 = vmatmul.mubr.msk.bf16.gmra.mrb[104].mxu0 %vm2372_vm3, %v15486_v31 }
 0x304   :  { %12949 = vmatprep.mubr.msk.bf16.mxu1 %vm14538_vm2, %v18119_v48  ;;  %13267 = vmatprep.mubr.msk.bf16.mxu0 %vm14538_vm2, %v18119_v48 }
 0x30b   :  { %12950 = vmatmul.mubr.msk.bf16.gmra.mrb[64].mxu1 %vm2372_vm3, %v15347_v20  ;;  %13268 = vmatmul.mubr.msk.bf16.gmra.mrb[108].mxu0 %vm2372_vm3, %v15496_v49 }
 0x30c   :  { %12953 = vmatprep.mubr.msk.bf16.mxu1 %vm14538_vm2, %v18119_v48  ;;  %13271 = vmatprep.mubr.msk.bf16.mxu0 %vm14538_vm2, %v18119_v48 }
 0x313   :  { %12954 = vmatmul.mubr.msk.bf16.gmra.mrb[68].mxu1 %vm2372_vm3, %v15365_v63  ;;  %13272 = vmatmul.mubr.msk.bf16.gmra.mrb[112].mxu0 %vm2372_vm3, %v15506_v62 }
 0x314   :  { %12957 = vmatprep.mubr.msk.bf16.mxu1 %vm14538_vm2, %v18119_v48  ;;  %13275 = vmatprep.mubr.msk.bf16.mxu0 %vm14538_vm2, %v18119_v48 }
 0x31b   :  { %12958 = vmatmul.mubr.msk.bf16.gmra.mrb[72].mxu1 %vm2372_vm3, %v15386_v57  ;;  %13276 = vmatmul.mubr.msk.bf16.gmra.mrb[116].mxu0 %vm2372_vm3, %v15516_v10 }
 0x31c   :  { %12961 = vmatprep.mubr.msk.bf16.mxu1 %vm14538_vm2, %v18119_v48  ;;  %13279 = vmatprep.mubr.msk.bf16.mxu0 %vm14538_vm2, %v18119_v48 }
 0x323   :  { %12962 = vmatmul.mubr.msk.bf16.gmra.mrb[76].mxu1 %vm2372_vm3, %v15408_v28  ;;  %13280 = vmatmul.mubr.msk.bf16.gmra.mrb[120].mxu0 %vm2372_vm3, %v15526_v25 }
 0x324   :  { %12965 = vmatprep.mubr.msk.bf16.mxu1 %vm14538_vm2, %v18119_v48  ;;  %13283 = vmatprep.mubr.msk.bf16.mxu0 %vm14538_vm2, %v18119_v48 }
 0x32b   :  { %12966 = vmatmul.mubr.msk.bf16.gmra.mrb[80].mxu1 %vm2372_vm3, %v15419_v18  ;;  %13284 = vmatmul.mubr.msk.bf16.gmra.mrb[124].mxu0 %vm2372_vm3, %v15536_v19 }
 0x32c   :  { %12969 = vmatprep.mubr.msk.bf16.mxu1 %vm14538_vm2, %v18119_v48  ;;  %13287 = vmatprep.mubr.msk.bf16.mxu0 %vm14538_vm2, %v18119_v48 }
 0x333   :  { %12970 = vmatmul.mubr.msk.bf16.gmra.mrb[84].mxu1 %vm2372_vm3, %v15428_v47  ;;  %13288 = vmatmul.mubr.msk.bf16.gmra.mrb[128].mxu0 %vm2372_vm3, %v15546_v41 }
 0x334   :  { %12973 = vmatprep.mubr.msk.bf16.mxu1 %vm14538_vm2, %v18119_v48  ;;  %13291 = vmatprep.mubr.msk.bf16.mxu0 %vm14538_vm2, %v18119_v48 }
 0x33b   :  { %12974 = vmatmul.mubr.msk.bf16.gmra.mrb[88].mxu1 %vm2372_vm3, %v15437_v55  ;;  %13292 = vmatmul.mubr.msk.bf16.gmra.mrb[132].mxu0 %vm2372_vm3, %v15556_v26 }
 0x33c   :  { %12977 = vmatprep.mubr.msk.bf16.mxu1 %vm14538_vm2, %v18119_v48  ;;  %13295 = vmatprep.mubr.msk.bf16.mxu0 %vm14538_vm2, %v18119_v48 }
 0x343   :  { %12978 = vmatmul.mubr.msk.bf16.gmra.mrb[92].mxu1 %vm2372_vm3, %v15446_v22  ;;  %13296 = vmatmul.mubr.msk.bf16.gmra.mrb[136].mxu0 %vm2372_vm3, %v4130_v45 }
 0x344   :  { %12983 = vmatprep.mubr.msk.bf16.mxu1 %vm14538_vm2, %v18119_v48  ;;  %13299 = vmatprep.mubr.msk.bf16.mxu0 %vm14538_vm2, %v18119_v48 }
 0x34b   :  { %12984 = vmatmul.mubr.msk.bf16.vlgmr.msra.gmra.mrb[96].mxu1 %vm2372_vm3, %v2813_v36  ;;  %13300 = vmatmul.mubr.msk.bf16.gmra.mrb[140].mxu0 %vm2372_vm3, %v4131_v37 }
 0x34c   :  { %13028 = vmatpush3.bf16.msra.mxu1 %v14400_v21  ;;  %12987 = vmatprep.mubr.msk.bf16.mxu1 %vm14538_vm2, %v18119_v48 }
 0x34d   :  { %13073 = vmatprep.subr.bf16.mxu1 %v18119_v48  ;;  %13575 = vmatprep.mubr.msk.bf16.mxu0 %vm14538_vm2, %v18119_v48 }
 0x353   :  { %12988 = vmatmul.mubr.msk.bf16.gmra.mrb[100].mxu1 %vm2372_vm3, %v15583_v50 }
 0x354   :  { %12991 = vmatprep.mubr.msk.bf16.mxu1 %vm14538_vm2, %v18119_v48 }
 0x35b   :  { %12992 = vmatmul.mubr.msk.bf16.gmra.mrb[104].mxu1 %vm2372_vm3, %v15476_v24 }
 0x35c   :  { %12995 = vmatprep.mubr.msk.bf16.mxu1 %vm14538_vm2, %v18119_v48 }
 0x363   :  { %12996 = vmatmul.mubr.msk.bf16.gmra.mrb[108].mxu1 %vm2372_vm3, %v15486_v31 }
 0x364   :  { %12999 = vmatprep.mubr.msk.bf16.mxu1 %vm14538_vm2, %v18119_v48 }
 0x36b   :  { %13000 = vmatmul.mubr.msk.bf16.gmra.mrb[112].mxu1 %vm2372_vm3, %v15496_v49 }
 0x36c   :  { %13003 = vmatprep.mubr.msk.bf16.mxu1 %vm14538_vm2, %v18119_v48 }
 0x36e   :  { %v15601_v59 = vpop.f32.mrb[8].mxu1 }
 0x36f   :  { %v12893_v60 = vpop.f32.mrb[9].mxu1 }
 0x370   :  { %v15603_v1 = vpop.f32.mrb[10].mxu1 }
 0x371   :  { %v12894_v2 = vpop.f32.mrb[11].mxu1 }
 0x373   :  { %13004 = vmatmul.mubr.msk.bf16.gmra.mrb[116].mxu1 %vm2372_vm3, %v15506_v62 }
 0x374   :  { %13007 = vmatprep.mubr.msk.bf16.mxu1 %vm14538_vm2, %v18119_v48 }
 0x376   :  { %v2552_v52 = vpop.f32.mrb[12].mxu1  ;;  %v15609_v5 = vpop.f32.mrb[56].mxu0 }
 0x377   :  { %v12897_v6 = vpop.f32.mrb[13].mxu1  ;;  %v13169_v13 = vpop.f32.mrb[57].mxu0 }
 0x378   :  { %v2555_v35 = vpop.f32.mrb[14].mxu1  ;;  %v15611_v15 = vpop.f32.mrb[58].mxu0  ;;  %v14401_v6 = vld [vmem:[%s18111_s3 + $0x20] sm:$0xff]  }
 0x379   :  { %v12898_v16 = vpop.f32.mrb[15].mxu1  ;;  %v13170_v24 = vpop.f32.mrb[59].mxu0 }
 0x37b   :  { %13008 = vmatmul.mubr.msk.bf16.gmra.mrb[120].mxu1 %vm2372_vm3, %v15516_v10 }
 0x37c   :  { %13011 = vmatprep.mubr.msk.bf16.mxu1 %vm14538_vm2, %v18119_v48 }
 0x37e   :  { %v15617_v32 = vpop.f32.mrb[16].mxu1  ;;  %v3780_v40 = vpop.f32.mrb[60].mxu0 }
 0x37f   :  { %v12901_v31 = vpop.f32.mrb[17].mxu1  ;;  %v13173_v39 = vpop.f32.mrb[61].mxu0 }
 0x380   :  { %v15619_v43 = vpop.f32.mrb[18].mxu1  ;;  %v3783_v49 = vpop.f32.mrb[62].mxu0 }
 0x381   :  { %v12902_v54 = vpop.f32.mrb[19].mxu1  ;;  %v13174_v61 = vpop.f32.mrb[63].mxu0 }
 0x383   :  { %13012 = vmatmul.mubr.msk.bf16.gmra.mrb[124].mxu1 %vm2372_vm3, %v15526_v25 }
 0x384   :  { %13015 = vmatprep.mubr.msk.bf16.mxu1 %vm14538_vm2, %v18119_v48 }
 0x386   :  { %v2568_v62 = vpop.f32.mrb[20].mxu1  ;;  %v15625_v3 = vpop.f32.mrb[64].mxu0 }
 0x387   :  { %v12905_v4 = vpop.f32.mrb[21].mxu1  ;;  %v13177_v10 = vpop.f32.mrb[65].mxu0 }
 0x388   :  { %v2571_v53 = vpop.f32.mrb[22].mxu1  ;;  %v15627_v38 = vpop.f32.mrb[66].mxu0 }
 0x389   :  { %v12906_v27 = vpop.f32.mrb[23].mxu1  ;;  %v13178_v12 = vpop.f32.mrb[67].mxu0 }
 0x38b   :  { %13016 = vmatmul.mubr.msk.bf16.gmra.mrb[128].mxu1 %vm2372_vm3, %v15536_v19 }
 0x38c   :  { %13019 = vmatprep.mubr.msk.bf16.mxu1 %vm14538_vm2, %v18119_v48 }
 0x38e   :  { %v15633_v25 = vpop.f32.mrb[24].mxu1  ;;  %v3796_v29 = vpop.f32.mrb[68].mxu0 }
 0x38f   :  { %v12909_v33 = vpop.f32.mrb[25].mxu1  ;;  %v13181_v42 = vpop.f32.mrb[69].mxu0 }
 0x390   :  { %v15635_v46 = vpop.f32.mrb[26].mxu1  ;;  %v3799_v30 = vpop.f32.mrb[70].mxu0 }
 0x391   :  { %v12910_v34 = vpop.f32.mrb[27].mxu1  ;;  %v13182_v45 = vpop.f32.mrb[71].mxu0 }
 0x393   :  { %13020 = vmatmul.mubr.msk.bf16.gmra.mrb[132].mxu1 %vm2372_vm3, %v15546_v41 }
 0x394   :  { %13023 = vmatprep.mubr.msk.bf16.mxu1 %vm14538_vm2, %v18119_v48 }
 0x396   :  { %v2584_v19 = vpop.f32.mrb[28].mxu1  ;;  %v15641_v56 = vpop.f32.mrb[72].mxu0 }
 0x397   :  { %v12913_v0 = vpop.f32.mrb[29].mxu1  ;;  %v13185_v7 = vpop.f32.mrb[73].mxu0 }
 0x398   :  { %v2587_v9 = vpop.f32.mrb[30].mxu1  ;;  %v15643_v21 = vpop.f32.mrb[74].mxu0 }
 0x399   :  { %v12914_v36 = vpop.f32.mrb[31].mxu1  ;;  %v13186_v37 = vpop.f32.mrb[75].mxu0 }
 0x39b   :  { %13024 = vmatmul.mubr.msk.bf16.gmra.mrb[136].mxu1 %vm2372_vm3, %v15556_v26 }
 0x39c   :  { %13029 = vmatprep.mubr.msk.bf16.mxu1 %vm14538_vm2, %v18119_v48 }
 0x39e   :  { %v15649_v41 = vpop.f32.mrb[32].mxu1  ;;  %v3812_v8 = vpop.f32.mrb[76].mxu0 }
 0x39f   :  { %v12917_v51 = vpop.f32.mrb[33].mxu1  ;;  %v13189_v60 = vpop.f32.mrb[77].mxu0 }
 0x3a0   :  { %v15651_v2 = vpop.f32.mrb[34].mxu1  ;;  %v3815_v52 = vpop.f32.mrb[78].mxu0 }
 0x3a1   :  { %v12918_v13 = vpop.f32.mrb[35].mxu1  ;;  %v13190_v35 = vpop.f32.mrb[79].mxu0 }
 0x3a3   :  { %13030 = vmatmul.mubr.msk.bf16.vlgmr.msra.gmra.mrb[140].mxu1 %vm2372_vm3, %v15474_v23 }
 0x3a4   :  { %13074 = vmatpush3.bf16.msra.mxu1 %v14401_v6  ;;  %13033 = vmatprep.mubr.msk.bf16.mxu1 %vm14538_vm2, %v18119_v48 }
 0x3a5   :  { %13119 = vmatprep.subr.bf16.mxu1 %v18119_v48 }
 0x3a6   :  { %v2600_v26 = vpop.f32.mrb[36].mxu1  ;;  %v15661_v16 = vpop.f32.mrb[80].mxu0 }
 0x3a7   :  { %v12921_v24 = vpop.f32.mrb[37].mxu1  ;;  %v13193_v40 = vpop.f32.mrb[81].mxu0 }
 0x3a8   :  { %v2603_v31 = vpop.f32.mrb[38].mxu1  ;;  %v15663_v39 = vpop.f32.mrb[82].mxu0 }
 0x3a9   :  { %v12922_v49 = vpop.f32.mrb[39].mxu1  ;;  %v13194_v54 = vpop.f32.mrb[83].mxu0 }
 0x3ab   :  { %13034 = vmatmul.mubr.msk.bf16.gmra.mrb[144].mxu1 %vm2372_vm3, %v15324_v14 }
 0x3ac   :  { %13037 = vmatprep.mubr.msk.bf16.mxu1 %vm14538_vm2, %v18119_v48 }
 0x3ae   :  { %v15669_v23 = vpop.f32.mrb[40].mxu1  ;;  %v3828_v61 = vpop.f32.mrb[84].mxu0 }
 0x3af   :  { %v12925_v62 = vpop.f32.mrb[41].mxu1  ;;  %v13197_v4 = vpop.f32.mrb[85].mxu0 }
 0x3b0   :  { %v15671_v10 = vpop.f32.mrb[42].mxu1  ;;  %v3831_v53 = vpop.f32.mrb[86].mxu0 }
 0x3b1   :  { %v12926_v27 = vpop.f32.mrb[43].mxu1  ;;  %v13198_v12 = vpop.f32.mrb[87].mxu0 }
 0x3b3   :  { %13038 = vmatmul.mubr.msk.bf16.gmra.mrb[148].mxu1 %vm2372_vm3, %v15347_v20 }
 0x3b4   :  { %13041 = vmatprep.mubr.msk.bf16.mxu1 %vm14538_vm2, %v18119_v48 }
 0x3b6   :  { %v2616_v14 = vpop.f32.mrb[44].mxu1  ;;  %v15677_v29 = vpop.f32.mrb[88].mxu0 }
 0x3b7   :  { %v12929_v33 = vpop.f32.mrb[45].mxu1  ;;  %v13201_v42 = vpop.f32.mrb[89].mxu0 }
 0x3b8   :  { %v2619_v30 = vpop.f32.mrb[46].mxu1  ;;  %v15679_v34 = vpop.f32.mrb[90].mxu0 }
 0x3b9   :  { %v12930_v45 = vpop.f32.mrb[47].mxu1  ;;  %v13202_v19 = vpop.f32.mrb[91].mxu0 }
 0x3bb   :  { %13042 = vmatmul.mubr.msk.bf16.gmra.mrb[152].mxu1 %vm2372_vm3, %v15365_v63 }
 0x3bc   :  { %13045 = vmatprep.mubr.msk.bf16.mxu1 %vm14538_vm2, %v18119_v48 }
 0x3be   :  { %v15685_v20 = vpop.f32.mrb[48].mxu1  ;;  %v3844_v0 = vpop.f32.mrb[92].mxu0 }
 0x3bf   :  { %v12933_v7 = vpop.f32.mrb[49].mxu1  ;;  %v13205_v9 = vpop.f32.mrb[93].mxu0 }
 0x3c0   :  { %v15687_v36 = vpop.f32.mrb[50].mxu1  ;;  %v3847_v37 = vpop.f32.mrb[94].mxu0 }
 0x3c1   :  { %v12934_v8 = vpop.f32.mrb[51].mxu1  ;;  %v13206_v51 = vpop.f32.mrb[95].mxu0 }
 0x3c3   :  { %13046 = vmatmul.mubr.msk.bf16.gmra.mrb[156].mxu1 %vm2372_vm3, %v15386_v57 }
 0x3c4   :  { %13049 = vmatprep.mubr.msk.bf16.mxu1 %vm14538_vm2, %v18119_v48 }
 0x3c6   :  { %v2704_v63 = vpop.f32.mrb[52].mxu1  ;;  %v15693_v60 = vpop.f32.mrb[96].mxu0 }
 0x3c7   :  { %v15696_v52 = vadd.f32 %v2704_v63, %v15601_v59  ;;  %v12939_v6 = vpop.f32.mrb[53].mxu1  ;;  %v13209_v13 = vpop.f32.mrb[97].mxu0 }
 0x3c8   :  { %v2707_v35 = vpop.f32.mrb[54].mxu1  ;;  %v15698_v26 = vpop.f32.mrb[98].mxu0 }
 0x3c9   :  { %v15701_v24 = vadd.f32 %v2707_v35, %v15603_v1  ;;  %v12940_v40 = vpop.f32.mrb[55].mxu1  ;;  %v13210_v31 = vpop.f32.mrb[99].mxu0 }
 0x3cb   :  { %13050 = vmatmul.mubr.msk.bf16.gmra.mrb[160].mxu1 %vm2372_vm3, %v15408_v28 }
 0x3cc   :  { %13053 = vmatprep.mubr.msk.bf16.mxu1 %vm14538_vm2, %v18119_v48 }
 0x3ce   :  { %v2712_v57 = vpop.f32.mrb[56].mxu1  ;;  %v15707_v49 = vpop.f32.mrb[100].mxu0 }
 0x3cf   :  { %v12943_v59 = vpop.f32.mrb[57].mxu1  ;;  %v13261_v54 = vpop.f32.mrb[101].mxu0 }
 0x3d0   :  { %v2715_v61 = vpop.f32.mrb[58].mxu1  ;;  %v15709_v62 = vpop.f32.mrb[102].mxu0 }
 0x3d1   :  { %v12944_v4 = vpop.f32.mrb[59].mxu1  ;;  %v13262_v53 = vpop.f32.mrb[103].mxu0 }
 0x3d3   :  { %13054 = vmatmul.mubr.msk.bf16.gmra.mrb[164].mxu1 %vm2372_vm3, %v15419_v18 }
 0x3d4   :  { %13057 = vmatprep.mubr.msk.bf16.mxu1 %vm14538_vm2, %v18119_v48 }
 0x3d6   :  { %v2720_v28 = vpop.f32.mrb[60].mxu1  ;;  %v4216_v1 = vpop.f32.mrb[104].mxu0 }
 0x3d7   :  { %v12947_v27 = vpop.f32.mrb[61].mxu1  ;;  %v13265_v12 = vpop.f32.mrb[105].mxu0  ;;  %v15716_v14 = vadd.f32 %v2720_v28, %v15617_v32 }
 0x3d8   :  { %v2723_v33 = vpop.f32.mrb[62].mxu1  ;;  %v4219_v42 = vpop.f32.mrb[106].mxu0  ;;  %v3228_v27 = vld [vmem:[#allocation2 + $0x19] sm:$0xff] }
 0x3d9   :  { %v12948_v30 = vpop.f32.mrb[63].mxu1  ;;  %v13266_v45 = vpop.f32.mrb[107].mxu0  ;;  %v15719_v19 = vadd.f32 %v2723_v33, %v15619_v43 }
 0x3db   :  { %13058 = vmatmul.mubr.msk.bf16.gmra.mrb[168].mxu1 %vm2372_vm3, %v15428_v47 }
 0x3dc   :  { %13061 = vmatprep.mubr.msk.bf16.mxu1 %vm14538_vm2, %v18119_v48 }
 0x3de   :  { %v2728_v18 = vpop.f32.mrb[64].mxu1  ;;  %v15725_v0 = vpop.f32.mrb[108].mxu0 }
 0x3df   :  { %v12951_v7 = vpop.f32.mrb[65].mxu1  ;;  %v13269_v9 = vpop.f32.mrb[109].mxu0  ;;  %v3227_v18 = vld [vmem:[#allocation2 + $0x11] sm:$0xff] }
 0x3e0   :  { %v2731_v32 = vpop.f32.mrb[66].mxu1  ;;  %v15727_v37 = vpop.f32.mrb[110].mxu0  ;;  %v14402_v7 = vld [vmem:[%s18111_s3 + $0x28] sm:$0xff]  }
 0x3e1   :  { %v12952_v8 = vpop.f32.mrb[67].mxu1  ;;  %v13270_v51 = vpop.f32.mrb[111].mxu0  ;;  %v3249_v32 = vpack.c.bf16 %v3228_v27, %v3227_v18  ;;  %v3231_v27 = vld [vmem:[#allocation2 + $0x31] sm:$0xff] }
 0x3e3   :  { %13062 = vmatmul.mubr.msk.bf16.gmra.mrb[172].mxu1 %vm2372_vm3, %v15437_v55 }
 0x3e4   :  { %13065 = vmatprep.mubr.msk.bf16.mxu1 %vm14538_vm2, %v18119_v48 }
 0x3e6   :  { %v2736_v47 = vpop.f32.mrb[68].mxu1  ;;  %v4232_v43 = vpop.f32.mrb[112].mxu0 }
 0x3e7   :  { %v12955_v63 = vpop.f32.mrb[69].mxu1  ;;  %v13273_v6 = vpop.f32.mrb[113].mxu0  ;;  %v15734_v13 = vadd.f32 %v2736_v47, %v15633_v25  ;;  %v3229_v47 = vld [vmem:[#allocation2 + $0x21] sm:$0xff]  ;;  %v3230_v43 = vld [vmem:[#allocation2 + $0x29] sm:$0xff] }
 0x3e8   :  { %v2739_v35 = vpop.f32.mrb[70].mxu1  ;;  %v4235_v40 = vpop.f32.mrb[114].mxu0 }
 0x3e9   :  { %v12956_v31 = vpop.f32.mrb[71].mxu1  ;;  %v13274_v57 = vpop.f32.mrb[115].mxu0  ;;  %v15737_v59 = vadd.f32 %v2739_v35, %v15635_v46 }
 0x3ea   :  { %v3250_v57 = vpack.c.bf16 %v3230_v43, %v3229_v47 }
 0x3eb   :  { %13066 = vmatmul.mubr.msk.bf16.gmra.mrb[176].mxu1 %vm2372_vm3, %v15446_v22 }
 0x3ec   :  { %13069 = vmatprep.mubr.msk.bf16.mxu1 %vm14538_vm2, %v18119_v48 }
 0x3ee   :  { %v2744_v55 = vpop.f32.mrb[72].mxu1  ;;  %v15743_v54 = vpop.f32.mrb[116].mxu0 }
 0x3ef   :  { %v12959_v61 = vpop.f32.mrb[73].mxu1  ;;  %v13277_v4 = vpop.f32.mrb[117].mxu0 }
 0x3f0   :  { %v2747_v25 = vpop.f32.mrb[74].mxu1  ;;  %v15745_v53 = vpop.f32.mrb[118].mxu0  ;;  %v3232_v4 = vld [vmem:[#allocation2 + $0x39] sm:$0xff] }
 0x3f1   :  { %v12960_v28 = vpop.f32.mrb[75].mxu1  ;;  %v13278_v1 = vpop.f32.mrb[119].mxu0 }
 0x3f3   :  { %13070 = vmatmul.mubr.msk.bf16.gmra.mrb[180].mxu1 %vm2372_vm3, %v15455_v58 }
 0x3f4   :  { %13075 = vmatprep.mubr.msk.bf16.mxu1 %vm14538_vm2, %v18119_v48 }
 0x3f6   :  { %v2752_v22 = vpop.f32.mrb[76].mxu1  ;;  %v4248_v46 = vpop.f32.mrb[120].mxu0 }
 0x3f7   :  { %v12963_v12 = vpop.f32.mrb[77].mxu1  ;;  %v13281_v33 = vpop.f32.mrb[121].mxu0  ;;  %v15752_v42 = vadd.f32 %v2752_v22, %v15649_v41 }
 0x3f8   :  { %v2755_v30 = vpop.f32.mrb[78].mxu1  ;;  %v4251_v45 = vpop.f32.mrb[122].mxu0 }
 0x3f9   :  { %v12964_v9 = vpop.f32.mrb[79].mxu1  ;;  %v13282_v58 = vpop.f32.mrb[123].mxu0  ;;  %v15758_v8 = vadd.f32 %v2755_v30, %v15651_v2  ;;  %v15777_v45 = vpack.c.bf16 %v3232_v4, %v3231_v27 }
 0x3fb   :  { %13076 = vmatmul.mubr.msk.bf16.vlgmr.msra.gmra.mrb[184].mxu1 %vm2372_vm3, %v3249_v32 }
 0x3fc   :  { %13120 = vmatpush3.bf16.msra.mxu1 %v14402_v7  ;;  %13079 = vmatprep.mubr.msk.bf16.mxu1 %vm14538_vm2, %v18119_v48 }
 0x3fd   :  { %13211 = vmatprep.subr.bf16.mxu1 %v18119_v48 }
 0x3fe   :  { %v2760_v41 = vpop.f32.mrb[80].mxu1  ;;  %v15764_v51 = vpop.f32.mrb[124].mxu0 }
 0x3ff   :  { %v12967_v63 = vpop.f32.mrb[81].mxu1  ;;  %v13285_v6 = vpop.f32.mrb[125].mxu0 }
 0x400   :  { %v2763_v35 = vpop.f32.mrb[82].mxu1  ;;  %v15766_v40 = vpop.f32.mrb[126].mxu0 }
 0x401   :  { %v12968_v2 = vpop.f32.mrb[83].mxu1  ;;  %v13286_v31 = vpop.f32.mrb[127].mxu0 }
 0x403   :  { %13080 = vmatmul.mubr.msk.bf16.gmra.mrb[188].mxu1 %vm2372_vm3, %v3250_v57 }
 0x404   :  { %13083 = vmatprep.mubr.msk.bf16.mxu1 %vm14538_vm2, %v18119_v48 }
 0x406   :  { %v2768_v55 = vpop.f32.mrb[84].mxu1  ;;  %v4264_v61 = vpop.f32.mrb[128].mxu0 }
 0x407   :  { %v15772_v25 = vadd.f32 %v2768_v55, %v15669_v23  ;;  %v12971_v28 = vpop.f32.mrb[85].mxu1  ;;  %v13289_v1 = vpop.f32.mrb[129].mxu0 }
 0x408   :  { %v2771_v22 = vpop.f32.mrb[86].mxu1  ;;  %v4267_v46 = vpop.f32.mrb[130].mxu0  ;;  %v3238_v28 = vld [vmem:[#allocation2 + $0x69] sm:$0xff] }
 0x409   :  { %v15775_v12 = vadd.f32 %v2771_v22, %v15671_v10  ;;  %v12972_v33 = vpop.f32.mrb[87].mxu1  ;;  %v13290_v30 = vpop.f32.mrb[131].mxu0 }
 0x40b   :  { %13084 = vmatmul.mubr.msk.bf16.gmra.mrb[192].mxu1 %vm2372_vm3, %v15777_v45 }
 0x40c   :  { %13087 = vmatprep.mubr.msk.bf16.mxu1 %vm14538_vm2, %v18119_v48 }
 0x40e   :  { %v2776_v23 = vpop.f32.mrb[88].mxu1  ;;  %v15783_v18 = vpop.f32.mrb[132].mxu0 }
 0x40f   :  { %v12975_v7 = vpop.f32.mrb[89].mxu1  ;;  %v13293_v9 = vpop.f32.mrb[133].mxu0 }
 0x410   :  { %v2779_v58 = vpop.f32.mrb[90].mxu1  ;;  %v15785_v32 = vpop.f32.mrb[134].mxu0  ;;  %v3240_v7 = vld [vmem:[#allocation2 + $0x79] sm:$0xff] }
 0x411   :  { %v12976_v10 = vpop.f32.mrb[91].mxu1  ;;  %v13294_v41 = vpop.f32.mrb[135].mxu0 }
 0x412   :  { %v3239_v10 = vld [vmem:[#allocation2 + $0x71] sm:$0xff] }
 0x413   :  { %13088 = vmatmul.mubr.msk.bf16.gmra.mrb[196].mxu1 %vm2372_vm3, %v15384_v44 }
 0x414   :  { %13091 = vmatprep.mubr.msk.bf16.mxu1 %vm14538_vm2, %v18119_v48 }
 0x416   :  { %v2784_v47 = vpop.f32.mrb[92].mxu1  ;;  %v4280_v43 = vpop.f32.mrb[136].mxu0 }
 0x417   :  { %v15792_v63 = vadd.f32 %v2784_v47, %v15685_v20  ;;  %v12979_v6 = vpop.f32.mrb[93].mxu1  ;;  %v13297_v35 = vpop.f32.mrb[137].mxu0  ;;  %v3237_v20 = vld [vmem:[#allocation2 + $0x61] sm:$0xff]  ;;  %v15817_v47 = vpack.c.bf16 %v3240_v7, %v3239_v10 }
 0x418   :  { %v2787_v2 = vpop.f32.mrb[94].mxu1  ;;  %v4283_v31 = vpop.f32.mrb[138].mxu0  ;;  %v15811_v23 = vpack.c.bf16 %v3238_v28, %v3237_v20  ;;  %v3241_v43 = vld [vmem:[#allocation2 + $0x81] sm:$0xff]  ;;  %v3242_v6 = vld [vmem:[#allocation2 + $0x89] sm:$0xff]  ;;  %v3244_v28 = vld [vmem:[#allocation2 + $0x99] sm:$0xff] }
 0x419   :  { %v15795_v57 = vadd.f32 %v2787_v2, %v15687_v36  ;;  %v12980_v55 = vpop.f32.mrb[95].mxu1  ;;  %v13298_v61 = vpop.f32.mrb[139].mxu0 }
 0x41b   :  { %13092 = vmatmul.mubr.msk.bf16.gmra.mrb[200].mxu1 %vm2372_vm3, %v15406_v11 }
 0x41c   :  { %13095 = vmatprep.mubr.msk.bf16.mxu1 %vm14538_vm2, %v18119_v48 }
 0x41e   :  { %v2900_v44 = vpop.f32.mrb[96].mxu1  ;;  %v15801_v4 = vpop.f32.mrb[140].mxu0 }
 0x41f   :  { %v15804_v1 = vadd.f32 %v2900_v44, %v15696_v52  ;;  %v12985_v22 = vpop.f32.mrb[97].mxu1  ;;  %v13301_v46 = vpop.f32.mrb[141].mxu0  ;;  %v15829_v44 = vpack.c.bf16 %v3242_v6, %v3241_v43  ;;  %v3248_v6 = vld [vmem:[#allocation2 + $0xb9] sm:$0xff] }
 0x420   :  { %v2903_v36 = vpop.f32.mrb[98].mxu1  ;;  %v15806_v27 = vpop.f32.mrb[142].mxu0 }
 0x421   :  { %v15809_v33 = vadd.f32 %v2903_v36, %v15701_v24  ;;  %v12986_v11 = vpop.f32.mrb[99].mxu1  ;;  %v13302_v30 = vpop.f32.mrb[143].mxu0 }
 0x422   :  { %v3245_v30 = vld [vmem:[#allocation2 + $0xa1] sm:$0xff] }
 0x423   :  { %13096 = vmatmul.mubr.msk.bf16.gmra.mrb[204].mxu1 %vm2372_vm3, %v15811_v23 }
 0x424   :  { %13099 = vmatprep.mubr.msk.bf16.mxu1 %vm14538_vm2, %v18119_v48 }
 0x426   :  { %v2908_v52 = vpop.f32.mrb[100].mxu1 }
 0x427   :  { %v12989_v9 = vpop.f32.mrb[101].mxu1  ;;  %v3246_v52 = vld [vmem:[#allocation2 + $0xa9] sm:$0xff] }
 0x428   :  { %v2911_v58 = vpop.f32.mrb[102].mxu1 }
 0x429   :  { %v12990_v41 = vpop.f32.mrb[103].mxu1 }
 0x42b   :  { %13100 = vmatmul.mubr.msk.bf16.gmra.mrb[208].mxu1 %vm2372_vm3, %v15817_v47 }
 0x42c   :  { %13103 = vmatprep.mubr.msk.bf16.mxu1 %vm14538_vm2, %v18119_v48 }
 0x42e   :  { %v2916_v24 = vpop.f32.mrb[104].mxu1 }
 0x42f   :  { %v15824_v35 = vadd.f32 %v2916_v24, %v15716_v14  ;;  %v12993_v2 = vpop.f32.mrb[105].mxu1  ;;  %v3243_v14 = vld [vmem:[#allocation2 + $0x91] sm:$0xff]  ;;  %v15847_v24 = vpack.c.bf16 %v3246_v52, %v3245_v30  ;;  %v15871_v30 = vld [vmem:[%s18109_s1 + $0x2] sm:$0x3] }
 0x430   :  { %v2919_v31 = vpop.f32.mrb[106].mxu1  ;;  %v15835_v11 = vpack.c.bf16 %v3244_v28, %v3243_v14  ;;  %v14403_v14 = vld [vmem:[%s18111_s3 + $0x38] sm:$0xff]   ;;  %v3447_v52 = vld [vmem:[#allocation2 + $0x22] sm:$0xff] }
 0x431   :  { %v15827_v55 = vadd.f32 %v2919_v31, %v15719_v19  ;;  %v12994_v61 = vpop.f32.mrb[107].mxu1 }
 0x433   :  { %13104 = vmatmul.mubr.msk.bf16.gmra.mrb[212].mxu1 %vm2372_vm3, %v15829_v44 }
 0x434   :  { %13107 = vmatprep.mubr.msk.bf16.mxu1 %vm14538_vm2, %v18119_v48 }
 0x436   :  { %v2924_v20 = vpop.f32.mrb[108].mxu1 }
 0x437   :  { %v12997_v22 = vpop.f32.mrb[109].mxu1 }
 0x438   :  { %v2927_v46 = vpop.f32.mrb[110].mxu1 }
 0x439   :  { %v12998_v36 = vpop.f32.mrb[111].mxu1 }
 0x43b   :  { %13108 = vmatmul.mubr.msk.bf16.gmra.mrb[216].mxu1 %vm2372_vm3, %v15835_v11 }
 0x43c   :  { %13111 = vmatprep.mubr.msk.bf16.mxu1 %vm14538_vm2, %v18119_v48 }
 0x43e   :  { %v2932_v19 = vpop.f32.mrb[112].mxu1 }
 0x43f   :  { %v15842_v7 = vadd.f32 %v2932_v19, %v15734_v13  ;;  %v13001_v9 = vpop.f32.mrb[113].mxu1  ;;  %v3247_v13 = vld [vmem:[#allocation2 + $0xb1] sm:$0xff] }
 0x440   :  { %v2935_v58 = vpop.f32.mrb[114].mxu1  ;;  %v15853_v20 = vpack.c.bf16 %v3248_v6, %v3247_v13  ;;  %v3450_v6 = vld [vmem:[#allocation2 + $0x3a] sm:$0xff] }
 0x441   :  { %v15845_v10 = vadd.f32 %v2935_v58, %v15737_v59  ;;  %v13002_v41 = vpop.f32.mrb[115].mxu1 }
 0x443   :  { %13112 = vmatmul.mubr.msk.bf16.gmra.mrb[220].mxu1 %vm2372_vm3, %v15847_v24 }
 0x444   :  { %13115 = vmatprep.mubr.msk.bf16.mxu1 %vm14538_vm2, %v18119_v48 }
 0x446   :  { %v2940_v43 = vpop.f32.mrb[116].mxu1 }
 0x447   :  { %v13005_v2 = vpop.f32.mrb[117].mxu1 }
 0x448   :  { %v2943_v31 = vpop.f32.mrb[118].mxu1 }
 0x449   :  { %v13006_v61 = vpop.f32.mrb[119].mxu1 }
 0x44a   :  { %v3449_v61 = vld [vmem:[#allocation2 + $0x32] sm:$0xff] }
 0x44b   :  { %13116 = vmatmul.mubr.msk.bf16.gmra.mrb[224].mxu1 %vm2372_vm3, %v15853_v20 }
 0x44c   :  { %13121 = vmatprep.mubr.msk.bf16.mxu1 %vm14538_vm2, %v18119_v48 }
 0x44e   :  { %v2948_v59 = vpop.f32.mrb[120].mxu1 }
 0x44f   :  { %v15860_v28 = vadd.f32 %v2948_v59, %v15752_v42  ;;  %v13009_v22 = vpop.f32.mrb[121].mxu1 }
 0x450   :  { %v2951_v46 = vpop.f32.mrb[122].mxu1 }
 0x451   :  { %v15866_v36 = vadd.f32 %v2951_v46, %v15758_v8  ;;  %v13010_v19 = vpop.f32.mrb[123].mxu1  ;;  %v3448_v8 = vld [vmem:[#allocation2 + $0x2a] sm:$0xff]  ;;  %v3469_v46 = vpack.c.bf16 %v3450_v6, %v3449_v61  ;;  %v3453_v6 = vld [vmem:[#allocation2 + $0x52] sm:$0xff] }
 0x452   :  { %v3468_v43 = vpack.c.bf16 %v3448_v8, %v3447_v52  ;;  %v3451_v19 = vld [vmem:[#allocation2 + $0x42] sm:$0xff] }
 0x453   :  { %13122 = vmatmul.mubr.msk.bf16.vlgmr.msra.gmra.mrb[228].mxu1 %vm2372_vm3, %v15583_v50 }
 0x454   :  { %13212 = vmatpush3.bf16.msra.mxu1 %v14403_v14  ;;  %13125 = vmatprep.mubr.msk.bf16.mxu1 %vm14538_vm2, %v18119_v48 }
 0x455   :  { %14383 = vmatprep.subr.msk.bf16.mxu1 %vm161_vm0, %v15871_v30 }
 0x456   :  { %v2956_v42 = vpop.f32.mrb[124].mxu1 }
 0x457   :  { %v13013_v9 = vpop.f32.mrb[125].mxu1  ;;  %v3452_v42 = vld [vmem:[#allocation2 + $0x4a] sm:$0xff] }
 0x458   :  { %v2959_v58 = vpop.f32.mrb[126].mxu1  ;;  %v3470_v9 = vpack.c.bf16 %v3452_v42, %v3451_v19 }
 0x459   :  { %v13014_v41 = vpop.f32.mrb[127].mxu1  ;;  %v3454_v58 = vld [vmem:[#allocation2 + $0x5a] sm:$0xff] }
 0x45a   :  { %v3471_v61 = vpack.c.bf16 %v3454_v58, %v3453_v6  ;;  %v3459_v6 = vld [vmem:[#allocation2 + $0x82] sm:$0xff] }
 0x45b   :  { %13126 = vmatmul.mubr.msk.bf16.gmra.mrb[232].mxu1 %vm2372_vm3, %v3468_v43 }
 0x45c   :  { %13129 = vmatprep.mubr.msk.bf16.mxu1 %vm14538_vm2, %v18119_v48 }
 0x45e   :  { %v2964_v50 = vpop.f32.mrb[128].mxu1 }
 0x45f   :  { %v15883_v2 = vadd.f32 %v2964_v50, %v15772_v25  ;;  %v13017_v31 = vpop.f32.mrb[129].mxu1 }
 0x460   :  { %v2967_v13 = vpop.f32.mrb[130].mxu1 }
 0x461   :  { %v15886_v59 = vadd.f32 %v2967_v13, %v15775_v12  ;;  %v13018_v22 = vpop.f32.mrb[131].mxu1 }
 0x463   :  { %13130 = vmatmul.mubr.msk.bf16.gmra.mrb[236].mxu1 %vm2372_vm3, %v3469_v46  ;;  %v3455_v46 = vld [vmem:[#allocation2 + $0x62] sm:$0xff] }
 0x464   :  { %13133 = vmatprep.mubr.msk.bf16.mxu1 %vm14538_vm2, %v18119_v48 }
 0x466   :  { %v2972_v14 = vpop.f32.mrb[132].mxu1 }
 0x467   :  { %v13021_v52 = vpop.f32.mrb[133].mxu1  ;;  %v3456_v14 = vld [vmem:[#allocation2 + $0x6a] sm:$0xff] }
 0x468   :  { %v2975_v8 = vpop.f32.mrb[134].mxu1 }
 0x469   :  { %v13022_v25 = vpop.f32.mrb[135].mxu1  ;;  %v3472_v8 = vpack.c.bf16 %v3456_v14, %v3455_v46 }
 0x46b   :  { %13134 = vmatmul.mubr.msk.bf16.gmra.mrb[240].mxu1 %vm2372_vm3, %v3470_v9  ;;  %v3458_v9 = vld [vmem:[#allocation2 + $0x7a] sm:$0xff] }
 0x46c   :  { %13137 = vmatprep.mubr.msk.bf16.mxu1 %vm14538_vm2, %v18119_v48 }
 0x46e   :  { %v2980_v12 = vpop.f32.mrb[136].mxu1 }
 0x46f   :  { %v15895_v41 = vadd.f32 %v2980_v12, %v15792_v63  ;;  %v13025_v43 = vpop.f32.mrb[137].mxu1 }
 0x470   :  { %v2983_v50 = vpop.f32.mrb[138].mxu1  ;;  %v3457_v43 = vld [vmem:[#allocation2 + $0x72] sm:$0xff] }
 0x471   :  { %v15898_v31 = vadd.f32 %v2983_v50, %v15795_v57  ;;  %v13026_v13 = vpop.f32.mrb[139].mxu1 }
 0x472   :  { %v3460_v13 = vld [vmem:[#allocation2 + $0x8a] sm:$0xff] }
 0x473   :  { %13138 = vmatmul.mubr.msk.bf16.gmra.mrb[244].mxu1 %vm2372_vm3, %v3471_v61 }
 0x474   :  { %13141 = vmatprep.mubr.msk.bf16.mxu1 %vm14538_vm2, %v18119_v48 }
 0x476   :  { %v3118_v22 = vpop.f32.mrb[140].mxu1 }
 0x477   :  { %v15904_v19 = vadd.f32 %v3118_v22, %v15804_v1  ;;  %v13031_v63 = vpop.f32.mrb[141].mxu1  ;;  %v3473_v1 = vpack.c.bf16 %v3458_v9, %v3457_v43  ;;  %v3463_v43 = vld [vmem:[#allocation2 + $0xa2] sm:$0xff] }
 0x478   :  { %v3121_v42 = vpop.f32.mrb[142].mxu1 }
 0x479   :  { %v15907_v52 = vadd.f32 %v3121_v42, %v15809_v33  ;;  %v13032_v57 = vpop.f32.mrb[143].mxu1  ;;  %v3474_v42 = vpack.c.bf16 %v3460_v13, %v3459_v6 }
 0x47b   :  { %13142 = vmatmul.mubr.msk.bf16.gmra.mrb[248].mxu1 %vm2372_vm3, %v3472_v8  ;;  %v3462_v8 = vld [vmem:[#allocation2 + $0x9a] sm:$0xff] }
 0x47c   :  { %13145 = vmatprep.mubr.msk.bf16.mxu1 %vm14538_vm2, %v18119_v48 }
 0x47e   :  { %v3126_v25 = vpop.f32.mrb[144].mxu1 }
 0x47f   :  { %v13035_v12 = vpop.f32.mrb[145].mxu1 }
 0x480   :  { %v3129_v58 = vpop.f32.mrb[146].mxu1  ;;  %v3461_v12 = vld [vmem:[#allocation2 + $0x92] sm:$0xff] }
 0x481   :  { %v13036_v50 = vpop.f32.mrb[147].mxu1 }
 0x482   :  { %v3464_v50 = vld [vmem:[#allocation2 + $0xaa] sm:$0xff] }
 0x483   :  { %13146 = vmatmul.mubr.msk.bf16.gmra.mrb[252].mxu1 %vm2372_vm3, %v3473_v1 }
 0x484   :  { %13149 = vmatprep.mubr.msk.bf16.mxu1 %vm14538_vm2, %v18119_v48 }
 0x486   :  { %v3134_v33 = vpop.f32.mrb[148].mxu1 }
 0x487   :  { %v15916_v61 = vadd.f32 %v3134_v33, %v15824_v35  ;;  %v13039_v22 = vpop.f32.mrb[149].mxu1  ;;  %v3475_v35 = vpack.c.bf16 %v3462_v8, %v3461_v12 }
 0x488   :  { %v3137_v46 = vpop.f32.mrb[150].mxu1 }
 0x489   :  { %v15919_v14 = vadd.f32 %v3137_v46, %v15827_v55  ;;  %v13040_v63 = vpop.f32.mrb[151].mxu1  ;;  %v3476_v46 = vpack.c.bf16 %v3464_v50, %v3463_v43  ;;  %v4518_v50 = vsel %vm161_vm0, %v15871_v30, 0 }
 0x48b   :  { %13150 = vmatmul.mubr.msk.bf16.gmra.mrb[4].mxu1 %vm2372_vm3, %v3474_v42  ;;  %v3466_v42 = vld [vmem:[#allocation2 + $0xba] sm:$0xff] }
 0x48c   :  { %13153 = vmatprep.mubr.msk.bf16.mxu1 %vm14538_vm2, %v18119_v48 }
 0x48e   :  { %v3142_v57 = vpop.f32.mrb[152].mxu1 }
 0x48f   :  { %v13043_v25 = vpop.f32.mrb[153].mxu1 }
 0x490   :  { %v3145_v9 = vpop.f32.mrb[154].mxu1  ;;  %v3465_v25 = vld [vmem:[#allocation2 + $0xb2] sm:$0xff] }
 0x491   :  { %v13044_v58 = vpop.f32.mrb[155].mxu1 }
 0x493   :  { %13154 = vmatmul.mubr.msk.bf16.gmra.mrb[0].mxu1 %vm2372_vm3, %v3475_v35 }
 0x494   :  { %13157 = vmatprep.mubr.msk.bf16.mxu1 %vm14538_vm2, %v18119_v48 }
 0x496   :  { %v3150_v55 = vpop.f32.mrb[156].mxu1 }
 0x497   :  { %v15928_v1 = vadd.f32 %v3150_v55, %v15842_v7  ;;  %v13047_v33 = vpop.f32.mrb[157].mxu1  ;;  %v3477_v7 = vpack.c.bf16 %v3466_v42, %v3465_v25 }
 0x498   :  { %v3153_v6 = vpop.f32.mrb[158].mxu1  ;;  %v15950_v33 = vld [vmem:[%s18109_s1] sm:$0x3] }
 0x499   :  { %v15931_v13 = vadd.f32 %v3153_v6, %v15845_v10  ;;  %v13048_v22 = vpop.f32.mrb[159].mxu1 }
 0x49b   :  { %13158 = vmatmul.mubr.msk.bf16.gmra.mrb[8].mxu1 %vm2372_vm3, %v3476_v46  ;;  %v3885_v46 = vld [vmem:[#allocation2 + $0x41] sm:$0xff] }
 0x49c   :  { %13161 = vmatprep.mubr.msk.bf16.mxu1 %vm14538_vm2, %v18119_v48 }
 0x49e   :  { %v3158_v63 = vpop.f32.mrb[160].mxu1 }
 0x49f   :  { %v13051_v57 = vpop.f32.mrb[161].mxu1 }
 0x4a0   :  { %v3161_v8 = vpop.f32.mrb[162].mxu1 }
 0x4a1   :  { %v13052_v9 = vpop.f32.mrb[163].mxu1 }
 0x4a3   :  { %13162 = vmatmul.mubr.msk.bf16.gmra.mrb[12].mxu1 %vm2372_vm3, %v3477_v7  ;;  %v3888_v7 = vld [vmem:[#allocation2 + $0x59] sm:$0xff] }
 0x4a4   :  { %13213 = vmatprep.mubr.msk.bf16.mxu1 %vm14538_vm2, %v18119_v48 }
 0x4a6   :  { %v3166_v10 = vpop.f32.mrb[164].mxu1 }
 0x4a7   :  { %v15940_v12 = vadd.f32 %v3166_v10, %v15860_v28  ;;  %v13055_v58 = vpop.f32.mrb[165].mxu1 }
 0x4a8   :  { %v3169_v35 = vpop.f32.mrb[166].mxu1 }
 0x4a9   :  { %v15943_v55 = vadd.f32 %v3169_v35, %v15866_v36  ;;  %v13056_v43 = vpop.f32.mrb[167].mxu1  ;;  %v3887_v35 = vld [vmem:[#allocation2 + $0x51] sm:$0xff] }
 0x4ab   :  { %13214 = vmatmul.mubr.msk.bf16.vlgmr.msra.gmra.mrb[16].mxu1 %vm2372_vm3, %v15344_v17  ;;  %v3886_v17 = vld [vmem:[#allocation2 + $0x49] sm:$0xff] }
 0x4ac   :  { %13304 = vmatpush3.bf16.msra.mxu1 %v4518_v50  ;;  %13217 = vmatprep.mubr.msk.bf16.mxu1 %vm14538_vm2, %v18119_v48  ;;  %v3905_v9 = vpack.c.bf16 %v3886_v17, %v3885_v46 }
 0x4ad   :  { %14384 = vmatprep.subr.msk.bf16.mxu1 %vm161_vm0, %v15950_v33 }
 0x4ae   :  { %v3174_v28 = vpop.f32.mrb[168].mxu1 }
 0x4af   :  { %v13059_v36 = vpop.f32.mrb[169].mxu1 }
 0x4b0   :  { %v3177_v6 = vpop.f32.mrb[170].mxu1 }
 0x4b1   :  { %v13060_v22 = vpop.f32.mrb[171].mxu1 }
 0x4b3   :  { %13218 = vmatmul.mubr.msk.bf16.gmra.mrb[20].mxu1 %vm2372_vm3, %v15777_v45 }
 0x4b4   :  { %13221 = vmatprep.mubr.msk.bf16.mxu1 %vm14538_vm2, %v18119_v48 }
 0x4b6   :  { %v3182_v30 = vpop.f32.mrb[172].mxu1 }
 0x4b7   :  { %v15963_v63 = vadd.f32 %v3182_v30, %v15883_v2  ;;  %v13063_v42 = vpop.f32.mrb[173].mxu1  ;;  %v3906_v2 = vpack.c.bf16 %v3888_v7, %v3887_v35 }
 0x4b8   :  { %v3185_v57 = vpop.f32.mrb[174].mxu1 }
 0x4b9   :  { %v15966_v8 = vadd.f32 %v3185_v57, %v15886_v59  ;;  %v13064_v25 = vpop.f32.mrb[175].mxu1 }
 0x4bb   :  { %13222 = vmatmul.mubr.msk.bf16.gmra.mrb[24].mxu1 %vm2372_vm3, %v3905_v9 }
 0x4bc   :  { %13225 = vmatprep.mubr.msk.bf16.mxu1 %vm14538_vm2, %v18119_v48 }
 0x4be   :  { %v3190_v45 = vpop.f32.mrb[176].mxu1 }
 0x4bf   :  { %v13067_v10 = vpop.f32.mrb[177].mxu1 }
 0x4c0   :  { %v3193_v58 = vpop.f32.mrb[178].mxu1 }
 0x4c1   :  { %v13068_v43 = vpop.f32.mrb[179].mxu1 }
 0x4c3   :  { %13226 = vmatmul.mubr.msk.bf16.gmra.mrb[28].mxu1 %vm2372_vm3, %v3906_v2 }
 0x4c4   :  { %13229 = vmatprep.mubr.msk.bf16.mxu1 %vm14538_vm2, %v18119_v48 }
 0x4c6   :  { %v3198_v59 = vpop.f32.mrb[180].mxu1 }
 0x4c7   :  { %v15975_v50 = vadd.f32 %v3198_v59, %v15895_v41  ;;  %v13071_v28 = vpop.f32.mrb[181].mxu1 }
 0x4c8   :  { %v3201_v36 = vpop.f32.mrb[182].mxu1 }
 0x4c9   :  { %v15978_v6 = vadd.f32 %v3201_v36, %v15898_v31  ;;  %v13072_v22 = vpop.f32.mrb[183].mxu1 }
 0x4ca   :  { %v3901_v22 = vld [vmem:[#allocation2 + $0xc1] sm:$0xff] }
 0x4cb   :  { %13230 = vmatmul.mubr.msk.bf16.gmra.mrb[32].mxu1 %vm2372_vm3, %v15811_v23 }
 0x4cc   :  { %13233 = vmatprep.mubr.msk.bf16.mxu1 %vm14538_vm2, %v18119_v48 }
 0x4ce   :  { %v3336_v30 = vpop.f32.mrb[184].mxu1 }
 0x4cf   :  { %v15985_v46 = vadd.f32 %v3336_v30, %v15904_v19  ;;  %v13077_v17 = vpop.f32.mrb[185].mxu1  ;;  %v3902_v30 = vld [vmem:[#allocation2 + $0xc9] sm:$0xff] }
 0x4d0   :  { %v3339_v42 = vpop.f32.mrb[186].mxu1 }
 0x4d1   :  { %v15988_v41 = vadd.f32 %v3339_v42, %v15907_v52  ;;  %v13078_v57 = vpop.f32.mrb[187].mxu1 }
 0x4d3   :  { %13234 = vmatmul.mubr.msk.bf16.gmra.mrb[36].mxu1 %vm2372_vm3, %v15817_v47 }
 0x4d4   :  { %13237 = vmatprep.mubr.msk.bf16.mxu1 %vm14538_vm2, %v18119_v48 }
 0x4d6   :  { %v3344_v23 = vpop.f32.mrb[188].mxu1 }
 0x4d7   :  { %v13081_v31 = vpop.f32.mrb[189].mxu1  ;;  %v3913_v23 = vpack.c.bf16 %v3902_v30, %v3901_v22 }
 0x4d8   :  { %v3347_v25 = vpop.f32.mrb[190].mxu1  ;;  %v11443_v31 = vld [vmem:[%s18110_s0 + $0x119] sm:$0xff] }
 0x4d9   :  { %v13082_v9 = vpop.f32.mrb[191].mxu1  ;;  %v11444_v25 = vld [vmem:[%s18110_s0 + $0x121] sm:$0xff] }
 0x4da   :  { %v11445_v9 = vld [vmem:[%s18110_s0 + $0x129] sm:$0xff] }
 0x4db   :  { %13238 = vmatmul.mubr.msk.bf16.gmra.mrb[40].mxu1 %vm2372_vm3, %v15829_v44 }
 0x4dc   :  { %13241 = vmatprep.mubr.msk.bf16.mxu1 %vm14538_vm2, %v18119_v48 }
 0x4de   :  { %v3352_v19 = vpop.f32.mrb[192].mxu1 }
 0x4df   :  { %v15999_v52 = vadd.f32 %v3352_v19, %v15916_v61  ;;  %v13085_v45 = vpop.f32.mrb[193].mxu1 }
 0x4e0   :  { %v3355_v7 = vpop.f32.mrb[194].mxu1 }
 0x4e1   :  { %v16002_v47 = vadd.f32 %v3355_v7, %v15919_v14  ;;  %v13086_v10 = vpop.f32.mrb[195].mxu1 }
 0x4e3   :  { %13242 = vmatmul.mubr.msk.bf16.gmra.mrb[44].mxu1 %vm2372_vm3, %v15835_v11 }
 0x4e4   :  { %13245 = vmatprep.mubr.msk.bf16.mxu1 %vm14538_vm2, %v18119_v48 }
 0x4e6   :  { %v3360_v44 = vpop.f32.mrb[196].mxu1 }
 0x4e7   :  { %v13089_v58 = vpop.f32.mrb[197].mxu1 }
 0x4e8   :  { %v3363_v35 = vpop.f32.mrb[198].mxu1  ;;  %v16047_v58 = vpack.c.bf16 %v11445_v9, %v11444_v25 }
 0x4e9   :  { %v13090_v43 = vpop.f32.mrb[199].mxu1 }
 0x4eb   :  { %13246 = vmatmul.mubr.msk.bf16.gmra.mrb[48].mxu1 %vm2372_vm3, %v15847_v24  ;;  %v11440_v24 = vld [vmem:[%s18110_s0 + $0x101] sm:$0xff] }
 0x4ec   :  { %13249 = vmatprep.mubr.msk.bf16.mxu1 %vm14538_vm2, %v18119_v48 }
 0x4ee   :  { %v3368_v61 = vpop.f32.mrb[200].mxu1 }
 0x4ef   :  { %v16013_v14 = vadd.f32 %v3368_v61, %v15928_v1  ;;  %v13093_v2 = vpop.f32.mrb[201].mxu1  ;;  %v11441_v1 = vld [vmem:[%s18110_s0 + $0x109] sm:$0xff]  ;;  %v4707_v61 = vsel %vm161_vm0, %v15950_v33, 0  ;;  %v11448_v33 = vld [vmem:[%s18110_s0 + $0x141] sm:$0xff] }
 0x4f0   :  { %v3371_v59 = vpop.f32.mrb[202].mxu1  ;;  %v4460_v42 = vpack.c.bf16 %v11441_v1, %v11440_v24  ;;  %v16057_v2 = vld [vmem:[%s18109_s1 + $0x4] sm:$0x3] }
 0x4f1   :  { %v16016_v11 = vadd.f32 %v3371_v59, %v15931_v13  ;;  %v13094_v28 = vpop.f32.mrb[203].mxu1  ;;  %v11449_v59 = vld [vmem:[%s18110_s0 + $0x149] sm:$0xff] }
 0x4f2   :  { %v16079_v22 = vpack.c.bf16 %v11449_v59, %v11448_v33 }
 0x4f3   :  { %13250 = vmatmul.mubr.msk.bf16.gmra.mrb[52].mxu1 %vm2372_vm3, %v15853_v20  ;;  %v11442_v20 = vld [vmem:[%s18110_s0 + $0x111] sm:$0xff] }
 0x4f4   :  { %13253 = vmatprep.mubr.msk.bf16.mxu1 %vm14538_vm2, %v18119_v48  ;;  %v16045_v10 = vpack.c.bf16 %v11443_v31, %v11442_v20 }
 0x4f6   :  { %v3376_v36 = vpop.f32.mrb[204].mxu1 }
 0x4f7   :  { %v13097_v13 = vpop.f32.mrb[205].mxu1 }
 0x4f8   :  { %v3379_v17 = vpop.f32.mrb[206].mxu1  ;;  %v11450_v13 = vld [vmem:[%s18110_s0 + $0x151] sm:$0xff] }
 0x4f9   :  { %v13098_v57 = vpop.f32.mrb[207].mxu1  ;;  %v11451_v17 = vld [vmem:[%s18110_s0 + $0x159] sm:$0xff] }
 0x4fa   :  { %v11453_v57 = vld [vmem:[%s18110_s0 + $0x169] sm:$0xff]  ;;  %v16100_v25 = vpack.c.bf16 %v11451_v17, %v11450_v13  ;;  %v11460_v13 = vld [vmem:[%s18110_s0 + $0x1a1] sm:$0xff] }
 0x4fb   :  { %13254 = vmatmul.mubr.msk.bf16.gmra.mrb[56].mxu1 %vm2372_vm3, %v3913_v23  ;;  %v11461_v17 = vld [vmem:[%s18110_s0 + $0x1a9] sm:$0xff] }
 0x4fc   :  { %13305 = vmatprep.mubr.msk.bf16.mxu1 %vm118_vm1, %v4460_v42  ;;  %v11452_v42 = vld [vmem:[%s18110_s0 + $0x161] sm:$0xff] }
 0x4fe   :  { %v3384_v19 = vpop.f32.mrb[208].mxu1 }
 0x4ff   :  { %v16043_v45 = vadd.f32 %v3384_v19, %v15940_v12  ;;  %v13101_v7 = vpop.f32.mrb[209].mxu1  ;;  %v11446_v12 = vld [vmem:[%s18110_s0 + $0x131] sm:$0xff]  ;;  %v16102_v19 = vpack.c.bf16 %v11453_v57, %v11452_v42 }
 0x500   :  { %v3387_v44 = vpop.f32.mrb[210].mxu1 }
 0x501   :  { %v16050_v35 = vadd.f32 %v3387_v44, %v15943_v55  ;;  %v13102_v43 = vpop.f32.mrb[211].mxu1  ;;  %v11447_v55 = vld [vmem:[%s18110_s0 + $0x139] sm:$0xff] }
 0x502   :  { %v16077_v1 = vpack.c.bf16 %v11447_v55, %v11446_v12  ;;  %v11455_v43 = vld [vmem:[%s18110_s0 + $0x179] sm:$0xff] }
 0x503   :  { %13306 = vmatmul.mubr.msk.bf16.vlgmr.msra.gmra.mrb[60].mxu1 %vm118_vm1, %v16045_v10 }
 0x504   :  { %13334 = vmatpush3.bf16.msra.mxu1 %v4707_v61  ;;  %13309 = vmatprep.mubr.msk.bf16.mxu1 %vm118_vm1, %v16047_v58  ;;  %v11457_v61 = vld [vmem:[%s18110_s0 + $0x189] sm:$0xff] }
 0x505   :  { %14385 = vmatprep.subr.msk.bf16.mxu1 %vm161_vm0, %v16057_v2 }
 0x506   :  { %v3392_v28 = vpop.f32.mrb[212].mxu1 }
 0x507   :  { %v13105_v24 = vpop.f32.mrb[213].mxu1 }
 0x508   :  { %v3395_v36 = vpop.f32.mrb[214].mxu1 }
 0x509   :  { %v13106_v30 = vpop.f32.mrb[215].mxu1  ;;  %v11458_v36 = vld [vmem:[%s18110_s0 + $0x191] sm:$0xff] }
 0x50a   :  { %v11459_v30 = vld [vmem:[%s18110_s0 + $0x199] sm:$0xff] }
 0x50b   :  { %13310 = vmatmul.mubr.msk.bf16.gmra.mrb[64].mxu1 %vm118_vm1, %v16077_v1 }
 0x50c   :  { %13313 = vmatprep.mubr.msk.bf16.mxu1 %vm118_vm1, %v16079_v22 }
 0x50e   :  { %v3400_v23 = vpop.f32.mrb[216].mxu1 }
 0x50f   :  { %v16098_v20 = vadd.f32 %v3400_v23, %v15963_v63  ;;  %v13109_v31 = vpop.f32.mrb[217].mxu1  ;;  %v11454_v63 = vld [vmem:[%s18110_s0 + $0x171] sm:$0xff] }
 0x510   :  { %v3403_v9 = vpop.f32.mrb[218].mxu1  ;;  %v16123_v33 = vpack.c.bf16 %v11455_v43, %v11454_v63  ;;  %v16146_v31 = vpack.c.bf16 %v11459_v30, %v11458_v36 }
 0x511   :  { %v16105_v7 = vadd.f32 %v3403_v9, %v15966_v8  ;;  %v13110_v44 = vpop.f32.mrb[219].mxu1  ;;  %v11456_v8 = vld [vmem:[%s18110_s0 + $0x181] sm:$0xff] }
 0x512   :  { %v16125_v28 = vpack.c.bf16 %v11457_v61, %v11456_v8  ;;  %v16148_v44 = vpack.c.bf16 %v11461_v17, %v11460_v13  ;;  %v11463_v8 = vld [vmem:[%s18110_s0 + $0x1b9] sm:$0xff]  ;;  %v11465_v61 = vld [vmem:[%s18110_s0 + $0x1c9] sm:$0xff] }
 0x513   :  { %13314 = vmatmul.mubr.msk.bf16.gmra.mrb[68].mxu1 %vm118_vm1, %v16100_v25 }
 0x514   :  { %13317 = vmatprep.mubr.msk.bf16.mxu1 %vm118_vm1, %v16102_v19 }
 0x516   :  { %v3408_v12 = vpop.f32.mrb[220].mxu1 }
 0x517   :  { %v13113_v55 = vpop.f32.mrb[221].mxu1 }
 0x518   :  { %v3411_v59 = vpop.f32.mrb[222].mxu1 }
 0x519   :  { %v13114_v24 = vpop.f32.mrb[223].mxu1 }
 0x51b   :  { %13318 = vmatmul.mubr.msk.bf16.gmra.mrb[72].mxu1 %vm118_vm1, %v16123_v33 }
 0x51c   :  { %13321 = vmatprep.mubr.msk.bf16.mxu1 %vm118_vm1, %v16125_v28 }
 0x51e   :  { %v3416_v42 = vpop.f32.mrb[224].mxu1 }
 0x51f   :  { %v16144_v57 = vadd.f32 %v3416_v42, %v15975_v50  ;;  %v13117_v23 = vpop.f32.mrb[225].mxu1  ;;  %v11462_v50 = vld [vmem:[%s18110_s0 + $0x1b1] sm:$0xff] }
 0x520   :  { %v3419_v9 = vpop.f32.mrb[226].mxu1  ;;  %v16170_v24 = vpack.c.bf16 %v11463_v8, %v11462_v50 }
 0x521   :  { %v16151_v63 = vadd.f32 %v3419_v9, %v15978_v6  ;;  %v13118_v43 = vpop.f32.mrb[227].mxu1  ;;  %v11464_v6 = vld [vmem:[%s18110_s0 + $0x1c1] sm:$0xff] }
 0x522   :  { %18129 = vst [vmem:[#allocation4_spill] sm:$0xff] %v16170_v24  ;;  %v16172_v30 = vpack.c.bf16 %v11465_v61, %v11464_v6  ;;  %v11415_v61 = vld [vmem:[%s18110_s0 + $0x110] sm:$0xff] }
 0x523   :  { %13322 = vmatmul.mubr.msk.bf16.gmra.mrb[76].mxu1 %vm118_vm1, %v16146_v31 }
 0x524   :  { %13325 = vmatprep.mubr.msk.bf16.mxu1 %vm118_vm1, %v16148_v44  ;;  %18130 = vst [vmem:[#allocation5_spill] sm:$0xff] %v16172_v30 }
 0x526   :  { %v3554_v12 = vpop.f32.mrb[228].mxu1 }
 0x527   :  { %v3641_v55 = vadd.f32 %v3554_v12, %v15985_v46  ;;  %v13123_v59 = vpop.f32.mrb[229].mxu1  ;;  %v16188_v46 = vld [vmem:[%s18110_s0 + $0x1d1] sm:$0xff] }
 0x528   :  { %v3557_v36 = vpop.f32.mrb[230].mxu1  ;;  %18131 = vst [vmem:[#allocation6_spill] sm:$0xff] %v16188_v46  ;;  %v11416_v12 = vld [vmem:[%s18110_s0 + $0x118] sm:$0xff]  ;;  %v11418_v59 = vld [vmem:[%s18110_s0 + $0x128] sm:$0xff] }
 0x529   :  { %v3642_v13 = vadd.f32 %v3557_v36, %v15988_v41  ;;  %v13124_v17 = vpop.f32.mrb[231].mxu1  ;;  %v16176_v42 = vadd.f32 %v15609_v5, %v3641_v55  ;;  %v11413_v41 = vld [vmem:[%s18110_s0 + $0x100] sm:$0xff]  ;;  %v11414_v5 = vld [vmem:[%s18110_s0 + $0x108] sm:$0xff] }
 0x52a   :  { %v4418_v8 = vpack.c.bf16 %v11414_v5, %v11413_v41  ;;  %v11417_v55 = vld [vmem:[%s18110_s0 + $0x120] sm:$0xff]  ;;  %v16213_v41 = vpack.c.bf16 %v11416_v12, %v11415_v61 }
 0x52b   :  { %13326 = vmatmul.mubr.msk.bf16.gmra.mrb[80].mxu1 %vm118_vm1, %v16170_v24  ;;  %v16181_v23 = vadd.f32 %v15611_v15, %v3642_v13  ;;  %v4473_v15 = vpack.c.bf16 %v16188_v46, %v16188_v46 }
 0x52c   :  { %13329 = vmatprep.mubr.msk.bf16.mxu1 %vm118_vm1, %v16172_v30 }
 0x52e   :  { %v3562_v9 = vpop.f32.mrb[232].mxu1 }
 0x52f   :  { %v13127_v43 = vpop.f32.mrb[233].mxu1  ;;  %v16215_v9 = vpack.c.bf16 %v11418_v59, %v11417_v55 }
 0x530   :  { %v3565_v50 = vpop.f32.mrb[234].mxu1 }
 0x531   :  { %v13128_v6 = vpop.f32.mrb[235].mxu1  ;;  %v4938_v50 = vsel %vm161_vm0, %v16057_v2, 0  ;;  %v11421_v2 = vld [vmem:[%s18110_s0 + $0x140] sm:$0xff] }
 0x532   :  { %v16226_v6 = vld [vmem:[%s18109_s1 + $0x6] sm:$0x3] }
 0x533   :  { %13330 = vmatmul.mubr.msk.bf16.gmra.mrb[84].mxu1 %vm118_vm1, %v4473_v15 }
 0x534   :  { %13335 = vmatprep.mubr.msk.bf16.mxu1 %vm118_vm1, %v4418_v8 }
 0x536   :  { %v3570_v36 = vpop.f32.mrb[236].mxu1 }
 0x537   :  { %v3645_v13 = vadd.f32 %v3570_v36, %v15999_v52  ;;  %v13131_v17 = vpop.f32.mrb[237].mxu1 }
 0x538   :  { %v3573_v5 = vpop.f32.mrb[238].mxu1  ;;  %v11423_v17 = vld [vmem:[%s18110_s0 + $0x150] sm:$0xff] }
 0x539   :  { %v3646_v43 = vadd.f32 %v3573_v5, %v16002_v47  ;;  %v13132_v15 = vpop.f32.mrb[239].mxu1  ;;  %v16221_v8 = vadd.f32 %v15625_v3, %v3645_v13  ;;  %v11419_v3 = vld [vmem:[%s18110_s0 + $0x130] sm:$0xff]  ;;  %v11420_v47 = vld [vmem:[%s18110_s0 + $0x138] sm:$0xff] }
 0x53a   :  { %v16249_v55 = vpack.c.bf16 %v11420_v47, %v11419_v3  ;;  %v11424_v5 = vld [vmem:[%s18110_s0 + $0x158] sm:$0xff]  ;;  %v11426_v15 = vld [vmem:[%s18110_s0 + $0x168] sm:$0xff] }
 0x53b   :  { %13336 = vmatmul.mubr.msk.bf16.vlgmr.msra.gmra.mrb[60].mxu1 %vm118_vm1, %v16213_v41  ;;  %v16231_v52 = vadd.f32 %v15627_v38, %v3646_v43  ;;  %v11422_v38 = vld [vmem:[%s18110_s0 + $0x148] sm:$0xff]  ;;  %v11425_v43 = vld [vmem:[%s18110_s0 + $0x160] sm:$0xff] }
 0x53c   :  { %13364 = vmatpush3.bf16.msra.mxu1 %v4938_v50  ;;  %13339 = vmatprep.mubr.msk.bf16.mxu1 %vm118_vm1, %v16215_v9  ;;  %v16251_v36 = vpack.c.bf16 %v11422_v38, %v11421_v2  ;;  %v16270_v2 = vpack.c.bf16 %v11424_v5, %v11423_v17 }
 0x53d   :  { %14386 = vmatprep.subr.msk.bf16.mxu1 %vm161_vm0, %v16226_v6 }
 0x53e   :  { %v3578_v61 = vpop.f32.mrb[240].mxu1 }
 0x53f   :  { %v13135_v12 = vpop.f32.mrb[241].mxu1  ;;  %v16272_v61 = vpack.c.bf16 %v11426_v15, %v11425_v43 }
 0x540   :  { %v3581_v59 = vpop.f32.mrb[242].mxu1 }
 0x541   :  { %v13136_v13 = vpop.f32.mrb[243].mxu1 }
 0x543   :  { %13340 = vmatmul.mubr.msk.bf16.gmra.mrb[64].mxu1 %vm118_vm1, %v16249_v55 }
 0x544   :  { %13343 = vmatprep.mubr.msk.bf16.mxu1 %vm118_vm1, %v16251_v36 }
 0x546   :  { %v3586_v50 = vpop.f32.mrb[244].mxu1 }
 0x547   :  { %v3649_v3 = vadd.f32 %v3586_v50, %v16013_v14  ;;  %v13139_v47 = vpop.f32.mrb[245].mxu1  ;;  %v11427_v14 = vld [vmem:[%s18110_s0 + $0x170] sm:$0xff] }
 0x548   :  { %v3589_v38 = vpop.f32.mrb[246].mxu1  ;;  %v11431_v47 = vld [vmem:[%s18110_s0 + $0x190] sm:$0xff] }
 0x549   :  { %v3650_v12 = vadd.f32 %v3589_v38, %v16016_v11  ;;  %v13140_v59 = vpop.f32.mrb[247].mxu1  ;;  %v16276_v13 = vadd.f32 %v15641_v56, %v3649_v3  ;;  %v11428_v11 = vld [vmem:[%s18110_s0 + $0x178] sm:$0xff]  ;;  %v11429_v56 = vld [vmem:[%s18110_s0 + $0x180] sm:$0xff] }
 0x54a   :  { %v16297_v43 = vpack.c.bf16 %v11428_v11, %v11427_v14  ;;  %v11432_v38 = vld [vmem:[%s18110_s0 + $0x198] sm:$0xff]  ;;  %v11434_v59 = vld [vmem:[%s18110_s0 + $0x1a8] sm:$0xff] }
 0x54b   :  { %13344 = vmatmul.mubr.msk.bf16.gmra.mrb[68].mxu1 %vm118_vm1, %v16270_v2  ;;  %v16281_v48 = vadd.f32 %v15643_v21, %v3650_v12  ;;  %v11430_v21 = vld [vmem:[%s18110_s0 + $0x188] sm:$0xff]  ;;  %v11433_v12 = vld [vmem:[%s18110_s0 + $0x1a0] sm:$0xff] }
 0x54c   :  { %13347 = vmatprep.mubr.msk.bf16.mxu1 %vm118_vm1, %v16272_v61  ;;  %v16299_v50 = vpack.c.bf16 %v11430_v21, %v11429_v56  ;;  %v16318_v21 = vpack.c.bf16 %v11432_v38, %v11431_v47 }
 0x54e   :  { %v3594_v17 = vpop.f32.mrb[248].mxu1 }
 0x54f   :  { %v13143_v5 = vpop.f32.mrb[249].mxu1 }
 0x550   :  { %v3597_v15 = vpop.f32.mrb[250].mxu1  ;;  %v16320_v5 = vpack.c.bf16 %v11434_v59, %v11433_v12 }
 0x551   :  { %v13144_v3 = vpop.f32.mrb[251].mxu1 }
 0x553   :  { %13348 = vmatmul.mubr.msk.bf16.gmra.mrb[72].mxu1 %vm118_vm1, %v16297_v43 }
 0x554   :  { %13351 = vmatprep.mubr.msk.bf16.mxu1 %vm118_vm1, %v16299_v50 }
 0x556   :  { %v3602_v14 = vpop.f32.mrb[252].mxu1 }
 0x557   :  { %v3653_v11 = vadd.f32 %v3602_v14, %v16043_v45  ;;  %v13147_v56 = vpop.f32.mrb[253].mxu1  ;;  %v11435_v45 = vld [vmem:[%s18110_s0 + $0x1b0] sm:$0xff] }
 0x558   :  { %v3605_v17 = vpop.f32.mrb[254].mxu1  ;;  %v16356_v56 = vld [vmem:[%s18110_s0 + $0x1d0] sm:$0xff] }
 0x559   :  { %v3654_v15 = vadd.f32 %v3605_v17, %v16050_v35  ;;  %v13148_v3 = vpop.f32.mrb[255].mxu1  ;;  %v16324_v30 = vadd.f32 %v15661_v16, %v3653_v11  ;;  %v11436_v35 = vld [vmem:[%s18110_s0 + $0x1b8] sm:$0xff]  ;;  %v11437_v16 = vld [vmem:[%s18110_s0 + $0x1c0] sm:$0xff] }
 0x55a   :  { %v16345_v12 = vpack.c.bf16 %v11436_v35, %v11435_v45  ;;  %v11496_v17 = vld [vmem:[%s18110_s0 + $0x102] sm:$0xff] }
 0x55b   :  { %13352 = vmatmul.mubr.msk.bf16.gmra.mrb[76].mxu1 %vm118_vm1, %v16318_v21  ;;  %v16329_v46 = vadd.f32 %v15663_v39, %v3654_v15  ;;  %v11438_v39 = vld [vmem:[%s18110_s0 + $0x1c8] sm:$0xff] }
 0x55c   :  { %13355 = vmatprep.mubr.msk.bf16.mxu1 %vm118_vm1, %v16320_v5  ;;  %v16347_v14 = vpack.c.bf16 %v11438_v39, %v11437_v16  ;;  %v11497_v15 = vld [vmem:[%s18110_s0 + $0x10a] sm:$0xff]  ;;  %v4431_v16 = vpack.c.bf16 %v16356_v56, %v16356_v56 }
 0x55e   :  { %v3610_v47 = vpop.f32.mrb[4].mxu1 }
 0x55f   :  { %v13151_v38 = vpop.f32.mrb[5].mxu1  ;;  %v4880_v47 = vpack.c.bf16 %v11497_v15, %v11496_v17  ;;  %v11499_v17 = vld [vmem:[%s18110_s0 + $0x11a] sm:$0xff] }
 0x560   :  { %v3613_v59 = vpop.f32.mrb[6].mxu1 }
 0x561   :  { %v13152_v11 = vpop.f32.mrb[7].mxu1 }
 0x563   :  { %13356 = vmatmul.mubr.msk.bf16.gmra.mrb[80].mxu1 %vm118_vm1, %v16345_v12 }
 0x564   :  { %13359 = vmatprep.mubr.msk.bf16.mxu1 %vm118_vm1, %v16347_v14 }
 0x566   :  { %v3618_v3 = vpop.f32.mrb[0].mxu1 }
 0x567   :  { %v3657_v45 = vadd.f32 %v3618_v3, %v16098_v20  ;;  %v13155_v35 = vpop.f32.mrb[1].mxu1  ;;  %v11498_v20 = vld [vmem:[%s18110_s0 + $0x112] sm:$0xff] }
 0x568   :  { %v3621_v39 = vpop.f32.mrb[2].mxu1  ;;  %v16388_v3 = vpack.c.bf16 %v11499_v17, %v11498_v20  ;;  %v11505_v20 = vld [vmem:[%s18110_s0 + $0x14a] sm:$0xff] }
 0x569   :  { %v3658_v38 = vadd.f32 %v3621_v39, %v16105_v7  ;;  %v13156_v59 = vpop.f32.mrb[3].mxu1  ;;  %v16369_v11 = vadd.f32 %v15677_v29, %v3657_v45  ;;  %v11500_v29 = vld [vmem:[%s18110_s0 + $0x122] sm:$0xff]  ;;  %v11501_v7 = vld [vmem:[%s18110_s0 + $0x12a] sm:$0xff]  ;;  %v5196_v39 = vsel %vm161_vm0, %v16226_v6, 0  ;;  %v11503_v6 = vld [vmem:[%s18110_s0 + $0x13a] sm:$0xff] }
 0x56a   :  { %18132 = vst [vmem:[#allocation7_spill] sm:$0xff] %v16388_v3  ;;  %v16390_v35 = vpack.c.bf16 %v11501_v7, %v11500_v29  ;;  %v11504_v59 = vld [vmem:[%s18110_s0 + $0x142] sm:$0xff] }
 0x56b   :  { %13360 = vmatmul.mubr.msk.bf16.gmra.mrb[88].mxu1 %vm118_vm1, %v4431_v16  ;;  %v16373_v24 = vadd.f32 %v15679_v34, %v3658_v38  ;;  %v11502_v38 = vld [vmem:[%s18110_s0 + $0x132] sm:$0xff] }
 0x56c   :  { %13365 = vmatprep.mubr.msk.bf16.mxu1 %vm118_vm1, %v4880_v47  ;;  %18133 = vst [vmem:[#allocation8_spill] sm:$0xff] %v16390_v35  ;;  %v16397_v47 = vld [vmem:[%s18109_s1 + $0x8] sm:$0x3] }
 0x56e   :  { %v3626_v34 = vpop.f32.mrb[8].mxu1 }
 0x56f   :  { %v13159_v15 = vpop.f32.mrb[9].mxu1  ;;  %v16418_v34 = vpack.c.bf16 %v11503_v6, %v11502_v38 }
 0x570   :  { %v3629_v45 = vpop.f32.mrb[10].mxu1 }
 0x571   :  { %v13160_v16 = vpop.f32.mrb[11].mxu1  ;;  %v16420_v45 = vpack.c.bf16 %v11505_v20, %v11504_v59 }
 0x573   :  { %13366 = vmatmul.mubr.msk.bf16.vlgmr.msra.gmra.mrb[60].mxu1 %vm118_vm1, %v16388_v3  ;;  %18134 = vst [vmem:[#allocation9_spill] sm:$0xff] %v16420_v45 }
 0x574   :  { %13394 = vmatpush3.bf16.msra.mxu1 %v5196_v39  ;;  %13369 = vmatprep.mubr.msk.bf16.mxu1 %vm118_vm1, %v16390_v35 }
 0x575   :  { %14387 = vmatprep.subr.msk.bf16.mxu1 %vm161_vm0, %v16397_v47 }
 0x576   :  { %v3634_v17 = vpop.f32.mrb[12].mxu1 }
 0x577   :  { %v3661_v29 = vadd.f32 %v3634_v17, %v16144_v57  ;;  %v13163_v7 = vpop.f32.mrb[13].mxu1  ;;  %v11506_v57 = vld [vmem:[%s18110_s0 + $0x152] sm:$0xff]  ;;  %v16451_v17 = vld [vmem:[%s18113_s4] ss:$0 sm:$0xff] }
 0x578   :  { %v3637_v15 = vpop.f32.mrb[14].mxu1 }
 0x579   :  { %v3662_v16 = vadd.f32 %v3637_v15, %v16151_v63  ;;  %v13164_v39 = vpop.f32.mrb[15].mxu1  ;;  %v16424_v35 = vadd.f32 %v15693_v60, %v3661_v29  ;;  %v11507_v63 = vld [vmem:[%s18110_s0 + $0x15a] sm:$0xff]  ;;  %v11508_v60 = vld [vmem:[%s18110_s0 + $0x162] sm:$0xff] }
 0x57a   :  { %v16446_v20 = vpack.c.bf16 %v11507_v63, %v11506_v57  ;;  %v11510_v57 = vld [vmem:[%s18110_s0 + $0x172] sm:$0xff] }
 0x57b   :  { %13370 = vmatmul.mubr.msk.bf16.gmra.mrb[64].mxu1 %vm118_vm1, %v16418_v34  ;;  %v16429_v3 = vadd.f32 %v15698_v26, %v3662_v16  ;;  %v11509_v26 = vld [vmem:[%s18110_s0 + $0x16a] sm:$0xff] }
 0x57c   :  { %13373 = vmatprep.mubr.msk.bf16.mxu1 %vm118_vm1, %v16420_v45  ;;  %v16453_v7 = vpack.c.bf16 %v11509_v26, %v11508_v60  ;;  %v11513_v60 = vld [vmem:[%s18110_s0 + $0x18a] sm:$0xff] }
 0x57e   :  { %v3990_v38 = vpop.f32.mrb[16].mxu1 }
 0x57f   :  { %v4077_v6 = vadd.f32 %v3990_v38, %v16176_v42  ;;  %v13215_v59 = vpop.f32.mrb[17].mxu1 }
 0x580   :  { %v3993_v29 = vpop.f32.mrb[18].mxu1 }
 0x581   :  { %v4295_v15 = vadd.f32 %v15707_v49, %v4077_v6  ;;  %v4078_v16 = vadd.f32 %v3993_v29, %v16181_v23  ;;  %v13216_v39 = vpop.f32.mrb[19].mxu1  ;;  %v11511_v49 = vld [vmem:[%s18110_s0 + $0x17a] sm:$0xff] }
 0x582   :  { %v16477_v59 = vpack.c.bf16 %v11511_v49, %v11510_v57  ;;  %v11515_v39 = vld [vmem:[%s18110_s0 + $0x19a] sm:$0xff]  ;;  %v11517_v57 = vld [vmem:[%s18110_s0 + $0x1aa] sm:$0xff] }
 0x583   :  { %v4324_v45 = vadd.f32 %v16451_v17, %v4295_v15  ;;  %v4296_v42 = vadd.f32 %v15709_v62, %v4078_v16  ;;  %13374 = vmatmul.mubr.msk.bf16.gmra.mrb[68].mxu1 %vm118_vm1, %v16446_v20  ;;  %v11512_v62 = vld [vmem:[%s18110_s0 + $0x182] sm:$0xff]  ;;  %v11514_v16 = vld [vmem:[%s18110_s0 + $0x192] sm:$0xff] }
 0x584   :  { %13377 = vmatprep.mubr.msk.bf16.mxu1 %vm118_vm1, %v16453_v7  ;;  %v16479_v15 = vpack.c.bf16 %v11513_v60, %v11512_v62  ;;  %v16499_v62 = vpack.c.bf16 %v11515_v39, %v11514_v16  ;;  %v11521_v39 = vld [vmem:[%s18110_s0 + $0x1ca] sm:$0xff] }
 0x585   :  { %v4346_v23 = vmax.f32 %v4324_v45, 0.0  ;;  %v4325_v63 = vadd.f32 %v16451_v17, %v4296_v42  ;;  %v11516_v42 = vld [vmem:[%s18110_s0 + $0x1a2] sm:$0xff] }
 0x586   :  { %v3998_v26 = vpop.f32.mrb[20].mxu1  ;;  %18135 = vst [vmem:[#allocation10_spill] sm:$0xff] %v16479_v15 }
 0x587   :  { %4368 = vst.msk [vmem:[#allocation3] sm:$0xff] %vm2372_vm3, %v4346_v23  ;;  %v4347_v38 = vmax.f32 %v4325_v63, 0.0  ;;  %v13219_v6 = vpop.f32.mrb[21].mxu1  ;;  %v16501_v26 = vpack.c.bf16 %v11517_v57, %v11516_v42 }
 0x588   :  { %v4001_v29 = vpop.f32.mrb[22].mxu1 }
 0x589   :  { %4369 = vst.msk [vmem:[#allocation3 + $0x8] sm:$0xff] %vm2372_vm3, %v4347_v38  ;;  %v13220_v45 = vpop.f32.mrb[23].mxu1 }
 0x58b   :  { %13378 = vmatmul.mubr.msk.bf16.gmra.mrb[72].mxu1 %vm118_vm1, %v16477_v59 }
 0x58c   :  { %13381 = vmatprep.mubr.msk.bf16.mxu1 %vm118_vm1, %v16479_v15 }
 0x58e   :  { %v4006_v49 = vpop.f32.mrb[24].mxu1 }
 0x58f   :  { %v4081_v23 = vadd.f32 %v4006_v49, %v16221_v8  ;;  %v13223_v63 = vpop.f32.mrb[25].mxu1  ;;  %v11518_v8 = vld [vmem:[%s18110_s0 + $0x1b2] sm:$0xff] }
 0x590   :  { %v4009_v60 = vpop.f32.mrb[26].mxu1 }
 0x591   :  { %v4299_v38 = vadd.f32 %v15725_v0, %v4081_v23  ;;  %v4082_v6 = vadd.f32 %v4009_v60, %v16231_v52  ;;  %v13224_v29 = vpop.f32.mrb[27].mxu1  ;;  %v11519_v0 = vld [vmem:[%s18110_s0 + $0x1ba] sm:$0xff] }
 0x592   :  { %v16525_v23 = vpack.c.bf16 %v11519_v0, %v11518_v8 }
 0x593   :  { %v4328_v45 = vadd.f32 %v16451_v17, %v4299_v38  ;;  %v4300_v15 = vadd.f32 %v15727_v37, %v4082_v6  ;;  %13382 = vmatmul.mubr.msk.bf16.gmra.mrb[76].mxu1 %vm118_vm1, %v16499_v62  ;;  %v11520_v37 = vld [vmem:[%s18110_s0 + $0x1c2] sm:$0xff]  ;;  %v16537_v38 = vld [vmem:[%s18110_s0 + $0x1d2] sm:$0xff] }
 0x594   :  { %13385 = vmatprep.mubr.msk.bf16.mxu1 %vm118_vm1, %v16501_v26  ;;  %v16527_v60 = vpack.c.bf16 %v11521_v39, %v11520_v37  ;;  %v4893_v8 = vpack.c.bf16 %v16537_v38, %v16537_v38 }
 0x595   :  { %v4350_v52 = vmax.f32 %v4328_v45, 0.0  ;;  %v4329_v16 = vadd.f32 %v16451_v17, %v4300_v15 }
 0x596   :  { %v4014_v42 = vpop.f32.mrb[28].mxu1 }
 0x597   :  { %4372 = vst.msk [vmem:[#allocation3 + $0x20] sm:$0xff] %vm2372_vm3, %v4350_v52  ;;  %v4351_v57 = vmax.f32 %v4329_v16, 0.0  ;;  %v13227_v49 = vpop.f32.mrb[29].mxu1 }
 0x598   :  { %v4017_v63 = vpop.f32.mrb[30].mxu1 }
 0x599   :  { %4373 = vst.msk [vmem:[#allocation3 + $0x28] sm:$0xff] %vm2372_vm3, %v4351_v57  ;;  %v13228_v15 = vpop.f32.mrb[31].mxu1 }
 0x59b   :  { %13386 = vmatmul.mubr.msk.bf16.gmra.mrb[80].mxu1 %vm118_vm1, %v16525_v23 }
 0x59c   :  { %13389 = vmatprep.mubr.msk.bf16.mxu1 %vm118_vm1, %v16527_v60 }
 0x59e   :  { %v4022_v6 = vpop.f32.mrb[32].mxu1 }
 0x59f   :  { %v4085_v29 = vadd.f32 %v4022_v6, %v16276_v13  ;;  %v13231_v45 = vpop.f32.mrb[33].mxu1  ;;  %v16557_v6 = vld [vmem:[%s18109_s1 + $0xa] sm:$0x3] }
 0x5a0   :  { %v4025_v0 = vpop.f32.mrb[34].mxu1 }
 0x5a1   :  { %v4303_v52 = vadd.f32 %v15743_v54, %v4085_v29  ;;  %v4086_v16 = vadd.f32 %v4025_v0, %v16281_v48  ;;  %v13232_v37 = vpop.f32.mrb[35].mxu1 }
 0x5a3   :  { %v4332_v39 = vadd.f32 %v16451_v17, %v4303_v52  ;;  %v4304_v42 = vadd.f32 %v15745_v53, %v4086_v16  ;;  %13390 = vmatmul.mubr.msk.bf16.gmra.mrb[92].mxu1 %vm118_vm1, %v4893_v8  ;;  %v5454_v53 = vsel %vm161_vm0, %v16397_v47, 0 }
 0x5a4   :  { %13395 = vmatprep.mubr.msk.bf16.mxu1 %vm118_vm1, %v16213_v41 }
 0x5a5   :  { %v4354_v13 = vmax.f32 %v4332_v39, 0.0  ;;  %v4333_v57 = vadd.f32 %v16451_v17, %v4304_v42 }
 0x5a6   :  { %v4030_v49 = vpop.f32.mrb[36].mxu1 }
 0x5a7   :  { %4376 = vst.msk [vmem:[#allocation3 + $0x40] sm:$0xff] %vm2372_vm3, %v4354_v13  ;;  %v4355_v63 = vmax.f32 %v4333_v57, 0.0  ;;  %v13235_v54 = vpop.f32.mrb[37].mxu1 }
 0x5a8   :  { %v4033_v15 = vpop.f32.mrb[38].mxu1 }
 0x5a9   :  { %4377 = vst.msk [vmem:[#allocation3 + $0x48] sm:$0xff] %vm2372_vm3, %v4355_v63  ;;  %v13236_v48 = vpop.f32.mrb[39].mxu1 }
 0x5ab   :  { %13396 = vmatmul.mubr.msk.bf16.vlgmr.msra.gmra.mrb[60].mxu1 %vm118_vm1, %v16215_v9 }
 0x5ac   :  { %13424 = vmatpush3.bf16.msra.mxu1 %v5454_v53  ;;  %13399 = vmatprep.mubr.msk.bf16.mxu1 %vm118_vm1, %v16249_v55 }
 0x5ad   :  { %14388 = vmatprep.subr.msk.bf16.mxu1 %vm161_vm0, %v16557_v6 }
 0x5ae   :  { %v4038_v41 = vpop.f32.mrb[40].mxu1 }
 0x5af   :  { %v4089_v29 = vadd.f32 %v4038_v41, %v16324_v30  ;;  %v13239_v45 = vpop.f32.mrb[41].mxu1 }
 0x5b0   :  { %v4041_v47 = vpop.f32.mrb[42].mxu1 }
 0x5b1   :  { %v4307_v8 = vadd.f32 %v15764_v51, %v4089_v29  ;;  %v4090_v0 = vadd.f32 %v4041_v47, %v16329_v46  ;;  %v13240_v52 = vpop.f32.mrb[43].mxu1 }
 0x5b3   :  { %v4336_v16 = vadd.f32 %v16451_v17, %v4307_v8  ;;  %v4308_v9 = vadd.f32 %v15766_v40, %v4090_v0  ;;  %13400 = vmatmul.mubr.msk.bf16.gmra.mrb[64].mxu1 %vm118_vm1, %v16251_v36 }
 0x5b4   :  { %13403 = vmatprep.mubr.msk.bf16.mxu1 %vm118_vm1, %v16270_v2 }
 0x5b5   :  { %v4358_v55 = vmax.f32 %v4336_v16, 0.0  ;;  %v4337_v30 = vadd.f32 %v16451_v17, %v4308_v9 }
 0x5b6   :  { %v4046_v37 = vpop.f32.mrb[44].mxu1 }
 0x5b7   :  { %4380 = vst.msk [vmem:[#allocation3 + $0x60] sm:$0xff] %vm2372_vm3, %v4358_v55  ;;  %v4359_v51 = vmax.f32 %v4337_v30, 0.0  ;;  %v13243_v39 = vpop.f32.mrb[45].mxu1 }
 0x5b8   :  { %v4049_v46 = vpop.f32.mrb[46].mxu1 }
 0x5b9   :  { %4381 = vst.msk [vmem:[#allocation3 + $0x68] sm:$0xff] %vm2372_vm3, %v4359_v51  ;;  %v13244_v42 = vpop.f32.mrb[47].mxu1  ;;  %v5712_v46 = vsel %vm161_vm0, %v16557_v6, 0  ;;  %v18138_v6 = vld [vmem:[#allocation5_spill] sm:$0xff] }
 0x5ba   :  { %v18139_v42 = vld [vmem:[#allocation7_spill] sm:$0xff] }
 0x5bb   :  { %13404 = vmatmul.mubr.msk.bf16.gmra.mrb[68].mxu1 %vm118_vm1, %v16272_v61 }
 0x5bc   :  { %13407 = vmatprep.mubr.msk.bf16.mxu1 %vm118_vm1, %v16297_v43 }
 0x5be   :  { %v4054_v40 = vpop.f32.mrb[48].mxu1 }
 0x5bf   :  { %v4093_v13 = vadd.f32 %v4054_v40, %v16369_v11  ;;  %v13247_v57 = vpop.f32.mrb[49].mxu1 }
 0x5c0   :  { %v4057_v49 = vpop.f32.mrb[50].mxu1  ;;  %v18140_v57 = vld [vmem:[#allocation8_spill] sm:$0xff] }
 0x5c1   :  { %v4311_v63 = vadd.f32 %v15783_v18, %v4093_v13  ;;  %v4094_v54 = vadd.f32 %v4057_v49, %v16373_v24  ;;  %v13248_v15 = vpop.f32.mrb[51].mxu1  ;;  %v11733_v13 = vld [vmem:[%s18109_s1 + $0xe] sm:$0x3]  ;;  %v18141_v49 = vld [vmem:[#allocation9_spill] sm:$0xff] }
 0x5c3   :  { %v4340_v48 = vadd.f32 %v16451_v17, %v4311_v63  ;;  %v4312_v53 = vadd.f32 %v15785_v32, %v4094_v54  ;;  %13408 = vmatmul.mubr.msk.bf16.gmra.mrb[72].mxu1 %vm118_vm1, %v16299_v50  ;;  %v11563_v32 = vld [vmem:[%s18110_s0 + $0x1d8] sm:$0xff]  ;;  %v18142_v63 = vld [vmem:[#allocation10_spill] sm:$0xff] }
 0x5c4   :  { %13411 = vmatprep.mubr.msk.bf16.mxu1 %vm118_vm1, %v16318_v21  ;;  %v16602_v9 = vpack.c.bf16 %v11563_v32, %v16356_v56  ;;  %v16615_v56 = vld [vmem:[%s18110_s0 + $0x1e0] sm:$0xff]  ;;  %v11666_v32 = vld [vmem:[%s18110_s0 + $0x130] sm:$0xff] }
 0x5c5   :  { %v4362_v41 = vmax.f32 %v4340_v48, 0.0  ;;  %v4341_v11 = vadd.f32 %v16451_v17, %v4312_v53 }
 0x5c6   :  { %v4062_v29 = vpop.f32.mrb[52].mxu1 }
 0x5c7   :  { %4384 = vst.msk [vmem:[#allocation3 + $0x80] sm:$0xff] %vm2372_vm3, %v4362_v41  ;;  %v4363_v18 = vmax.f32 %v4341_v11, 0.0  ;;  %v13251_v45 = vpop.f32.mrb[53].mxu1 }
 0x5c8   :  { %v4065_v24 = vpop.f32.mrb[54].mxu1  ;;  %v11664_v45 = vld [vmem:[%s18110_s0 + $0x120] sm:$0xff] }
 0x5c9   :  { %4385 = vst.msk [vmem:[#allocation3 + $0x88] sm:$0xff] %vm2372_vm3, %v4363_v18  ;;  %v13252_v47 = vpop.f32.mrb[55].mxu1  ;;  %v16709_v18 = vld [vmem:[%s18110_s0 + $0x1e2] sm:$0xff] }
 0x5ca   :  { %v5667_v24 = vpack.c.bf16 %v16709_v18, %v16709_v18 }
 0x5cb   :  { %13412 = vmatmul.mubr.msk.bf16.gmra.mrb[76].mxu1 %vm118_vm1, %v16320_v5 }
 0x5cc   :  { %13415 = vmatprep.mubr.msk.bf16.mxu1 %vm118_vm1, %v16345_v12 }
 0x5ce   :  { %v4070_v8 = vpop.f32.mrb[56].mxu1 }
 0x5cf   :  { %v4097_v0 = vadd.f32 %v4070_v8, %v16424_v35  ;;  %v13255_v52 = vpop.f32.mrb[57].mxu1  ;;  %v11667_v8 = vld [vmem:[%s18110_s0 + $0x138] sm:$0xff] }
 0x5d0   :  { %v4073_v16 = vpop.f32.mrb[58].mxu1  ;;  %v6228_v52 = vsel %vm161_vm0, %v11733_v13, 0 }
 0x5d1   :  { %v4315_v55 = vadd.f32 %v15801_v4, %v4097_v0  ;;  %v4098_v30 = vadd.f32 %v4073_v16, %v16429_v3  ;;  %v13256_v37 = vpop.f32.mrb[59].mxu1  ;;  %v5913_v0 = vpack.c.bf16 %v11667_v8, %v11666_v32  ;;  %v11775_v16 = vld [vmem:[%s18109_s1 + $0x10] sm:$0x3] }
 0x5d2   :  { %v11707_v37 = vld [vmem:[%s18110_s0 + $0x129] sm:$0xff] }
 0x5d3   :  { %v4344_v51 = vadd.f32 %v16451_v17, %v4315_v55  ;;  %v4316_v39 = vadd.f32 %v15806_v27, %v4098_v30  ;;  %13416 = vmatmul.mubr.msk.bf16.gmra.mrb[80].mxu1 %vm118_vm1, %v16347_v14  ;;  %v5151_v27 = vpack.c.bf16 %v16615_v56, %v16615_v56  ;;  %v11731_v32 = vld [vmem:[%s18110_s0 + $0x1e9] sm:$0xff] }
 0x5d4   :  { %13419 = vmatprep.mubr.msk.bf16.mxu1 %vm118_vm1, %v16602_v9 }
 0x5d5   :  { %v4366_v35 = vmax.f32 %v4344_v51, 0.0  ;;  %v4345_v4 = vadd.f32 %v16451_v17, %v4316_v39  ;;  %v11691_v17 = vld [vmem:[%s18109_s1 + $0xc] sm:$0x3] }
 0x5d6   :  { %v5970_v40 = vsel %vm161_vm0, %v11691_v17, 0 }
 0x5d7   :  { %4388 = vst.msk [vmem:[#allocation3 + $0xa0] sm:$0xff] %vm2372_vm3, %v4366_v35  ;;  %v4367_v3 = vmax.f32 %v4345_v4, 0.0  ;;  %v11710_v35 = vld [vmem:[%s18110_s0 + $0x141] sm:$0xff]  ;;  %v11711_v4 = vld [vmem:[%s18110_s0 + $0x149] sm:$0xff] }
 0x5d9   :  { %4389 = vst.msk [vmem:[#allocation3 + $0xa8] sm:$0xff] %vm2372_vm3, %v4367_v3 }
 0x5db   :  { %13420 = vmatmul.mubr.msk.bf16.gmra.mrb[96].mxu1 %vm118_vm1, %v5151_v27  ;;  %v6172_v27 = vpack.c.bf16 %v11711_v4, %v11710_v35 }
 0x5dc   :  { %13425 = vmatprep.mubr.msk.bf16.mxu1 %vm118_vm1, %v16045_v10  ;;  %v18136_v10 = vld [vmem:[#allocation4_spill] sm:$0xff] }
 0x5e3   :  { %13426 = vmatmul.mubr.msk.bf16.vlgmr.msra.gmra.mrb[60].mxu1 %vm118_vm1, %v16047_v58  ;;  %v16654_v58 = vld [vmem:[%s18110_s0 + $0x1d9] sm:$0xff] }
 0x5e4   :  { %13454 = vmatpush3.bf16.msra.mxu1 %v5712_v46  ;;  %13429 = vmatprep.mubr.msk.bf16.mxu1 %vm118_vm1, %v16077_v1  ;;  %v6486_v46 = vsel %vm161_vm0, %v11775_v16, 0 }
 0x5e5   :  { %14389 = vmatprep.subr.msk.bf16.mxu1 %vm161_vm0, %v11691_v17  ;;  %v11712_v17 = vld [vmem:[%s18110_s0 + $0x151] sm:$0xff] }
 0x5eb   :  { %13430 = vmatmul.mubr.msk.bf16.gmra.mrb[64].mxu1 %vm118_vm1, %v16079_v22 }
 0x5ec   :  { %13433 = vmatprep.mubr.msk.bf16.mxu1 %vm118_vm1, %v16100_v25 }
 0x5f3   :  { %13434 = vmatmul.mubr.msk.bf16.gmra.mrb[68].mxu1 %vm118_vm1, %v16102_v19  ;;  %v18137_v19 = vld [vmem:[#allocation6_spill] sm:$0xff] }
 0x5f4   :  { %13437 = vmatprep.mubr.msk.bf16.mxu1 %vm118_vm1, %v16123_v33  ;;  %v5408_v33 = vpack.c.bf16 %v16654_v58, %v18137_v19 }
 0x5fb   :  { %13438 = vmatmul.mubr.msk.bf16.gmra.mrb[72].mxu1 %vm118_vm1, %v16125_v28 }
 0x5fc   :  { %13441 = vmatprep.mubr.msk.bf16.mxu1 %vm118_vm1, %v16146_v31  ;;  %v16664_v31 = vld [vmem:[%s18110_s0 + $0x1e1] sm:$0xff] }
 0x603   :  { %13442 = vmatmul.mubr.msk.bf16.gmra.mrb[76].mxu1 %vm118_vm1, %v16148_v44  ;;  %v5409_v44 = vpack.c.bf16 %v16664_v31, %v16664_v31 }
 0x604   :  { %13445 = vmatprep.mubr.msk.bf16.mxu1 %vm118_vm1, %v18136_v10  ;;  %v11713_v10 = vld [vmem:[%s18110_s0 + $0x159] sm:$0xff] }
 0x605   :  { %v6173_v19 = vpack.c.bf16 %v11713_v10, %v11712_v17 }
 0x606   :  { %v13331_v1 = vpop.f32.mrb[84].mxu1 }
 0x607   :  { %v4650_v22 = vpop.f32.mrb[85].mxu1 }
 0x608   :  { %v13332_v25 = vpop.f32.mrb[86].mxu1 }
 0x609   :  { %v4653_v28 = vpop.f32.mrb[87].mxu1  ;;  %v18143_v25 = vmov 0.0  }
 0x60b   :  { %13446 = vmatmul.mubr.msk.bf16.gmra.mrb[80].mxu1 %vm118_vm1, %v18138_v6  ;;  %v11717_v6 = vld [vmem:[%s18110_s0 + $0x179] sm:$0xff] }
 0x60c   :  { %13449 = vmatprep.mubr.msk.bf16.mxu1 %vm118_vm1, %v5408_v33 }
 0x613   :  { %13450 = vmatmul.mubr.msk.bf16.gmra.mrb[100].mxu1 %vm118_vm1, %v5409_v44  ;;  %v11718_v44 = vld [vmem:[%s18110_s0 + $0x181] sm:$0xff] }
 0x614   :  { %13455 = vmatprep.mubr.msk.bf16.mxu1 %vm118_vm1, %v18139_v42  ;;  %v11719_v42 = vld [vmem:[%s18110_s0 + $0x189] sm:$0xff] }
 0x61b   :  { %13456 = vmatmul.mubr.msk.bf16.vlgmr.msra.gmra.mrb[60].mxu1 %vm118_vm1, %v18140_v57  ;;  %v11720_v57 = vld [vmem:[%s18110_s0 + $0x191] sm:$0xff] }
 0x61c   :  { %13484 = vmatpush3.bf16.msra.mxu1 %v5970_v40  ;;  %13459 = vmatprep.mubr.msk.bf16.mxu1 %vm118_vm1, %v16418_v34  ;;  %v11647_v34 = vld [vmem:[%s18110_s0 + $0x1da] sm:$0xff] }
 0x61d   :  { %14390 = vmatprep.subr.msk.bf16.mxu1 %vm161_vm0, %v11733_v13  ;;  %v16700_v41 = vpack.c.bf16 %v11647_v34, %v16537_v38  ;;  %v11665_v38 = vld [vmem:[%s18110_s0 + $0x128] sm:$0xff]  ;;  %v6176_v13 = vpack.c.bf16 %v11719_v42, %v11718_v44 }
 0x61e   :  { %v5912_v47 = vpack.c.bf16 %v11665_v38, %v11664_v45  ;;  %v11722_v34 = vld [vmem:[%s18110_s0 + $0x1a1] sm:$0xff]  ;;  %v11727_v45 = vld [vmem:[%s18110_s0 + $0x1c9] sm:$0xff] }
 0x623   :  { %13460 = vmatmul.mubr.msk.bf16.gmra.mrb[64].mxu1 %vm118_vm1, %v18141_v49  ;;  %v11721_v49 = vld [vmem:[%s18110_s0 + $0x199] sm:$0xff] }
 0x624   :  { %13463 = vmatprep.mubr.msk.bf16.mxu1 %vm118_vm1, %v16446_v20 }
 0x62b   :  { %13464 = vmatmul.mubr.msk.bf16.gmra.mrb[68].mxu1 %vm118_vm1, %v16453_v7 }
 0x62c   :  { %13467 = vmatprep.mubr.msk.bf16.mxu1 %vm118_vm1, %v16477_v59 }
 0x633   :  { %13468 = vmatmul.mubr.msk.bf16.gmra.mrb[72].mxu1 %vm118_vm1, %v18142_v63 }
 0x634   :  { %13471 = vmatprep.mubr.msk.bf16.mxu1 %vm118_vm1, %v16499_v62 }
 0x63b   :  { %13472 = vmatmul.mubr.msk.bf16.gmra.mrb[76].mxu1 %vm118_vm1, %v16501_v26 }
 0x63c   :  { %13475 = vmatprep.mubr.msk.bf16.mxu1 %vm118_vm1, %v16525_v23 }
 0x63e   :  { %v13361_v20 = vpop.f32.mrb[88].mxu1 }
 0x63f   :  { %v4848_v54 = vadd.f32 %v13361_v20, %v13331_v1  ;;  %v4839_v15 = vpop.f32.mrb[89].mxu1  ;;  %v11714_v1 = vld [vmem:[%s18110_s0 + $0x161] sm:$0xff]  ;;  %v11723_v20 = vld [vmem:[%s18110_s0 + $0x1a9] sm:$0xff] }
 0x640   :  { %v4840_v48 = vadd.f32 %v4839_v15, %v4650_v22  ;;  %v13362_v53 = vpop.f32.mrb[90].mxu1  ;;  %v11715_v22 = vld [vmem:[%s18110_s0 + $0x169] sm:$0xff]  ;;  %v6178_v15 = vpack.c.bf16 %v11723_v20, %v11722_v34 }
 0x641   :  { %v4842_v11 = vpop.f32.mrb[91].mxu1  ;;  %v6174_v33 = vpack.c.bf16 %v11715_v22, %v11714_v1  ;;  %v11724_v53 = vld [vmem:[%s18110_s0 + $0x1b1] sm:$0xff] }
 0x642   :  { %v4843_v29 = vadd.f32 %v4842_v11, %v4653_v28  ;;  %v11716_v28 = vld [vmem:[%s18110_s0 + $0x171] sm:$0xff]  ;;  %v11725_v11 = vld [vmem:[%s18110_s0 + $0x1b9] sm:$0xff] }
 0x643   :  { %13476 = vmatmul.mubr.msk.bf16.gmra.mrb[80].mxu1 %vm118_vm1, %v16527_v60  ;;  %v6175_v40 = vpack.c.bf16 %v11717_v6, %v11716_v28  ;;  %v6179_v38 = vpack.c.bf16 %v11725_v11, %v11724_v53  ;;  %v16936_v11 = vld [vmem:[%s18112_s2] ss:$0 sm:$0xff] }
 0x644   :  { %13479 = vmatprep.mubr.msk.bf16.mxu1 %vm118_vm1, %v16700_v41 }
 0x64b   :  { %13480 = vmatmul.mubr.msk.bf16.gmra.mrb[104].mxu1 %vm118_vm1, %v5667_v24 }
 0x64c   :  { %13485 = vmatprep.mubr.msk.bf16.mxu1 %vm118_vm1, %v5912_v47  ;;  %v11728_v47 = vld [vmem:[%s18110_s0 + $0x1d1] sm:$0xff] }
 0x653   :  { %13486 = vmatmul.mubr.msk.bf16.vlgmr.msra.gmra.mrb[60].mxu1 %vm118_vm1, %v5913_v0 }
 0x654   :  { %13514 = vmatpush3.bf16.msra.mxu1 %v6228_v52  ;;  %13489 = vmatprep.mubr.msk.bf16.mxu1 %vm118_vm1, %v16251_v36  ;;  %v11689_v36 = vld [vmem:[%s18110_s0 + $0x1e8] sm:$0xff] }
 0x655   :  { %14391 = vmatprep.subr.msk.bf16.mxu1 %vm161_vm0, %v11775_v16  ;;  %v5924_v55 = vpack.c.bf16 %v11689_v36, %v16615_v56  ;;  %v11709_v56 = vld [vmem:[%s18110_s0 + $0x139] sm:$0xff]  ;;  %v6181_v16 = vpack.c.bf16 %v16654_v58, %v11728_v47  ;;  %v11748_v58 = vld [vmem:[%s18110_s0 + $0x122] sm:$0xff] }
 0x65b   :  { %13490 = vmatmul.mubr.msk.bf16.gmra.mrb[64].mxu1 %vm118_vm1, %v16270_v2 }
 0x65c   :  { %13493 = vmatprep.mubr.msk.bf16.mxu1 %vm118_vm1, %v16272_v61 }
 0x663   :  { %13494 = vmatmul.mubr.msk.bf16.gmra.mrb[68].mxu1 %vm118_vm1, %v16297_v43 }
 0x664   :  { %13497 = vmatprep.mubr.msk.bf16.mxu1 %vm118_vm1, %v16299_v50 }
 0x66b   :  { %13498 = vmatmul.mubr.msk.bf16.gmra.mrb[72].mxu1 %vm118_vm1, %v16318_v21 }
 0x66c   :  { %13501 = vmatprep.mubr.msk.bf16.mxu1 %vm118_vm1, %v16320_v5 }
 0x673   :  { %13502 = vmatmul.mubr.msk.bf16.gmra.mrb[76].mxu1 %vm118_vm1, %v16345_v12  ;;  %v11690_v12 = vld [vmem:[%s18110_s0 + $0x1f0] sm:$0xff] }
 0x674   :  { %13505 = vmatprep.mubr.msk.bf16.mxu1 %vm118_vm1, %v16347_v14  ;;  %v11706_v14 = vld [vmem:[%s18110_s0 + $0x121] sm:$0xff]  ;;  %v5925_v51 = vpack.c.bf16 %v11690_v12, %v11690_v12 }
 0x675   :  { %v6170_v39 = vpack.c.bf16 %v11707_v37, %v11706_v14  ;;  %v11751_v12 = vld [vmem:[%s18110_s0 + $0x13a] sm:$0xff]  ;;  %v11752_v14 = vld [vmem:[%s18110_s0 + $0x142] sm:$0xff]  ;;  %v11753_v37 = vld [vmem:[%s18110_s0 + $0x14a] sm:$0xff] }
 0x676   :  { %v13391_v2 = vpop.f32.mrb[92].mxu1 }
 0x677   :  { %v16754_v61 = vadd.f32 %v13391_v2, %v4848_v54  ;;  %v5070_v43 = vpop.f32.mrb[93].mxu1  ;;  %v6177_v54 = vpack.c.bf16 %v11721_v49, %v11720_v57 }
 0x678   :  { %v16756_v50 = vadd.f32 %v5070_v43, %v4840_v48  ;;  %v13392_v21 = vpop.f32.mrb[94].mxu1  ;;  %v14404_v48 = vld [vmem:[%s18111_s3 + $0x8] sm:$0xff]   ;;  %v6182_v43 = vpack.c.bf16 %v11731_v32, %v16664_v31 }
 0x679   :  { %v5073_v5 = vpop.f32.mrb[95].mxu1  ;;  %13574 = vmatpush3.bf16.msra.mxu0 %v14404_v48 }
 0x67a   :  { %v16759_v30 = vadd.f32 %v5073_v5, %v4843_v29  ;;  %v11726_v29 = vld [vmem:[%s18110_s0 + $0x1c1] sm:$0xff]  ;;  %13619 = vmatprep.subr.bf16.mxu0 %v18143_v25  ;;  %v11732_v5 = vld [vmem:[%s18110_s0 + $0x1f1] sm:$0xff] }
 0x67b   :  { %13506 = vmatmul.mubr.msk.bf16.gmra.mrb[80].mxu1 %vm118_vm1, %v16602_v9  ;;  %v11708_v9 = vld [vmem:[%s18110_s0 + $0x131] sm:$0xff]  ;;  %v6180_v24 = vpack.c.bf16 %v11727_v45, %v11726_v29  ;;  %v6183_v31 = vpack.c.bf16 %v11732_v5, %v11732_v5 }
 0x67c   :  { %13509 = vmatprep.mubr.msk.bf16.mxu1 %vm118_vm1, %v5924_v55  ;;  %v6171_v3 = vpack.c.bf16 %v11709_v56, %v11708_v9  ;;  %v11754_v9 = vld [vmem:[%s18110_s0 + $0x152] sm:$0xff]  ;;  %v11755_v56 = vld [vmem:[%s18110_s0 + $0x15a] sm:$0xff] }
 0x67d   :  { %v6431_v35 = vpack.c.bf16 %v11755_v56, %v11754_v9  ;;  %v14405_v9 = vld [vmem:[%s18111_s3] sm:$0xff]  }
 0x683   :  { %13510 = vmatmul.mubr.msk.bf16.gmra.mrb[108].mxu1 %vm118_vm1, %v5925_v51 }
 0x684   :  { %13515 = vmatprep.mubr.msk.bf16.mxu1 %vm118_vm1, %v6170_v39  ;;  %v6430_v39 = vpack.c.bf16 %v11753_v37, %v11752_v14 }
 0x68b   :  { %13516 = vmatmul.mubr.msk.bf16.vlgmr.msra.gmra.mrb[60].mxu1 %vm118_vm1, %v6171_v3 }
 0x68c   :  { %13544 = vmatpush3.bf16.msra.mxu1 %v6486_v46  ;;  %13519 = vmatprep.mubr.msk.bf16.mxu1 %vm118_vm1, %v6172_v27 }
 0x68d   :  { %13849 = vmatprep.subr.bf16.mxu1 %v18143_v25 }
 0x693   :  { %13520 = vmatmul.mubr.msk.bf16.gmra.mrb[64].mxu1 %vm118_vm1, %v6173_v19 }
 0x694   :  { %13523 = vmatprep.mubr.msk.bf16.mxu1 %vm118_vm1, %v6174_v33 }
 0x69b   :  { %13524 = vmatmul.mubr.msk.bf16.gmra.mrb[68].mxu1 %vm118_vm1, %v6175_v40 }
 0x69c   :  { %13527 = vmatprep.mubr.msk.bf16.mxu1 %vm118_vm1, %v6176_v13 }
 0x6a3   :  { %13528 = vmatmul.mubr.msk.bf16.gmra.mrb[72].mxu1 %vm118_vm1, %v6177_v54 }
 0x6a4   :  { %13531 = vmatprep.mubr.msk.bf16.mxu1 %vm118_vm1, %v6178_v15 }
 0x6ab   :  { %13532 = vmatmul.mubr.msk.bf16.gmra.mrb[76].mxu1 %vm118_vm1, %v6179_v38 }
 0x6ac   :  { %13535 = vmatprep.mubr.msk.bf16.mxu1 %vm118_vm1, %v6180_v24 }
 0x6ae   :  { %v13421_v8 = vpop.f32.mrb[96].mxu1 }
 0x6af   :  { %v5368_v0 = vadd.f32 %v13421_v8, %v16754_v61  ;;  %v5328_v52 = vpop.f32.mrb[97].mxu1  ;;  %v11749_v61 = vld [vmem:[%s18110_s0 + $0x12a] sm:$0xff] }
 0x6b0   :  { %v5366_v36 = vadd.f32 %v5328_v52, %v16756_v50  ;;  %v13422_v2 = vpop.f32.mrb[98].mxu1  ;;  %v6428_v50 = vpack.c.bf16 %v11749_v61, %v11748_v58 }
 0x6b1   :  { %v5331_v21 = vpop.f32.mrb[99].mxu1 }
 0x6b2   :  { %v5367_v55 = vadd.f32 %v5331_v21, %v16759_v30  ;;  %v11750_v30 = vld [vmem:[%s18110_s0 + $0x132] sm:$0xff] }
 0x6b3   :  { %13536 = vmatmul.mubr.msk.bf16.gmra.mrb[80].mxu1 %vm118_vm1, %v6181_v16  ;;  %v6429_v51 = vpack.c.bf16 %v11751_v12, %v11750_v30 }
 0x6b4   :  { %13539 = vmatprep.mubr.msk.bf16.mxu1 %vm118_vm1, %v6182_v43 }
 0x6bb   :  { %13540 = vmatmul.mubr.msk.bf16.gmra.mrb[112].mxu1 %vm118_vm1, %v6183_v31 }
 0x6bc   :  { %13545 = vmatprep.mubr.msk.bf16.mxu1 %vm118_vm1, %v6428_v50 }
 0x6c3   :  { %13546 = vmatmul.mubr.msk.bf16.vlgmr.msra.gmra.mrb[60].mxu1 %vm118_vm1, %v6429_v51 }
 0x6c4   :  { %13549 = vmatprep.mubr.msk.bf16.mxu1 %vm118_vm1, %v6430_v39 }
 0x6cb   :  { %13550 = vmatmul.mubr.msk.bf16.gmra.mrb[64].mxu1 %vm118_vm1, %v6431_v35 }
 0x6cc   :  { %13553 = vmatprep.mubr.msk.bf16.mxu1 %vm118_vm1, %v16453_v7  ;;  %v11773_v7 = vld [vmem:[%s18110_s0 + $0x1ea] sm:$0xff] }
 0x6d3   :  { %13554 = vmatmul.mubr.msk.bf16.gmra.mrb[68].mxu1 %vm118_vm1, %v16477_v59 }
 0x6d4   :  { %13557 = vmatprep.mubr.msk.bf16.mxu1 %vm118_vm1, %v18142_v63 }
 0x6db   :  { %13558 = vmatmul.mubr.msk.bf16.gmra.mrb[72].mxu1 %vm118_vm1, %v16499_v62  ;;  %v6440_v62 = vpack.c.bf16 %v11773_v7, %v16709_v18 }
 0x6dc   :  { %13561 = vmatprep.mubr.msk.bf16.mxu1 %vm118_vm1, %v16501_v26  ;;  %v11774_v26 = vld [vmem:[%s18110_s0 + $0x1f2] sm:$0xff] }
 0x6e3   :  { %13562 = vmatmul.mubr.msk.bf16.gmra.mrb[76].mxu1 %vm118_vm1, %v16525_v23  ;;  %v6441_v23 = vpack.c.bf16 %v11774_v26, %v11774_v26 }
 0x6e4   :  { %13565 = vmatprep.mubr.msk.bf16.mxu1 %vm118_vm1, %v16527_v60 }
 0x6e6   :  { %v13451_v59 = vpop.f32.mrb[100].mxu1 }
 0x6e7   :  { %v5626_v4 = vadd.f32 %v13451_v59, %v5368_v0  ;;  %v5586_v3 = vpop.f32.mrb[101].mxu1 }
 0x6e8   :  { %v5624_v63 = vadd.f32 %v5586_v3, %v5366_v36  ;;  %v13452_v27 = vpop.f32.mrb[102].mxu1 }
 0x6e9   :  { %v5589_v46 = vpop.f32.mrb[103].mxu1 }
 0x6ea   :  { %v5625_v17 = vadd.f32 %v5589_v46, %v5367_v55 }
 0x6eb   :  { %13566 = vmatmul.mubr.msk.bf16.gmra.mrb[80].mxu1 %vm118_vm1, %v16700_v41  ;;  %v14406_v41 = vld [vmem:[%s18111_s3 + $0x30] sm:$0xff]  }
 0x6ec   :  { %13569 = vmatprep.mubr.msk.bf16.mxu1 %vm118_vm1, %v6440_v62  ;;  %13850 = vmatpush3.bf16.msra.mxu1 %v14406_v41  ;;  %v14408_v41 = vld [vmem:[%s18111_s3 + $0x40] sm:$0xff]  }
 0x6ed   :  { %13941 = vmatprep.subr.bf16.mxu1 %v18143_v25 }
 0x6f3   :  { %13570 = vmatmul.mubr.msk.bf16.gmra.mrb[116].mxu1 %vm118_vm1, %v6441_v23 }
 0x6f4   :  { %13851 = vmatprep.mubr.msk.bf16.mxu1 %vm14538_vm2, %v18143_v25 }
 0x71e   :  { %v13481_v60 = vpop.f32.mrb[104].mxu1 }
 0x71f   :  { %v5884_v10 = vadd.f32 %v13481_v60, %v5626_v4  ;;  %v5844_v18 = vpop.f32.mrb[105].mxu1 }
 0x720   :  { %v5882_v1 = vadd.f32 %v5844_v18, %v5624_v63  ;;  %v13482_v22 = vpop.f32.mrb[106].mxu1 }
 0x721   :  { %v5847_v19 = vpop.f32.mrb[107].mxu1 }
 0x722   :  { %v5883_v33 = vadd.f32 %v5847_v19, %v5625_v17 }
 0x756   :  { %v13511_v28 = vpop.f32.mrb[108].mxu1 }
 0x757   :  { %v6142_v6 = vadd.f32 %v13511_v28, %v5884_v10  ;;  %v6102_v44 = vpop.f32.mrb[109].mxu1 }
 0x758   :  { %v6140_v42 = vadd.f32 %v6102_v44, %v5882_v1  ;;  %v13512_v40 = vpop.f32.mrb[110].mxu1 }
 0x759   :  { %v6105_v13 = vpop.f32.mrb[111].mxu1 }
 0x75a   :  { %v6141_v57 = vadd.f32 %v6105_v13, %v5883_v33 }
 0x78e   :  { %v13541_v49 = vpop.f32.mrb[112].mxu1 }
 0x78f   :  { %v16927_v34 = vadd.f32 %v13541_v49, %v6142_v6  ;;  %v6360_v20 = vpop.f32.mrb[113].mxu1 }
 0x790   :  { %v16929_v54 = vadd.f32 %v6360_v20, %v6140_v42  ;;  %v13542_v15 = vpop.f32.mrb[114].mxu1 }
 0x791   :  { %v6363_v48 = vpop.f32.mrb[115].mxu1 }
 0x792   :  { %v16931_v53 = vadd.f32 %v6363_v48, %v6141_v57 }
 0x796   :  { %v13547_v29 = vpop.f32.mrb[60].mxu1 }
 0x797   :  { %v6668_v45 = vadd.f32 %v13547_v29, %v16936_v11  ;;  %v6522_v38 = vpop.f32.mrb[61].mxu1 }
 0x798   :  { %v6666_v24 = vadd.f32 %v16936_v11, %v6522_v38  ;;  %v13548_v47 = vpop.f32.mrb[62].mxu1 }
 0x799   :  { %v6695_v32 = vmax.f32 %v6668_v45, 0.0  ;;  %v6669_v8 = vadd.f32 %v13548_v47, %v16936_v11  ;;  %v6525_v0 = vpop.f32.mrb[63].mxu1 }
 0x79a   :  { %v6693_v52 = vmax.f32 %v6666_v24, 0.0  ;;  %v6667_v16 = vadd.f32 %v16936_v11, %v6525_v0 }
 0x79b   :  { %6722 = vst.msk [vmem:[#allocation2 + $0x10] sm:$0xff] %vm2372_vm3, %v6695_v32  ;;  %v6696_v36 = vmax.f32 %v6669_v8, 0.0 }
 0x79c   :  { %6720 = vst.msk [vmem:[#allocation2] sm:$0xff] %vm2372_vm3, %v6693_v52  ;;  %v6694_v2 = vmax.f32 %v6667_v16, 0.0 }
 0x79d   :  { %6723 = vst.msk [vmem:[#allocation2 + $0x18] sm:$0xff] %vm2372_vm3, %v6696_v36 }
 0x79e   :  { %6721 = vst.msk [vmem:[#allocation2 + $0x8] sm:$0xff] %vm2372_vm3, %v6694_v2  ;;  %v13551_v43 = vpop.f32.mrb[64].mxu1 }
 0x79f   :  { %v6672_v21 = vadd.f32 %v13551_v43, %v16936_v11  ;;  %v6538_v55 = vpop.f32.mrb[65].mxu1 }
 0x7a0   :  { %v6670_v5 = vadd.f32 %v16936_v11, %v6538_v55  ;;  %v13552_v58 = vpop.f32.mrb[66].mxu1 }
 0x7a1   :  { %v6699_v61 = vmax.f32 %v6672_v21, 0.0  ;;  %v6673_v31 = vadd.f32 %v13552_v58, %v16936_v11  ;;  %v6541_v50 = vpop.f32.mrb[67].mxu1 }
 0x7a2   :  { %v6697_v30 = vmax.f32 %v6670_v5, 0.0  ;;  %v6671_v12 = vadd.f32 %v16936_v11, %v6541_v50 }
 0x7a3   :  { %6726 = vst.msk [vmem:[#allocation2 + $0x30] sm:$0xff] %vm2372_vm3, %v6699_v61  ;;  %v6700_v14 = vmax.f32 %v6673_v31, 0.0 }
 0x7a4   :  { %6724 = vst.msk [vmem:[#allocation2 + $0x20] sm:$0xff] %vm2372_vm3, %v6697_v30  ;;  %v6698_v37 = vmax.f32 %v6671_v12, 0.0  ;;  %v6784_v10 = vld [vmem:[#allocation2 + $0x11] sm:$0xff] }
 0x7a5   :  { %6727 = vst.msk [vmem:[#allocation2 + $0x38] sm:$0xff] %vm2372_vm3, %v6700_v14  ;;  %v6782_v51 = vld [vmem:[#allocation2 + $0x1] sm:$0xff]  ;;  %v6783_v39 = vld [vmem:[#allocation2 + $0x9] sm:$0xff] }
 0x7a6   :  { %6725 = vst.msk [vmem:[#allocation2 + $0x28] sm:$0xff] %vm2372_vm3, %v6698_v37  ;;  %v13555_v56 = vpop.f32.mrb[68].mxu1  ;;  %v6804_v35 = vpack.c.bf16 %v6783_v39, %v6782_v51 }
 0x7a7   :  { %v6676_v7 = vadd.f32 %v13555_v56, %v16936_v11  ;;  %v6554_v59 = vpop.f32.mrb[69].mxu1 }
 0x7a8   :  { %v6674_v4 = vadd.f32 %v16936_v11, %v6554_v59  ;;  %v13556_v3 = vpop.f32.mrb[70].mxu1  ;;  %13576 = vmatmul.mubr.msk.bf16.vlgmr.msra.gmra.mrb[144].mxu0 %vm2372_vm3, %v6804_v35 }
 0x7a9   :  { %v6703_v63 = vmax.f32 %v6676_v7, 0.0  ;;  %v6677_v27 = vadd.f32 %v13556_v3, %v16936_v11  ;;  %v6557_v62 = vpop.f32.mrb[71].mxu1  ;;  %13620 = vmatpush3.bf16.msra.mxu0 %v14405_v9  ;;  %13579 = vmatprep.mubr.msk.bf16.mxu0 %vm14538_vm2, %v18143_v25 }
 0x7aa   :  { %v6701_v46 = vmax.f32 %v6674_v4, 0.0  ;;  %v6675_v17 = vadd.f32 %v16936_v11, %v6557_v62  ;;  %13665 = vmatprep.subr.bf16.mxu0 %v18143_v25  ;;  %v8007_v24 = vld [vmem:[#allocation2 + $0x30] sm:$0xff] }
 0x7ab   :  { %6730 = vst.msk [vmem:[#allocation2 + $0x50] sm:$0xff] %vm2372_vm3, %v6703_v63  ;;  %v6704_v26 = vmax.f32 %v6677_v27, 0.0  ;;  %v6785_v23 = vld [vmem:[#allocation2 + $0x19] sm:$0xff] }
 0x7ac   :  { %6728 = vst.msk [vmem:[#allocation2 + $0x40] sm:$0xff] %vm2372_vm3, %v6701_v46  ;;  %v6702_v60 = vmax.f32 %v6675_v17, 0.0  ;;  %v8005_v18 = vld [vmem:[#allocation2 + $0x20] sm:$0xff]  ;;  %v6805_v19 = vpack.c.bf16 %v6785_v23, %v6784_v10  ;;  %v8008_v45 = vld [vmem:[#allocation2 + $0x38] sm:$0xff] }
 0x7ad   :  { %6731 = vst.msk [vmem:[#allocation2 + $0x58] sm:$0xff] %vm2372_vm3, %v6704_v26  ;;  %v8006_v1 = vld [vmem:[#allocation2 + $0x28] sm:$0xff]  ;;  %v16989_v8 = vpack.c.bf16 %v8008_v45, %v8007_v24  ;;  %v6788_v30 = vld [vmem:[#allocation2 + $0x31] sm:$0xff] }
 0x7ae   :  { %6729 = vst.msk [vmem:[#allocation2 + $0x48] sm:$0xff] %vm2372_vm3, %v6702_v60  ;;  %v13559_v22 = vpop.f32.mrb[72].mxu1  ;;  %v16969_v33 = vpack.c.bf16 %v8006_v1, %v8005_v18  ;;  %v6786_v48 = vld [vmem:[#allocation2 + $0x21] sm:$0xff]  ;;  %v6787_v29 = vld [vmem:[#allocation2 + $0x29] sm:$0xff] }
 0x7af   :  { %v6680_v28 = vadd.f32 %v13559_v22, %v16936_v11  ;;  %v6570_v6 = vpop.f32.mrb[73].mxu1  ;;  %v6806_v32 = vpack.c.bf16 %v6787_v29, %v6786_v48 }
 0x7b0   :  { %v6678_v44 = vadd.f32 %v16936_v11, %v6570_v6  ;;  %v13560_v42 = vpop.f32.mrb[74].mxu1  ;;  %13580 = vmatmul.mubr.msk.bf16.gmra.mrb[148].mxu0 %vm2372_vm3, %v6805_v19  ;;  %13852 = vmatmul.mubr.msk.bf16.vlgmr.msra.gmra.mrb[120].mxu1 %vm2372_vm3, %v16969_v33 }
 0x7b1   :  { %v6707_v40 = vmax.f32 %v6680_v28, 0.0  ;;  %v6681_v13 = vadd.f32 %v13560_v42, %v16936_v11  ;;  %v6573_v57 = vpop.f32.mrb[75].mxu1  ;;  %13583 = vmatprep.mubr.msk.bf16.mxu0 %vm14538_vm2, %v18143_v25  ;;  %13855 = vmatprep.mubr.msk.bf16.mxu1 %vm14538_vm2, %v18143_v25 }
 0x7b2   :  { %v6705_v49 = vmax.f32 %v6678_v44, 0.0  ;;  %v6679_v20 = vadd.f32 %v16936_v11, %v6573_v57  ;;  %13942 = vmatpush3.bf16.msra.mxu1 %v14408_v41  ;;  %v8011_v23 = vld [vmem:[#allocation2 + $0x50] sm:$0xff] }
 0x7b3   :  { %6734 = vst.msk [vmem:[#allocation2 + $0x70] sm:$0xff] %vm2372_vm3, %v6707_v40  ;;  %v6708_v15 = vmax.f32 %v6681_v13, 0.0  ;;  %v6789_v61 = vld [vmem:[#allocation2 + $0x39] sm:$0xff] }
 0x7b4   :  { %6732 = vst.msk [vmem:[#allocation2 + $0x60] sm:$0xff] %vm2372_vm3, %v6705_v49  ;;  %v6706_v38 = vmax.f32 %v6679_v20, 0.0  ;;  %v8009_v12 = vld [vmem:[#allocation2 + $0x40] sm:$0xff]  ;;  %v6807_v37 = vpack.c.bf16 %v6789_v61, %v6788_v30  ;;  %v8012_v17 = vld [vmem:[#allocation2 + $0x58] sm:$0xff] }
 0x7b5   :  { %6735 = vst.msk [vmem:[#allocation2 + $0x78] sm:$0xff] %vm2372_vm3, %v6708_v15  ;;  %v8010_v31 = vld [vmem:[#allocation2 + $0x48] sm:$0xff]  ;;  %v17023_v18 = vpack.c.bf16 %v8012_v17, %v8011_v23  ;;  %v6792_v49 = vld [vmem:[#allocation2 + $0x51] sm:$0xff] }
 0x7b6   :  { %6733 = vst.msk [vmem:[#allocation2 + $0x68] sm:$0xff] %vm2372_vm3, %v6706_v38  ;;  %v13563_v47 = vpop.f32.mrb[76].mxu1  ;;  %v17006_v51 = vpack.c.bf16 %v8010_v31, %v8009_v12  ;;  %v6790_v62 = vld [vmem:[#allocation2 + $0x41] sm:$0xff]  ;;  %v6791_v46 = vld [vmem:[#allocation2 + $0x49] sm:$0xff] }
 0x7b7   :  { %v6684_v0 = vadd.f32 %v13563_v47, %v16936_v11  ;;  %v6586_v52 = vpop.f32.mrb[77].mxu1  ;;  %v6808_v10 = vpack.c.bf16 %v6791_v46, %v6790_v62  ;;  %v14407_v62 = vld [vmem:[%s18111_s3 + $0x10] sm:$0xff]   ;;  %v8439_v23 = vld [vmem:[#allocation2 + $0x22] sm:$0xff] }
 0x7b8   :  { %v6682_v16 = vadd.f32 %v16936_v11, %v6586_v52  ;;  %v13564_v36 = vpop.f32.mrb[78].mxu1  ;;  %13584 = vmatmul.mubr.msk.bf16.gmra.mrb[152].mxu0 %vm2372_vm3, %v6806_v32  ;;  %13856 = vmatmul.mubr.msk.bf16.gmra.mrb[124].mxu1 %vm2372_vm3, %v16989_v8 }
 0x7b9   :  { %v6711_v2 = vmax.f32 %v6684_v0, 0.0  ;;  %v6685_v43 = vadd.f32 %v13564_v36, %v16936_v11  ;;  %v6589_v21 = vpop.f32.mrb[79].mxu1  ;;  %13587 = vmatprep.mubr.msk.bf16.mxu0 %vm14538_vm2, %v18143_v25  ;;  %13859 = vmatprep.mubr.msk.bf16.mxu1 %vm14538_vm2, %v18143_v25 }
 0x7ba   :  { %v6709_v55 = vmax.f32 %v6682_v16, 0.0  ;;  %v6683_v5 = vadd.f32 %v16936_v11, %v6589_v21  ;;  %v8015_v38 = vld [vmem:[#allocation2 + $0x70] sm:$0xff] }
 0x7bb   :  { %6738 = vst.msk [vmem:[#allocation2 + $0x90] sm:$0xff] %vm2372_vm3, %v6711_v2  ;;  %v6712_v58 = vmax.f32 %v6685_v43, 0.0  ;;  %v6793_v42 = vld [vmem:[#allocation2 + $0x59] sm:$0xff] }
 0x7bc   :  { %6736 = vst.msk [vmem:[#allocation2 + $0x80] sm:$0xff] %vm2372_vm3, %v6709_v55  ;;  %v6710_v50 = vmax.f32 %v6683_v5, 0.0  ;;  %v8013_v20 = vld [vmem:[#allocation2 + $0x60] sm:$0xff]  ;;  %v6809_v48 = vpack.c.bf16 %v6793_v42, %v6792_v49  ;;  %v8016_v45 = vld [vmem:[#allocation2 + $0x78] sm:$0xff] }
 0x7bd   :  { %6739 = vst.msk [vmem:[#allocation2 + $0x98] sm:$0xff] %vm2372_vm3, %v6712_v58  ;;  %v8014_v40 = vld [vmem:[#allocation2 + $0x68] sm:$0xff]  ;;  %v17050_v47 = vpack.c.bf16 %v8016_v45, %v8015_v38  ;;  %v6796_v52 = vld [vmem:[#allocation2 + $0x71] sm:$0xff] }
 0x7be   :  { %6737 = vst.msk [vmem:[#allocation2 + $0x88] sm:$0xff] %vm2372_vm3, %v6710_v50  ;;  %v13567_v14 = vpop.f32.mrb[80].mxu1  ;;  %v17040_v29 = vpack.c.bf16 %v8014_v40, %v8013_v20  ;;  %v8445_v42 = vld [vmem:[#allocation2 + $0x52] sm:$0xff] }
 0x7bf   :  { %v6688_v39 = vadd.f32 %v13567_v14, %v16936_v11  ;;  %v6602_v9 = vpop.f32.mrb[81].mxu1 }
 0x7c0   :  { %v6686_v56 = vadd.f32 %v16936_v11, %v6602_v9  ;;  %v13568_v35 = vpop.f32.mrb[82].mxu1  ;;  %13588 = vmatmul.mubr.msk.bf16.gmra.mrb[156].mxu0 %vm2372_vm3, %v6807_v37  ;;  %13860 = vmatmul.mubr.msk.bf16.gmra.mrb[128].mxu1 %vm2372_vm3, %v17006_v51 }
 0x7c1   :  { %v6715_v7 = vmax.f32 %v6688_v39, 0.0  ;;  %v6689_v59 = vadd.f32 %v13568_v35, %v16936_v11  ;;  %v6605_v4 = vpop.f32.mrb[83].mxu1  ;;  %13591 = vmatprep.mubr.msk.bf16.mxu0 %vm14538_vm2, %v18143_v25  ;;  %13863 = vmatprep.mubr.msk.bf16.mxu1 %vm14538_vm2, %v18143_v25 }
 0x7c2   :  { %v6713_v3 = vmax.f32 %v6686_v56, 0.0  ;;  %v6687_v63 = vadd.f32 %v16936_v11, %v6605_v4  ;;  %v8019_v5 = vld [vmem:[#allocation2 + $0x90] sm:$0xff]  ;;  %v6748_v4 = vld [vmem:[#allocation2 + $0x8] sm:$0xff] }
 0x7c3   :  { %6742 = vst.msk [vmem:[#allocation2 + $0xb0] sm:$0xff] %vm2372_vm3, %v6715_v7  ;;  %v6716_v27 = vmax.f32 %v6689_v59, 0.0  ;;  %v6797_v32 = vld [vmem:[#allocation2 + $0x79] sm:$0xff] }
 0x7c4   :  { %6740 = vst.msk [vmem:[#allocation2 + $0xa0] sm:$0xff] %vm2372_vm3, %v6713_v3  ;;  %v6714_v26 = vmax.f32 %v6687_v63, 0.0  ;;  %v8017_v16 = vld [vmem:[#allocation2 + $0x80] sm:$0xff]  ;;  %v6811_v36 = vpack.c.bf16 %v6797_v32, %v6796_v52  ;;  %v8020_v55 = vld [vmem:[#allocation2 + $0x98] sm:$0xff] }
 0x7c5   :  { %6743 = vst.msk [vmem:[#allocation2 + $0xb8] sm:$0xff] %vm2372_vm3, %v6716_v27  ;;  %v8018_v0 = vld [vmem:[#allocation2 + $0x88] sm:$0xff]  ;;  %v17068_v61 = vpack.c.bf16 %v8020_v55, %v8019_v5  ;;  %v6800_v30 = vld [vmem:[#allocation2 + $0x91] sm:$0xff]  ;;  %v6747_v63 = vld [vmem:[#allocation2] sm:$0xff] }
 0x7c6   :  { %6741 = vst.msk [vmem:[#allocation2 + $0xa8] sm:$0xff] %vm2372_vm3, %v6714_v26  ;;  %v13571_v60 = vpop.f32.mrb[116].mxu1  ;;  %v17059_v2 = vpack.c.bf16 %v8018_v0, %v8017_v16  ;;  %v6798_v43 = vld [vmem:[#allocation2 + $0x81] sm:$0xff]  ;;  %v6799_v21 = vld [vmem:[#allocation2 + $0x89] sm:$0xff]  ;;  %v6769_v46 = vpack.c.bf16 %v6748_v4, %v6747_v63  ;;  %v6750_v26 = vld [vmem:[#allocation2 + $0x18] sm:$0xff] }
 0x7c7   :  { %v6658_v1 = vadd.f32 %v13571_v60, %v16927_v34  ;;  %v6618_v22 = vpop.f32.mrb[117].mxu1  ;;  %v6812_v58 = vpack.c.bf16 %v6799_v21, %v6798_v43  ;;  %v8440_v60 = vld [vmem:[#allocation2 + $0x2a] sm:$0xff]  ;;  %v8450_v20 = vld [vmem:[#allocation2 + $0x7a] sm:$0xff]  ;;  %v7137_v55 = vld [vmem:[#allocation2 + $0x2] sm:$0xff] }
 0x7c8   :  { %v6656_v19 = vadd.f32 %v6618_v22, %v16929_v54  ;;  %v13572_v41 = vpop.f32.mrb[118].mxu1  ;;  %13592 = vmatmul.mubr.msk.bf16.gmra.mrb[160].mxu0 %vm2372_vm3, %v6808_v10  ;;  %13864 = vmatmul.mubr.msk.bf16.gmra.mrb[132].mxu1 %vm2372_vm3, %v17023_v18  ;;  %v6749_v10 = vld [vmem:[#allocation2 + $0x10] sm:$0xff]  ;;  %v17107_v22 = vpack.c.bf16 %v8440_v60, %v8439_v23 }
 0x7c9   :  { %v6692_v28 = vadd.f32 %v16936_v11, %v6658_v1  ;;  %v6621_v6 = vpop.f32.mrb[119].mxu1  ;;  %13595 = vmatprep.mubr.msk.bf16.mxu0 %vm14538_vm2, %v18143_v25  ;;  %13867 = vmatprep.mubr.msk.bf16.mxu1 %vm14538_vm2, %v18143_v25  ;;  %v17105_v1 = vpack.c.bf16 %v6750_v26, %v6749_v10  ;;  %v8441_v41 = vld [vmem:[#allocation2 + $0x32] sm:$0xff]  ;;  %v7138_v5 = vld [vmem:[#allocation2 + $0xa] sm:$0xff] }
 0x7ca   :  { %v6690_v34 = vadd.f32 %v16936_v11, %v6656_v19  ;;  %v6657_v44 = vadd.f32 %v6621_v6, %v16931_v53  ;;  %v6794_v53 = vld [vmem:[#allocation2 + $0x61] sm:$0xff]  ;;  %v8023_v35 = vld [vmem:[#allocation2 + $0xb0] sm:$0xff] }
 0x7cb   :  { %v6719_v54 = vmax.f32 %v6692_v28, 0.0  ;;  %v6801_v31 = vld [vmem:[#allocation2 + $0x99] sm:$0xff]  ;;  %v8443_v6 = vld [vmem:[#allocation2 + $0x42] sm:$0xff] }
 0x7cc   :  { %v6717_v13 = vmax.f32 %v6690_v34, 0.0  ;;  %v6691_v57 = vadd.f32 %v16936_v11, %v6657_v44  ;;  %v6795_v11 = vld [vmem:[#allocation2 + $0x69] sm:$0xff]  ;;  %v8021_v12 = vld [vmem:[#allocation2 + $0xa0] sm:$0xff]  ;;  %v6813_v14 = vpack.c.bf16 %v6801_v31, %v6800_v30  ;;  %v8024_v56 = vld [vmem:[#allocation2 + $0xb8] sm:$0xff]  ;;  %v7159_v30 = vpack.c.bf16 %v7138_v5, %v7137_v55 }
 0x7cd   :  { %6746 = vst.msk [vmem:[#allocation2 + $0xd0] sm:$0xff] %vm2372_vm3, %v6719_v54  ;;  %v6810_v24 = vpack.c.bf16 %v6795_v11, %v6794_v53  ;;  %v8022_v50 = vld [vmem:[#allocation2 + $0xa8] sm:$0xff]  ;;  %v17086_v59 = vpack.c.bf16 %v8024_v56, %v8023_v35  ;;  %v8442_v19 = vld [vmem:[#allocation2 + $0x3a] sm:$0xff]  ;;  %v8457_v43 = vld [vmem:[#allocation2 + $0xb2] sm:$0xff] }
 0x7ce   :  { %6744 = vst.msk [vmem:[#allocation2 + $0xc0] sm:$0xff] %vm2372_vm3, %v6717_v13  ;;  %v6718_v15 = vmax.f32 %v6691_v57, 0.0  ;;  %v17077_v37 = vpack.c.bf16 %v8022_v50, %v8021_v12  ;;  %v6802_v39 = vld [vmem:[#allocation2 + $0xa1] sm:$0xff]  ;;  %v6803_v9 = vld [vmem:[#allocation2 + $0xa9] sm:$0xff]  ;;  %v17117_v28 = vpack.c.bf16 %v8442_v19, %v8441_v41  ;;  %v14409_v50 = vld [vmem:[%s18111_s3 + $0x18] sm:$0xff]  }
 0x7cf   :  { %v6814_v7 = vpack.c.bf16 %v6803_v9, %v6802_v39  ;;  %v8444_v34 = vld [vmem:[#allocation2 + $0x4a] sm:$0xff]  ;;  %v8446_v54 = vld [vmem:[#allocation2 + $0x5a] sm:$0xff]  ;;  %v8447_v13 = vld [vmem:[#allocation2 + $0x62] sm:$0xff] }
 0x7d0   :  { %6745 = vst.msk [vmem:[#allocation2 + $0xc8] sm:$0xff] %vm2372_vm3, %v6718_v15  ;;  %13596 = vmatmul.mubr.msk.bf16.gmra.mrb[164].mxu0 %vm2372_vm3, %v6809_v48  ;;  %13868 = vmatmul.mubr.msk.bf16.gmra.mrb[136].mxu1 %vm2372_vm3, %v17040_v29  ;;  %v17127_v44 = vpack.c.bf16 %v8444_v34, %v8443_v6  ;;  %v17137_v40 = vpack.c.bf16 %v8446_v54, %v8445_v42  ;;  %v8448_v57 = vld [vmem:[#allocation2 + $0x6a] sm:$0xff]  ;;  %v8449_v15 = vld [vmem:[#allocation2 + $0x72] sm:$0xff]  ;;  %v8451_v53 = vld [vmem:[#allocation2 + $0x82] sm:$0xff] }
 0x7d1   :  { %13599 = vmatprep.mubr.msk.bf16.mxu0 %vm14538_vm2, %v18143_v25  ;;  %13871 = vmatprep.mubr.msk.bf16.mxu1 %vm14538_vm2, %v18143_v25  ;;  %v17147_v49 = vpack.c.bf16 %v8448_v57, %v8447_v13  ;;  %v17157_v48 = vpack.c.bf16 %v8450_v20, %v8449_v15  ;;  %v8452_v11 = vld [vmem:[#allocation2 + $0x8a] sm:$0xff]  ;;  %v8454_v38 = vld [vmem:[#allocation2 + $0x9a] sm:$0xff]  ;;  %v8455_v0 = vld [vmem:[#allocation2 + $0xa2] sm:$0xff] }
 0x7d2   :  { %v17167_v45 = vpack.c.bf16 %v8452_v11, %v8451_v53  ;;  %v8456_v52 = vld [vmem:[#allocation2 + $0xaa] sm:$0xff]  ;;  %v7139_v39 = vld [vmem:[#allocation2 + $0x12] sm:$0xff] }
 0x7d3   :  { %v17187_v16 = vpack.c.bf16 %v8456_v52, %v8455_v0 }
 0x7d5   :  { %v8025_v27 = vld [vmem:[#allocation2 + $0xc0] sm:$0xff] }
 0x7d7   :  { %v8026_v3 = vld [vmem:[#allocation2 + $0xc8] sm:$0xff] }
 0x7d8   :  { %13600 = vmatmul.mubr.msk.bf16.gmra.mrb[168].mxu0 %vm2372_vm3, %v6810_v24  ;;  %13872 = vmatmul.mubr.msk.bf16.gmra.mrb[140].mxu1 %vm2372_vm3, %v17050_v47  ;;  %v8037_v17 = vpack.c.bf16 %v8026_v3, %v8025_v27  ;;  %v8453_v24 = vld [vmem:[#allocation2 + $0x92] sm:$0xff]  ;;  %v8460_v31 = vld [vmem:[#allocation2 + $0xca] sm:$0xff] }
 0x7d9   :  { %13603 = vmatprep.mubr.msk.bf16.mxu0 %vm14538_vm2, %v18143_v25  ;;  %13875 = vmatprep.mubr.msk.bf16.mxu1 %vm14538_vm2, %v18143_v25  ;;  %v17177_v32 = vpack.c.bf16 %v8454_v38, %v8453_v24 }
 0x7e0   :  { %13604 = vmatmul.mubr.msk.bf16.gmra.mrb[172].mxu0 %vm2372_vm3, %v6811_v36  ;;  %13876 = vmatmul.mubr.msk.bf16.gmra.mrb[144].mxu1 %vm2372_vm3, %v17059_v2  ;;  %v8458_v36 = vld [vmem:[#allocation2 + $0xba] sm:$0xff] }
 0x7e1   :  { %13607 = vmatprep.mubr.msk.bf16.mxu0 %vm14538_vm2, %v18143_v25  ;;  %13879 = vmatprep.mubr.msk.bf16.mxu1 %vm14538_vm2, %v18143_v25  ;;  %v8470_v21 = vpack.c.bf16 %v8458_v36, %v8457_v43 }
 0x7e8   :  { %13608 = vmatmul.mubr.msk.bf16.gmra.mrb[176].mxu0 %vm2372_vm3, %v6812_v58  ;;  %13880 = vmatmul.mubr.msk.bf16.gmra.mrb[148].mxu1 %vm2372_vm3, %v17068_v61  ;;  %v8459_v58 = vld [vmem:[#allocation2 + $0xc2] sm:$0xff] }
 0x7e9   :  { %13611 = vmatprep.mubr.msk.bf16.mxu0 %vm14538_vm2, %v18143_v25  ;;  %13883 = vmatprep.mubr.msk.bf16.mxu1 %vm14538_vm2, %v18143_v25  ;;  %v8471_v12 = vpack.c.bf16 %v8460_v31, %v8459_v58 }
 0x7f0   :  { %13612 = vmatmul.mubr.msk.bf16.gmra.mrb[180].mxu0 %vm2372_vm3, %v6813_v14  ;;  %13884 = vmatmul.mubr.msk.bf16.gmra.mrb[152].mxu1 %vm2372_vm3, %v17077_v37  ;;  %v7140_v14 = vld [vmem:[#allocation2 + $0x1a] sm:$0xff] }
 0x7f1   :  { %13615 = vmatprep.mubr.msk.bf16.mxu0 %vm14538_vm2, %v18143_v25  ;;  %13887 = vmatprep.mubr.msk.bf16.mxu1 %vm14538_vm2, %v18143_v25  ;;  %v17212_v9 = vpack.c.bf16 %v7140_v14, %v7139_v39 }
 0x7f8   :  { %13616 = vmatmul.mubr.msk.bf16.gmra.mrb[184].mxu0 %vm2372_vm3, %v6814_v7  ;;  %13888 = vmatmul.mubr.msk.bf16.gmra.mrb[156].mxu1 %vm2372_vm3, %v17086_v59 }
 0x7f9   :  { %13621 = vmatprep.mubr.msk.bf16.mxu0 %vm14538_vm2, %v18143_v25  ;;  %13891 = vmatprep.mubr.msk.bf16.mxu1 %vm14538_vm2, %v18143_v25 }
 0x800   :  { %13622 = vmatmul.mubr.msk.bf16.vlgmr.msra.gmra.mrb[188].mxu0 %vm2372_vm3, %v6769_v46  ;;  %13892 = vmatmul.mubr.msk.bf16.gmra.mrb[160].mxu1 %vm2372_vm3, %v8037_v17 }
 0x801   :  { %13666 = vmatpush3.bf16.msra.mxu0 %v14407_v62  ;;  %13625 = vmatprep.mubr.msk.bf16.mxu0 %vm14538_vm2, %v18143_v25 }
 0x802   :  { %13943 = vmatprep.mubr.msk.bf16.mxu1 %vm14538_vm2, %v18143_v25  ;;  %13711 = vmatprep.subr.bf16.mxu0 %v18143_v25 }
 0x808   :  { %13626 = vmatmul.mubr.msk.bf16.gmra.mrb[192].mxu0 %vm2372_vm3, %v17105_v1  ;;  %13944 = vmatmul.mubr.msk.bf16.vlgmr.msra.gmra.mrb[164].mxu1 %vm2372_vm3, %v17107_v22 }
 0x809   :  { %13629 = vmatprep.mubr.msk.bf16.mxu0 %vm14538_vm2, %v18143_v25  ;;  %13947 = vmatprep.mubr.msk.bf16.mxu1 %vm14538_vm2, %v18143_v25 }
 0x810   :  { %13630 = vmatmul.mubr.msk.bf16.gmra.mrb[196].mxu0 %vm2372_vm3, %v16969_v33  ;;  %13948 = vmatmul.mubr.msk.bf16.gmra.mrb[168].mxu1 %vm2372_vm3, %v17117_v28 }
 0x811   :  { %13633 = vmatprep.mubr.msk.bf16.mxu0 %vm14538_vm2, %v18143_v25  ;;  %13951 = vmatprep.mubr.msk.bf16.mxu1 %vm14538_vm2, %v18143_v25 }
 0x818   :  { %13634 = vmatmul.mubr.msk.bf16.gmra.mrb[200].mxu0 %vm2372_vm3, %v16989_v8  ;;  %13952 = vmatmul.mubr.msk.bf16.gmra.mrb[172].mxu1 %vm2372_vm3, %v17127_v44 }
 0x819   :  { %13637 = vmatprep.mubr.msk.bf16.mxu0 %vm14538_vm2, %v18143_v25  ;;  %13955 = vmatprep.mubr.msk.bf16.mxu1 %vm14538_vm2, %v18143_v25 }
 0x820   :  { %13638 = vmatmul.mubr.msk.bf16.gmra.mrb[204].mxu0 %vm2372_vm3, %v17006_v51  ;;  %13956 = vmatmul.mubr.msk.bf16.gmra.mrb[176].mxu1 %vm2372_vm3, %v17137_v40 }
 0x821   :  { %13641 = vmatprep.mubr.msk.bf16.mxu0 %vm14538_vm2, %v18143_v25  ;;  %13959 = vmatprep.mubr.msk.bf16.mxu1 %vm14538_vm2, %v18143_v25 }
 0x828   :  { %13642 = vmatmul.mubr.msk.bf16.gmra.mrb[208].mxu0 %vm2372_vm3, %v17023_v18  ;;  %13960 = vmatmul.mubr.msk.bf16.gmra.mrb[180].mxu1 %vm2372_vm3, %v17147_v49 }
 0x829   :  { %13645 = vmatprep.mubr.msk.bf16.mxu0 %vm14538_vm2, %v18143_v25  ;;  %13963 = vmatprep.mubr.msk.bf16.mxu1 %vm14538_vm2, %v18143_v25 }
 0x830   :  { %13646 = vmatmul.mubr.msk.bf16.gmra.mrb[212].mxu0 %vm2372_vm3, %v17040_v29  ;;  %13964 = vmatmul.mubr.msk.bf16.gmra.mrb[184].mxu1 %vm2372_vm3, %v17157_v48 }
 0x831   :  { %13649 = vmatprep.mubr.msk.bf16.mxu0 %vm14538_vm2, %v18143_v25  ;;  %13967 = vmatprep.mubr.msk.bf16.mxu1 %vm14538_vm2, %v18143_v25 }
 0x838   :  { %13650 = vmatmul.mubr.msk.bf16.gmra.mrb[216].mxu0 %vm2372_vm3, %v17050_v47  ;;  %13968 = vmatmul.mubr.msk.bf16.gmra.mrb[188].mxu1 %vm2372_vm3, %v17167_v45 }
 0x839   :  { %13653 = vmatprep.mubr.msk.bf16.mxu0 %vm14538_vm2, %v18143_v25  ;;  %13971 = vmatprep.mubr.msk.bf16.mxu1 %vm14538_vm2, %v18143_v25 }
 0x840   :  { %13654 = vmatmul.mubr.msk.bf16.gmra.mrb[220].mxu0 %vm2372_vm3, %v17059_v2  ;;  %13972 = vmatmul.mubr.msk.bf16.gmra.mrb[192].mxu1 %vm2372_vm3, %v17177_v32 }
 0x841   :  { %13657 = vmatprep.mubr.msk.bf16.mxu0 %vm14538_vm2, %v18143_v25  ;;  %13975 = vmatprep.mubr.msk.bf16.mxu1 %vm14538_vm2, %v18143_v25 }
 0x848   :  { %13658 = vmatmul.mubr.msk.bf16.gmra.mrb[224].mxu0 %vm2372_vm3, %v17068_v61  ;;  %13976 = vmatmul.mubr.msk.bf16.gmra.mrb[196].mxu1 %vm2372_vm3, %v17187_v16 }
 0x849   :  { %13661 = vmatprep.mubr.msk.bf16.mxu0 %vm14538_vm2, %v18143_v25  ;;  %13979 = vmatprep.mubr.msk.bf16.mxu1 %vm14538_vm2, %v18143_v25 }
 0x850   :  { %13662 = vmatmul.mubr.msk.bf16.gmra.mrb[228].mxu0 %vm2372_vm3, %v17077_v37  ;;  %13980 = vmatmul.mubr.msk.bf16.gmra.mrb[200].mxu1 %vm2372_vm3, %v8470_v21 }
 0x851   :  { %13667 = vmatprep.mubr.msk.bf16.mxu0 %vm14538_vm2, %v18143_v25  ;;  %13983 = vmatprep.mubr.msk.bf16.mxu1 %vm14538_vm2, %v18143_v25 }
 0x858   :  { %13668 = vmatmul.mubr.msk.bf16.vlgmr.msra.gmra.mrb[232].mxu0 %vm2372_vm3, %v7159_v30  ;;  %13984 = vmatmul.mubr.msk.bf16.gmra.mrb[204].mxu1 %vm2372_vm3, %v8471_v12 }
 0x859   :  { %13712 = vmatpush3.bf16.msra.mxu0 %v14409_v50  ;;  %13671 = vmatprep.mubr.msk.bf16.mxu0 %vm14538_vm2, %v18143_v25 }
 0x85a   :  { %13757 = vmatprep.subr.bf16.mxu0 %v18143_v25 }
 0x860   :  { %13672 = vmatmul.mubr.msk.bf16.gmra.mrb[236].mxu0 %vm2372_vm3, %v17212_v9 }
 0x861   :  { %13675 = vmatprep.mubr.msk.bf16.mxu0 %vm14538_vm2, %v18143_v25 }
 0x868   :  { %13676 = vmatmul.mubr.msk.bf16.gmra.mrb[240].mxu0 %vm2372_vm3, %v17107_v22 }
 0x869   :  { %13679 = vmatprep.mubr.msk.bf16.mxu0 %vm14538_vm2, %v18143_v25 }
 0x870   :  { %13680 = vmatmul.mubr.msk.bf16.gmra.mrb[244].mxu0 %vm2372_vm3, %v17117_v28 }
 0x871   :  { %13683 = vmatprep.mubr.msk.bf16.mxu0 %vm14538_vm2, %v18143_v25 }
 0x878   :  { %13684 = vmatmul.mubr.msk.bf16.gmra.mrb[248].mxu0 %vm2372_vm3, %v17127_v44 }
 0x879   :  { %13687 = vmatprep.mubr.msk.bf16.mxu0 %vm14538_vm2, %v18143_v25 }
 0x87b   :  { %v17230_v56 = vpop.f32.mrb[144].mxu0 }
 0x87c   :  { %v13577_v35 = vpop.f32.mrb[145].mxu0 }
 0x87d   :  { %v17232_v7 = vpop.f32.mrb[146].mxu0  ;;  %v14410_v35 = vld [vmem:[%s18111_s3 + $0x20] sm:$0xff]  }
 0x87e   :  { %v13578_v4 = vpop.f32.mrb[147].mxu0 }
 0x880   :  { %13688 = vmatmul.mubr.msk.bf16.gmra.mrb[252].mxu0 %vm2372_vm3, %v17137_v40 }
 0x881   :  { %13691 = vmatprep.mubr.msk.bf16.mxu0 %vm14538_vm2, %v18143_v25 }
 0x883   :  { %v6898_v3 = vpop.f32.mrb[148].mxu0  ;;  %v17238_v63 = vpop.f32.mrb[120].mxu1 }
 0x884   :  { %v13581_v27 = vpop.f32.mrb[149].mxu0  ;;  %v13853_v62 = vpop.f32.mrb[121].mxu1 }
 0x885   :  { %v6901_v46 = vpop.f32.mrb[150].mxu0  ;;  %v17240_v17 = vpop.f32.mrb[122].mxu1 }
 0x886   :  { %v13582_v26 = vpop.f32.mrb[151].mxu0  ;;  %v13854_v23 = vpop.f32.mrb[123].mxu1 }
 0x888   :  { %13692 = vmatmul.mubr.msk.bf16.gmra.mrb[24].mxu0 %vm2372_vm3, %v17147_v49 }
 0x889   :  { %13695 = vmatprep.mubr.msk.bf16.mxu0 %vm14538_vm2, %v18143_v25 }
 0x88b   :  { %v17246_v60 = vpop.f32.mrb[152].mxu0  ;;  %v8121_v10 = vpop.f32.mrb[124].mxu1 }
 0x88c   :  { %v13585_v22 = vpop.f32.mrb[153].mxu0  ;;  %v13857_v19 = vpop.f32.mrb[125].mxu1 }
 0x88d   :  { %v17248_v41 = vpop.f32.mrb[154].mxu0  ;;  %v8124_v28 = vpop.f32.mrb[126].mxu1 }
 0x88e   :  { %v13586_v6 = vpop.f32.mrb[155].mxu0  ;;  %v13858_v34 = vpop.f32.mrb[127].mxu1 }
 0x890   :  { %13696 = vmatmul.mubr.msk.bf16.gmra.mrb[28].mxu0 %vm2372_vm3, %v17157_v48 }
 0x891   :  { %13699 = vmatprep.mubr.msk.bf16.mxu0 %vm14538_vm2, %v18143_v25 }
 0x893   :  { %v6914_v44 = vpop.f32.mrb[156].mxu0  ;;  %v17254_v54 = vpop.f32.mrb[128].mxu1 }
 0x894   :  { %v13589_v42 = vpop.f32.mrb[157].mxu0  ;;  %v13861_v40 = vpop.f32.mrb[129].mxu1 }
 0x895   :  { %v6917_v13 = vpop.f32.mrb[158].mxu0  ;;  %v17256_v57 = vpop.f32.mrb[130].mxu1 }
 0x896   :  { %v13590_v49 = vpop.f32.mrb[159].mxu0  ;;  %v13862_v20 = vpop.f32.mrb[131].mxu1 }
 0x898   :  { %13700 = vmatmul.mubr.msk.bf16.gmra.mrb[32].mxu0 %vm2372_vm3, %v17167_v45 }
 0x899   :  { %13703 = vmatprep.mubr.msk.bf16.mxu0 %vm14538_vm2, %v18143_v25 }
 0x89b   :  { %v17262_v15 = vpop.f32.mrb[160].mxu0  ;;  %v8137_v48 = vpop.f32.mrb[132].mxu1 }
 0x89c   :  { %v13593_v53 = vpop.f32.mrb[161].mxu0  ;;  %v13865_v11 = vpop.f32.mrb[133].mxu1 }
 0x89d   :  { %v17264_v38 = vpop.f32.mrb[162].mxu0  ;;  %v8140_v24 = vpop.f32.mrb[134].mxu1 }
 0x89e   :  { %v13594_v0 = vpop.f32.mrb[163].mxu0  ;;  %v13866_v52 = vpop.f32.mrb[135].mxu1 }
 0x8a0   :  { %13704 = vmatmul.mubr.msk.bf16.gmra.mrb[36].mxu0 %vm2372_vm3, %v17177_v32 }
 0x8a1   :  { %13707 = vmatprep.mubr.msk.bf16.mxu0 %vm14538_vm2, %v18143_v25 }
 0x8a3   :  { %v6930_v45 = vpop.f32.mrb[164].mxu0  ;;  %v17270_v36 = vpop.f32.mrb[136].mxu1 }
 0x8a4   :  { %v13597_v43 = vpop.f32.mrb[165].mxu0  ;;  %v13869_v21 = vpop.f32.mrb[137].mxu1 }
 0x8a5   :  { %v6933_v55 = vpop.f32.mrb[166].mxu0  ;;  %v17272_v5 = vpop.f32.mrb[138].mxu1 }
 0x8a6   :  { %v13598_v58 = vpop.f32.mrb[167].mxu0  ;;  %v13870_v31 = vpop.f32.mrb[139].mxu1 }
 0x8a8   :  { %13708 = vmatmul.mubr.msk.bf16.gmra.mrb[40].mxu0 %vm2372_vm3, %v17187_v16 }
 0x8a9   :  { %13713 = vmatprep.mubr.msk.bf16.mxu0 %vm14538_vm2, %v18143_v25 }
 0x8ab   :  { %v17278_v32 = vpop.f32.mrb[168].mxu0  ;;  %v8153_v50 = vpop.f32.mrb[140].mxu1 }
 0x8ac   :  { %v13601_v30 = vpop.f32.mrb[169].mxu0  ;;  %v13873_v12 = vpop.f32.mrb[141].mxu1 }
 0x8ad   :  { %v17280_v14 = vpop.f32.mrb[170].mxu0  ;;  %v8156_v39 = vpop.f32.mrb[142].mxu1 }
 0x8ae   :  { %v13602_v4 = vpop.f32.mrb[171].mxu0  ;;  %v13874_v3 = vpop.f32.mrb[143].mxu1 }
 0x8b0   :  { %13714 = vmatmul.mubr.msk.bf16.vlgmr.msra.gmra.mrb[44].mxu0 %vm2372_vm3, %v17105_v1 }
 0x8b1   :  { %13758 = vmatpush3.bf16.msra.mxu0 %v14410_v35  ;;  %13717 = vmatprep.mubr.msk.bf16.mxu0 %vm14538_vm2, %v18143_v25 }
 0x8b2   :  { %13803 = vmatprep.subr.bf16.mxu0 %v18143_v25 }
 0x8b3   :  { %v6946_v16 = vpop.f32.mrb[172].mxu0  ;;  %v17290_v27 = vpop.f32.mrb[144].mxu1 }
 0x8b4   :  { %v13605_v62 = vpop.f32.mrb[173].mxu0  ;;  %v13877_v46 = vpop.f32.mrb[145].mxu1 }
 0x8b5   :  { %v6949_v26 = vpop.f32.mrb[174].mxu0  ;;  %v17292_v23 = vpop.f32.mrb[146].mxu1 }
 0x8b6   :  { %v13606_v10 = vpop.f32.mrb[175].mxu0  ;;  %v13878_v22 = vpop.f32.mrb[147].mxu1 }
 0x8b8   :  { %13718 = vmatmul.mubr.msk.bf16.gmra.mrb[48].mxu0 %vm2372_vm3, %v16969_v33 }
 0x8b9   :  { %13721 = vmatprep.mubr.msk.bf16.mxu0 %vm14538_vm2, %v18143_v25 }
 0x8bb   :  { %v17298_v1 = vpop.f32.mrb[176].mxu0  ;;  %v8169_v19 = vpop.f32.mrb[148].mxu1 }
 0x8bc   :  { %v13609_v28 = vpop.f32.mrb[177].mxu0  ;;  %v13881_v6 = vpop.f32.mrb[149].mxu1 }
 0x8bd   :  { %v17300_v34 = vpop.f32.mrb[178].mxu0  ;;  %v8172_v44 = vpop.f32.mrb[150].mxu1 }
 0x8be   :  { %v13610_v42 = vpop.f32.mrb[179].mxu0  ;;  %v13882_v40 = vpop.f32.mrb[151].mxu1 }
 0x8c0   :  { %13722 = vmatmul.mubr.msk.bf16.gmra.mrb[0].mxu0 %vm2372_vm3, %v16989_v8 }
 0x8c1   :  { %13725 = vmatprep.mubr.msk.bf16.mxu0 %vm14538_vm2, %v18143_v25 }
 0x8c3   :  { %v6962_v33 = vpop.f32.mrb[180].mxu0  ;;  %v17306_v13 = vpop.f32.mrb[152].mxu1 }
 0x8c4   :  { %v13613_v49 = vpop.f32.mrb[181].mxu0  ;;  %v13885_v20 = vpop.f32.mrb[153].mxu1 }
 0x8c5   :  { %v6965_v48 = vpop.f32.mrb[182].mxu0  ;;  %v17308_v53 = vpop.f32.mrb[154].mxu1 }
 0x8c6   :  { %v13614_v11 = vpop.f32.mrb[183].mxu0  ;;  %v13886_v24 = vpop.f32.mrb[155].mxu1 }
 0x8c8   :  { %13726 = vmatmul.mubr.msk.bf16.gmra.mrb[4].mxu0 %vm2372_vm3, %v17006_v51 }
 0x8c9   :  { %13729 = vmatprep.mubr.msk.bf16.mxu0 %vm14538_vm2, %v18143_v25 }
 0x8cb   :  { %v17314_v8 = vpop.f32.mrb[184].mxu0  ;;  %v8185_v0 = vpop.f32.mrb[156].mxu1 }
 0x8cc   :  { %v13617_v52 = vpop.f32.mrb[185].mxu0  ;;  %v13889_v45 = vpop.f32.mrb[157].mxu1 }
 0x8cd   :  { %v17316_v43 = vpop.f32.mrb[186].mxu0  ;;  %v8188_v21 = vpop.f32.mrb[158].mxu1 }
 0x8ce   :  { %v13618_v55 = vpop.f32.mrb[187].mxu0  ;;  %v13890_v58 = vpop.f32.mrb[159].mxu1 }
 0x8d0   :  { %13730 = vmatmul.mubr.msk.bf16.gmra.mrb[8].mxu0 %vm2372_vm3, %v17023_v18 }
 0x8d1   :  { %13733 = vmatprep.mubr.msk.bf16.mxu0 %vm14538_vm2, %v18143_v25 }
 0x8d3   :  { %v7050_v51 = vpop.f32.mrb[188].mxu0  ;;  %v17322_v31 = vpop.f32.mrb[160].mxu1 }
 0x8d4   :  { %v17325_v50 = vadd.f32 %v7050_v51, %v17230_v56  ;;  %v13623_v30 = vpop.f32.mrb[189].mxu0  ;;  %v13893_v12 = vpop.f32.mrb[161].mxu1 }
 0x8d5   :  { %v7053_v39 = vpop.f32.mrb[190].mxu0  ;;  %v17327_v35 = vpop.f32.mrb[162].mxu1 }
 0x8d6   :  { %v17330_v4 = vadd.f32 %v7053_v39, %v17232_v7  ;;  %v13624_v3 = vpop.f32.mrb[191].mxu0  ;;  %v13894_v16 = vpop.f32.mrb[163].mxu1 }
 0x8d8   :  { %13734 = vmatmul.mubr.msk.bf16.gmra.mrb[12].mxu0 %vm2372_vm3, %v17040_v29 }
 0x8d9   :  { %13737 = vmatprep.mubr.msk.bf16.mxu0 %vm14538_vm2, %v18143_v25 }
 0x8db   :  { %v7058_v18 = vpop.f32.mrb[192].mxu0  ;;  %v17336_v62 = vpop.f32.mrb[164].mxu1 }
 0x8dc   :  { %v13627_v56 = vpop.f32.mrb[193].mxu0  ;;  %v13945_v46 = vpop.f32.mrb[165].mxu1 }
 0x8dd   :  { %v7061_v26 = vpop.f32.mrb[194].mxu0  ;;  %v17338_v10 = vpop.f32.mrb[166].mxu1 }
 0x8de   :  { %v13628_v22 = vpop.f32.mrb[195].mxu0  ;;  %v13946_v19 = vpop.f32.mrb[167].mxu1 }
 0x8df   :  { %v7572_v19 = vld [vmem:[#allocation2 + $0x19] sm:$0xff] }
 0x8e0   :  { %13738 = vmatmul.mubr.msk.bf16.gmra.mrb[16].mxu0 %vm2372_vm3, %v17050_v47 }
 0x8e1   :  { %13741 = vmatprep.mubr.msk.bf16.mxu0 %vm14538_vm2, %v18143_v25 }
 0x8e3   :  { %v7066_v29 = vpop.f32.mrb[196].mxu0  ;;  %v8555_v7 = vpop.f32.mrb[168].mxu1 }
 0x8e4   :  { %v17345_v28 = vadd.f32 %v7066_v29, %v17246_v60  ;;  %v13631_v6 = vpop.f32.mrb[197].mxu0  ;;  %v13949_v44 = vpop.f32.mrb[169].mxu1 }
 0x8e5   :  { %v7069_v42 = vpop.f32.mrb[198].mxu0  ;;  %v8558_v40 = vpop.f32.mrb[170].mxu1 }
 0x8e6   :  { %v17348_v33 = vadd.f32 %v7069_v42, %v17248_v41  ;;  %v13632_v49 = vpop.f32.mrb[199].mxu0  ;;  %v13950_v20 = vpop.f32.mrb[171].mxu1  ;;  %v7571_v40 = vld [vmem:[#allocation2 + $0x11] sm:$0xff] }
 0x8e7   :  { %v14411_v49 = vld [vmem:[%s18111_s3 + $0x28] sm:$0xff]  }
 0x8e8   :  { %13742 = vmatmul.mubr.msk.bf16.gmra.mrb[20].mxu0 %vm2372_vm3, %v17059_v2 }
 0x8e9   :  { %13745 = vmatprep.mubr.msk.bf16.mxu0 %vm14538_vm2, %v18143_v25 }
 0x8eb   :  { %v7074_v47 = vpop.f32.mrb[200].mxu0  ;;  %v17354_v48 = vpop.f32.mrb[172].mxu1 }
 0x8ec   :  { %v13635_v60 = vpop.f32.mrb[201].mxu0  ;;  %v13953_v11 = vpop.f32.mrb[173].mxu1 }
 0x8ed   :  { %v7077_v24 = vpop.f32.mrb[202].mxu0  ;;  %v17356_v0 = vpop.f32.mrb[174].mxu1  ;;  %v7593_v60 = vpack.c.bf16 %v7572_v19, %v7571_v40 }
 0x8ee   :  { %v13636_v52 = vpop.f32.mrb[203].mxu0  ;;  %v13954_v45 = vpop.f32.mrb[175].mxu1  ;;  %v7573_v24 = vld [vmem:[#allocation2 + $0x21] sm:$0xff] }
 0x8ef   :  { %v7574_v52 = vld [vmem:[#allocation2 + $0x29] sm:$0xff] }
 0x8f0   :  { %13746 = vmatmul.mubr.msk.bf16.gmra.mrb[52].mxu0 %vm2372_vm3, %v17068_v61 }
 0x8f1   :  { %13749 = vmatprep.mubr.msk.bf16.mxu0 %vm14538_vm2, %v18143_v25 }
 0x8f3   :  { %v7082_v2 = vpop.f32.mrb[204].mxu0  ;;  %v8571_v41 = vpop.f32.mrb[176].mxu1 }
 0x8f4   :  { %v17363_v21 = vadd.f32 %v7082_v2, %v17262_v15  ;;  %v13639_v55 = vpop.f32.mrb[205].mxu0  ;;  %v13957_v58 = vpop.f32.mrb[177].mxu1 }
 0x8f5   :  { %v7085_v51 = vpop.f32.mrb[206].mxu0  ;;  %v8574_v30 = vpop.f32.mrb[178].mxu1 }
 0x8f6   :  { %v17366_v12 = vadd.f32 %v7085_v51, %v17264_v38  ;;  %v13640_v39 = vpop.f32.mrb[207].mxu0  ;;  %v13958_v3 = vpop.f32.mrb[179].mxu1  ;;  %v17397_v51 = vpack.c.bf16 %v7574_v52, %v7573_v24 }
 0x8f7   :  { %v7576_v3 = vld [vmem:[#allocation2 + $0x39] sm:$0xff] }
 0x8f8   :  { %13750 = vmatmul.mubr.msk.bf16.gmra.mrb[56].mxu0 %vm2372_vm3, %v17077_v37 }
 0x8f9   :  { %13753 = vmatprep.mubr.msk.bf16.mxu0 %vm14538_vm2, %v18143_v25 }
 0x8fb   :  { %v7090_v61 = vpop.f32.mrb[208].mxu0  ;;  %v17372_v16 = vpop.f32.mrb[180].mxu1 }
 0x8fc   :  { %v13643_v15 = vpop.f32.mrb[209].mxu0  ;;  %v13961_v18 = vpop.f32.mrb[181].mxu1 }
 0x8fd   :  { %v7093_v56 = vpop.f32.mrb[210].mxu0  ;;  %v17374_v46 = vpop.f32.mrb[182].mxu1 }
 0x8fe   :  { %v13644_v26 = vpop.f32.mrb[211].mxu0  ;;  %v13962_v22 = vpop.f32.mrb[183].mxu1 }
 0x8ff   :  { %v7575_v22 = vld [vmem:[#allocation2 + $0x31] sm:$0xff] }
 0x900   :  { %13754 = vmatmul.mubr.msk.bf16.gmra.mrb[60].mxu0 %vm2372_vm3, %v17086_v59 }
 0x901   :  { %13759 = vmatprep.mubr.msk.bf16.mxu0 %vm14538_vm2, %v18143_v25 }
 0x903   :  { %v7098_v37 = vpop.f32.mrb[212].mxu0  ;;  %v8587_v38 = vpop.f32.mrb[184].mxu1 }
 0x904   :  { %v17381_v29 = vadd.f32 %v7098_v37, %v17278_v32  ;;  %v13647_v7 = vpop.f32.mrb[213].mxu0  ;;  %v13965_v6 = vpop.f32.mrb[185].mxu1 }
 0x905   :  { %v7101_v44 = vpop.f32.mrb[214].mxu0  ;;  %v8590_v42 = vpop.f32.mrb[186].mxu1  ;;  %v17409_v7 = vpack.c.bf16 %v7576_v3, %v7575_v22 }
 0x906   :  { %v17387_v59 = vadd.f32 %v7101_v44, %v17280_v14  ;;  %v13648_v20 = vpop.f32.mrb[215].mxu0  ;;  %v13966_v47 = vpop.f32.mrb[187].mxu1  ;;  %v7577_v44 = vld [vmem:[#allocation2 + $0x41] sm:$0xff]  ;;  %v7578_v42 = vld [vmem:[#allocation2 + $0x49] sm:$0xff] }
 0x908   :  { %13760 = vmatmul.mubr.msk.bf16.vlgmr.msra.gmra.mrb[64].mxu0 %vm2372_vm3, %v7593_v60 }
 0x909   :  { %13804 = vmatpush3.bf16.msra.mxu0 %v14411_v49  ;;  %13763 = vmatprep.mubr.msk.bf16.mxu0 %vm14538_vm2, %v18143_v25 }
 0x90a   :  { %13895 = vmatprep.subr.bf16.mxu0 %v18143_v25 }
 0x90b   :  { %v7106_v32 = vpop.f32.mrb[216].mxu0  ;;  %v17393_v11 = vpop.f32.mrb[188].mxu1 }
 0x90c   :  { %v13651_v45 = vpop.f32.mrb[217].mxu0  ;;  %v13969_v2 = vpop.f32.mrb[189].mxu1  ;;  %v17419_v32 = vpack.c.bf16 %v7578_v42, %v7577_v44 }
 0x90d   :  { %v7109_v14 = vpop.f32.mrb[218].mxu0  ;;  %v17395_v41 = vpop.f32.mrb[190].mxu1  ;;  %v7580_v45 = vld [vmem:[#allocation2 + $0x59] sm:$0xff] }
 0x90e   :  { %v13652_v55 = vpop.f32.mrb[219].mxu0  ;;  %v13970_v58 = vpop.f32.mrb[191].mxu1 }
 0x910   :  { %13764 = vmatmul.mubr.msk.bf16.gmra.mrb[68].mxu0 %vm2372_vm3, %v17397_v51 }
 0x911   :  { %13767 = vmatprep.mubr.msk.bf16.mxu0 %vm14538_vm2, %v18143_v25 }
 0x913   :  { %v7114_v30 = vpop.f32.mrb[220].mxu0  ;;  %v8603_v39 = vpop.f32.mrb[192].mxu1 }
 0x914   :  { %v17404_v61 = vadd.f32 %v7114_v30, %v17298_v1  ;;  %v13655_v15 = vpop.f32.mrb[221].mxu0  ;;  %v13973_v18 = vpop.f32.mrb[193].mxu1  ;;  %v7579_v39 = vld [vmem:[#allocation2 + $0x51] sm:$0xff] }
 0x915   :  { %v7117_v56 = vpop.f32.mrb[222].mxu0  ;;  %v8606_v26 = vpop.f32.mrb[194].mxu1  ;;  %v17428_v18 = vpack.c.bf16 %v7580_v45, %v7579_v39  ;;  %v7583_v45 = vld [vmem:[#allocation2 + $0x71] sm:$0xff] }
 0x916   :  { %v17407_v37 = vadd.f32 %v7117_v56, %v17300_v34  ;;  %v13656_v38 = vpop.f32.mrb[223].mxu0  ;;  %v13974_v19 = vpop.f32.mrb[195].mxu1 }
 0x917   :  { %v7582_v38 = vld [vmem:[#allocation2 + $0x69] sm:$0xff] }
 0x918   :  { %13768 = vmatmul.mubr.msk.bf16.gmra.mrb[72].mxu0 %vm2372_vm3, %v17409_v7 }
 0x919   :  { %13771 = vmatprep.mubr.msk.bf16.mxu0 %vm14538_vm2, %v18143_v25 }
 0x91b   :  { %v7122_v1 = vpop.f32.mrb[224].mxu0  ;;  %v17415_v6 = vpop.f32.mrb[196].mxu1 }
 0x91c   :  { %v13659_v40 = vpop.f32.mrb[225].mxu0  ;;  %v13977_v49 = vpop.f32.mrb[197].mxu1 }
 0x91d   :  { %v7125_v20 = vpop.f32.mrb[226].mxu0  ;;  %v17417_v34 = vpop.f32.mrb[198].mxu1 }
 0x91e   :  { %v13660_v47 = vpop.f32.mrb[227].mxu0  ;;  %v13978_v60 = vpop.f32.mrb[199].mxu1 }
 0x920   :  { %13772 = vmatmul.mubr.msk.bf16.gmra.mrb[76].mxu0 %vm2372_vm3, %v17419_v32 }
 0x921   :  { %13775 = vmatprep.mubr.msk.bf16.mxu0 %vm14538_vm2, %v18143_v25 }
 0x923   :  { %v7130_v24 = vpop.f32.mrb[228].mxu0  ;;  %v8619_v52 = vpop.f32.mrb[200].mxu1 }
 0x924   :  { %v13663_v2 = vpop.f32.mrb[229].mxu0  ;;  %v13981_v14 = vpop.f32.mrb[201].mxu1  ;;  %v17426_v55 = vadd.f32 %v7130_v24, %v17314_v8  ;;  %v7581_v8 = vld [vmem:[#allocation2 + $0x61] sm:$0xff]  ;;  %v7584_v24 = vld [vmem:[#allocation2 + $0x79] sm:$0xff] }
 0x925   :  { %v7133_v58 = vpop.f32.mrb[230].mxu0  ;;  %v8622_v30 = vpop.f32.mrb[202].mxu1  ;;  %v17444_v20 = vpack.c.bf16 %v7582_v38, %v7581_v8  ;;  %v17453_v14 = vpack.c.bf16 %v7584_v24, %v7583_v45  ;;  %v7589_v24 = vld [vmem:[#allocation2 + $0xa1] sm:$0xff] }
 0x926   :  { %v13664_v3 = vpop.f32.mrb[231].mxu0  ;;  %v13982_v15 = vpop.f32.mrb[203].mxu1  ;;  %v17431_v56 = vadd.f32 %v7133_v58, %v17316_v43  ;;  %v7585_v58 = vld [vmem:[#allocation2 + $0x81] sm:$0xff]  ;;  %v7586_v30 = vld [vmem:[#allocation2 + $0x89] sm:$0xff] }
 0x927   :  { %v17462_v8 = vpack.c.bf16 %v7586_v30, %v7585_v58 }
 0x928   :  { %13776 = vmatmul.mubr.msk.bf16.gmra.mrb[80].mxu0 %vm2372_vm3, %v17428_v18 }
 0x929   :  { %13779 = vmatprep.mubr.msk.bf16.mxu0 %vm14538_vm2, %v18143_v25 }
 0x92b   :  { %v7245_v26 = vpop.f32.mrb[232].mxu0  ;;  %v17437_v22 = vpop.f32.mrb[204].mxu1 }
 0x92c   :  { %v13669_v19 = vpop.f32.mrb[233].mxu0  ;;  %v13985_v1 = vpop.f32.mrb[205].mxu1  ;;  %v17440_v44 = vadd.f32 %v7245_v26, %v17325_v50 }
 0x92d   :  { %v7248_v42 = vpop.f32.mrb[234].mxu0  ;;  %v17442_v40 = vpop.f32.mrb[206].mxu1  ;;  %v7588_v1 = vld [vmem:[#allocation2 + $0x99] sm:$0xff] }
 0x92e   :  { %v13670_v43 = vpop.f32.mrb[235].mxu0  ;;  %v13986_v49 = vpop.f32.mrb[207].mxu1  ;;  %v17447_v47 = vadd.f32 %v7248_v42, %v17330_v4 }
 0x92f   :  { %v7587_v49 = vld [vmem:[#allocation2 + $0x91] sm:$0xff] }
 0x930   :  { %13780 = vmatmul.mubr.msk.bf16.gmra.mrb[84].mxu0 %vm2372_vm3, %v17444_v20 }
 0x931   :  { %13783 = vmatprep.mubr.msk.bf16.mxu0 %vm14538_vm2, %v18143_v25 }
 0x933   :  { %v7253_v60 = vpop.f32.mrb[236].mxu0 }
 0x934   :  { %v13673_v50 = vpop.f32.mrb[237].mxu0  ;;  %v17471_v60 = vpack.c.bf16 %v7588_v1, %v7587_v49  ;;  %v7591_v1 = vld [vmem:[#allocation2 + $0xb1] sm:$0xff] }
 0x935   :  { %v7256_v52 = vpop.f32.mrb[238].mxu0  ;;  %v7590_v50 = vld [vmem:[#allocation2 + $0xa9] sm:$0xff] }
 0x936   :  { %v13674_v2 = vpop.f32.mrb[239].mxu0  ;;  %v17480_v58 = vpack.c.bf16 %v7590_v50, %v7589_v24 }
 0x938   :  { %13784 = vmatmul.mubr.msk.bf16.gmra.mrb[88].mxu0 %vm2372_vm3, %v17453_v14 }
 0x939   :  { %13787 = vmatprep.mubr.msk.bf16.mxu0 %vm14538_vm2, %v18143_v25 }
 0x93b   :  { %v7261_v4 = vpop.f32.mrb[240].mxu0 }
 0x93c   :  { %v13677_v39 = vpop.f32.mrb[241].mxu0  ;;  %v17460_v3 = vadd.f32 %v7261_v4, %v17345_v28 }
 0x93d   :  { %v7264_v15 = vpop.f32.mrb[242].mxu0 }
 0x93e   :  { %v13678_v26 = vpop.f32.mrb[243].mxu0  ;;  %v17465_v38 = vadd.f32 %v7264_v15, %v17348_v33  ;;  %v7592_v15 = vld [vmem:[#allocation2 + $0xb9] sm:$0xff] }
 0x940   :  { %13788 = vmatmul.mubr.msk.bf16.gmra.mrb[92].mxu0 %vm2372_vm3, %v17462_v8 }
 0x941   :  { %13791 = vmatprep.mubr.msk.bf16.mxu0 %vm14538_vm2, %v18143_v25 }
 0x943   :  { %v7269_v19 = vpop.f32.mrb[244].mxu0 }
 0x944   :  { %v13681_v42 = vpop.f32.mrb[245].mxu0 }
 0x945   :  { %v7272_v43 = vpop.f32.mrb[246].mxu0  ;;  %v17489_v42 = vpack.c.bf16 %v7592_v15, %v7591_v1 }
 0x946   :  { %v13682_v28 = vpop.f32.mrb[247].mxu0 }
 0x948   :  { %13792 = vmatmul.mubr.msk.bf16.gmra.mrb[96].mxu0 %vm2372_vm3, %v17471_v60 }
 0x949   :  { %13795 = vmatprep.mubr.msk.bf16.mxu0 %vm14538_vm2, %v18143_v25 }
 0x94b   :  { %v7277_v33 = vpop.f32.mrb[248].mxu0 }
 0x94c   :  { %v13685_v52 = vpop.f32.mrb[249].mxu0  ;;  %v17478_v45 = vadd.f32 %v7277_v33, %v17363_v21  ;;  %v14412_v33 = vld [vmem:[%s18111_s3 + $0x38] sm:$0xff]  }
 0x94d   :  { %v7280_v2 = vpop.f32.mrb[250].mxu0 }
 0x94e   :  { %v13686_v4 = vpop.f32.mrb[251].mxu0  ;;  %v17483_v30 = vadd.f32 %v7280_v2, %v17366_v12  ;;  %v7790_v2 = vld [vmem:[#allocation2 + $0x22] sm:$0xff] }
 0x950   :  { %13796 = vmatmul.mubr.msk.bf16.gmra.mrb[100].mxu0 %vm2372_vm3, %v17480_v58 }
 0x951   :  { %13799 = vmatprep.mubr.msk.bf16.mxu0 %vm14538_vm2, %v18143_v25 }
 0x953   :  { %v7285_v39 = vpop.f32.mrb[252].mxu0 }
 0x954   :  { %v13689_v26 = vpop.f32.mrb[253].mxu0 }
 0x955   :  { %v7288_v19 = vpop.f32.mrb[254].mxu0 }
 0x956   :  { %v13690_v21 = vpop.f32.mrb[255].mxu0  ;;  %v7793_v19 = vld [vmem:[#allocation2 + $0x3a] sm:$0xff] }
 0x958   :  { %13800 = vmatmul.mubr.msk.bf16.gmra.mrb[104].mxu0 %vm2372_vm3, %v17489_v42 }
 0x959   :  { %13805 = vmatprep.mubr.msk.bf16.mxu0 %vm14538_vm2, %v18143_v25 }
 0x95b   :  { %v7293_v12 = vpop.f32.mrb[24].mxu0 }
 0x95c   :  { %v13693_v43 = vpop.f32.mrb[25].mxu0  ;;  %v17496_v49 = vadd.f32 %v7293_v12, %v17381_v29  ;;  %v7791_v29 = vld [vmem:[#allocation2 + $0x2a] sm:$0xff]  ;;  %v7792_v12 = vld [vmem:[#allocation2 + $0x32] sm:$0xff] }
 0x95d   :  { %v7296_v28 = vpop.f32.mrb[26].mxu0  ;;  %v7811_v26 = vpack.c.bf16 %v7791_v29, %v7790_v2  ;;  %v7795_v2 = vld [vmem:[#allocation2 + $0x4a] sm:$0xff] }
 0x95e   :  { %v13694_v24 = vpop.f32.mrb[27].mxu0  ;;  %v17502_v50 = vadd.f32 %v7296_v28, %v17387_v59  ;;  %v7812_v28 = vpack.c.bf16 %v7793_v19, %v7792_v12 }
 0x960   :  { %13806 = vmatmul.mubr.msk.bf16.vlgmr.msra.gmra.mrb[108].mxu0 %vm2372_vm3, %v17212_v9 }
 0x961   :  { %13896 = vmatpush3.bf16.msra.mxu0 %v14412_v33  ;;  %13809 = vmatprep.mubr.msk.bf16.mxu0 %vm14538_vm2, %v18143_v25 }
 0x963   :  { %v7301_v52 = vpop.f32.mrb[28].mxu0 }
 0x964   :  { %v13697_v4 = vpop.f32.mrb[29].mxu0  ;;  %v7794_v52 = vld [vmem:[#allocation2 + $0x42] sm:$0xff] }
 0x965   :  { %v7304_v39 = vpop.f32.mrb[30].mxu0 }
 0x966   :  { %v13698_v15 = vpop.f32.mrb[31].mxu0 }
 0x968   :  { %13810 = vmatmul.mubr.msk.bf16.gmra.mrb[112].mxu0 %vm2372_vm3, %v7811_v26 }
 0x969   :  { %13813 = vmatprep.mubr.msk.bf16.mxu0 %vm14538_vm2, %v18143_v25 }
 0x96b   :  { %v7309_v59 = vpop.f32.mrb[32].mxu0 }
 0x96c   :  { %v13701_v1 = vpop.f32.mrb[33].mxu0  ;;  %v17512_v9 = vadd.f32 %v7309_v59, %v17404_v61  ;;  %v7813_v61 = vpack.c.bf16 %v7795_v2, %v7794_v52  ;;  %v7799_v52 = vld [vmem:[#allocation2 + $0x6a] sm:$0xff] }
 0x96d   :  { %v7312_v21 = vpop.f32.mrb[34].mxu0  ;;  %v7796_v1 = vld [vmem:[#allocation2 + $0x52] sm:$0xff] }
 0x96e   :  { %v13702_v43 = vpop.f32.mrb[35].mxu0  ;;  %v17515_v33 = vadd.f32 %v7312_v21, %v17407_v37  ;;  %v7797_v37 = vld [vmem:[#allocation2 + $0x5a] sm:$0xff] }
 0x96f   :  { %v7814_v43 = vpack.c.bf16 %v7797_v37, %v7796_v1 }
 0x970   :  { %13814 = vmatmul.mubr.msk.bf16.gmra.mrb[116].mxu0 %vm2372_vm3, %v7812_v28 }
 0x971   :  { %13817 = vmatprep.mubr.msk.bf16.mxu0 %vm14538_vm2, %v18143_v25 }
 0x973   :  { %v7317_v24 = vpop.f32.mrb[36].mxu0 }
 0x974   :  { %v13705_v29 = vpop.f32.mrb[37].mxu0  ;;  %v7798_v24 = vld [vmem:[#allocation2 + $0x62] sm:$0xff] }
 0x975   :  { %v7320_v4 = vpop.f32.mrb[38].mxu0 }
 0x976   :  { %v13706_v39 = vpop.f32.mrb[39].mxu0 }
 0x977   :  { %v7815_v39 = vpack.c.bf16 %v7799_v52, %v7798_v24 }
 0x978   :  { %13818 = vmatmul.mubr.msk.bf16.gmra.mrb[120].mxu0 %vm2372_vm3, %v7813_v61 }
 0x979   :  { %13821 = vmatprep.mubr.msk.bf16.mxu0 %vm14538_vm2, %v18143_v25 }
 0x97b   :  { %v7325_v15 = vpop.f32.mrb[40].mxu0 }
 0x97c   :  { %v17524_v26 = vadd.f32 %v7325_v15, %v17426_v55  ;;  %v13709_v59 = vpop.f32.mrb[41].mxu0  ;;  %v7801_v15 = vld [vmem:[#allocation2 + $0x7a] sm:$0xff] }
 0x97d   :  { %v7328_v19 = vpop.f32.mrb[42].mxu0 }
 0x97e   :  { %v17527_v21 = vadd.f32 %v7328_v19, %v17431_v56  ;;  %v13710_v12 = vpop.f32.mrb[43].mxu0  ;;  %v7800_v19 = vld [vmem:[#allocation2 + $0x72] sm:$0xff] }
 0x97f   :  { %v7802_v12 = vld [vmem:[#allocation2 + $0x82] sm:$0xff] }
 0x980   :  { %13822 = vmatmul.mubr.msk.bf16.gmra.mrb[124].mxu0 %vm2372_vm3, %v7814_v43  ;;  %v7803_v43 = vld [vmem:[#allocation2 + $0x8a] sm:$0xff] }
 0x981   :  { %13825 = vmatprep.mubr.msk.bf16.mxu0 %vm14538_vm2, %v18143_v25 }
 0x983   :  { %v7462_v28 = vpop.f32.mrb[44].mxu0 }
 0x984   :  { %v17533_v2 = vadd.f32 %v7462_v28, %v17440_v44  ;;  %v13715_v55 = vpop.f32.mrb[45].mxu0  ;;  %v7816_v44 = vpack.c.bf16 %v7801_v15, %v7800_v19 }
 0x985   :  { %v7465_v29 = vpop.f32.mrb[46].mxu0 }
 0x986   :  { %v17536_v4 = vadd.f32 %v7465_v29, %v17447_v47  ;;  %v13716_v56 = vpop.f32.mrb[47].mxu0 }
 0x987   :  { %v7817_v56 = vpack.c.bf16 %v7803_v43, %v7802_v12 }
 0x988   :  { %13826 = vmatmul.mubr.msk.bf16.gmra.mrb[128].mxu0 %vm2372_vm3, %v7815_v39 }
 0x989   :  { %13829 = vmatprep.mubr.msk.bf16.mxu0 %vm14538_vm2, %v18143_v25 }
 0x98b   :  { %v7470_v61 = vpop.f32.mrb[48].mxu0 }
 0x98c   :  { %v13719_v37 = vpop.f32.mrb[49].mxu0  ;;  %v7805_v61 = vld [vmem:[#allocation2 + $0x9a] sm:$0xff] }
 0x98d   :  { %v7473_v59 = vpop.f32.mrb[50].mxu0 }
 0x98e   :  { %v13720_v1 = vpop.f32.mrb[51].mxu0  ;;  %v7804_v59 = vld [vmem:[#allocation2 + $0x92] sm:$0xff] }
 0x98f   :  { %v7806_v1 = vld [vmem:[#allocation2 + $0xa2] sm:$0xff] }
 0x990   :  { %13830 = vmatmul.mubr.msk.bf16.gmra.mrb[132].mxu0 %vm2372_vm3, %v7816_v44  ;;  %v7807_v44 = vld [vmem:[#allocation2 + $0xaa] sm:$0xff] }
 0x991   :  { %13833 = vmatprep.mubr.msk.bf16.mxu0 %vm14538_vm2, %v18143_v25 }
 0x993   :  { %v7478_v47 = vpop.f32.mrb[0].mxu0 }
 0x994   :  { %v17545_v28 = vadd.f32 %v7478_v47, %v17460_v3  ;;  %v13723_v24 = vpop.f32.mrb[1].mxu0  ;;  %v7818_v3 = vpack.c.bf16 %v7805_v61, %v7804_v59 }
 0x995   :  { %v7481_v52 = vpop.f32.mrb[2].mxu0 }
 0x996   :  { %v17548_v55 = vadd.f32 %v7481_v52, %v17465_v38  ;;  %v13724_v29 = vpop.f32.mrb[3].mxu0 }
 0x997   :  { %v7819_v29 = vpack.c.bf16 %v7807_v44, %v7806_v1 }
 0x998   :  { %13834 = vmatmul.mubr.msk.bf16.gmra.mrb[136].mxu0 %vm2372_vm3, %v7817_v56 }
 0x999   :  { %13837 = vmatprep.mubr.msk.bf16.mxu0 %vm14538_vm2, %v18143_v25 }
 0x99b   :  { %v7486_v39 = vpop.f32.mrb[4].mxu0 }
 0x99c   :  { %v13727_v15 = vpop.f32.mrb[5].mxu0  ;;  %v7809_v39 = vld [vmem:[#allocation2 + $0xba] sm:$0xff] }
 0x99d   :  { %v7489_v37 = vpop.f32.mrb[6].mxu0 }
 0x99e   :  { %v13728_v19 = vpop.f32.mrb[7].mxu0  ;;  %v7808_v37 = vld [vmem:[#allocation2 + $0xb2] sm:$0xff] }
 0x9a0   :  { %13838 = vmatmul.mubr.msk.bf16.gmra.mrb[140].mxu0 %vm2372_vm3, %v7818_v3 }
 0x9a1   :  { %13841 = vmatprep.mubr.msk.bf16.mxu0 %vm14538_vm2, %v18143_v25 }
 0x9a3   :  { %v7494_v38 = vpop.f32.mrb[8].mxu0 }
 0x9a4   :  { %v17557_v47 = vadd.f32 %v7494_v38, %v17478_v45  ;;  %v13731_v12 = vpop.f32.mrb[9].mxu0  ;;  %v7820_v45 = vpack.c.bf16 %v7809_v39, %v7808_v37 }
 0x9a5   :  { %v7497_v43 = vpop.f32.mrb[10].mxu0 }
 0x9a6   :  { %v17560_v24 = vadd.f32 %v7497_v43, %v17483_v30  ;;  %v13732_v52 = vpop.f32.mrb[11].mxu0 }
 0x9a8   :  { %13842 = vmatmul.mubr.msk.bf16.gmra.mrb[144].mxu0 %vm2372_vm3, %v7819_v29 }
 0x9a9   :  { %13845 = vmatprep.mubr.msk.bf16.mxu0 %vm14538_vm2, %v18143_v25 }
 0x9ab   :  { %v7502_v56 = vpop.f32.mrb[12].mxu0 }
 0x9ac   :  { %v13735_v61 = vpop.f32.mrb[13].mxu0 }
 0x9ad   :  { %v7505_v15 = vpop.f32.mrb[14].mxu0 }
 0x9ae   :  { %v13736_v59 = vpop.f32.mrb[15].mxu0  ;;  %v14413_v15 = vld [vmem:[%s18114_s5 + $0x10] ss:$8 sps:$4 sm:$0xff]  }
 0x9b0   :  { %13846 = vmatmul.mubr.msk.bf16.gmra.mrb[148].mxu0 %vm2372_vm3, %v7820_v45 }
 0x9b1   :  { %13897 = vmatprep.mubr.msk.bf16.mxu0 %vm14538_vm2, %v18143_v25 }
 0x9b3   :  { %v7510_v30 = vpop.f32.mrb[16].mxu0 }
 0x9b4   :  { %v17569_v19 = vadd.f32 %v7510_v30, %v17496_v49  ;;  %v13739_v3 = vpop.f32.mrb[17].mxu0 }
 0x9b5   :  { %v7513_v38 = vpop.f32.mrb[18].mxu0 }
 0x9b6   :  { %v17572_v1 = vadd.f32 %v7513_v38, %v17502_v50  ;;  %v13740_v44 = vpop.f32.mrb[19].mxu0 }
 0x9b8   :  { %13898 = vmatmul.mubr.msk.bf16.vlgmr.msra.gmra.mrb[152].mxu0 %vm2372_vm3, %v17397_v51 }
 0x9b9   :  { %13901 = vmatprep.mubr.msk.bf16.mxu0 %vm14538_vm2, %v18143_v25 }
 0x9bb   :  { %v7518_v12 = vpop.f32.mrb[20].mxu0 }
 0x9bc   :  { %v13743_v43 = vpop.f32.mrb[21].mxu0 }
 0x9bd   :  { %v7521_v52 = vpop.f32.mrb[22].mxu0 }
 0x9be   :  { %v13744_v29 = vpop.f32.mrb[23].mxu0 }
 0x9c0   :  { %13902 = vmatmul.mubr.msk.bf16.gmra.mrb[156].mxu0 %vm2372_vm3, %v17409_v7  ;;  %v14415_v7 = vld [vmem:[%s18114_s5 + $0x14] ss:$8 sps:$4 sm:$0xff]  }
 0x9c1   :  { %13905 = vmatprep.mubr.msk.bf16.mxu0 %vm14538_vm2, %v18143_v25  ;;  %8752 = vmatprep.subr.bf16.mxu0 %v14415_v7 }
 0x9c2   :  { %8753 = vmatpush1.bf16.msra.mxu0 %v14413_v15 }
 0x9c3   :  { %v7526_v49 = vpop.f32.mrb[52].mxu0 }
 0x9c4   :  { %v17583_v50 = vadd.f32 %v7526_v49, %v17512_v9  ;;  %v13747_v56 = vpop.f32.mrb[53].mxu0  ;;  %v14416_v9 = vld [vmem:[%s18114_s5] ss:$8 sps:$4 sm:$0xff]  }
 0x9c5   :  { %v7529_v39 = vpop.f32.mrb[54].mxu0 }
 0x9c6   :  { %v17586_v51 = vadd.f32 %v7529_v39, %v17515_v33  ;;  %v13748_v61 = vpop.f32.mrb[55].mxu0  ;;  %v14418_v33 = vld [vmem:[%s18114_s5 + $0x4] ss:$8 sps:$4 sm:$0xff]  }
 0x9c7   :  { %8806 = vmatprep.subr.bf16.mxu1 %v14418_v33 }
 0x9c8   :  { %13906 = vmatmul.mubr.msk.bf16.gmra.mrb[160].mxu0 %vm2372_vm3, %v17419_v32  ;;  %8807 = vmatpush1.bf16.msra.mxu1 %v14416_v9 }
 0x9c9   :  { %13909 = vmatprep.mubr.msk.bf16.mxu0 %vm14538_vm2, %v18143_v25 }
 0x9cb   :  { %v7534_v37 = vpop.f32.mrb[56].mxu0 }
 0x9cc   :  { %v13751_v32 = vpop.f32.mrb[57].mxu0 }
 0x9cd   :  { %v7537_v59 = vpop.f32.mrb[58].mxu0 }
 0x9ce   :  { %v13752_v45 = vpop.f32.mrb[59].mxu0 }
 0x9d0   :  { %13910 = vmatmul.mubr.msk.bf16.gmra.mrb[164].mxu0 %vm2372_vm3, %v17428_v18 }
 0x9d1   :  { %13913 = vmatprep.mubr.msk.bf16.mxu0 %vm14538_vm2, %v18143_v25 }
 0x9d3   :  { %v7542_v30 = vpop.f32.mrb[60].mxu0 }
 0x9d4   :  { %v17609_v3 = vadd.f32 %v7542_v30, %v17524_v26  ;;  %v13755_v38 = vpop.f32.mrb[61].mxu0 }
 0x9d5   :  { %v7545_v44 = vpop.f32.mrb[62].mxu0  ;;  %v8242_v38 = vld [vmem:[#allocation2 + $0xc1] sm:$0xff] }
 0x9d6   :  { %v17612_v12 = vadd.f32 %v7545_v44, %v17527_v21  ;;  %v13756_v43 = vpop.f32.mrb[63].mxu0  ;;  %v8243_v44 = vld [vmem:[#allocation2 + $0xc9] sm:$0xff] }
 0x9d8   :  { %13914 = vmatmul.mubr.msk.bf16.gmra.mrb[168].mxu0 %vm2372_vm3, %v17444_v20 }
 0x9d9   :  { %13917 = vmatprep.mubr.msk.bf16.mxu0 %vm14538_vm2, %v18143_v25 }
 0x9db   :  { %v7679_v18 = vpop.f32.mrb[64].mxu0 }
 0x9dc   :  { %v17619_v52 = vadd.f32 %v7679_v18, %v17533_v2  ;;  %v13761_v29 = vpop.f32.mrb[65].mxu0 }
 0x9dd   :  { %v7682_v49 = vpop.f32.mrb[66].mxu0 }
 0x9de   :  { %v17622_v26 = vadd.f32 %v7682_v49, %v17536_v4  ;;  %v13762_v56 = vpop.f32.mrb[67].mxu0 }
 0x9e0   :  { %13918 = vmatmul.mubr.msk.bf16.gmra.mrb[172].mxu0 %vm2372_vm3, %v17453_v14 }
 0x9e1   :  { %13921 = vmatprep.mubr.msk.bf16.mxu0 %vm14538_vm2, %v18143_v25 }
 0x9e3   :  { %v7687_v20 = vpop.f32.mrb[68].mxu0 }
 0x9e4   :  { %v13765_v21 = vpop.f32.mrb[69].mxu0 }
 0x9e5   :  { %v7690_v39 = vpop.f32.mrb[70].mxu0 }
 0x9e6   :  { %v13766_v61 = vpop.f32.mrb[71].mxu0 }
 0x9e8   :  { %13922 = vmatmul.mubr.msk.bf16.gmra.mrb[176].mxu0 %vm2372_vm3, %v17462_v8 }
 0x9e9   :  { %13925 = vmatprep.mubr.msk.bf16.mxu0 %vm14538_vm2, %v18143_v25 }
 0x9eb   :  { %v7695_v2 = vpop.f32.mrb[72].mxu0 }
 0x9ec   :  { %v17633_v4 = vadd.f32 %v7695_v2, %v17545_v28  ;;  %v13769_v15 = vpop.f32.mrb[73].mxu0 }
 0x9ed   :  { %v7698_v7 = vpop.f32.mrb[74].mxu0 }
 0x9ee   :  { %v17636_v14 = vadd.f32 %v7698_v7, %v17548_v55  ;;  %v13770_v9 = vpop.f32.mrb[75].mxu0 }
 0x9f0   :  { %13926 = vmatmul.mubr.msk.bf16.gmra.mrb[180].mxu0 %vm2372_vm3, %v17471_v60 }
 0x9f1   :  { %13929 = vmatprep.mubr.msk.bf16.mxu0 %vm14538_vm2, %v18143_v25 }
 0x9f3   :  { %v7703_v8 = vpop.f32.mrb[76].mxu0 }
 0x9f4   :  { %v13773_v33 = vpop.f32.mrb[77].mxu0 }
 0x9f5   :  { %v7706_v37 = vpop.f32.mrb[78].mxu0 }
 0x9f6   :  { %v13774_v32 = vpop.f32.mrb[79].mxu0 }
 0x9f7   :  { %v14539_v32 = vmov 0  }
 0x9f8   :  { %13930 = vmatmul.mubr.msk.bf16.gmra.mrb[184].mxu0 %vm2372_vm3, %v17480_v58  ;;  %8838 = vmatprep.mubr.bf16.mxu1 %v14539_v32 }
 0x9f9   :  { %13933 = vmatprep.mubr.msk.bf16.mxu0 %vm14538_vm2, %v18143_v25 }
 0x9fb   :  { %v7711_v28 = vpop.f32.mrb[80].mxu0 }
 0x9fc   :  { %v17647_v55 = vadd.f32 %v7711_v28, %v17557_v47  ;;  %v13777_v59 = vpop.f32.mrb[81].mxu0  ;;  %v8254_v47 = vpack.c.bf16 %v8243_v44, %v8242_v38 }
 0x9fd   :  { %v7714_v45 = vpop.f32.mrb[82].mxu0 }
 0x9fe   :  { %v17650_v60 = vadd.f32 %v7714_v45, %v17560_v24  ;;  %v13778_v30 = vpop.f32.mrb[83].mxu0  ;;  %v14424_v45 = vld [vmem:[%s18114_s5 + $0x34] ss:$8 sps:$4 sm:$0xff]  }
 0x9ff   :  { %8928 = vmatprep.subr.bf16.mxu1 %v14424_v45 }
 0xa00   :  { %13934 = vmatmul.mubr.msk.bf16.gmra.mrb[188].mxu0 %vm2372_vm3, %v17489_v42 }
 0xa01   :  { %13937 = vmatprep.mubr.msk.bf16.mxu0 %vm14538_vm2, %v18143_v25 }
 0xa03   :  { %v7719_v58 = vpop.f32.mrb[84].mxu0 }
 0xa04   :  { %v13781_v43 = vpop.f32.mrb[85].mxu0 }
 0xa05   :  { %v7722_v18 = vpop.f32.mrb[86].mxu0 }
 0xa06   :  { %v13782_v29 = vpop.f32.mrb[87].mxu0 }
 0xa08   :  { %13938 = vmatmul.mubr.msk.bf16.gmra.mrb[192].mxu0 %vm2372_vm3, %v8254_v47 }
 0xa09   :  { %8784 = vmatprep.mubr.bf16.mxu0 %v14539_v32 }
 0xa0b   :  { %v7727_v49 = vpop.f32.mrb[88].mxu0 }
 0xa0c   :  { %v17658_v24 = vadd.f32 %v7727_v49, %v17569_v19  ;;  %v13785_v56 = vpop.f32.mrb[89].mxu0 }
 0xa0d   :  { %v7730_v20 = vpop.f32.mrb[90].mxu0 }
 0xa0e   :  { %v17661_v42 = vadd.f32 %v7730_v20, %v17572_v1  ;;  %v13786_v21 = vpop.f32.mrb[91].mxu0 }
 0xa13   :  { %v7735_v25 = vpop.f32.mrb[92].mxu0 }
 0xa14   :  { %v13789_v39 = vpop.f32.mrb[93].mxu0 }
 0xa15   :  { %v7738_v61 = vpop.f32.mrb[94].mxu0 }
 0xa16   :  { %v13790_v2 = vpop.f32.mrb[95].mxu0 }
 0xa1b   :  { %v7743_v15 = vpop.f32.mrb[96].mxu0 }
 0xa1c   :  { %v17664_v7 = vadd.f32 %v7743_v15, %v17583_v50  ;;  %v13793_v9 = vpop.f32.mrb[97].mxu0  ;;  %v14421_v50 = vld [vmem:[%s18114_s5 + $0x24] ss:$8 sps:$4 sm:$0xff]  }
 0xa1d   :  { %v7746_v8 = vpop.f32.mrb[98].mxu0  ;;  %8866 = vmatprep.subr.bf16.mxu0 %v14421_v50 }
 0xa1e   :  { %v17667_v33 = vadd.f32 %v7746_v8, %v17586_v51  ;;  %v13794_v19 = vpop.f32.mrb[99].mxu0 }
 0xa23   :  { %v7751_v37 = vpop.f32.mrb[100].mxu0 }
 0xa24   :  { %v13797_v1 = vpop.f32.mrb[101].mxu0 }
 0xa25   :  { %v7754_v28 = vpop.f32.mrb[102].mxu0 }
 0xa26   :  { %v13798_v59 = vpop.f32.mrb[103].mxu0 }
 0xa2b   :  { %v7759_v51 = vpop.f32.mrb[104].mxu0 }
 0xa2c   :  { %v17678_v30 = vadd.f32 %v7759_v51, %v17609_v3  ;;  %v13801_v58 = vpop.f32.mrb[105].mxu0 }
 0xa2d   :  { %v7762_v38 = vpop.f32.mrb[106].mxu0 }
 0xa2e   :  { %v17681_v44 = vadd.f32 %v7762_v38, %v17612_v12  ;;  %v13802_v43 = vpop.f32.mrb[107].mxu0 }
 0xa33   :  { %v7896_v18 = vpop.f32.mrb[108].mxu0 }
 0xa34   :  { %v7983_v29 = vadd.f32 %v7896_v18, %v17619_v52  ;;  %v13807_v47 = vpop.f32.mrb[109].mxu0 }
 0xa35   :  { %v7899_v49 = vpop.f32.mrb[110].mxu0 }
 0xa36   :  { %v7984_v56 = vadd.f32 %v7899_v49, %v17622_v26  ;;  %v13808_v20 = vpop.f32.mrb[111].mxu0  ;;  %v17686_v21 = vadd.f32 %v17238_v63, %v7983_v29 }
 0xa38   :  { %v17689_v3 = vadd.f32 %v17240_v17, %v7984_v56 }
 0xa3b   :  { %v7904_v25 = vpop.f32.mrb[112].mxu0 }
 0xa3c   :  { %v13811_v39 = vpop.f32.mrb[113].mxu0 }
 0xa3d   :  { %v7907_v61 = vpop.f32.mrb[114].mxu0 }
 0xa3e   :  { %v13812_v12 = vpop.f32.mrb[115].mxu0 }
 0xa43   :  { %v7912_v2 = vpop.f32.mrb[116].mxu0 }
 0xa44   :  { %v7987_v15 = vadd.f32 %v7912_v2, %v17633_v4  ;;  %v13815_v9 = vpop.f32.mrb[117].mxu0 }
 0xa45   :  { %v7915_v52 = vpop.f32.mrb[118].mxu0 }
 0xa46   :  { %v7988_v8 = vadd.f32 %v7915_v52, %v17636_v14  ;;  %v13816_v19 = vpop.f32.mrb[119].mxu0  ;;  %v17694_v26 = vadd.f32 %v17254_v54, %v7987_v15 }
 0xa48   :  { %v17697_v63 = vadd.f32 %v17256_v57, %v7988_v8 }
 0xa4b   :  { %v7920_v17 = vpop.f32.mrb[120].mxu0 }
 0xa4c   :  { %v13819_v37 = vpop.f32.mrb[121].mxu0 }
 0xa4d   :  { %v7923_v1 = vpop.f32.mrb[122].mxu0 }
 0xa4e   :  { %v13820_v28 = vpop.f32.mrb[123].mxu0 }
 0xa53   :  { %v7928_v59 = vpop.f32.mrb[124].mxu0 }
 0xa54   :  { %v7991_v50 = vadd.f32 %v7928_v59, %v17647_v55  ;;  %v13823_v45 = vpop.f32.mrb[125].mxu0 }
 0xa55   :  { %v7931_v4 = vpop.f32.mrb[126].mxu0 }
 0xa56   :  { %v7992_v51 = vadd.f32 %v7931_v4, %v17650_v60  ;;  %v13824_v58 = vpop.f32.mrb[127].mxu0  ;;  %v17702_v14 = vadd.f32 %v17270_v36, %v7991_v50 }
 0xa58   :  { %v17705_v54 = vadd.f32 %v17272_v5, %v7992_v51  ;;  %v17735_v51 = vld [vmem:[%s18113_s4] ss:$0 sm:$0xff] }
 0xa5b   :  { %v7936_v57 = vpop.f32.mrb[128].mxu0 }
 0xa5c   :  { %v13827_v38 = vpop.f32.mrb[129].mxu0 }
 0xa5d   :  { %v7939_v43 = vpop.f32.mrb[130].mxu0 }
 0xa5e   :  { %v13828_v18 = vpop.f32.mrb[131].mxu0 }
 0xa63   :  { %v7944_v29 = vpop.f32.mrb[132].mxu0 }
 0xa64   :  { %v7995_v47 = vadd.f32 %v7944_v29, %v17658_v24  ;;  %v13831_v49 = vpop.f32.mrb[133].mxu0 }
 0xa65   :  { %v7947_v55 = vpop.f32.mrb[134].mxu0 }
 0xa66   :  { %v7996_v56 = vadd.f32 %v7947_v55, %v17661_v42  ;;  %v13832_v20 = vpop.f32.mrb[135].mxu0  ;;  %v17710_v60 = vadd.f32 %v17290_v27, %v7995_v47 }
 0xa68   :  { %v17713_v36 = vadd.f32 %v17292_v23, %v7996_v56 }
 0xa6b   :  { %v7952_v5 = vpop.f32.mrb[136].mxu0 }
 0xa6c   :  { %v13835_v25 = vpop.f32.mrb[137].mxu0  ;;  %v14427_v5 = vld [vmem:[%s18114_s5 + $0x44] ss:$8 sps:$4 sm:$0xff]  }
 0xa6d   :  { %v7955_v39 = vpop.f32.mrb[138].mxu0  ;;  %v14430_v25 = vld [vmem:[%s18114_s5 + $0x54] ss:$8 sps:$4 sm:$0xff]  }
 0xa6e   :  { %v13836_v61 = vpop.f32.mrb[139].mxu0 }
 0xa73   :  { %v7960_v12 = vpop.f32.mrb[140].mxu0 }
 0xa74   :  { %v7999_v2 = vadd.f32 %v7960_v12, %v17664_v7  ;;  %v13839_v15 = vpop.f32.mrb[141].mxu0 }
 0xa75   :  { %v7963_v24 = vpop.f32.mrb[142].mxu0 }
 0xa76   :  { %v8000_v9 = vadd.f32 %v7963_v24, %v17667_v33  ;;  %v13840_v52 = vpop.f32.mrb[143].mxu0  ;;  %v17718_v42 = vadd.f32 %v17306_v13, %v7999_v2 }
 0xa78   :  { %v17721_v27 = vadd.f32 %v17308_v53, %v8000_v9 }
 0xa7b   :  { %v7968_v23 = vpop.f32.mrb[144].mxu0 }
 0xa7c   :  { %v13843_v8 = vpop.f32.mrb[145].mxu0 }
 0xa7d   :  { %v7971_v19 = vpop.f32.mrb[146].mxu0 }
 0xa7e   :  { %v13844_v17 = vpop.f32.mrb[147].mxu0 }
 0xa7f   :  { %v14425_v17 = vld [vmem:[%s18114_s5 + $0x40] ss:$8 sps:$4 sm:$0xff]  }
 0xa83   :  { %v7976_v37 = vpop.f32.mrb[148].mxu0 }
 0xa84   :  { %v8003_v1 = vadd.f32 %v7976_v37, %v17678_v30  ;;  %v13847_v28 = vpop.f32.mrb[149].mxu0  ;;  %v14428_v37 = vld [vmem:[%s18114_s5 + $0x50] ss:$8 sps:$4 sm:$0xff]  }
 0xa85   :  { %v7979_v7 = vpop.f32.mrb[150].mxu0 }
 0xa86   :  { %v8004_v59 = vadd.f32 %v7979_v7, %v17681_v44  ;;  %v13848_v50 = vpop.f32.mrb[151].mxu0  ;;  %v17726_v33 = vadd.f32 %v17322_v31, %v8003_v1 }
 0xa87   :  { %v14436_v50 = vld [vmem:[%s18114_s5 + $0x74] ss:$8 sps:$4 sm:$0xff]  }
 0xa88   :  { %v17729_v13 = vadd.f32 %v17327_v35, %v8004_v59 }
 0xa8b   :  { %v8330_v53 = vpop.f32.mrb[152].mxu0 }
 0xa8c   :  { %v8417_v45 = vadd.f32 %v8330_v53, %v17686_v21  ;;  %v13899_v4 = vpop.f32.mrb[153].mxu0 }
 0xa8d   :  { %v8333_v30 = vpop.f32.mrb[154].mxu0 }
 0xa8e   :  { %v8634_v58 = vadd.f32 %v17336_v62, %v8417_v45  ;;  %v8418_v44 = vadd.f32 %v8333_v30, %v17689_v3  ;;  %v13900_v57 = vpop.f32.mrb[155].mxu0  ;;  %v14419_v62 = vld [vmem:[%s18114_s5 + $0x20] ss:$8 sps:$4 sm:$0xff]  }
 0xa8f   :  { %v14434_v57 = vld [vmem:[%s18114_s5 + $0x70] ss:$8 sps:$4 sm:$0xff]  }
 0xa90   :  { %v8663_v31 = vadd.f32 %v17735_v51, %v8634_v58  ;;  %v8635_v35 = vadd.f32 %v17338_v10, %v8418_v44  ;;  %v14422_v10 = vld [vmem:[%s18114_s5 + $0x30] ss:$8 sps:$4 sm:$0xff]   ;;  %v14431_v44 = vld [vmem:[%s18114_s5 + $0x60] ss:$8 sps:$4 sm:$0xff]  }
 0xa92   :  { %v8685_v38 = vmax.f32 %v8663_v31, 0.0  ;;  %v8664_v43 = vadd.f32 %v17735_v51, %v8635_v35 }
 0xa93   :  { %v8338_v21 = vpop.f32.mrb[156].mxu0 }
 0xa94   :  { %8707 = vst.msk [vmem:[#allocation3 + $0xb0] sm:$0xff] %vm2372_vm3, %v8685_v38  ;;  %v8686_v18 = vmax.f32 %v8664_v43, 0.0  ;;  %v13903_v29 = vpop.f32.mrb[157].mxu0 }
 0xa95   :  { %v8341_v47 = vpop.f32.mrb[158].mxu0 }
 0xa96   :  { %8708 = vst.msk [vmem:[#allocation3 + $0xb8] sm:$0xff] %vm2372_vm3, %v8686_v18  ;;  %v13904_v49 = vpop.f32.mrb[159].mxu0  ;;  %v14439_v18 = vld [vmem:[%s18114_s5 + $0x84] ss:$8 sps:$4 sm:$0xff]  }
 0xa97   :  { %v14442_v49 = vld [vmem:[%s18114_s5 + $0x94] ss:$8 sps:$4 sm:$0xff]  }
 0xa9b   :  { %v8729_v3 = vld [vmem:[#allocation3] ss:$176 sm:$0x3]  ;;  %v8734_v55 = vld [vmem:[#allocation3 + $0x2] ss:$176 sm:$0x3] }
 0xa9c   :  { %v8730_v56 = vpack.c.bf16 %v8729_v3, %v8729_v3  ;;  %v8735_v20 = vpack.c.bf16 %v8734_v55, %v8734_v55  ;;  %v8346_v39 = vpop.f32.mrb[160].mxu0  ;;  %v8848_v2 = vld [vmem:[#allocation3 + $0x4] ss:$176 sm:$0x3] }
 0xa9d   :  { %v8421_v61 = vadd.f32 %v8346_v39, %v17694_v26  ;;  %v13907_v12 = vpop.f32.mrb[161].mxu0  ;;  %v8910_v24 = vld [vmem:[#allocation3 + $0x6] ss:$176 sm:$0x3]  ;;  %v8849_v1 = vpack.c.bf16 %v8848_v2, %v8848_v2 }
 0xa9e   :  { %11920 = vmatmul.mubr.msk.bf16.vlgmr.msra.gmra.mrb[196].mxu0 %vm2372_vm3, %v8735_v20  ;;  %11923 = vmatmul.mubr.msk.bf16.vlgmr.msra.gmra.mrb[208].mxu1 %vm2372_vm3, %v8730_v56  ;;  %v8349_v15 = vpop.f32.mrb[162].mxu0  ;;  %v8972_v4 = vld [vmem:[#allocation3 + $0x8] ss:$176 sm:$0x3]  ;;  %v14445_v2 = vld [vmem:[%s18114_s5 + $0xa4] ss:$8 sps:$4 sm:$0xff]  }
 0xa9f   :  { %8867 = vmatpush1.bf16.msra.mxu0 %v14419_v62  ;;  %8929 = vmatpush1.bf16.msra.mxu1 %v14422_v10  ;;  %v8638_v9 = vadd.f32 %v17354_v48, %v8421_v61  ;;  %v8422_v52 = vadd.f32 %v8349_v15, %v17697_v63  ;;  %v13908_v23 = vpop.f32.mrb[163].mxu0  ;;  %v8911_v48 = vpack.c.bf16 %v8910_v24, %v8910_v24  ;;  %v9034_v30 = vld [vmem:[#allocation3 + $0xa] ss:$176 sm:$0x3]  ;;  %v14448_v15 = vld [vmem:[%s18114_s5 + $0xb4] ss:$8 sps:$4 sm:$0xff]  }
 0xaa0   :  { %8898 = vmatprep.mubr.bf16.mxu0 %v14539_v32  ;;  %8960 = vmatprep.mubr.bf16.mxu1 %v14539_v32  ;;  %v8973_v31 = vpack.c.bf16 %v8972_v4, %v8972_v4  ;;  %v9035_v35 = vpack.c.bf16 %v9034_v30, %v9034_v30  ;;  %v14437_v20 = vld [vmem:[%s18114_s5 + $0x80] ss:$8 sps:$4 sm:$0xff]  }
 0xaa1   :  { %8990 = vmatprep.subr.bf16.mxu0 %v14427_v5  ;;  %9052 = vmatprep.subr.bf16.mxu1 %v14430_v25  ;;  %v8667_v8 = vadd.f32 %v17735_v51, %v8638_v9  ;;  %v8639_v26 = vadd.f32 %v17356_v0, %v8422_v52  ;;  %v14433_v0 = vld [vmem:[%s18114_s5 + $0x64] ss:$8 sps:$4 sm:$0xff]   ;;  %v14443_v23 = vld [vmem:[%s18114_s5 + $0xa0] ss:$8 sps:$4 sm:$0xff]  }
 0xaa2   :  { %v14449_v30 = vld [vmem:[%s18114_s5 + $0xc0] ss:$8 sps:$4 sm:$0xff]  }
 0xaa3   :  { %v8354_v19 = vpop.f32.mrb[164].mxu0  ;;  %v8689_v63 = vmax.f32 %v8667_v8, 0.0  ;;  %v8668_v7 = vadd.f32 %v17735_v51, %v8639_v26  ;;  %v14446_v8 = vld [vmem:[%s18114_s5 + $0xb0] ss:$8 sps:$4 sm:$0xff]  }
 0xaa4   :  { %v13911_v28 = vpop.f32.mrb[165].mxu0 }
 0xaa5   :  { %v8357_v59 = vpop.f32.mrb[166].mxu0  ;;  %8711 = vst.msk [vmem:[#allocation3 + $0xd0] sm:$0xff] %vm2372_vm3, %v8689_v63  ;;  %v8690_v45 = vmax.f32 %v8668_v7, 0.0 }
 0xaa6   :  { %v13912_v53 = vpop.f32.mrb[167].mxu0  ;;  %11928 = vmatmul.mubr.msk.bf16.vlgmr.msra.gmra.mrb[200].mxu0 %vm2372_vm3, %v8849_v1  ;;  %11933 = vmatmul.mubr.msk.bf16.vlgmr.msra.gmra.mrb[212].mxu1 %vm2372_vm3, %v8911_v48 }
 0xaa7   :  { %8991 = vmatpush1.bf16.msra.mxu0 %v14425_v17  ;;  %9053 = vmatpush1.bf16.msra.mxu1 %v14428_v37  ;;  %8712 = vst.msk [vmem:[#allocation3 + $0xd8] sm:$0xff] %vm2372_vm3, %v8690_v45  ;;  %v14451_v17 = vld [vmem:[%s18114_s5 + $0xc4] ss:$8 sps:$4 sm:$0xff]   ;;  %v14454_v37 = vld [vmem:[%s18114_s5 + $0xd4] ss:$8 sps:$4 sm:$0xff]  }
 0xaa8   :  { %9022 = vmatprep.mubr.bf16.mxu0 %v14539_v32  ;;  %9084 = vmatprep.mubr.bf16.mxu1 %v14539_v32 }
 0xaa9   :  { %9114 = vmatprep.subr.bf16.mxu0 %v14433_v0  ;;  %9176 = vmatprep.subr.bf16.mxu1 %v14436_v50 }
 0xaab   :  { %v8362_v58 = vpop.f32.mrb[168].mxu0 }
 0xaac   :  { %v8425_v38 = vadd.f32 %v8362_v58, %v17702_v14  ;;  %v13915_v43 = vpop.f32.mrb[169].mxu0  ;;  %v9096_v14 = vld [vmem:[#allocation3 + $0x20] ss:$176 sm:$0x3] }
 0xaad   :  { %v8365_v21 = vpop.f32.mrb[170].mxu0  ;;  %v9097_v5 = vpack.c.bf16 %v9096_v14, %v9096_v14  ;;  %v9220_v9 = vld [vmem:[#allocation3 + $0x24] ss:$176 sm:$0x3]  ;;  %v14452_v58 = vld [vmem:[%s18114_s5 + $0xd0] ss:$8 sps:$4 sm:$0xff]  }
 0xaae   :  { %v8642_v29 = vadd.f32 %v17372_v16, %v8425_v38  ;;  %v8426_v47 = vadd.f32 %v8365_v21, %v17705_v54  ;;  %11938 = vmatmul.mubr.msk.bf16.vlgmr.msra.gmra.mrb[204].mxu0 %vm2372_vm3, %v8973_v31  ;;  %11943 = vmatmul.mubr.msk.bf16.vlgmr.msra.gmra.mrb[216].mxu1 %vm2372_vm3, %v9035_v35  ;;  %v9158_v16 = vld [vmem:[#allocation3 + $0x22] ss:$176 sm:$0x3]  ;;  %v13916_v3 = vpop.f32.mrb[171].mxu0  ;;  %v9221_v26 = vpack.c.bf16 %v9220_v9, %v9220_v9  ;;  %v14460_v38 = vld [vmem:[%s18114_s5 + $0xf4] ss:$8 sps:$4 sm:$0xff]  }
 0xaaf   :  { %9115 = vmatpush1.bf16.msra.mxu0 %v14431_v44  ;;  %9177 = vmatpush1.bf16.msra.mxu1 %v14434_v57  ;;  %v9159_v25 = vpack.c.bf16 %v9158_v16, %v9158_v16  ;;  %v9282_v52 = vld [vmem:[#allocation3 + $0x26] ss:$176 sm:$0x3]  ;;  %v9344_v63 = vld [vmem:[#allocation3 + $0x28] ss:$176 sm:$0x3] }
 0xab0   :  { %v8671_v62 = vadd.f32 %v17735_v51, %v8642_v29  ;;  %v8643_v10 = vadd.f32 %v17374_v46, %v8426_v47  ;;  %9146 = vmatprep.mubr.bf16.mxu0 %v14539_v32  ;;  %9208 = vmatprep.mubr.bf16.mxu1 %v14539_v32  ;;  %v14440_v46 = vld [vmem:[%s18114_s5 + $0x90] ss:$8 sps:$4 sm:$0xff]   ;;  %v9283_v19 = vpack.c.bf16 %v9282_v52, %v9282_v52 }
 0xab1   :  { %9238 = vmatprep.subr.bf16.mxu0 %v14439_v18  ;;  %9300 = vmatprep.subr.bf16.mxu1 %v14442_v49  ;;  %v9406_v59 = vld [vmem:[#allocation3 + $0x2a] ss:$176 sm:$0x3]  ;;  %v9345_v44 = vpack.c.bf16 %v9344_v63, %v9344_v63 }
 0xab2   :  { %v8693_v54 = vmax.f32 %v8671_v62, 0.0  ;;  %v8672_v55 = vadd.f32 %v17735_v51, %v8643_v10  ;;  %v14455_v49 = vld [vmem:[%s18114_s5 + $0xe0] ss:$8 sps:$4 sm:$0xff]   ;;  %v14458_v14 = vld [vmem:[%s18114_s5 + $0xf0] ss:$8 sps:$4 sm:$0xff]  }
 0xab3   :  { %v8370_v56 = vpop.f32.mrb[172].mxu0 }
 0xab4   :  { %8715 = vst.msk [vmem:[#allocation3 + $0xf0] sm:$0xff] %vm2372_vm3, %v8693_v54  ;;  %v8694_v39 = vmax.f32 %v8672_v55, 0.0  ;;  %v13919_v61 = vpop.f32.mrb[173].mxu0  ;;  %v14463_v55 = vld [vmem:[%s18114_s5 + $0x104] ss:$8 sps:$4 sm:$0xff]  }
 0xab5   :  { %v8373_v12 = vpop.f32.mrb[174].mxu0 }
 0xab6   :  { %8716 = vst.msk [vmem:[#allocation3 + $0xf8] sm:$0xff] %vm2372_vm3, %v8694_v39  ;;  %v13920_v24 = vpop.f32.mrb[175].mxu0  ;;  %11948 = vmatmul.mubr.msk.bf16.vlgmr.msra.gmra.mrb[208].mxu0 %vm2372_vm3, %v9097_v5  ;;  %11953 = vmatmul.mubr.msk.bf16.vlgmr.msra.gmra.mrb[220].mxu1 %vm2372_vm3, %v9159_v25 }
 0xab7   :  { %9239 = vmatpush1.bf16.msra.mxu0 %v14437_v20  ;;  %9301 = vmatpush1.bf16.msra.mxu1 %v14440_v46  ;;  %v14466_v46 = vld [vmem:[%s18114_s5 + $0x114] ss:$8 sps:$4 sm:$0xff]  }
 0xab8   :  { %9270 = vmatprep.mubr.bf16.mxu0 %v14539_v32  ;;  %9332 = vmatprep.mubr.bf16.mxu1 %v14539_v32 }
 0xab9   :  { %9362 = vmatprep.subr.bf16.mxu0 %v14445_v2  ;;  %9424 = vmatprep.subr.bf16.mxu1 %v14448_v15  ;;  %v14461_v2 = vld [vmem:[%s18114_s5 + $0x100] ss:$8 sps:$4 sm:$0xff]  }
 0xabb   :  { %v8378_v1 = vpop.f32.mrb[176].mxu0  ;;  %v9468_v18 = vld [vmem:[#allocation3 + $0x40] ss:$176 sm:$0x3] }
 0xabc   :  { %v8429_v48 = vadd.f32 %v8378_v1, %v17710_v60  ;;  %v13923_v28 = vpop.f32.mrb[177].mxu0  ;;  %v9530_v29 = vld [vmem:[#allocation3 + $0x42] ss:$176 sm:$0x3]  ;;  %v9469_v62 = vpack.c.bf16 %v9468_v18, %v9468_v18 }
 0xabd   :  { %v8381_v7 = vpop.f32.mrb[178].mxu0  ;;  %v9531_v10 = vpack.c.bf16 %v9530_v29, %v9530_v29  ;;  %v14467_v1 = vld [vmem:[%s18114_s5 + $0x120] ss:$8 sps:$4 sm:$0xff]   ;;  %v14482_v18 = vld [vmem:[%s18114_s5 + $0x170] ss:$8 sps:$4 sm:$0xff]  }
 0xabe   :  { %11958 = vmatmul.mubr.msk.bf16.vlgmr.msra.gmra.mrb[212].mxu0 %vm2372_vm3, %v9221_v26  ;;  %11963 = vmatmul.mubr.msk.bf16.vlgmr.msra.gmra.mrb[224].mxu1 %vm2372_vm3, %v9283_v19  ;;  %v8646_v0 = vadd.f32 %v17393_v11, %v8429_v48  ;;  %v8430_v50 = vadd.f32 %v8381_v7, %v17713_v36  ;;  %v13924_v53 = vpop.f32.mrb[179].mxu0  ;;  %v9407_v11 = vpack.c.bf16 %v9406_v59, %v9406_v59  ;;  %v14472_v26 = vld [vmem:[%s18114_s5 + $0x134] ss:$8 sps:$4 sm:$0xff]   ;;  %v14470_v48 = vld [vmem:[%s18114_s5 + $0x130] ss:$8 sps:$4 sm:$0xff]  }
 0xabf   :  { %9363 = vmatpush1.bf16.msra.mxu0 %v14443_v23  ;;  %9425 = vmatpush1.bf16.msra.mxu1 %v14446_v8  ;;  %v14469_v8 = vld [vmem:[%s18114_s5 + $0x124] ss:$8 sps:$4 sm:$0xff]   ;;  %v14478_v59 = vld [vmem:[%s18114_s5 + $0x154] ss:$8 sps:$4 sm:$0xff]  }
 0xac0   :  { %9394 = vmatprep.mubr.bf16.mxu0 %v14539_v32  ;;  %9456 = vmatprep.mubr.bf16.mxu1 %v14539_v32  ;;  %v8675_v45 = vadd.f32 %v17735_v51, %v8646_v0  ;;  %v8647_v60 = vadd.f32 %v17395_v41, %v8430_v50  ;;  %v14457_v41 = vld [vmem:[%s18114_s5 + $0xe4] ss:$8 sps:$4 sm:$0xff]  }
 0xac1   :  { %9486 = vmatprep.subr.bf16.mxu0 %v14451_v17  ;;  %9548 = vmatprep.subr.bf16.mxu1 %v14454_v37  ;;  %v9716_v17 = vld [vmem:[#allocation3 + $0x48] ss:$176 sm:$0x3]  ;;  %v9778_v37 = vld [vmem:[#allocation3 + $0x4a] ss:$176 sm:$0x3] }
 0xac2   :  { %v8697_v36 = vmax.f32 %v8675_v45, 0.0  ;;  %v8676_v31 = vadd.f32 %v17735_v51, %v8647_v60  ;;  %v9717_v28 = vpack.c.bf16 %v9716_v17, %v9716_v17  ;;  %v9779_v63 = vpack.c.bf16 %v9778_v37, %v9778_v37  ;;  %v14475_v7 = vld [vmem:[%s18114_s5 + $0x144] ss:$8 sps:$4 sm:$0xff]   ;;  %v14506_v17 = vld [vmem:[%s18114_s5 + $0x1f0] ss:$8 sps:$4 sm:$0xff]  }
 0xac3   :  { %v8386_v4 = vpop.f32.mrb[180].mxu0 }
 0xac4   :  { %v13927_v57 = vpop.f32.mrb[181].mxu0  ;;  %8719 = vst.msk [vmem:[#allocation3 + $0x110] sm:$0xff] %vm2372_vm3, %v8697_v36  ;;  %v8698_v21 = vmax.f32 %v8676_v31, 0.0  ;;  %v14476_v36 = vld [vmem:[%s18114_s5 + $0x150] ss:$8 sps:$4 sm:$0xff]  }
 0xac5   :  { %v8389_v35 = vpop.f32.mrb[182].mxu0  ;;  %v14473_v57 = vld [vmem:[%s18114_s5 + $0x140] ss:$8 sps:$4 sm:$0xff]  }
 0xac6   :  { %v13928_v43 = vpop.f32.mrb[183].mxu0  ;;  %11968 = vmatmul.mubr.msk.bf16.vlgmr.msra.gmra.mrb[216].mxu0 %vm2372_vm3, %v9345_v44  ;;  %11973 = vmatmul.mubr.msk.bf16.vlgmr.msra.gmra.mrb[228].mxu1 %vm2372_vm3, %v9407_v11  ;;  %8720 = vst.msk [vmem:[#allocation3 + $0x118] sm:$0xff] %vm2372_vm3, %v8698_v21  ;;  %v14479_v21 = vld [vmem:[%s18114_s5 + $0x160] ss:$8 sps:$4 sm:$0xff]  }
 0xac7   :  { %9487 = vmatpush1.bf16.msra.mxu0 %v14449_v30  ;;  %9549 = vmatpush1.bf16.msra.mxu1 %v14452_v58 }
 0xac8   :  { %9518 = vmatprep.mubr.bf16.mxu0 %v14539_v32  ;;  %9580 = vmatprep.mubr.bf16.mxu1 %v14539_v32 }
 0xac9   :  { %9610 = vmatprep.subr.bf16.mxu0 %v14457_v41  ;;  %9672 = vmatprep.subr.bf16.mxu1 %v14460_v38  ;;  %v14481_v41 = vld [vmem:[%s18114_s5 + $0x164] ss:$8 sps:$4 sm:$0xff]  }
 0xacb   :  { %v8394_v47 = vpop.f32.mrb[184].mxu0  ;;  %v9840_v45 = vld [vmem:[#allocation3 + $0x60] ss:$176 sm:$0x3] }
 0xacc   :  { %v8433_v16 = vadd.f32 %v8394_v47, %v17718_v42  ;;  %v13931_v3 = vpop.f32.mrb[185].mxu0  ;;  %v9592_v42 = vld [vmem:[#allocation3 + $0x44] ss:$176 sm:$0x3]  ;;  %v9841_v31 = vpack.c.bf16 %v9840_v45, %v9840_v45 }
 0xacd   :  { %v8397_v54 = vpop.f32.mrb[186].mxu0  ;;  %v9593_v15 = vpack.c.bf16 %v9592_v42, %v9592_v42  ;;  %v9902_v4 = vld [vmem:[#allocation3 + $0x62] ss:$176 sm:$0x3]  ;;  %v14517_v45 = vld [vmem:[%s18114_s5 + $0x224] ss:$8 sps:$4 sm:$0xff]  }
 0xace   :  { %v8650_v56 = vadd.f32 %v17415_v6, %v8433_v16  ;;  %v8434_v20 = vadd.f32 %v8397_v54, %v17721_v27  ;;  %11978 = vmatmul.mubr.msk.bf16.vlgmr.msra.gmra.mrb[220].mxu0 %vm2372_vm3, %v9469_v62  ;;  %11983 = vmatmul.mubr.msk.bf16.vlgmr.msra.gmra.mrb[232].mxu1 %vm2372_vm3, %v9531_v10  ;;  %v9654_v6 = vld [vmem:[#allocation3 + $0x46] ss:$176 sm:$0x3]  ;;  %v13932_v39 = vpop.f32.mrb[187].mxu0  ;;  %v9903_v35 = vpack.c.bf16 %v9902_v4, %v9902_v4  ;;  %v14485_v16 = vld [vmem:[%s18114_s5 + $0x180] ss:$8 sps:$4 sm:$0xff]  }
 0xacf   :  { %9611 = vmatpush1.bf16.msra.mxu0 %v14455_v49  ;;  %9673 = vmatpush1.bf16.msra.mxu1 %v14458_v14  ;;  %v9655_v24 = vpack.c.bf16 %v9654_v6, %v9654_v6  ;;  %v10026_v43 = vld [vmem:[#allocation3 + $0x66] ss:$176 sm:$0x3]  ;;  %v10088_v62 = vld [vmem:[#allocation3 + $0x68] ss:$176 sm:$0x3] }
 0xad0   :  { %v8679_v5 = vadd.f32 %v17735_v51, %v8650_v56  ;;  %v8651_v25 = vadd.f32 %v17417_v34, %v8434_v20  ;;  %9642 = vmatprep.mubr.bf16.mxu0 %v14539_v32  ;;  %9704 = vmatprep.mubr.bf16.mxu1 %v14539_v32  ;;  %v14464_v34 = vld [vmem:[%s18114_s5 + $0x110] ss:$8 sps:$4 sm:$0xff]   ;;  %v10027_v47 = vpack.c.bf16 %v10026_v43, %v10026_v43  ;;  %v14487_v49 = vld [vmem:[%s18114_s5 + $0x184] ss:$8 sps:$4 sm:$0xff]   ;;  %v14490_v14 = vld [vmem:[%s18114_s5 + $0x194] ss:$8 sps:$4 sm:$0xff]  }
 0xad1   :  { %9734 = vmatprep.subr.bf16.mxu0 %v14463_v55  ;;  %9796 = vmatprep.subr.bf16.mxu1 %v14466_v46  ;;  %v10150_v10 = vld [vmem:[#allocation3 + $0x6a] ss:$176 sm:$0x3]  ;;  %v10089_v54 = vpack.c.bf16 %v10088_v62, %v10088_v62  ;;  %v14493_v56 = vld [vmem:[%s18114_s5 + $0x1a4] ss:$8 sps:$4 sm:$0xff]  }
 0xad2   :  { %v8701_v27 = vmax.f32 %v8679_v5, 0.0  ;;  %v8680_v61 = vadd.f32 %v17735_v51, %v8651_v25  ;;  %v14488_v3 = vld [vmem:[%s18114_s5 + $0x190] ss:$8 sps:$4 sm:$0xff]   ;;  %v10151_v55 = vpack.c.bf16 %v10150_v10, %v10150_v10  ;;  %v14496_v20 = vld [vmem:[%s18114_s5 + $0x1b4] ss:$8 sps:$4 sm:$0xff]  }
 0xad3   :  { %v8402_v12 = vpop.f32.mrb[188].mxu0  ;;  %v14491_v5 = vld [vmem:[%s18114_s5 + $0x1a0] ss:$8 sps:$4 sm:$0xff]   ;;  %v14494_v25 = vld [vmem:[%s18114_s5 + $0x1b0] ss:$8 sps:$4 sm:$0xff]  }
 0xad4   :  { %8723 = vst.msk [vmem:[#allocation3 + $0x130] sm:$0xff] %vm2372_vm3, %v8701_v27  ;;  %v8702_v9 = vmax.f32 %v8680_v61, 0.0  ;;  %v13935_v52 = vpop.f32.mrb[189].mxu0  ;;  %v14499_v27 = vld [vmem:[%s18114_s5 + $0x1c4] ss:$8 sps:$4 sm:$0xff]  }
 0xad5   :  { %v8405_v23 = vpop.f32.mrb[190].mxu0  ;;  %v14502_v61 = vld [vmem:[%s18114_s5 + $0x1d4] ss:$8 sps:$4 sm:$0xff]   ;;  %v14505_v52 = vld [vmem:[%s18114_s5 + $0x1e4] ss:$8 sps:$4 sm:$0xff]  }
 0xad6   :  { %8724 = vst.msk [vmem:[#allocation3 + $0x138] sm:$0xff] %vm2372_vm3, %v8702_v9  ;;  %v13936_v19 = vpop.f32.mrb[191].mxu0  ;;  %11988 = vmatmul.mubr.msk.bf16.vlgmr.msra.gmra.mrb[224].mxu0 %vm2372_vm3, %v9593_v15  ;;  %11993 = vmatmul.mubr.msk.bf16.vlgmr.msra.gmra.mrb[236].mxu1 %vm2372_vm3, %v9655_v24  ;;  %v14500_v15 = vld [vmem:[%s18114_s5 + $0x1d0] ss:$8 sps:$4 sm:$0xff]   ;;  %v14508_v23 = vld [vmem:[%s18114_s5 + $0x1f4] ss:$8 sps:$4 sm:$0xff]  }
 0xad7   :  { %9735 = vmatpush1.bf16.msra.mxu0 %v14461_v2  ;;  %9797 = vmatpush1.bf16.msra.mxu1 %v14464_v34  ;;  %v14497_v34 = vld [vmem:[%s18114_s5 + $0x1c0] ss:$8 sps:$4 sm:$0xff]  }
 0xad8   :  { %9766 = vmatprep.mubr.bf16.mxu0 %v14539_v32  ;;  %9828 = vmatprep.mubr.bf16.mxu1 %v14539_v32  ;;  %v14503_v19 = vld [vmem:[%s18114_s5 + $0x1e0] ss:$8 sps:$4 sm:$0xff]  }
 0xad9   :  { %9858 = vmatprep.subr.bf16.mxu0 %v14469_v8  ;;  %9920 = vmatprep.subr.bf16.mxu1 %v14472_v26 }
 0xadb   :  { %v8410_v0 = vpop.f32.mrb[192].mxu0  ;;  %v10212_v46 = vld [vmem:[#allocation3 + $0x80] ss:$176 sm:$0x3] }
 0xadc   :  { %v8437_v50 = vadd.f32 %v8410_v0, %v17726_v33  ;;  %v13939_v53 = vpop.f32.mrb[193].mxu0  ;;  %v10274_v42 = vld [vmem:[#allocation3 + $0x82] ss:$176 sm:$0x3]  ;;  %v10213_v6 = vpack.c.bf16 %v10212_v46, %v10212_v46 }
 0xadd   :  { %v8413_v60 = vpop.f32.mrb[194].mxu0  ;;  %v10275_v39 = vpack.c.bf16 %v10274_v42, %v10274_v42  ;;  %v10336_v12 = vld [vmem:[#allocation3 + $0x84] ss:$176 sm:$0x3]  ;;  %v14512_v0 = vld [vmem:[%s18114_s5 + $0x210] ss:$8 sps:$4 sm:$0xff]  }
 0xade   :  { %11998 = vmatmul.mubr.msk.bf16.vlgmr.msra.gmra.mrb[228].mxu0 %vm2372_vm3, %v9717_v28  ;;  %12003 = vmatmul.mubr.msk.bf16.vlgmr.msra.gmra.mrb[240].mxu1 %vm2372_vm3, %v9779_v63  ;;  %v8654_v30 = vadd.f32 %v17437_v22, %v8437_v50  ;;  %v8438_v58 = vadd.f32 %v8413_v60, %v17729_v13  ;;  %v13940_v44 = vpop.f32.mrb[195].mxu0  ;;  %v10398_v2 = vld [vmem:[#allocation3 + $0x86] ss:$176 sm:$0x3]  ;;  %v10337_v24 = vpack.c.bf16 %v10336_v12, %v10336_v12 }
 0xadf   :  { %9859 = vmatpush1.bf16.msra.mxu0 %v14467_v1  ;;  %9921 = vmatpush1.bf16.msra.mxu1 %v14470_v48  ;;  %v10399_v9 = vpack.c.bf16 %v10398_v2, %v10398_v2  ;;  %v10460_v8 = vld [vmem:[#allocation3 + $0x88] ss:$176 sm:$0x3]  ;;  %v10522_v26 = vld [vmem:[#allocation3 + $0x8a] ss:$176 sm:$0x3] }
 0xae0   :  { %9890 = vmatprep.mubr.bf16.mxu0 %v14539_v32  ;;  %9952 = vmatprep.mubr.bf16.mxu1 %v14539_v32  ;;  %v8683_v11 = vadd.f32 %v17735_v51, %v8654_v30  ;;  %v8655_v33 = vadd.f32 %v17442_v40, %v8438_v58  ;;  %v14484_v40 = vld [vmem:[%s18114_s5 + $0x174] ss:$8 sps:$4 sm:$0xff]   ;;  %v10461_v37 = vpack.c.bf16 %v10460_v8, %v10460_v8  ;;  %v14511_v48 = vld [vmem:[%s18114_s5 + $0x204] ss:$8 sps:$4 sm:$0xff]   ;;  %v14515_v58 = vld [vmem:[%s18114_s5 + $0x220] ss:$8 sps:$4 sm:$0xff]  }
 0xae1   :  { %9982 = vmatprep.subr.bf16.mxu0 %v14475_v7  ;;  %10044 = vmatprep.subr.bf16.mxu1 %v14478_v59  ;;  %v10523_v1 = vpack.c.bf16 %v10522_v26, %v10522_v26  ;;  %v14514_v28 = vld [vmem:[%s18114_s5 + $0x214] ss:$8 sps:$4 sm:$0xff]   ;;  %v14509_v59 = vld [vmem:[%s18114_s5 + $0x200] ss:$8 sps:$4 sm:$0xff]   ;;  %v14518_v44 = vld [vmem:[%s18114_s5 + $0x230] ss:$8 sps:$4 sm:$0xff]  }
 0xae2   :  { %v8705_v22 = vmax.f32 %v8683_v11, 0.0  ;;  %v8684_v13 = vadd.f32 %v17735_v51, %v8655_v33  ;;  %v9964_v51 = vld [vmem:[#allocation3 + $0x64] ss:$176 sm:$0x3]  ;;  %v14533_v26 = vld [vmem:[%s18115_s7 + $0x70] sm:$0xff]  }
 0xae3   :  { %v9965_v29 = vpack.c.bf16 %v9964_v51, %v9964_v51  ;;  %v14520_v60 = vld [vmem:[%s18114_s5 + $0x234] ss:$8 sps:$4 sm:$0xff]  }
 0xae4   :  { %8727 = vst.msk [vmem:[#allocation3 + $0x150] sm:$0xff] %vm2372_vm3, %v8705_v22  ;;  %v8706_v38 = vmax.f32 %v8684_v13, 0.0  ;;  %v14521_v22 = vld [vmem:[%s18115_s7 + $0x40] sm:$0xff]  }
 0xae5   :  { %v14522_v13 = vld [vmem:[%s18115_s7] sm:$0xff]  }
 0xae6   :  { %12008 = vmatmul.mubr.msk.bf16.vlgmr.msra.gmra.mrb[232].mxu0 %vm2372_vm3, %v9841_v31  ;;  %12013 = vmatmul.mubr.msk.bf16.vlgmr.msra.gmra.mrb[244].mxu1 %vm2372_vm3, %v9903_v35  ;;  %8728 = vst.msk [vmem:[#allocation3 + $0x158] sm:$0xff] %vm2372_vm3, %v8706_v38  ;;  %v14526_v38 = vld [vmem:[%s18115_s7 + $0x10] sm:$0xff]  }
 0xae7   :  { %9983 = vmatpush1.bf16.msra.mxu0 %v14473_v57  ;;  %10045 = vmatpush1.bf16.msra.mxu1 %v14476_v36 }
 0xae8   :  { %10014 = vmatprep.mubr.bf16.mxu0 %v14539_v32  ;;  %10076 = vmatprep.mubr.bf16.mxu1 %v14539_v32 }
 0xae9   :  { %10106 = vmatprep.subr.bf16.mxu0 %v14481_v41  ;;  %10168 = vmatprep.subr.bf16.mxu1 %v14484_v40  ;;  %v14524_v41 = vld [vmem:[%s18115_s7 + $0x8] sm:$0xff]   ;;  %v14525_v40 = vld [vmem:[%s18115_s7 + $0x50] sm:$0xff]  }
 0xaeb   :  { %v10584_v63 = vld [vmem:[#allocation3 + $0xa0] ss:$176 sm:$0x3]  ;;  %v10646_v7 = vld [vmem:[#allocation3 + $0xa2] ss:$176 sm:$0x3] }
 0xaec   :  { %v10585_v50 = vpack.c.bf16 %v10584_v63, %v10584_v63  ;;  %v10647_v53 = vpack.c.bf16 %v10646_v7, %v10646_v7  ;;  %v10708_v4 = vld [vmem:[#allocation3 + $0xa4] ss:$176 sm:$0x3]  ;;  %v10770_v30 = vld [vmem:[#allocation3 + $0xa6] ss:$176 sm:$0x3] }
 0xaed   :  { %v10709_v11 = vpack.c.bf16 %v10708_v4, %v10708_v4  ;;  %v10771_v33 = vpack.c.bf16 %v10770_v30, %v10770_v30  ;;  %v10832_v57 = vld [vmem:[#allocation3 + $0xa8] ss:$176 sm:$0x3]  ;;  %v10894_v36 = vld [vmem:[#allocation3 + $0xaa] ss:$176 sm:$0x3] }
 0xaee   :  { %12018 = vmatmul.mubr.msk.bf16.vlgmr.msra.gmra.mrb[236].mxu0 %vm2372_vm3, %v9965_v29  ;;  %12023 = vmatmul.mubr.msk.bf16.vlgmr.msra.gmra.mrb[248].mxu1 %vm2372_vm3, %v10027_v47  ;;  %v10833_v31 = vpack.c.bf16 %v10832_v57, %v10832_v57  ;;  %v10895_v35 = vpack.c.bf16 %v10894_v36, %v10894_v36 }
 0xaef   :  { %10107 = vmatpush1.bf16.msra.mxu0 %v14479_v21  ;;  %10169 = vmatpush1.bf16.msra.mxu1 %v14482_v18 }
 0xaf0   :  { %10138 = vmatprep.mubr.bf16.mxu0 %v14539_v32  ;;  %10200 = vmatprep.mubr.bf16.mxu1 %v14539_v32 }
 0xaf1   :  { %10230 = vmatprep.subr.bf16.mxu0 %v14487_v49  ;;  %10292 = vmatprep.subr.bf16.mxu1 %v14490_v14 }
 0xaf6   :  { %12028 = vmatmul.mubr.msk.bf16.vlgmr.msra.gmra.mrb[240].mxu0 %vm2372_vm3, %v10089_v54  ;;  %12033 = vmatmul.mubr.msk.bf16.vlgmr.msra.gmra.mrb[252].mxu1 %vm2372_vm3, %v10151_v55  ;;  %v14529_v54 = vld [vmem:[%s18115_s7 + $0x60] sm:$0xff]  }
 0xaf7   :  { %10231 = vmatpush1.bf16.msra.mxu0 %v14485_v16  ;;  %10293 = vmatpush1.bf16.msra.mxu1 %v14488_v3  ;;  %v14527_v16 = vld [vmem:[%s18115_s7 + $0x58] sm:$0xff]   ;;  %v14530_v55 = vld [vmem:[%s18115_s7 + $0x20] sm:$0xff]  }
 0xaf8   :  { %10262 = vmatprep.mubr.bf16.mxu0 %v14539_v32  ;;  %10324 = vmatprep.mubr.bf16.mxu1 %v14539_v32  ;;  %v14528_v3 = vld [vmem:[%s18115_s7 + $0x18] sm:$0xff]  }
 0xaf9   :  { %10354 = vmatprep.subr.bf16.mxu0 %v14493_v56  ;;  %10416 = vmatprep.subr.bf16.mxu1 %v14496_v20 }
 0xafe   :  { %12038 = vmatmul.mubr.msk.bf16.vlgmr.msra.gmra.mrb[244].mxu0 %vm2372_vm3, %v10213_v6  ;;  %12043 = vmatmul.mubr.msk.bf16.vlgmr.msra.gmra.mrb[4].mxu1 %vm2372_vm3, %v10275_v39 }
 0xaff   :  { %10355 = vmatpush1.bf16.msra.mxu0 %v14491_v5  ;;  %10417 = vmatpush1.bf16.msra.mxu1 %v14494_v25 }
 0xb00   :  { %10386 = vmatprep.mubr.bf16.mxu0 %v14539_v32  ;;  %10448 = vmatprep.mubr.bf16.mxu1 %v14539_v32 }
 0xb01   :  { %10478 = vmatprep.subr.bf16.mxu0 %v14499_v27  ;;  %10540 = vmatprep.subr.bf16.mxu1 %v14502_v61 }
 0xb06   :  { %12048 = vmatmul.mubr.msk.bf16.vlgmr.msra.gmra.mrb[248].mxu0 %vm2372_vm3, %v10337_v24  ;;  %12053 = vmatmul.mubr.msk.bf16.vlgmr.msra.gmra.mrb[0].mxu1 %vm2372_vm3, %v10399_v9 }
 0xb07   :  { %10479 = vmatpush1.bf16.msra.mxu0 %v14497_v34  ;;  %10541 = vmatpush1.bf16.msra.mxu1 %v14500_v15  ;;  %v14531_v34 = vld [vmem:[%s18115_s7 + $0x68] sm:$0xff]  }
 0xb08   :  { %10510 = vmatprep.mubr.bf16.mxu0 %v14539_v32  ;;  %10572 = vmatprep.mubr.bf16.mxu1 %v14539_v32  ;;  %v14532_v15 = vld [vmem:[%s18115_s7 + $0x28] sm:$0xff]  }
 0xb09   :  { %10602 = vmatprep.subr.bf16.mxu0 %v14505_v52  ;;  %10664 = vmatprep.subr.bf16.mxu1 %v14508_v23 }
 0xb0e   :  { %12058 = vmatmul.mubr.msk.bf16.vlgmr.msra.gmra.mrb[252].mxu0 %vm2372_vm3, %v10461_v37  ;;  %12063 = vmatmul.mubr.msk.bf16.vlgmr.msra.gmra.mrb[8].mxu1 %vm2372_vm3, %v10523_v1  ;;  %v14534_v1 = vld [vmem:[%s18115_s7 + $0x30] sm:$0xff]  }
 0xb0f   :  { %10603 = vmatpush1.bf16.msra.mxu0 %v14503_v19  ;;  %10665 = vmatpush1.bf16.msra.mxu1 %v14506_v17 }
 0xb10   :  { %10634 = vmatprep.mubr.bf16.mxu0 %v14539_v32  ;;  %10696 = vmatprep.mubr.bf16.mxu1 %v14539_v32 }
 0xb11   :  { %10726 = vmatprep.subr.bf16.mxu0 %v14511_v48  ;;  %10788 = vmatprep.subr.bf16.mxu1 %v14514_v28  ;;  %v14535_v48 = vld [vmem:[%s18115_s7 + $0x78] sm:$0xff]  }
 0xb16   :  { %12068 = vmatmul.mubr.msk.bf16.vlgmr.msra.gmra.mrb[24].mxu0 %vm2372_vm3, %v10585_v50  ;;  %12073 = vmatmul.mubr.msk.bf16.vlgmr.msra.gmra.mrb[12].mxu1 %vm2372_vm3, %v10647_v53 }
 0xb17   :  { %10727 = vmatpush1.bf16.msra.mxu0 %v14509_v59  ;;  %10789 = vmatpush1.bf16.msra.mxu1 %v14512_v0  ;;  %v14536_v0 = vld [vmem:[%s18115_s7 + $0x38] sm:$0xff]  }
 0xb18   :  { %10758 = vmatprep.mubr.bf16.mxu0 %v14539_v32  ;;  %10820 = vmatprep.mubr.bf16.mxu1 %v14539_v32 }
 0xb19   :  { %10850 = vmatprep.subr.bf16.mxu0 %v14517_v45  ;;  %10912 = vmatprep.subr.bf16.mxu1 %v14520_v60 }
 0xb1e   :  { %12078 = vmatmul.mubr.msk.bf16.vlgmr.msra.gmra.mrb[28].mxu0 %vm2372_vm3, %v10709_v11  ;;  %12083 = vmatmul.mubr.msk.bf16.vlgmr.msra.gmra.mrb[16].mxu1 %vm2372_vm3, %v10771_v33 }
 0xb1f   :  { %10851 = vmatpush1.bf16.msra.mxu0 %v14515_v58  ;;  %10913 = vmatpush1.bf16.msra.mxu1 %v14518_v44 }
 0xb20   :  { %10882 = vmatprep.mubr.bf16.mxu0 %v14539_v32  ;;  %10944 = vmatprep.mubr.bf16.mxu1 %v14539_v32  ;;  %v14523_v32 = vld [vmem:[%s18115_s7 + $0x48] sm:$0xff]  }
 0xb21   :  { %12597 = vmatprep.subr.bf16.mxu0 %v14521_v22 }
 0xb26   :  { %12088 = vmatmul.mubr.msk.bf16.vlgmr.msra.gmra.mrb[32].mxu0 %vm2372_vm3, %v10833_v31  ;;  %12093 = vmatmul.mubr.msk.bf16.vlgmr.msra.gmra.mrb[20].mxu1 %vm2372_vm3, %v10895_v35 }
 0xb27   :  { %12598 = vmatpush3.bf16.msra.mxu0 %v14522_v13 }
 0xb28   :  { %12599 = vmatprep.subr.bf16.mxu0 %v14523_v32 }
 0xb2b   :  { %12600 = vmatpush3.bf16.msra.mxu0 %v14524_v41 }
 0xb2c   :  { %12601 = vmatprep.subr.bf16.mxu0 %v14525_v40 }
 0xb2f   :  { %12602 = vmatpush3.bf16.msra.mxu0 %v14526_v38 }
 0xb30   :  { %12603 = vmatprep.subr.bf16.mxu0 %v14527_v16 }
 0xb33   :  { %12604 = vmatpush3.bf16.msra.mxu0 %v14528_v3 }
 0xb34   :  { %12605 = vmatprep.subr.bf16.mxu0 %v14529_v54 }
 0xb37   :  { %12606 = vmatpush3.bf16.msra.mxu0 %v14530_v55 }
 0xb38   :  { %12607 = vmatprep.subr.bf16.mxu0 %v14531_v34 }
 0xb3b   :  { %12608 = vmatpush3.bf16.msra.mxu0 %v14532_v15 }
 0xb3c   :  { %12609 = vmatprep.subr.bf16.mxu0 %v14533_v26 }
 0xb3f   :  { %12610 = vmatpush3.bf16.msra.mxu0 %v14534_v1 }
 0xb40   :  { %12611 = vmatprep.subr.bf16.mxu0 %v14535_v48 }
 0xb43   :  { %12612 = vmatpush3.bf16.msra.mxu0 %v14536_v0 }
 0xb71   :  { %v8786_v51 = vpop.f32.mrb[196].mxu0  ;;  %v8840_v43 = vpop.f32.mrb[208].mxu1 }
 0xb72   :  { %v8841_v21 = vadd.f32 %v8840_v43, %v8786_v51  ;;  %v8788_v18 = vpop.f32.mrb[197].mxu0  ;;  %v8842_v29 = vpop.f32.mrb[209].mxu1 }
 0xb73   :  { %v8843_v47 = vadd.f32 %v8842_v29, %v8788_v18  ;;  %v8790_v49 = vpop.f32.mrb[198].mxu0  ;;  %v8844_v14 = vpop.f32.mrb[210].mxu1 }
 0xb74   :  { %v8791_v62 = vpop.f32.mrb[199].mxu0  ;;  %v8845_v10 = vpop.f32.mrb[211].mxu1 }
 0xb79   :  { %v8900_v56 = vpop.f32.mrb[200].mxu0  ;;  %v8962_v20 = vpop.f32.mrb[212].mxu1 }
 0xb7a   :  { %v8907_v46 = vadd.f32 %v8900_v56, %v8841_v21  ;;  %v8902_v42 = vpop.f32.mrb[201].mxu0  ;;  %v8964_v5 = vpop.f32.mrb[213].mxu1 }
 0xb7b   :  { %v8908_v25 = vadd.f32 %v8902_v42, %v8843_v47  ;;  %v8904_v6 = vpop.f32.mrb[202].mxu0  ;;  %v8966_v39 = vpop.f32.mrb[214].mxu1 }
 0xb7c   :  { %v8969_v27 = vadd.f32 %v8962_v20, %v8907_v46  ;;  %v8905_v61 = vpop.f32.mrb[203].mxu0  ;;  %v8967_v12 = vpop.f32.mrb[215].mxu1 }
 0xb7d   :  { %v8970_v2 = vadd.f32 %v8964_v5, %v8908_v25 }
 0xb81   :  { %v9024_v24 = vpop.f32.mrb[204].mxu0  ;;  %v9086_v9 = vpop.f32.mrb[216].mxu1 }
 0xb82   :  { %v9031_v52 = vadd.f32 %v9024_v24, %v8969_v27  ;;  %v9026_v23 = vpop.f32.mrb[205].mxu0  ;;  %v9088_v8 = vpop.f32.mrb[217].mxu1 }
 0xb83   :  { %v9032_v19 = vadd.f32 %v9026_v23, %v8970_v2  ;;  %v9028_v17 = vpop.f32.mrb[206].mxu0  ;;  %v9090_v37 = vpop.f32.mrb[218].mxu1 }
 0xb84   :  { %v9093_v28 = vadd.f32 %v9086_v9, %v9031_v52  ;;  %v9029_v63 = vpop.f32.mrb[207].mxu0  ;;  %v9091_v7 = vpop.f32.mrb[219].mxu1 }
 0xb85   :  { %v9094_v59 = vadd.f32 %v9088_v8, %v9032_v19 }
 0xb89   :  { %v9148_v50 = vpop.f32.mrb[208].mxu0  ;;  %v9210_v53 = vpop.f32.mrb[220].mxu1 }
 0xb8a   :  { %v9155_v45 = vadd.f32 %v9148_v50, %v9093_v28  ;;  %v9150_v60 = vpop.f32.mrb[209].mxu0  ;;  %v9212_v4 = vpop.f32.mrb[221].mxu1 }
 0xb8b   :  { %v9156_v30 = vadd.f32 %v9150_v60, %v9094_v59  ;;  %v9152_v58 = vpop.f32.mrb[210].mxu0  ;;  %v9214_v44 = vpop.f32.mrb[222].mxu1 }
 0xb8c   :  { %v9217_v11 = vadd.f32 %v9210_v53, %v9155_v45  ;;  %v9153_v33 = vpop.f32.mrb[211].mxu0  ;;  %v9215_v57 = vpop.f32.mrb[223].mxu1 }
 0xb8d   :  { %v9218_v36 = vadd.f32 %v9212_v4, %v9156_v30 }
 0xb91   :  { %v9272_v31 = vpop.f32.mrb[212].mxu0  ;;  %v9334_v35 = vpop.f32.mrb[224].mxu1 }
 0xb92   :  { %v9279_v22 = vadd.f32 %v9272_v31, %v9217_v11  ;;  %v9274_v13 = vpop.f32.mrb[213].mxu0  ;;  %v9336_v32 = vpop.f32.mrb[225].mxu1 }
 0xb93   :  { %v9280_v41 = vadd.f32 %v9274_v13, %v9218_v36  ;;  %v9276_v40 = vpop.f32.mrb[214].mxu0  ;;  %v9338_v38 = vpop.f32.mrb[226].mxu1 }
 0xb94   :  { %v9341_v51 = vadd.f32 %v9334_v35, %v9279_v22  ;;  %v9277_v43 = vpop.f32.mrb[215].mxu0  ;;  %v9339_v21 = vpop.f32.mrb[227].mxu1 }
 0xb95   :  { %v9342_v18 = vadd.f32 %v9336_v32, %v9280_v41 }
 0xb99   :  { %v9396_v29 = vpop.f32.mrb[216].mxu0  ;;  %v9458_v47 = vpop.f32.mrb[228].mxu1 }
 0xb9a   :  { %v9403_v49 = vadd.f32 %v9396_v29, %v9341_v51  ;;  %v9398_v14 = vpop.f32.mrb[217].mxu0  ;;  %v9460_v62 = vpop.f32.mrb[229].mxu1 }
 0xb9b   :  { %v9404_v10 = vadd.f32 %v9398_v14, %v9342_v18  ;;  %v9400_v16 = vpop.f32.mrb[218].mxu0  ;;  %v9462_v3 = vpop.f32.mrb[230].mxu1 }
 0xb9c   :  { %v9465_v54 = vadd.f32 %v9458_v47, %v9403_v49  ;;  %v9401_v55 = vpop.f32.mrb[219].mxu0  ;;  %v9463_v56 = vpop.f32.mrb[231].mxu1 }
 0xb9d   :  { %v9466_v20 = vadd.f32 %v9460_v62, %v9404_v10 }
 0xba1   :  { %v9520_v46 = vpop.f32.mrb[220].mxu0  ;;  %v9582_v42 = vpop.f32.mrb[232].mxu1 }
 0xba2   :  { %v9527_v5 = vadd.f32 %v9520_v46, %v9465_v54  ;;  %v9522_v25 = vpop.f32.mrb[221].mxu0  ;;  %v9584_v6 = vpop.f32.mrb[233].mxu1 }
 0xba3   :  { %v9528_v39 = vadd.f32 %v9522_v25, %v9466_v20  ;;  %v9524_v27 = vpop.f32.mrb[222].mxu0  ;;  %v9586_v61 = vpop.f32.mrb[234].mxu1 }
 0xba4   :  { %v9589_v12 = vadd.f32 %v9582_v42, %v9527_v5  ;;  %v9525_v2 = vpop.f32.mrb[223].mxu0  ;;  %v9587_v34 = vpop.f32.mrb[235].mxu1 }
 0xba5   :  { %v9590_v15 = vadd.f32 %v9584_v6, %v9528_v39 }
 0xba9   :  { %v9644_v24 = vpop.f32.mrb[224].mxu0  ;;  %v9706_v9 = vpop.f32.mrb[236].mxu1 }
 0xbaa   :  { %v9651_v52 = vadd.f32 %v9644_v24, %v9589_v12  ;;  %v9646_v23 = vpop.f32.mrb[225].mxu0  ;;  %v9708_v8 = vpop.f32.mrb[237].mxu1 }
 0xbab   :  { %v9652_v26 = vadd.f32 %v9646_v23, %v9590_v15  ;;  %v9648_v19 = vpop.f32.mrb[226].mxu0  ;;  %v9710_v17 = vpop.f32.mrb[238].mxu1 }
 0xbac   :  { %v9713_v37 = vadd.f32 %v9706_v9, %v9651_v52  ;;  %v9649_v1 = vpop.f32.mrb[227].mxu0  ;;  %v9711_v48 = vpop.f32.mrb[239].mxu1 }
 0xbad   :  { %v9714_v28 = vadd.f32 %v9708_v8, %v9652_v26 }
 0xbb1   :  { %v9768_v63 = vpop.f32.mrb[228].mxu0  ;;  %v9830_v7 = vpop.f32.mrb[240].mxu1 }
 0xbb2   :  { %v9775_v59 = vadd.f32 %v9768_v63, %v9713_v37  ;;  %v9770_v0 = vpop.f32.mrb[229].mxu0  ;;  %v9832_v50 = vpop.f32.mrb[241].mxu1 }
 0xbb3   :  { %v9776_v53 = vadd.f32 %v9770_v0, %v9714_v28  ;;  %v9772_v45 = vpop.f32.mrb[230].mxu0  ;;  %v9834_v60 = vpop.f32.mrb[242].mxu1 }
 0xbb4   :  { %v9837_v4 = vadd.f32 %v9830_v7, %v9775_v59  ;;  %v9773_v30 = vpop.f32.mrb[231].mxu0  ;;  %v9835_v58 = vpop.f32.mrb[243].mxu1 }
 0xbb5   :  { %v9838_v44 = vadd.f32 %v9832_v50, %v9776_v53 }
 0xbb9   :  { %v9892_v11 = vpop.f32.mrb[232].mxu0  ;;  %v9954_v33 = vpop.f32.mrb[244].mxu1 }
 0xbba   :  { %v9899_v57 = vadd.f32 %v9892_v11, %v9837_v4  ;;  %v9894_v36 = vpop.f32.mrb[233].mxu0  ;;  %v9956_v31 = vpop.f32.mrb[245].mxu1 }
 0xbbb   :  { %v9900_v35 = vadd.f32 %v9894_v36, %v9838_v44  ;;  %v9896_v22 = vpop.f32.mrb[234].mxu0  ;;  %v9958_v13 = vpop.f32.mrb[246].mxu1 }
 0xbbc   :  { %v9961_v32 = vadd.f32 %v9954_v33, %v9899_v57  ;;  %v9897_v41 = vpop.f32.mrb[235].mxu0  ;;  %v9959_v40 = vpop.f32.mrb[247].mxu1 }
 0xbbd   :  { %v9962_v38 = vadd.f32 %v9956_v31, %v9900_v35 }
 0xbc1   :  { %v10016_v51 = vpop.f32.mrb[236].mxu0  ;;  %v10078_v43 = vpop.f32.mrb[248].mxu1 }
 0xbc2   :  { %v10023_v21 = vadd.f32 %v10016_v51, %v9961_v32  ;;  %v10018_v18 = vpop.f32.mrb[237].mxu0  ;;  %v10080_v29 = vpop.f32.mrb[249].mxu1 }
 0xbc3   :  { %v10024_v47 = vadd.f32 %v10018_v18, %v9962_v38  ;;  %v10020_v49 = vpop.f32.mrb[238].mxu0  ;;  %v10082_v14 = vpop.f32.mrb[250].mxu1 }
 0xbc4   :  { %v10085_v62 = vadd.f32 %v10078_v43, %v10023_v21  ;;  %v10021_v10 = vpop.f32.mrb[239].mxu0  ;;  %v10083_v16 = vpop.f32.mrb[251].mxu1 }
 0xbc5   :  { %v10086_v3 = vadd.f32 %v10080_v29, %v10024_v47 }
 0xbc9   :  { %v10140_v54 = vpop.f32.mrb[240].mxu0  ;;  %v10202_v55 = vpop.f32.mrb[252].mxu1 }
 0xbca   :  { %v10147_v56 = vadd.f32 %v10140_v54, %v10085_v62  ;;  %v10142_v20 = vpop.f32.mrb[241].mxu0  ;;  %v10204_v46 = vpop.f32.mrb[253].mxu1  ;;  %v10957_v62 = vlaneseq }
 0xbcb   :  { %v10148_v42 = vadd.f32 %v10142_v20, %v10086_v3  ;;  %v10144_v5 = vpop.f32.mrb[242].mxu0  ;;  %v10206_v25 = vpop.f32.mrb[254].mxu1 }
 0xbcc   :  { %v10209_v6 = vadd.f32 %v10202_v55, %v10147_v56  ;;  %v10145_v39 = vpop.f32.mrb[243].mxu0  ;;  %v10207_v27 = vpop.f32.mrb[255].mxu1  ;;  %v10958_v56 = vshrl.u32 %v10957_v62, 7 }
 0xbcd   :  { %v10210_v61 = vadd.f32 %v10204_v46, %v10148_v42 }
 0xbce   :  { %v10959_v27 = vsub.s32 0, %v10958_v56 }
 0xbd1   :  { %v10264_v12 = vpop.f32.mrb[244].mxu0  ;;  %v10326_v2 = vpop.f32.mrb[4].mxu1 }
 0xbd2   :  { %v10271_v34 = vadd.f32 %v10264_v12, %v10209_v6  ;;  %v10266_v15 = vpop.f32.mrb[245].mxu0  ;;  %v10328_v24 = vpop.f32.mrb[5].mxu1  ;;  %v10963_v12 = vsub.s32 1, %v10958_v56 }
 0xbd3   :  { %v10272_v9 = vadd.f32 %v10266_v15, %v10210_v61  ;;  %v10268_v52 = vpop.f32.mrb[246].mxu0  ;;  %v10330_v23 = vpop.f32.mrb[6].mxu1  ;;  %v10955_v61 = vld [vmem:[%s18116_s6] sm:$0x3] }
 0xbd4   :  { %v10333_v8 = vadd.f32 %v10326_v2, %v10271_v34  ;;  %v10269_v26 = vpop.f32.mrb[247].mxu0  ;;  %v10331_v19 = vpop.f32.mrb[7].mxu1 }
 0xbd5   :  { %v10334_v17 = vadd.f32 %v10328_v24, %v10272_v9  ;;  %v10960_v24 = vrot.slane %v10955_v61, %v10959_v27 }
 0xbd9   :  { %v10388_v37 = vpop.f32.mrb[248].mxu0  ;;  %v10450_v1 = vpop.f32.mrb[0].mxu1 }
 0xbda   :  { %v10395_v48 = vadd.f32 %v10388_v37, %v10333_v8  ;;  %v10390_v28 = vpop.f32.mrb[249].mxu0  ;;  %v10452_v63 = vpop.f32.mrb[1].mxu1  ;;  %v10964_v8 = vrot.slane %v10955_v61, %v10963_v12 }
 0xbdb   :  { %v10396_v7 = vadd.f32 %v10390_v28, %v10334_v17  ;;  %v10392_v59 = vpop.f32.mrb[250].mxu0  ;;  %v10454_v0 = vpop.f32.mrb[2].mxu1 }
 0xbdc   :  { %v10457_v50 = vadd.f32 %v10450_v1, %v10395_v48  ;;  %v10393_v53 = vpop.f32.mrb[251].mxu0  ;;  %v10455_v45 = vpop.f32.mrb[3].mxu1 }
 0xbdd   :  { %v10458_v60 = vadd.f32 %v10452_v63, %v10396_v7  ;;  %v12094_v45 = vld [vmem:[%s18117_s8] ss:$0 sm:$0xff] }
 0xbe1   :  { %v10512_v4 = vpop.f32.mrb[252].mxu0  ;;  %v10574_v30 = vpop.f32.mrb[8].mxu1 }
 0xbe2   :  { %v10519_v58 = vadd.f32 %v10512_v4, %v10457_v50  ;;  %v10514_v44 = vpop.f32.mrb[253].mxu0  ;;  %v10576_v11 = vpop.f32.mrb[9].mxu1 }
 0xbe3   :  { %v10520_v33 = vadd.f32 %v10514_v44, %v10458_v60  ;;  %v10516_v57 = vpop.f32.mrb[254].mxu0  ;;  %v10578_v36 = vpop.f32.mrb[10].mxu1 }
 0xbe4   :  { %v10581_v31 = vadd.f32 %v10574_v30, %v10519_v58  ;;  %v10517_v35 = vpop.f32.mrb[255].mxu0  ;;  %v10579_v22 = vpop.f32.mrb[11].mxu1 }
 0xbe5   :  { %v10582_v13 = vadd.f32 %v10576_v11, %v10520_v33 }
 0xbe9   :  { %v10636_v32 = vpop.f32.mrb[24].mxu0  ;;  %v10698_v41 = vpop.f32.mrb[12].mxu1 }
 0xbea   :  { %v10643_v40 = vadd.f32 %v10636_v32, %v10581_v31  ;;  %v10638_v38 = vpop.f32.mrb[25].mxu0  ;;  %v10700_v51 = vpop.f32.mrb[13].mxu1 }
 0xbeb   :  { %v10644_v43 = vadd.f32 %v10638_v38, %v10582_v13  ;;  %v10640_v21 = vpop.f32.mrb[26].mxu0  ;;  %v10702_v18 = vpop.f32.mrb[14].mxu1 }
 0xbec   :  { %v10705_v29 = vadd.f32 %v10698_v41, %v10643_v40  ;;  %v10641_v47 = vpop.f32.mrb[27].mxu0  ;;  %v10703_v49 = vpop.f32.mrb[15].mxu1 }
 0xbed   :  { %v10706_v14 = vadd.f32 %v10700_v51, %v10644_v43 }
 0xbf1   :  { %v10760_v10 = vpop.f32.mrb[28].mxu0  ;;  %v10822_v16 = vpop.f32.mrb[16].mxu1 }
 0xbf2   :  { %v10767_v3 = vadd.f32 %v10760_v10, %v10705_v29  ;;  %v10762_v54 = vpop.f32.mrb[29].mxu0  ;;  %v10824_v55 = vpop.f32.mrb[17].mxu1 }
 0xbf3   :  { %v10768_v20 = vadd.f32 %v10762_v54, %v10706_v14  ;;  %v10764_v46 = vpop.f32.mrb[30].mxu0  ;;  %v10826_v42 = vpop.f32.mrb[18].mxu1 }
 0xbf4   :  { %v10829_v5 = vadd.f32 %v10822_v16, %v10767_v3  ;;  %v10765_v25 = vpop.f32.mrb[31].mxu0  ;;  %v10827_v6 = vpop.f32.mrb[19].mxu1 }
 0xbf5   :  { %v10830_v39 = vadd.f32 %v10824_v55, %v10768_v20 }
 0xbf9   :  { %v10884_v2 = vpop.f32.mrb[32].mxu0  ;;  %v10946_v34 = vpop.f32.mrb[20].mxu1 }
 0xbfa   :  { %v10891_v15 = vadd.f32 %v10884_v2, %v10829_v5  ;;  %v10886_v9 = vpop.f32.mrb[33].mxu0  ;;  %v10948_v52 = vpop.f32.mrb[21].mxu1 }
 0xbfb   :  { %v10892_v23 = vadd.f32 %v10886_v9, %v10830_v39  ;;  %v10888_v26 = vpop.f32.mrb[34].mxu0  ;;  %v10950_v19 = vpop.f32.mrb[22].mxu1 }
 0xbfc   :  { %v10953_v17 = vadd.f32 %v10946_v34, %v10891_v15  ;;  %v10889_v37 = vpop.f32.mrb[35].mxu0  ;;  %v10951_v1 = vpop.f32.mrb[23].mxu1 }
 0xbfd   :  { %v10954_v48 = vadd.f32 %v10948_v52, %v10892_v23 }
 0xbfe   :  { %v10967_v28 = vadd.f32 %v10960_v24, %v10953_v17 }
 0xbff   :  { %v10968_v63 = vadd.f32 %v10964_v8, %v10954_v48 }
 0xc00   :  { %v10969_v7 = vmax.f32 %v10967_v28, 0.0 }
 0xc01   :  { %v10970_v59 = vmax.f32 %v10968_v63, 0.0 }
 0xc02   :  { %v10971_v50 = vpack.c.bf16 %v10969_v7, %v10969_v7 }
 0xc03   :  { %v10972_v0 = vpack.c.bf16 %v10970_v59, %v10970_v59 }
 0xc05   :  { %11140 = vmatprep.mubr.bf16.mxu0 %v10972_v0 }
 0xc06   :  { %11141 = vmatmul.mubr.bf16.vlgmr.msra.gmra.mrb[36].mxu0 %v10971_v50 }
 0xcd9   :  { %v12613_v53 = vpop.f32.mrb[36].mxu0 }
 0xcda   :  { %v12614_v60 = vpop.f32.mrb[37].mxu0 }
 0xcdb   :  { %v12615_v4 = vadd.f32 %v12614_v60, %v12613_v53  ;;  %v12616_v30 = vpop.f32.mrb[38].mxu0 }
 0xcdc   :  { %v12617_v58 = vpop.f32.mrb[39].mxu0 }
 0xcdd   :  { %v11143_v44 = vadd.f32 %v12615_v4, %v12094_v45 }
 0xcdf   :  { %11148 = vst [vmem:[%s18118_s9] sm:$0x3] %v11143_v44 }

</bundles_post_ra>
